<compile_context>
chip_gen: v5e
topology: v5e:2x2
jax: 0.10.0
libtpu: 0.0.40
codegen_flags: <defaults>
</compile_context>

<pallas_src>
import functools

import jax
import jax.numpy as jnp
from jax.experimental import pallas as pl
from jax.experimental.pallas import tpu as pltpu

EPS = 1e-5
EXPANSION = 4


def _default_vmem_limit():
    # ~5/8 of physical VMEM: 40 MiB on v7x (64 MiB/TC), 80 MiB on v5e/v6e (128 MiB).
    try:
        cap = pltpu.get_tpu_info().vmem_capacity_bytes
        return int(min(cap * 5 // 8, 96 * 1024 * 1024))
    except Exception:
        return 40 * 1024 * 1024


_VMEM_LIMIT = _default_vmem_limit()


# ----------------------------------------------------------------------------
# helpers
# ----------------------------------------------------------------------------
def _round_up(x, m):
    return (x + m - 1) // m * m


def _pick_row_tile(m, cap):
    """>=2 row blocks when possible (keeps both v7x TensorCores busy), tile %8."""
    return max(8, min(cap, _round_up(pl.cdiv(m, 2), 8)))


# ----------------------------------------------------------------------------
# Pallas kernels
# ----------------------------------------------------------------------------
def _mm_kernel(a_ref, b_ref, s_ref, t_ref, o_ref, ssum_ref, ssq_ref, *scratch,
               a_relu, fuse_affine, gk, m_valid, tm):
    """y = relu?(A*scale+shift) @ B  (bf16 MXU operands, f32 accumulation).

    Grid = (M/tm, N/tn, K/tk); K ("arbitrary") collapses to a single block for the
    bottleneck shapes, in which case no accumulator scratch is used.  The epilogue
    also emits the per-channel sum / sum-of-squares of the f32 result (BN stats).
    """
    # TODO(synk): on v6e/v7x do this prologue in bf16 (bf16 VPU) to cut VALU issue.
    if fuse_affine:
        a = a_ref[...].astype(jnp.float32) * s_ref[...] + t_ref[...]
        if a_relu:
            a = jnp.maximum(a, 0.0)
        if m_valid is not None:   # mask padded rows so output + stats stay exact
            rows = jax.lax.broadcasted_iota(jnp.int32, a.shape, 0) + pl.program_id(0) * tm
            a = jnp.where(rows < m_valid, a, 0.0)
        a_mx = a.astype(jnp.bfloat16)
    else:
        a_mx = a_ref[...]         # already bf16; padded rows are zero

    contrib = jnp.dot(a_mx, b_ref[...], preferred_element_type=jnp.float32)

    def _epilogue(acc):
        o_ref[...] = acc.astype(o_ref.dtype)
        ssum_ref[...] = jnp.sum(acc, axis=0, keepdims=True)
        ssq_ref[...] = jnp.sum(acc * acc, axis=0, keepdims=True)

    if gk == 1:
        _epilogue(contrib)
    else:
        acc_ref = scratch[0]

        @pl.when(pl.program_id(2) == 0)
        def _init():
            acc_ref[...] = jnp.zeros_like(acc_ref)

        acc_ref[...] += contrib

        @pl.when(pl.program_id(2) == gk - 1)
        def _done():
            _epilogue(acc_ref[...])


def _conv3x3_s1_kernel(x_ref, w_ref, s_ref, t_ref, mask_ref,
                       o_ref, ssum_ref, ssq_ref):
    """3x3 / stride-1 / pad-1 conv for one image, with BN1+ReLU fused on the input.

    x_ref:   (H+2, W+2, C)  bf16, zero-padded raw conv1 output
    w_ref:   (9, C, Co)     bf16 tap-major weights
    s/t_ref: (1, 1, C)      f32 BN1 scale/shift
    mask:    (H+2, W+2, 1)  f32, 0 on the 1-pixel border (exact zero padding)
    o_ref:   (H, W, Co)     bf16;  ssum/ssq: (1, Co) f32 per-image partial stats
    """
    Ho, Wo, Co = o_ref.shape
    C = x_ref.shape[-1]

    a = x_ref[...].astype(jnp.float32) * s_ref[...] + t_ref[...]
    a = jnp.maximum(a, 0.0) * mask_ref[...]
    a = a.astype(jnp.bfloat16)

    acc = jnp.zeros((Ho * Wo, Co), jnp.float32)
    for di in range(3):                       # unrolled 9-tap accumulation (MXU)
        for dj in range(3):
            win = a[di:di + Ho, dj:dj + Wo, :].reshape(Ho * Wo, C)
            acc = acc + jnp.dot(win, w_ref[di * 3 + dj],
                                preferred_element_type=jnp.float32)

    o_ref[...] = acc.reshape(Ho, Wo, Co).astype(o_ref.dtype)
    ssum_ref[...] = jnp.sum(acc, axis=0, keepdims=True)
    ssq_ref[...] = jnp.sum(acc * acc, axis=0, keepdims=True)


def _bn_add_relu_kernel(a_ref, sa_ref, ta_ref, b_ref, sb_ref, tb_ref, o_ref):
    """relu( BN3(a) + BN_shortcut(b) ) with both BNs folded to per-channel affines."""
    ya = a_ref[...] * sa_ref[...] + ta_ref[...]
    yb = b_ref[...] * sb_ref[...] + tb_ref[...]
    o_ref[...] = jnp.maximum(ya + yb, 0.0)


# ----------------------------------------------------------------------------
# Pallas wrappers
# ----------------------------------------------------------------------------
def fused_matmul(a, b, a_scale=None, a_shift=None, a_relu=False,
                 out_dtype=jnp.float32):
    """Returns (y, col_sum, col_sumsq) with y = relu?(a*scale+shift) @ b.

    A is consumed in bf16; the result and the fused BN statistics are accumulated
    in f32.  N and K collapse to single blocks for bottleneck-sized operands.
    """
    M, K = a.shape
    Kb, N = b.shape
    assert K == Kb
    fuse_affine = a_scale is not None

    # Tiling: single full-K / full-N block unless they would blow the VMEM budget;
    # >= 2 row blocks so a v7x chip can spread the "parallel" M axis over 2 TCs.
    tk, Kp = (K, K) if K <= 2048 else (512, _round_up(K, 512))
    tn, Np = (N, N) if N <= 1024 else (512, _round_up(N, 512))
    tm = _pick_row_tile(M, 512)
    Mp = _round_up(M, tm)
    gm, gn, gk = Mp // tm, Np // tn, Kp // tk

    a_p = a.astype(jnp.bfloat16)
    if (Mp, Kp) != (M, K):
        a_p = jnp.pad(a_p, ((0, Mp - M), (0, Kp - K)))
    b_p = b.astype(jnp.bfloat16)
    if (Kp, Np) != (K, N):
        b_p = jnp.pad(b_p, ((0, Kp - K), (0, Np - N)))

    if fuse_affine:
        s_p = a_scale.reshape(1, K).astype(jnp.float32)
        t_p = a_shift.reshape(1, K).astype(jnp.float32)
    else:
        s_p = jnp.ones((1, K), jnp.float32)
        t_p = jnp.zeros((1, K), jnp.float32)
    if Kp != K:
        s_p = jnp.pad(s_p, ((0, 0), (0, Kp - K)))
        t_p = jnp.pad(t_p, ((0, 0), (0, Kp - K)))

    m_valid = M if (fuse_affine and Mp != M) else None
    out_bytes = jnp.dtype(out_dtype).itemsize

    y, psum, psq = pl.pallas_call(
        functools.partial(_mm_kernel, a_relu=a_relu, fuse_affine=fuse_affine,
                          gk=gk, m_valid=m_valid, tm=tm),
        out_shape=(jax.ShapeDtypeStruct((Mp, Np), out_dtype),
                   jax.ShapeDtypeStruct((gm, 1, Np), jnp.float32),
                   jax.ShapeDtypeStruct((gm, 1, Np), jnp.float32)),
        grid_spec=pltpu.PrefetchScalarGridSpec(
            num_scalar_prefetch=0,
            grid=(gm, gn, gk),
            in_specs=[
                pl.BlockSpec((tm, tk), lambda i, j, k: (i, k)),
                pl.BlockSpec((tk, tn), lambda i, j, k: (k, j)),
                pl.BlockSpec((1, tk), lambda i, j, k: (0, k)),
                pl.BlockSpec((1, tk), lambda i, j, k: (0, k)),
            ],
            out_specs=(pl.BlockSpec((tm, tn), lambda i, j, k: (i, j)),
                       pl.BlockSpec((None, 1, tn), lambda i, j, k: (i, 0, j)),
                       pl.BlockSpec((None, 1, tn), lambda i, j, k: (i, 0, j))),
            scratch_shapes=([pltpu.VMEM((tm, tn), jnp.float32)] if gk > 1 else []),
        ),
        compiler_params=pltpu.CompilerParams(
            dimension_semantics=("parallel", "parallel", "arbitrary"),
            vmem_limit_bytes=_VMEM_LIMIT),
        cost_estimate=pl.CostEstimate(
            flops=2 * Mp * Np * Kp,
            transcendentals=0,
            bytes_accessed=Mp * Kp * 2 + Kp * Np * 2 + Mp * Np * out_bytes
                           + 2 * gm * Np * 4),
    )(a_p, b_p, s_p, t_p)

    ssum = jnp.sum(psum, axis=(0, 1))
    ssq = jnp.sum(psq, axis=(0, 1))
    if (Mp, Np) != (M, N):
        y = y[:M, :N]
        ssum = ssum[:N]
        ssq = ssq[:N]
    return y, ssum, ssq


def conv3x3_s1(y1_img, w2, s1, t1):
    """Stride-1 3x3 conv (pad 1) on the raw conv1 output, BN1+ReLU fused in-kernel.

    y1_img: (N, H, W, C) bf16 raw conv1 output.  Returns (y2 (N,H,W,Co) bf16,
    per-channel sum, per-channel sum-of-squares) of the f32 conv result.
    """
    N, H, W, C = y1_img.shape
    Co = w2.shape[-1]
    Hp, Wp = H + 2, W + 2

    x_pad = jnp.pad(y1_img, ((0, 0), (1, 1), (1, 1), (0, 0)))
    mask = jnp.pad(jnp.ones((H, W, 1), jnp.float32), ((1, 1), (1, 1), (0, 0)))
    w9 = w2.reshape(9, C, Co).astype(jnp.bfloat16)

    y2, psum, psq = pl.pallas_call(
        _conv3x3_s1_kernel,
        out_shape=(jax.ShapeDtypeStruct((N, H, W, Co), jnp.bfloat16),
                   jax.ShapeDtypeStruct((N, 1, Co), jnp.float32),
                   jax.ShapeDtypeStruct((N, 1, Co), jnp.float32)),
        grid_spec=pltpu.PrefetchScalarGridSpec(
            num_scalar_prefetch=0,
            grid=(N,),
            in_specs=[
                pl.BlockSpec((None, Hp, Wp, C), lambda n: (n, 0, 0, 0)),
                pl.BlockSpec((9, C, Co), lambda n: (0, 0, 0)),
                pl.BlockSpec((1, 1, C), lambda n: (0, 0, 0)),
                pl.BlockSpec((1, 1, C), lambda n: (0, 0, 0)),
                pl.BlockSpec((Hp, Wp, 1), lambda n: (0, 0, 0)),
            ],
            out_specs=(pl.BlockSpec((None, H, W, Co), lambda n: (n, 0, 0, 0)),
                       pl.BlockSpec((None, 1, Co), lambda n: (n, 0, 0)),
                       pl.BlockSpec((None, 1, Co), lambda n: (n, 0, 0))),
        ),
        compiler_params=pltpu.CompilerParams(
            dimension_semantics=("parallel",),
            vmem_limit_bytes=_VMEM_LIMIT),
        cost_estimate=pl.CostEstimate(
            flops=2 * N * H * W * 9 * C * Co,
            transcendentals=0,
            bytes_accessed=N * (Hp * Wp * C * 2 + H * W * Co * 2) + 9 * C * Co * 2),
    )(x_pad, w9, s1.reshape(1, 1, C).astype(jnp.float32),
      t1.reshape(1, 1, C).astype(jnp.float32), mask)

    return y2, jnp.sum(psum, axis=(0, 1)), jnp.sum(psq, axis=(0, 1))


def bn_add_relu(a, sa, ta, b, sb, tb):
    """relu((a*sa+ta) + (b*sb+tb)): BN3 + shortcut-BN + residual add + ReLU fused."""
    M, C = a.shape
    tm = _pick_row_tile(M, 1024)
    Mp = _round_up(M, tm)
    if Mp != M:
        a = jnp.pad(a, ((0, Mp - M), (0, 0)))
        b = jnp.pad(b, ((0, Mp - M), (0, 0)))
    out = pl.pallas_call(
        _bn_add_relu_kernel,
        out_shape=jax.ShapeDtypeStruct((Mp, C), jnp.float32),
        grid_spec=pltpu.PrefetchScalarGridSpec(
            num_scalar_prefetch=0,
            grid=(Mp // tm,),
            in_specs=[
                pl.BlockSpec((tm, C), lambda i: (i, 0)),
                pl.BlockSpec((1, C), lambda i: (0, 0)),
                pl.BlockSpec((1, C), lambda i: (0, 0)),
                pl.BlockSpec((tm, C), lambda i: (i, 0)),
                pl.BlockSpec((1, C), lambda i: (0, 0)),
                pl.BlockSpec((1, C), lambda i: (0, 0)),
            ],
            out_specs=pl.BlockSpec((tm, C), lambda i: (i, 0)),
        ),
        compiler_params=pltpu.CompilerParams(
            dimension_semantics=("parallel",),
            vmem_limit_bytes=_VMEM_LIMIT),
    )(a.astype(jnp.float32), sa.reshape(1, C), ta.reshape(1, C),
      b.astype(jnp.float32), sb.reshape(1, C), tb.reshape(1, C))
    return out[:M] if Mp != M else out


def _affine_from_stats(ssum, ssq, count, gamma, beta):
    """Fold training-mode BatchNorm (population stats) into (scale, shift)."""
    mean = ssum / count
    var = jnp.maximum(ssq / count - mean * mean, 0.0)
    scale = gamma * jax.lax.rsqrt(var + EPS)
    shift = beta - mean * scale
    return scale, shift


def _im2col_3x3(x, stride, pad_value_c):
    # Fallback for stride != 1 only (2.25x materialization).  Borders use the
    # per-channel BN-neutral value v_c (v_c*scale_c + shift_c == 0) so the fused
    # BN1+ReLU in the consuming matmul reproduces PyTorch's zero padding.
    # TODO(synk): replace with an in-kernel parity-split tap accumulation so the
    # strided 3x3 conv also avoids the HBM im2col.
    N, H, W, C = x.shape
    v = pad_value_c.reshape(1, 1, 1, C).astype(x.dtype)
    rows = jnp.broadcast_to(v, (N, 1, W, C))
    xp = jnp.concatenate([rows, x, rows], axis=1)
    cols_pad = jnp.broadcast_to(v, (N, H + 2, 1, C))
    xp = jnp.concatenate([cols_pad, xp, cols_pad], axis=2)
    Ho = (H + 2 - 3) // stride + 1
    Wo = (W + 2 - 3) // stride + 1
    taps = []
    for i in range(3):
        for j in range(3):
            taps.append(xp[:, i:i + (Ho - 1) * stride + 1:stride,
                            j:j + (Wo - 1) * stride + 1:stride, :])
    cols = jnp.concatenate(taps, axis=-1)           # (N, Ho, Wo, 9*C), tap-major
    return cols.reshape(N * Ho * Wo, 9 * C), Ho, Wo


# ----------------------------------------------------------------------------
# Bottleneck block (matches the PyTorch module: all convs bias=False, BN training
# mode, expansion=4, projection shortcut iff stride!=1 or cin != 4*width).
# ----------------------------------------------------------------------------
def init_params(key, input_channels, in_channels, stride):
    cout = EXPANSION * in_channels
    ks = jax.random.split(key, 12)

    def conv_w(k, kh, kw, ci, co):
        fan = kh * kw * ci
        return jax.random.normal(k, (kh, kw, ci, co), jnp.float32) * jnp.sqrt(2.0 / fan)

    def bn_p(kg, kb, c):
        return (1.0 + 0.1 * jax.random.normal(kg, (c,), jnp.float32),
                0.1 * jax.random.normal(kb, (c,), jnp.float32))

    p = {
        'stride': stride,
        'w1': conv_w(ks[0], 1, 1, input_channels, in_channels),
        'w2': conv_w(ks[1], 3, 3, in_channels, in_channels),
        'w3': conv_w(ks[2], 1, 1, in_channels, cout),
    }
    p['g1'], p['b1'] = bn_p(ks[3], ks[4], in_channels)
    p['g2'], p['b2'] = bn_p(ks[5], ks[6], in_channels)
    p['g3'], p['b3'] = bn_p(ks[7], ks[8], cout)
    if stride != 1 or input_channels != cout:
        p['ws'] = conv_w(ks[9], 1, 1, input_channels, cout)
        p['gs'], p['bs'] = bn_p(ks[10], ks[11], cout)
    return p


def bottleneck_forward_nhwc(params, x):
    """NHWC-in / NHWC-out forward (chain blocks without intermediate transposes)."""
    stride = params['stride']
    x = x.astype(jnp.float32)
    N, H, W, cin = x.shape
    width = params['w1'].shape[-1]
    cout = params['w3'].shape[-1]

    x16 = x.astype(jnp.bfloat16)                       # bf16 A operand for the convs
    x_slab16 = x16.reshape(N * H * W, cin)

    # conv1 (1x1, stride 1): raw y1 in bf16 + fused BN1 statistics.
    y1, s1sum, s1sq = fused_matmul(x_slab16, params['w1'].reshape(cin, width),
                                   out_dtype=jnp.bfloat16)
    s1, t1 = _affine_from_stats(s1sum, s1sq, N * H * W, params['g1'], params['b1'])

    # conv2 (3x3, stride, pad 1) with BN1+ReLU fused into the input read.
    if stride == 1:
        Ho, Wo = H, W
        y2_img, s2sum, s2sq = conv3x3_s1(y1.reshape(N, H, W, width),
                                         params['w2'], s1, t1)
        y2 = y2_img.reshape(N * Ho * Wo, width)
    else:
        # NOTE: if gamma1 is exactly 0 for a channel the neutral-pad trick cannot
        # represent PyTorch's zero padding (degenerate; never hit with real BN init).
        safe = jnp.where(s1 == 0.0, 1.0, s1)
        neutral1 = jnp.where(s1 == 0.0, 0.0, -t1 / safe)
        a2, Ho, Wo = _im2col_3x3(y1.reshape(N, H, W, width), stride, neutral1)
        y2, s2sum, s2sq = fused_matmul(a2, params['w2'].reshape(9 * width, width),
                                       a_scale=jnp.tile(s1, 9),
                                       a_shift=jnp.tile(t1, 9),
                                       a_relu=True, out_dtype=jnp.bfloat16)
    s2, t2 = _affine_from_stats(s2sum, s2sq, N * Ho * Wo, params['g2'], params['b2'])

    # conv3 (1x1, width -> 4*width) with BN2+ReLU fused into the input read.
    y3, s3sum, s3sq = fused_matmul(y2, params['w3'].reshape(width, cout),
                                   a_scale=s2, a_shift=t2, a_relu=True,
                                   out_dtype=jnp.float32)
    s3, t3 = _affine_from_stats(s3sum, s3sq, N * Ho * Wo, params['g3'], params['b3'])

    # shortcut branch
    if 'ws' in params:
        xs = x16[:, ::stride, ::stride, :].reshape(N * Ho * Wo, cin)
        ysc, sssum, sssq = fused_matmul(xs, params['ws'].reshape(cin, cout),
                                        out_dtype=jnp.float32)
        ss, ts = _affine_from_stats(sssum, sssq, N * Ho * Wo,
                                    params['gs'], params['bs'])
    else:
        ysc = x.reshape(N * H * W, cout)               # identity shortcut (f32)
        ss = jnp.ones((cout,), jnp.float32)
        ts = jnp.zeros((cout,), jnp.float32)

    # BN3 + shortcut-BN + residual add + ReLU, fused & lane-dense (C = 4*width).
    out = bn_add_relu(y3, s3, t3, ysc, ss, ts)
    return out.reshape(N, Ho, Wo, cout)


def bottleneck_forward(params, x_nchw):
    """NCHW convenience wrapper (single block)."""
    x = jnp.transpose(x_nchw, (0, 2, 3, 1))
    out = bottleneck_forward_nhwc(params, x)
    return jnp.transpose(out, (0, 3, 1, 2))


# ----------------------------------------------------------------------------
# Pure-JAX reference (bf16 conv operands, f32 accumulation, f32 BatchNorm).
# TODO(synk): BatchNorm running-stats (momentum) buffer updates are not modeled;
# they do not affect the training-mode forward output.
# ----------------------------------------------------------------------------
def _ref_conv(x, w, stride, pad):
    return jax.lax.conv_general_dilated(
        x.astype(jnp.bfloat16), w.astype(jnp.bfloat16),
        window_strides=(stride, stride), padding=((pad, pad), (pad, pad)),
        dimension_numbers=('NHWC', 'HWIO', 'NHWC'),
        preferred_element_type=jnp.float32)


def _ref_bn(y, gamma, beta, relu):
    mean = jnp.mean(y, axis=(0, 1, 2))
    var = jnp.var(y, axis=(0, 1, 2))
    out = (y - mean) * jax.lax.rsqrt(var + EPS) * gamma + beta
    return jnp.maximum(out, 0.0) if relu else out


def bottleneck_ref(params, x_nchw):
    stride = params['stride']
    x = jnp.transpose(x_nchw, (0, 2, 3, 1)).astype(jnp.float32)
    z = _ref_bn(_ref_conv(x, params['w1'], 1, 0), params['g1'], params['b1'], True)
    z = _ref_bn(_ref_conv(z, params['w2'], stride, 1), params['g2'], params['b2'], True)
    z = _ref_bn(_ref_conv(z, params['w3'], 1, 0), params['g3'], params['b3'], False)
    if 'ws' in params:
        s = _ref_bn(_ref_conv(x, params['ws'], stride, 0), params['gs'], params['bs'], False)
    else:
        s = x
    out = jnp.maximum(z + s, 0.0)
    return jnp.transpose(out, (0, 3, 1, 2))


# ----------------------------------------------------------------------------
if __name__ == "__main__":
    key = jax.random.PRNGKey(0)
    k1, k2, kx = jax.random.split(key, 3)

    N, H, W = 2, 16, 16
    CIN, WIDTH, STRIDE = 256, 128, 2   # bottleneck 256 -> 128 -> 512, stride 2

    # Block 1: projection shortcut (stride 2, channel change) -> im2col fallback.
    params1 = init_params(k1, CIN, WIDTH, STRIDE)
    # Block 2: identity shortcut (input == expansion*width, stride 1) -> tap kernel.
    params2 = init_params(k2, EXPANSION * WIDTH, WIDTH, 1)

    x = jax.random.normal(kx, (N, CIN, H, W), jnp.float32)

    @jax.jit
    def fwd(inp):
        z = jnp.transpose(inp, (0, 2, 3, 1))          # single NCHW->NHWC transpose
        z = bottleneck_forward_nhwc(params1, z)
        z = bottleneck_forward_nhwc(params2, z)       # no transpose between blocks
        return jnp.transpose(z, (0, 3, 1, 2))

    out = jax.block_until_ready(fwd(x))
    ref = jax.block_until_ready(
        jax.jit(lambda inp: bottleneck_ref(params2, bottleneck_ref(params1, inp)))(x))

    assert out.shape == (N, EXPANSION * WIDTH, H // STRIDE, W // STRIDE), out.shape
    assert bool(jnp.all(jnp.isfinite(out)))
    max_err = float(jnp.max(jnp.abs(out - ref)))
    mean_err = float(jnp.mean(jnp.abs(out - ref)))
    # bf16 activation storage (A operands) + bf16 MXU operands cause a small,
    # expected drift vs the f32-BatchNorm reference across two chained blocks.
    assert max_err < 1e-1, f"max abs diff vs reference = {max_err}"
    assert mean_err < 1e-2, f"mean abs diff vs reference = {mean_err}"
    print("KERNEL_OK")
</pallas_src>

<mosaic_0001>
module attributes {stable_mosaic.version = 11 : i64} {
  func.func @_mm_kernel(%arg0: i32, %arg1: i32, %arg2: i32, %arg3: memref<256x256xbf16, #tpu.memory_space<vmem>>, %arg4: memref<256x128xbf16, #tpu.memory_space<vmem>>, %arg5: memref<1x256xf32, #tpu.memory_space<vmem>>, %arg6: memref<1x256xf32, #tpu.memory_space<vmem>>, %arg7: memref<256x128xbf16, #tpu.memory_space<vmem>>, %arg8: memref<1x1x128xf32, #tpu.memory_space<vmem>>, %arg9: memref<1x1x128xf32, #tpu.memory_space<vmem>>) attributes {dimension_semantics = [#tpu.dimension_semantics<parallel>, #tpu.dimension_semantics<parallel>, #tpu.dimension_semantics<arbitrary>], iteration_bounds = array<i64: 2, 1, 1>, scalar_prefetch = 0 : i64, scratch_operands = 0 : i64, tpu.core_type = #tpu.core_type<tc>, window_params = [{transform_indices = @transform_0, window_bounds = array<i64: 256, 256>}, {transform_indices = @transform_1, window_bounds = array<i64: 256, 128>}, {transform_indices = @transform_2, window_bounds = array<i64: 1, 256>}, {transform_indices = @transform_3, window_bounds = array<i64: 1, 256>}, {transform_indices = @transform_4, window_bounds = array<i64: 256, 128>}, {transform_indices = @transform_5, window_bounds = array<i64: 1, 1, 128>}, {transform_indices = @transform_6, window_bounds = array<i64: 1, 1, 128>}]} {
    %c0 = arith.constant 0 : index
    %c0_0 = arith.constant 0 : index
    %0 = vector.load %arg3[%c0, %c0_0] : memref<256x256xbf16, #tpu.memory_space<vmem>>, vector<256x256xbf16>
    %c0_1 = arith.constant 0 : index
    %c0_2 = arith.constant 0 : index
    %1 = vector.load %arg4[%c0_1, %c0_2] : memref<256x128xbf16, #tpu.memory_space<vmem>>, vector<256x128xbf16>
    %cst = arith.constant dense<0.000000e+00> : vector<256x128xf32>
    %2 = tpu.matmul %0, %1, %cst {dimension_numbers = #tpu.dot_dimension_numbers<[1], [0], [0], [1], [0, 0, 1, 1], [], []>} : vector<256x256xbf16>, vector<256x128xbf16>, vector<256x128xf32> -> vector<256x128xf32>
    %3 = arith.truncf %2 : vector<256x128xf32> to vector<256x128xbf16>
    %c0_3 = arith.constant 0 : index
    %c0_4 = arith.constant 0 : index
    %4 = vector.load %arg7[%c0_3, %c0_4] : memref<256x128xbf16, #tpu.memory_space<vmem>>, vector<256x128xbf16>
    tpu.vector_store %arg7[%c0_3, %c0_4], %3 {strides = array<i32>} : memref<256x128xbf16, #tpu.memory_space<vmem>>, vector<256x128xbf16>,
    %cst_5 = arith.constant dense<0.000000e+00> : vector<128xf32>
    %5 = vector.multi_reduction <add>, %2, %cst_5 [0] : vector<256x128xf32> to vector<128xf32>
    %6 = vector.shape_cast %5 : vector<128xf32> to vector<1x128xf32>
    %c0_6 = arith.constant 0 : index
    %c0_7 = arith.constant 0 : index
    %c0_8 = arith.constant 0 : index
    %7 = vector.load %arg8[%c0_6, %c0_7, %c0_8] : memref<1x1x128xf32, #tpu.memory_space<vmem>>, vector<1x1x128xf32>
    %8 = vector.shape_cast %7 : vector<1x1x128xf32> to vector<1x128xf32>
    %9 = vector.shape_cast %6 : vector<1x128xf32> to vector<1x1x128xf32>
    tpu.vector_store %arg8[%c0_6, %c0_7, %c0_8], %9 {strides = array<i32>} : memref<1x1x128xf32, #tpu.memory_space<vmem>>, vector<1x1x128xf32>,
    %10 = arith.mulf %2, %2 : vector<256x128xf32>
    %cst_9 = arith.constant dense<0.000000e+00> : vector<128xf32>
    %11 = vector.multi_reduction <add>, %10, %cst_9 [0] : vector<256x128xf32> to vector<128xf32>
    %12 = vector.shape_cast %11 : vector<128xf32> to vector<1x128xf32>
    %c0_10 = arith.constant 0 : index
    %c0_11 = arith.constant 0 : index
    %c0_12 = arith.constant 0 : index
    %13 = vector.load %arg9[%c0_10, %c0_11, %c0_12] : memref<1x1x128xf32, #tpu.memory_space<vmem>>, vector<1x1x128xf32>
    %14 = vector.shape_cast %13 : vector<1x1x128xf32> to vector<1x128xf32>
    %15 = vector.shape_cast %12 : vector<1x128xf32> to vector<1x1x128xf32>
    tpu.vector_store %arg9[%c0_10, %c0_11, %c0_12], %15 {strides = array<i32>} : memref<1x1x128xf32, #tpu.memory_space<vmem>>, vector<1x1x128xf32>,
    return
  }
  func.func @transform_0(%arg0: i32, %arg1: i32, %arg2: i32) -> (i32, i32) {
    %c0_i32 = arith.constant 0 : i32
    return %arg0, %arg2 : i32, i32
  }
  func.func @transform_1(%arg0: i32, %arg1: i32, %arg2: i32) -> (i32, i32) {
    %c0_i32 = arith.constant 0 : i32
    return %arg2, %arg1 : i32, i32
  }
  func.func @transform_2(%arg0: i32, %arg1: i32, %arg2: i32) -> (i32, i32) {
    %c0_i32 = arith.constant 0 : i32
    %c0_i32_0 = arith.constant 0 : i32
    return %c0_i32, %arg2 : i32, i32
  }
  func.func @transform_3(%arg0: i32, %arg1: i32, %arg2: i32) -> (i32, i32) {
    %c0_i32 = arith.constant 0 : i32
    %c0_i32_0 = arith.constant 0 : i32
    return %c0_i32, %arg2 : i32, i32
  }
  func.func @transform_4(%arg0: i32, %arg1: i32, %arg2: i32) -> (i32, i32) {
    %c0_i32 = arith.constant 0 : i32
    return %arg0, %arg1 : i32, i32
  }
  func.func @transform_5(%arg0: i32, %arg1: i32, %arg2: i32) -> (i32, i32, i32) {
    %c0_i32 = arith.constant 0 : i32
    %c0_i32_0 = arith.constant 0 : i32
    return %arg0, %c0_i32, %arg1 : i32, i32, i32
  }
  func.func @transform_6(%arg0: i32, %arg1: i32, %arg2: i32) -> (i32, i32, i32) {
    %c0_i32 = arith.constant 0 : i32
    %c0_i32_0 = arith.constant 0 : i32
    return %arg0, %c0_i32, %arg1 : i32, i32, i32
  }
}

module attributes {stable_mosaic.version = 11 : i64} {
  func.func @_mm_kernel(%arg0: i32, %arg1: i32, %arg2: i32, %arg3: memref<64x1152xbf16, #tpu.memory_space<vmem>>, %arg4: memref<1152x128xbf16, #tpu.memory_space<vmem>>, %arg5: memref<1x1152xf32, #tpu.memory_space<vmem>>, %arg6: memref<1x1152xf32, #tpu.memory_space<vmem>>, %arg7: memref<64x128xbf16, #tpu.memory_space<vmem>>, %arg8: memref<1x1x128xf32, #tpu.memory_space<vmem>>, %arg9: memref<1x1x128xf32, #tpu.memory_space<vmem>>) attributes {dimension_semantics = [#tpu.dimension_semantics<parallel>, #tpu.dimension_semantics<parallel>, #tpu.dimension_semantics<arbitrary>], iteration_bounds = array<i64: 2, 1, 1>, scalar_prefetch = 0 : i64, scratch_operands = 0 : i64, tpu.core_type = #tpu.core_type<tc>, window_params = [{transform_indices = @transform_0, window_bounds = array<i64: 64, 1152>}, {transform_indices = @transform_1, window_bounds = array<i64: 1152, 128>}, {transform_indices = @transform_2, window_bounds = array<i64: 1, 1152>}, {transform_indices = @transform_3, window_bounds = array<i64: 1, 1152>}, {transform_indices = @transform_4, window_bounds = array<i64: 64, 128>}, {transform_indices = @transform_5, window_bounds = array<i64: 1, 1, 128>}, {transform_indices = @transform_6, window_bounds = array<i64: 1, 1, 128>}]} {
    %c0 = arith.constant 0 : index
    %c0_0 = arith.constant 0 : index
    %0 = vector.load %arg3[%c0, %c0_0] : memref<64x1152xbf16, #tpu.memory_space<vmem>>, vector<64x1152xbf16>
    %1 = arith.extf %0 : vector<64x1152xbf16> to vector<64x1152xf32>
    %c0_1 = arith.constant 0 : index
    %c0_2 = arith.constant 0 : index
    %2 = vector.load %arg5[%c0_1, %c0_2] : memref<1x1152xf32, #tpu.memory_space<vmem>>, vector<1x1152xf32>
    %3 = vector.broadcast %2 : vector<1x1152xf32> to vector<64x1152xf32>
    %4 = arith.mulf %1, %3 : vector<64x1152xf32>
    %c0_3 = arith.constant 0 : index
    %c0_4 = arith.constant 0 : index
    %5 = vector.load %arg6[%c0_3, %c0_4] : memref<1x1152xf32, #tpu.memory_space<vmem>>, vector<1x1152xf32>
    %6 = vector.broadcast %5 : vector<1x1152xf32> to vector<64x1152xf32>
    %7 = arith.addf %4, %6 : vector<64x1152xf32>
    %cst = arith.constant 0.000000e+00 : f32
    %8 = vector.broadcast %cst : f32 to vector<64x1152xf32>
    %9 = arith.maximumf %7, %8 : vector<64x1152xf32>
    %10 = arith.truncf %9 : vector<64x1152xf32> to vector<64x1152xbf16>
    %c0_5 = arith.constant 0 : index
    %c0_6 = arith.constant 0 : index
    %11 = vector.load %arg4[%c0_5, %c0_6] : memref<1152x128xbf16, #tpu.memory_space<vmem>>, vector<1152x128xbf16>
    %cst_7 = arith.constant dense<0.000000e+00> : vector<64x128xf32>
    %12 = tpu.matmul %10, %11, %cst_7 {dimension_numbers = #tpu.dot_dimension_numbers<[1], [0], [0], [1], [0, 0, 1, 1], [], []>} : vector<64x1152xbf16>, vector<1152x128xbf16>, vector<64x128xf32> -> vector<64x128xf32>
    %13 = arith.truncf %12 : vector<64x128xf32> to vector<64x128xbf16>
    %c0_8 = arith.constant 0 : index
    %c0_9 = arith.constant 0 : index
    %14 = vector.load %arg7[%c0_8, %c0_9] : memref<64x128xbf16, #tpu.memory_space<vmem>>, vector<64x128xbf16>
    tpu.vector_store %arg7[%c0_8, %c0_9], %13 {strides = array<i32>} : memref<64x128xbf16, #tpu.memory_space<vmem>>, vector<64x128xbf16>,
    %cst_10 = arith.constant dense<0.000000e+00> : vector<128xf32>
    %15 = vector.multi_reduction <add>, %12, %cst_10 [0] : vector<64x128xf32> to vector<128xf32>
    %16 = vector.shape_cast %15 : vector<128xf32> to vector<1x128xf32>
    %c0_11 = arith.constant 0 : index
    %c0_12 = arith.constant 0 : index
    %c0_13 = arith.constant 0 : index
    %17 = vector.load %arg8[%c0_11, %c0_12, %c0_13] : memref<1x1x128xf32, #tpu.memory_space<vmem>>, vector<1x1x128xf32>
    %18 = vector.shape_cast %17 : vector<1x1x128xf32> to vector<1x128xf32>
    %19 = vector.shape_cast %16 : vector<1x128xf32> to vector<1x1x128xf32>
    tpu.vector_store %arg8[%c0_11, %c0_12, %c0_13], %19 {strides = array<i32>} : memref<1x1x128xf32, #tpu.memory_space<vmem>>, vector<1x1x128xf32>,
    %20 = arith.mulf %12, %12 : vector<64x128xf32>
    %cst_14 = arith.constant dense<0.000000e+00> : vector<128xf32>
    %21 = vector.multi_reduction <add>, %20, %cst_14 [0] : vector<64x128xf32> to vector<128xf32>
    %22 = vector.shape_cast %21 : vector<128xf32> to vector<1x128xf32>
    %c0_15 = arith.constant 0 : index
    %c0_16 = arith.constant 0 : index
    %c0_17 = arith.constant 0 : index
    %23 = vector.load %arg9[%c0_15, %c0_16, %c0_17] : memref<1x1x128xf32, #tpu.memory_space<vmem>>, vector<1x1x128xf32>
    %24 = vector.shape_cast %23 : vector<1x1x128xf32> to vector<1x128xf32>
    %25 = vector.shape_cast %22 : vector<1x128xf32> to vector<1x1x128xf32>
    tpu.vector_store %arg9[%c0_15, %c0_16, %c0_17], %25 {strides = array<i32>} : memref<1x1x128xf32, #tpu.memory_space<vmem>>, vector<1x1x128xf32>,
    return
  }
  func.func @transform_0(%arg0: i32, %arg1: i32, %arg2: i32) -> (i32, i32) {
    %c0_i32 = arith.constant 0 : i32
    return %arg0, %arg2 : i32, i32
  }
  func.func @transform_1(%arg0: i32, %arg1: i32, %arg2: i32) -> (i32, i32) {
    %c0_i32 = arith.constant 0 : i32
    return %arg2, %arg1 : i32, i32
  }
  func.func @transform_2(%arg0: i32, %arg1: i32, %arg2: i32) -> (i32, i32) {
    %c0_i32 = arith.constant 0 : i32
    %c0_i32_0 = arith.constant 0 : i32
    return %c0_i32, %arg2 : i32, i32
  }
  func.func @transform_3(%arg0: i32, %arg1: i32, %arg2: i32) -> (i32, i32) {
    %c0_i32 = arith.constant 0 : i32
    %c0_i32_0 = arith.constant 0 : i32
    return %c0_i32, %arg2 : i32, i32
  }
  func.func @transform_4(%arg0: i32, %arg1: i32, %arg2: i32) -> (i32, i32) {
    %c0_i32 = arith.constant 0 : i32
    return %arg0, %arg1 : i32, i32
  }
  func.func @transform_5(%arg0: i32, %arg1: i32, %arg2: i32) -> (i32, i32, i32) {
    %c0_i32 = arith.constant 0 : i32
    %c0_i32_0 = arith.constant 0 : i32
    return %arg0, %c0_i32, %arg1 : i32, i32, i32
  }
  func.func @transform_6(%arg0: i32, %arg1: i32, %arg2: i32) -> (i32, i32, i32) {
    %c0_i32 = arith.constant 0 : i32
    %c0_i32_0 = arith.constant 0 : i32
    return %arg0, %c0_i32, %arg1 : i32, i32, i32
  }
}

module attributes {stable_mosaic.version = 11 : i64} {
  func.func @_mm_kernel(%arg0: i32, %arg1: i32, %arg2: i32, %arg3: memref<64x128xbf16, #tpu.memory_space<vmem>>, %arg4: memref<128x512xbf16, #tpu.memory_space<vmem>>, %arg5: memref<1x128xf32, #tpu.memory_space<vmem>>, %arg6: memref<1x128xf32, #tpu.memory_space<vmem>>, %arg7: memref<64x512xf32, #tpu.memory_space<vmem>>, %arg8: memref<1x1x512xf32, #tpu.memory_space<vmem>>, %arg9: memref<1x1x512xf32, #tpu.memory_space<vmem>>) attributes {dimension_semantics = [#tpu.dimension_semantics<parallel>, #tpu.dimension_semantics<parallel>, #tpu.dimension_semantics<arbitrary>], iteration_bounds = array<i64: 2, 1, 1>, scalar_prefetch = 0 : i64, scratch_operands = 0 : i64, tpu.core_type = #tpu.core_type<tc>, window_params = [{transform_indices = @transform_0, window_bounds = array<i64: 64, 128>}, {transform_indices = @transform_1, window_bounds = array<i64: 128, 512>}, {transform_indices = @transform_2, window_bounds = array<i64: 1, 128>}, {transform_indices = @transform_3, window_bounds = array<i64: 1, 128>}, {transform_indices = @transform_4, window_bounds = array<i64: 64, 512>}, {transform_indices = @transform_5, window_bounds = array<i64: 1, 1, 512>}, {transform_indices = @transform_6, window_bounds = array<i64: 1, 1, 512>}]} {
    %c0 = arith.constant 0 : index
    %c0_0 = arith.constant 0 : index
    %0 = vector.load %arg3[%c0, %c0_0] : memref<64x128xbf16, #tpu.memory_space<vmem>>, vector<64x128xbf16>
    %1 = arith.extf %0 : vector<64x128xbf16> to vector<64x128xf32>
    %c0_1 = arith.constant 0 : index
    %c0_2 = arith.constant 0 : index
    %2 = vector.load %arg5[%c0_1, %c0_2] : memref<1x128xf32, #tpu.memory_space<vmem>>, vector<1x128xf32>
    %3 = vector.broadcast %2 : vector<1x128xf32> to vector<64x128xf32>
    %4 = arith.mulf %1, %3 : vector<64x128xf32>
    %c0_3 = arith.constant 0 : index
    %c0_4 = arith.constant 0 : index
    %5 = vector.load %arg6[%c0_3, %c0_4] : memref<1x128xf32, #tpu.memory_space<vmem>>, vector<1x128xf32>
    %6 = vector.broadcast %5 : vector<1x128xf32> to vector<64x128xf32>
    %7 = arith.addf %4, %6 : vector<64x128xf32>
    %cst = arith.constant 0.000000e+00 : f32
    %8 = vector.broadcast %cst : f32 to vector<64x128xf32>
    %9 = arith.maximumf %7, %8 : vector<64x128xf32>
    %10 = arith.truncf %9 : vector<64x128xf32> to vector<64x128xbf16>
    %c0_5 = arith.constant 0 : index
    %c0_6 = arith.constant 0 : index
    %11 = vector.load %arg4[%c0_5, %c0_6] : memref<128x512xbf16, #tpu.memory_space<vmem>>, vector<128x512xbf16>
    %cst_7 = arith.constant dense<0.000000e+00> : vector<64x512xf32>
    %12 = tpu.matmul %10, %11, %cst_7 {dimension_numbers = #tpu.dot_dimension_numbers<[1], [0], [0], [1], [0, 0, 1, 1], [], []>} : vector<64x128xbf16>, vector<128x512xbf16>, vector<64x512xf32> -> vector<64x512xf32>
    %c0_8 = arith.constant 0 : index
    %c0_9 = arith.constant 0 : index
    %13 = vector.load %arg7[%c0_8, %c0_9] : memref<64x512xf32, #tpu.memory_space<vmem>>, vector<64x512xf32>
    tpu.vector_store %arg7[%c0_8, %c0_9], %12 {strides = array<i32>} : memref<64x512xf32, #tpu.memory_space<vmem>>, vector<64x512xf32>,
    %cst_10 = arith.constant dense<0.000000e+00> : vector<512xf32>
    %14 = vector.multi_reduction <add>, %12, %cst_10 [0] : vector<64x512xf32> to vector<512xf32>
    %15 = vector.shape_cast %14 : vector<512xf32> to vector<1x512xf32>
    %c0_11 = arith.constant 0 : index
    %c0_12 = arith.constant 0 : index
    %c0_13 = arith.constant 0 : index
    %16 = vector.load %arg8[%c0_11, %c0_12, %c0_13] : memref<1x1x512xf32, #tpu.memory_space<vmem>>, vector<1x1x512xf32>
    %17 = vector.shape_cast %16 : vector<1x1x512xf32> to vector<1x512xf32>
    %18 = vector.shape_cast %15 : vector<1x512xf32> to vector<1x1x512xf32>
    tpu.vector_store %arg8[%c0_11, %c0_12, %c0_13], %18 {strides = array<i32>} : memref<1x1x512xf32, #tpu.memory_space<vmem>>, vector<1x1x512xf32>,
    %19 = arith.mulf %12, %12 : vector<64x512xf32>
    %cst_14 = arith.constant dense<0.000000e+00> : vector<512xf32>
    %20 = vector.multi_reduction <add>, %19, %cst_14 [0] : vector<64x512xf32> to vector<512xf32>
    %21 = vector.shape_cast %20 : vector<512xf32> to vector<1x512xf32>
    %c0_15 = arith.constant 0 : index
    %c0_16 = arith.constant 0 : index
    %c0_17 = arith.constant 0 : index
    %22 = vector.load %arg9[%c0_15, %c0_16, %c0_17] : memref<1x1x512xf32, #tpu.memory_space<vmem>>, vector<1x1x512xf32>
    %23 = vector.shape_cast %22 : vector<1x1x512xf32> to vector<1x512xf32>
    %24 = vector.shape_cast %21 : vector<1x512xf32> to vector<1x1x512xf32>
    tpu.vector_store %arg9[%c0_15, %c0_16, %c0_17], %24 {strides = array<i32>} : memref<1x1x512xf32, #tpu.memory_space<vmem>>, vector<1x1x512xf32>,
    return
  }
  func.func @transform_0(%arg0: i32, %arg1: i32, %arg2: i32) -> (i32, i32) {
    %c0_i32 = arith.constant 0 : i32
    return %arg0, %arg2 : i32, i32
  }
  func.func @transform_1(%arg0: i32, %arg1: i32, %arg2: i32) -> (i32, i32) {
    %c0_i32 = arith.constant 0 : i32
    return %arg2, %arg1 : i32, i32
  }
  func.func @transform_2(%arg0: i32, %arg1: i32, %arg2: i32) -> (i32, i32) {
    %c0_i32 = arith.constant 0 : i32
    %c0_i32_0 = arith.constant 0 : i32
    return %c0_i32, %arg2 : i32, i32
  }
  func.func @transform_3(%arg0: i32, %arg1: i32, %arg2: i32) -> (i32, i32) {
    %c0_i32 = arith.constant 0 : i32
    %c0_i32_0 = arith.constant 0 : i32
    return %c0_i32, %arg2 : i32, i32
  }
  func.func @transform_4(%arg0: i32, %arg1: i32, %arg2: i32) -> (i32, i32) {
    %c0_i32 = arith.constant 0 : i32
    return %arg0, %arg1 : i32, i32
  }
  func.func @transform_5(%arg0: i32, %arg1: i32, %arg2: i32) -> (i32, i32, i32) {
    %c0_i32 = arith.constant 0 : i32
    %c0_i32_0 = arith.constant 0 : i32
    return %arg0, %c0_i32, %arg1 : i32, i32, i32
  }
  func.func @transform_6(%arg0: i32, %arg1: i32, %arg2: i32) -> (i32, i32, i32) {
    %c0_i32 = arith.constant 0 : i32
    %c0_i32_0 = arith.constant 0 : i32
    return %arg0, %c0_i32, %arg1 : i32, i32, i32
  }
}

module attributes {stable_mosaic.version = 11 : i64} {
  func.func @_mm_kernel(%arg0: i32, %arg1: i32, %arg2: i32, %arg3: memref<64x256xbf16, #tpu.memory_space<vmem>>, %arg4: memref<256x512xbf16, #tpu.memory_space<vmem>>, %arg5: memref<1x256xf32, #tpu.memory_space<vmem>>, %arg6: memref<1x256xf32, #tpu.memory_space<vmem>>, %arg7: memref<64x512xf32, #tpu.memory_space<vmem>>, %arg8: memref<1x1x512xf32, #tpu.memory_space<vmem>>, %arg9: memref<1x1x512xf32, #tpu.memory_space<vmem>>) attributes {dimension_semantics = [#tpu.dimension_semantics<parallel>, #tpu.dimension_semantics<parallel>, #tpu.dimension_semantics<arbitrary>], iteration_bounds = array<i64: 2, 1, 1>, scalar_prefetch = 0 : i64, scratch_operands = 0 : i64, tpu.core_type = #tpu.core_type<tc>, window_params = [{transform_indices = @transform_0, window_bounds = array<i64: 64, 256>}, {transform_indices = @transform_1, window_bounds = array<i64: 256, 512>}, {transform_indices = @transform_2, window_bounds = array<i64: 1, 256>}, {transform_indices = @transform_3, window_bounds = array<i64: 1, 256>}, {transform_indices = @transform_4, window_bounds = array<i64: 64, 512>}, {transform_indices = @transform_5, window_bounds = array<i64: 1, 1, 512>}, {transform_indices = @transform_6, window_bounds = array<i64: 1, 1, 512>}]} {
    %c0 = arith.constant 0 : index
    %c0_0 = arith.constant 0 : index
    %0 = vector.load %arg3[%c0, %c0_0] : memref<64x256xbf16, #tpu.memory_space<vmem>>, vector<64x256xbf16>
    %c0_1 = arith.constant 0 : index
    %c0_2 = arith.constant 0 : index
    %1 = vector.load %arg4[%c0_1, %c0_2] : memref<256x512xbf16, #tpu.memory_space<vmem>>, vector<256x512xbf16>
    %cst = arith.constant dense<0.000000e+00> : vector<64x512xf32>
    %2 = tpu.matmul %0, %1, %cst {dimension_numbers = #tpu.dot_dimension_numbers<[1], [0], [0], [1], [0, 0, 1, 1], [], []>} : vector<64x256xbf16>, vector<256x512xbf16>, vector<64x512xf32> -> vector<64x512xf32>
    %c0_3 = arith.constant 0 : index
    %c0_4 = arith.constant 0 : index
    %3 = vector.load %arg7[%c0_3, %c0_4] : memref<64x512xf32, #tpu.memory_space<vmem>>, vector<64x512xf32>
    tpu.vector_store %arg7[%c0_3, %c0_4], %2 {strides = array<i32>} : memref<64x512xf32, #tpu.memory_space<vmem>>, vector<64x512xf32>,
    %cst_5 = arith.constant dense<0.000000e+00> : vector<512xf32>
    %4 = vector.multi_reduction <add>, %2, %cst_5 [0] : vector<64x512xf32> to vector<512xf32>
    %5 = vector.shape_cast %4 : vector<512xf32> to vector<1x512xf32>
    %c0_6 = arith.constant 0 : index
    %c0_7 = arith.constant 0 : index
    %c0_8 = arith.constant 0 : index
    %6 = vector.load %arg8[%c0_6, %c0_7, %c0_8] : memref<1x1x512xf32, #tpu.memory_space<vmem>>, vector<1x1x512xf32>
    %7 = vector.shape_cast %6 : vector<1x1x512xf32> to vector<1x512xf32>
    %8 = vector.shape_cast %5 : vector<1x512xf32> to vector<1x1x512xf32>
    tpu.vector_store %arg8[%c0_6, %c0_7, %c0_8], %8 {strides = array<i32>} : memref<1x1x512xf32, #tpu.memory_space<vmem>>, vector<1x1x512xf32>,
    %9 = arith.mulf %2, %2 : vector<64x512xf32>
    %cst_9 = arith.constant dense<0.000000e+00> : vector<512xf32>
    %10 = vector.multi_reduction <add>, %9, %cst_9 [0] : vector<64x512xf32> to vector<512xf32>
    %11 = vector.shape_cast %10 : vector<512xf32> to vector<1x512xf32>
    %c0_10 = arith.constant 0 : index
    %c0_11 = arith.constant 0 : index
    %c0_12 = arith.constant 0 : index
    %12 = vector.load %arg9[%c0_10, %c0_11, %c0_12] : memref<1x1x512xf32, #tpu.memory_space<vmem>>, vector<1x1x512xf32>
    %13 = vector.shape_cast %12 : vector<1x1x512xf32> to vector<1x512xf32>
    %14 = vector.shape_cast %11 : vector<1x512xf32> to vector<1x1x512xf32>
    tpu.vector_store %arg9[%c0_10, %c0_11, %c0_12], %14 {strides = array<i32>} : memref<1x1x512xf32, #tpu.memory_space<vmem>>, vector<1x1x512xf32>,
    return
  }
  func.func @transform_0(%arg0: i32, %arg1: i32, %arg2: i32) -> (i32, i32) {
    %c0_i32 = arith.constant 0 : i32
    return %arg0, %arg2 : i32, i32
  }
  func.func @transform_1(%arg0: i32, %arg1: i32, %arg2: i32) -> (i32, i32) {
    %c0_i32 = arith.constant 0 : i32
    return %arg2, %arg1 : i32, i32
  }
  func.func @transform_2(%arg0: i32, %arg1: i32, %arg2: i32) -> (i32, i32) {
    %c0_i32 = arith.constant 0 : i32
    %c0_i32_0 = arith.constant 0 : i32
    return %c0_i32, %arg2 : i32, i32
  }
  func.func @transform_3(%arg0: i32, %arg1: i32, %arg2: i32) -> (i32, i32) {
    %c0_i32 = arith.constant 0 : i32
    %c0_i32_0 = arith.constant 0 : i32
    return %c0_i32, %arg2 : i32, i32
  }
  func.func @transform_4(%arg0: i32, %arg1: i32, %arg2: i32) -> (i32, i32) {
    %c0_i32 = arith.constant 0 : i32
    return %arg0, %arg1 : i32, i32
  }
  func.func @transform_5(%arg0: i32, %arg1: i32, %arg2: i32) -> (i32, i32, i32) {
    %c0_i32 = arith.constant 0 : i32
    %c0_i32_0 = arith.constant 0 : i32
    return %arg0, %c0_i32, %arg1 : i32, i32, i32
  }
  func.func @transform_6(%arg0: i32, %arg1: i32, %arg2: i32) -> (i32, i32, i32) {
    %c0_i32 = arith.constant 0 : i32
    %c0_i32_0 = arith.constant 0 : i32
    return %arg0, %c0_i32, %arg1 : i32, i32, i32
  }
}

module attributes {stable_mosaic.version = 11 : i64} {
  func.func @_bn_add_relu_kernel(%arg0: i32, %arg1: memref<64x512xf32, #tpu.memory_space<vmem>>, %arg2: memref<1x512xf32, #tpu.memory_space<vmem>>, %arg3: memref<1x512xf32, #tpu.memory_space<vmem>>, %arg4: memref<64x512xf32, #tpu.memory_space<vmem>>, %arg5: memref<1x512xf32, #tpu.memory_space<vmem>>, %arg6: memref<1x512xf32, #tpu.memory_space<vmem>>, %arg7: memref<64x512xf32, #tpu.memory_space<vmem>>) attributes {dimension_semantics = [#tpu.dimension_semantics<parallel>], iteration_bounds = array<i64: 2>, scalar_prefetch = 0 : i64, scratch_operands = 0 : i64, tpu.core_type = #tpu.core_type<tc>, window_params = [{transform_indices = @transform_0, window_bounds = array<i64: 64, 512>}, {pipeline_mode = #tpu.pipeline_mode<synchronous>, transform_indices = @transform_1, window_bounds = array<i64: 1, 512>}, {pipeline_mode = #tpu.pipeline_mode<synchronous>, transform_indices = @transform_2, window_bounds = array<i64: 1, 512>}, {transform_indices = @transform_3, window_bounds = array<i64: 64, 512>}, {pipeline_mode = #tpu.pipeline_mode<synchronous>, transform_indices = @transform_4, window_bounds = array<i64: 1, 512>}, {pipeline_mode = #tpu.pipeline_mode<synchronous>, transform_indices = @transform_5, window_bounds = array<i64: 1, 512>}, {transform_indices = @transform_6, window_bounds = array<i64: 64, 512>}]} {
    %c0 = arith.constant 0 : index
    %c0_0 = arith.constant 0 : index
    %0 = vector.load %arg1[%c0, %c0_0] : memref<64x512xf32, #tpu.memory_space<vmem>>, vector<64x512xf32>
    %c0_1 = arith.constant 0 : index
    %c0_2 = arith.constant 0 : index
    %1 = vector.load %arg2[%c0_1, %c0_2] : memref<1x512xf32, #tpu.memory_space<vmem>>, vector<1x512xf32>
    %2 = vector.broadcast %1 : vector<1x512xf32> to vector<64x512xf32>
    %3 = arith.mulf %0, %2 : vector<64x512xf32>
    %c0_3 = arith.constant 0 : index
    %c0_4 = arith.constant 0 : index
    %4 = vector.load %arg3[%c0_3, %c0_4] : memref<1x512xf32, #tpu.memory_space<vmem>>, vector<1x512xf32>
    %5 = vector.broadcast %4 : vector<1x512xf32> to vector<64x512xf32>
    %6 = arith.addf %3, %5 : vector<64x512xf32>
    %c0_5 = arith.constant 0 : index
    %c0_6 = arith.constant 0 : index
    %7 = vector.load %arg4[%c0_5, %c0_6] : memref<64x512xf32, #tpu.memory_space<vmem>>, vector<64x512xf32>
    %c0_7 = arith.constant 0 : index
    %c0_8 = arith.constant 0 : index
    %8 = vector.load %arg5[%c0_7, %c0_8] : memref<1x512xf32, #tpu.memory_space<vmem>>, vector<1x512xf32>
    %9 = vector.broadcast %8 : vector<1x512xf32> to vector<64x512xf32>
    %10 = arith.mulf %7, %9 : vector<64x512xf32>
    %c0_9 = arith.constant 0 : index
    %c0_10 = arith.constant 0 : index
    %11 = vector.load %arg6[%c0_9, %c0_10] : memref<1x512xf32, #tpu.memory_space<vmem>>, vector<1x512xf32>
    %12 = vector.broadcast %11 : vector<1x512xf32> to vector<64x512xf32>
    %13 = arith.addf %10, %12 : vector<64x512xf32>
    %14 = arith.addf %6, %13 : vector<64x512xf32>
    %cst = arith.constant 0.000000e+00 : f32
    %15 = vector.broadcast %cst : f32 to vector<64x512xf32>
    %16 = arith.maximumf %14, %15 : vector<64x512xf32>
    %c0_11 = arith.constant 0 : index
    %c0_12 = arith.constant 0 : index
    %17 = vector.load %arg7[%c0_11, %c0_12] : memref<64x512xf32, #tpu.memory_space<vmem>>, vector<64x512xf32>
    tpu.vector_store %arg7[%c0_11, %c0_12], %16 {strides = array<i32>} : memref<64x512xf32, #tpu.memory_space<vmem>>, vector<64x512xf32>,
    return
  }
  func.func @transform_0(%arg0: i32) -> (i32, i32) {
    %c0_i32 = arith.constant 0 : i32
    %c0_i32_0 = arith.constant 0 : i32
    return %arg0, %c0_i32 : i32, i32
  }
  func.func @transform_1(%arg0: i32) -> (i32, i32) {
    %c0_i32 = arith.constant 0 : i32
    %c0_i32_0 = arith.constant 0 : i32
    %c0_i32_1 = arith.constant 0 : i32
    return %c0_i32, %c0_i32_0 : i32, i32
  }
  func.func @transform_2(%arg0: i32) -> (i32, i32) {
    %c0_i32 = arith.constant 0 : i32
    %c0_i32_0 = arith.constant 0 : i32
    %c0_i32_1 = arith.constant 0 : i32
    return %c0_i32, %c0_i32_0 : i32, i32
  }
  func.func @transform_3(%arg0: i32) -> (i32, i32) {
    %c0_i32 = arith.constant 0 : i32
    %c0_i32_0 = arith.constant 0 : i32
    return %arg0, %c0_i32 : i32, i32
  }
  func.func @transform_4(%arg0: i32) -> (i32, i32) {
    %c0_i32 = arith.constant 0 : i32
    %c0_i32_0 = arith.constant 0 : i32
    %c0_i32_1 = arith.constant 0 : i32
    return %c0_i32, %c0_i32_0 : i32, i32
  }
  func.func @transform_5(%arg0: i32) -> (i32, i32) {
    %c0_i32 = arith.constant 0 : i32
    %c0_i32_0 = arith.constant 0 : i32
    %c0_i32_1 = arith.constant 0 : i32
    return %c0_i32, %c0_i32_0 : i32, i32
  }
  func.func @transform_6(%arg0: i32) -> (i32, i32) {
    %c0_i32 = arith.constant 0 : i32
    %c0_i32_0 = arith.constant 0 : i32
    return %arg0, %c0_i32 : i32, i32
  }
}

module attributes {stable_mosaic.version = 11 : i64} {
  func.func @_mm_kernel(%arg0: i32, %arg1: i32, %arg2: i32, %arg3: memref<64x512xbf16, #tpu.memory_space<vmem>>, %arg4: memref<512x128xbf16, #tpu.memory_space<vmem>>, %arg5: memref<1x512xf32, #tpu.memory_space<vmem>>, %arg6: memref<1x512xf32, #tpu.memory_space<vmem>>, %arg7: memref<64x128xbf16, #tpu.memory_space<vmem>>, %arg8: memref<1x1x128xf32, #tpu.memory_space<vmem>>, %arg9: memref<1x1x128xf32, #tpu.memory_space<vmem>>) attributes {dimension_semantics = [#tpu.dimension_semantics<parallel>, #tpu.dimension_semantics<parallel>, #tpu.dimension_semantics<arbitrary>], iteration_bounds = array<i64: 2, 1, 1>, scalar_prefetch = 0 : i64, scratch_operands = 0 : i64, tpu.core_type = #tpu.core_type<tc>, window_params = [{transform_indices = @transform_0, window_bounds = array<i64: 64, 512>}, {transform_indices = @transform_1, window_bounds = array<i64: 512, 128>}, {transform_indices = @transform_2, window_bounds = array<i64: 1, 512>}, {transform_indices = @transform_3, window_bounds = array<i64: 1, 512>}, {transform_indices = @transform_4, window_bounds = array<i64: 64, 128>}, {transform_indices = @transform_5, window_bounds = array<i64: 1, 1, 128>}, {transform_indices = @transform_6, window_bounds = array<i64: 1, 1, 128>}]} {
    %c0 = arith.constant 0 : index
    %c0_0 = arith.constant 0 : index
    %0 = vector.load %arg3[%c0, %c0_0] : memref<64x512xbf16, #tpu.memory_space<vmem>>, vector<64x512xbf16>
    %c0_1 = arith.constant 0 : index
    %c0_2 = arith.constant 0 : index
    %1 = vector.load %arg4[%c0_1, %c0_2] : memref<512x128xbf16, #tpu.memory_space<vmem>>, vector<512x128xbf16>
    %cst = arith.constant dense<0.000000e+00> : vector<64x128xf32>
    %2 = tpu.matmul %0, %1, %cst {dimension_numbers = #tpu.dot_dimension_numbers<[1], [0], [0], [1], [0, 0, 1, 1], [], []>} : vector<64x512xbf16>, vector<512x128xbf16>, vector<64x128xf32> -> vector<64x128xf32>
    %3 = arith.truncf %2 : vector<64x128xf32> to vector<64x128xbf16>
    %c0_3 = arith.constant 0 : index
    %c0_4 = arith.constant 0 : index
    %4 = vector.load %arg7[%c0_3, %c0_4] : memref<64x128xbf16, #tpu.memory_space<vmem>>, vector<64x128xbf16>
    tpu.vector_store %arg7[%c0_3, %c0_4], %3 {strides = array<i32>} : memref<64x128xbf16, #tpu.memory_space<vmem>>, vector<64x128xbf16>,
    %cst_5 = arith.constant dense<0.000000e+00> : vector<128xf32>
    %5 = vector.multi_reduction <add>, %2, %cst_5 [0] : vector<64x128xf32> to vector<128xf32>
    %6 = vector.shape_cast %5 : vector<128xf32> to vector<1x128xf32>
    %c0_6 = arith.constant 0 : index
    %c0_7 = arith.constant 0 : index
    %c0_8 = arith.constant 0 : index
    %7 = vector.load %arg8[%c0_6, %c0_7, %c0_8] : memref<1x1x128xf32, #tpu.memory_space<vmem>>, vector<1x1x128xf32>
    %8 = vector.shape_cast %7 : vector<1x1x128xf32> to vector<1x128xf32>
    %9 = vector.shape_cast %6 : vector<1x128xf32> to vector<1x1x128xf32>
    tpu.vector_store %arg8[%c0_6, %c0_7, %c0_8], %9 {strides = array<i32>} : memref<1x1x128xf32, #tpu.memory_space<vmem>>, vector<1x1x128xf32>,
    %10 = arith.mulf %2, %2 : vector<64x128xf32>
    %cst_9 = arith.constant dense<0.000000e+00> : vector<128xf32>
    %11 = vector.multi_reduction <add>, %10, %cst_9 [0] : vector<64x128xf32> to vector<128xf32>
    %12 = vector.shape_cast %11 : vector<128xf32> to vector<1x128xf32>
    %c0_10 = arith.constant 0 : index
    %c0_11 = arith.constant 0 : index
    %c0_12 = arith.constant 0 : index
    %13 = vector.load %arg9[%c0_10, %c0_11, %c0_12] : memref<1x1x128xf32, #tpu.memory_space<vmem>>, vector<1x1x128xf32>
    %14 = vector.shape_cast %13 : vector<1x1x128xf32> to vector<1x128xf32>
    %15 = vector.shape_cast %12 : vector<1x128xf32> to vector<1x1x128xf32>
    tpu.vector_store %arg9[%c0_10, %c0_11, %c0_12], %15 {strides = array<i32>} : memref<1x1x128xf32, #tpu.memory_space<vmem>>, vector<1x1x128xf32>,
    return
  }
  func.func @transform_0(%arg0: i32, %arg1: i32, %arg2: i32) -> (i32, i32) {
    %c0_i32 = arith.constant 0 : i32
    return %arg0, %arg2 : i32, i32
  }
  func.func @transform_1(%arg0: i32, %arg1: i32, %arg2: i32) -> (i32, i32) {
    %c0_i32 = arith.constant 0 : i32
    return %arg2, %arg1 : i32, i32
  }
  func.func @transform_2(%arg0: i32, %arg1: i32, %arg2: i32) -> (i32, i32) {
    %c0_i32 = arith.constant 0 : i32
    %c0_i32_0 = arith.constant 0 : i32
    return %c0_i32, %arg2 : i32, i32
  }
  func.func @transform_3(%arg0: i32, %arg1: i32, %arg2: i32) -> (i32, i32) {
    %c0_i32 = arith.constant 0 : i32
    %c0_i32_0 = arith.constant 0 : i32
    return %c0_i32, %arg2 : i32, i32
  }
  func.func @transform_4(%arg0: i32, %arg1: i32, %arg2: i32) -> (i32, i32) {
    %c0_i32 = arith.constant 0 : i32
    return %arg0, %arg1 : i32, i32
  }
  func.func @transform_5(%arg0: i32, %arg1: i32, %arg2: i32) -> (i32, i32, i32) {
    %c0_i32 = arith.constant 0 : i32
    %c0_i32_0 = arith.constant 0 : i32
    return %arg0, %c0_i32, %arg1 : i32, i32, i32
  }
  func.func @transform_6(%arg0: i32, %arg1: i32, %arg2: i32) -> (i32, i32, i32) {
    %c0_i32 = arith.constant 0 : i32
    %c0_i32_0 = arith.constant 0 : i32
    return %arg0, %c0_i32, %arg1 : i32, i32, i32
  }
}

module attributes {stable_mosaic.version = 11 : i64} {
  func.func @_conv3x3_s1_kernel(%arg0: i32, %arg1: memref<1x10x10x128xbf16, #tpu.memory_space<vmem>>, %arg2: memref<9x128x128xbf16, #tpu.memory_space<vmem>>, %arg3: memref<1x1x128xf32, #tpu.memory_space<vmem>>, %arg4: memref<1x1x128xf32, #tpu.memory_space<vmem>>, %arg5: memref<10x10x1xf32, #tpu.memory_space<vmem>>, %arg6: memref<1x8x8x128xbf16, #tpu.memory_space<vmem>>, %arg7: memref<1x1x128xf32, #tpu.memory_space<vmem>>, %arg8: memref<1x1x128xf32, #tpu.memory_space<vmem>>) attributes {dimension_semantics = [#tpu.dimension_semantics<parallel>], iteration_bounds = array<i64: 2>, scalar_prefetch = 0 : i64, scratch_operands = 0 : i64, tpu.core_type = #tpu.core_type<tc>, window_params = [{transform_indices = @transform_0, window_bounds = array<i64: 1, 10, 10, 128>}, {pipeline_mode = #tpu.pipeline_mode<synchronous>, transform_indices = @transform_1, window_bounds = array<i64: 9, 128, 128>}, {pipeline_mode = #tpu.pipeline_mode<synchronous>, transform_indices = @transform_2, window_bounds = array<i64: 1, 1, 128>}, {pipeline_mode = #tpu.pipeline_mode<synchronous>, transform_indices = @transform_3, window_bounds = array<i64: 1, 1, 128>}, {pipeline_mode = #tpu.pipeline_mode<synchronous>, transform_indices = @transform_4, window_bounds = array<i64: 10, 10, 1>}, {transform_indices = @transform_5, window_bounds = array<i64: 1, 8, 8, 128>}, {transform_indices = @transform_6, window_bounds = array<i64: 1, 1, 128>}, {transform_indices = @transform_7, window_bounds = array<i64: 1, 1, 128>}]} {
    %c0 = arith.constant 0 : index
    %c0_0 = arith.constant 0 : index
    %c0_1 = arith.constant 0 : index
    %c0_2 = arith.constant 0 : index
    %0 = vector.load %arg1[%c0, %c0_0, %c0_1, %c0_2] : memref<1x10x10x128xbf16, #tpu.memory_space<vmem>>, vector<1x10x10x128xbf16>
    %1 = vector.shape_cast %0 : vector<1x10x10x128xbf16> to vector<10x10x128xbf16>
    %2 = arith.extf %1 : vector<10x10x128xbf16> to vector<10x10x128xf32>
    %c0_3 = arith.constant 0 : index
    %c0_4 = arith.constant 0 : index
    %c0_5 = arith.constant 0 : index
    %3 = vector.load %arg3[%c0_3, %c0_4, %c0_5] : memref<1x1x128xf32, #tpu.memory_space<vmem>>, vector<1x1x128xf32>
    %4 = vector.broadcast %3 : vector<1x1x128xf32> to vector<10x10x128xf32>
    %5 = arith.mulf %2, %4 : vector<10x10x128xf32>
    %c0_6 = arith.constant 0 : index
    %c0_7 = arith.constant 0 : index
    %c0_8 = arith.constant 0 : index
    %6 = vector.load %arg4[%c0_6, %c0_7, %c0_8] : memref<1x1x128xf32, #tpu.memory_space<vmem>>, vector<1x1x128xf32>
    %7 = vector.broadcast %6 : vector<1x1x128xf32> to vector<10x10x128xf32>
    %8 = arith.addf %5, %7 : vector<10x10x128xf32>
    %cst = arith.constant 0.000000e+00 : f32
    %9 = vector.broadcast %cst : f32 to vector<10x10x128xf32>
    %10 = arith.maximumf %8, %9 : vector<10x10x128xf32>
    %c0_9 = arith.constant 0 : index
    %c0_10 = arith.constant 0 : index
    %c0_11 = arith.constant 0 : index
    %11 = vector.load %arg5[%c0_9, %c0_10, %c0_11] : memref<10x10x1xf32, #tpu.memory_space<vmem>>, vector<10x10x1xf32>
    %12 = vector.broadcast %11 : vector<10x10x1xf32> to vector<10x10x128xf32>
    %13 = arith.mulf %10, %12 : vector<10x10x128xf32>
    %14 = arith.truncf %13 : vector<10x10x128xf32> to vector<10x10x128xbf16>
    %cst_12 = arith.constant 0.000000e+00 : f32
    %15 = vector.broadcast %cst_12 : f32 to vector<64x128xf32>
    %16 = vector.extract_strided_slice %14 {offsets = [0, 0, 0], sizes = [8, 8, 128], strides = [1, 1, 1]} : vector<10x10x128xbf16> to vector<8x8x128xbf16>
    %17 = vector.shape_cast %16 : vector<8x8x128xbf16> to vector<64x128xbf16>
    %c0_13 = arith.constant 0 : index
    %c0_14 = arith.constant 0 : index
    %c0_15 = arith.constant 0 : index
    %18 = vector.load %arg2[%c0_13, %c0_14, %c0_15] : memref<9x128x128xbf16, #tpu.memory_space<vmem>>, vector<1x128x128xbf16>
    %19 = vector.shape_cast %18 : vector<1x128x128xbf16> to vector<128x128xbf16>
    %cst_16 = arith.constant dense<0.000000e+00> : vector<64x128xf32>
    %20 = tpu.matmul %17, %19, %cst_16 {dimension_numbers = #tpu.dot_dimension_numbers<[1], [0], [0], [1], [0, 0, 1, 1], [], []>} : vector<64x128xbf16>, vector<128x128xbf16>, vector<64x128xf32> -> vector<64x128xf32>
    %21 = arith.addf %15, %20 : vector<64x128xf32>
    %22 = vector.extract_strided_slice %14 {offsets = [0, 1, 0], sizes = [8, 8, 128], strides = [1, 1, 1]} : vector<10x10x128xbf16> to vector<8x8x128xbf16>
    %23 = vector.shape_cast %22 : vector<8x8x128xbf16> to vector<64x128xbf16>
    %c1 = arith.constant 1 : index
    %c0_17 = arith.constant 0 : index
    %c0_18 = arith.constant 0 : index
    %24 = vector.load %arg2[%c1, %c0_17, %c0_18] : memref<9x128x128xbf16, #tpu.memory_space<vmem>>, vector<1x128x128xbf16>
    %25 = vector.shape_cast %24 : vector<1x128x128xbf16> to vector<128x128xbf16>
    %cst_19 = arith.constant dense<0.000000e+00> : vector<64x128xf32>
    %26 = tpu.matmul %23, %25, %cst_19 {dimension_numbers = #tpu.dot_dimension_numbers<[1], [0], [0], [1], [0, 0, 1, 1], [], []>} : vector<64x128xbf16>, vector<128x128xbf16>, vector<64x128xf32> -> vector<64x128xf32>
    %27 = arith.addf %21, %26 : vector<64x128xf32>
    %28 = vector.extract_strided_slice %14 {offsets = [0, 2, 0], sizes = [8, 8, 128], strides = [1, 1, 1]} : vector<10x10x128xbf16> to vector<8x8x128xbf16>
    %29 = vector.shape_cast %28 : vector<8x8x128xbf16> to vector<64x128xbf16>
    %c2 = arith.constant 2 : index
    %c0_20 = arith.constant 0 : index
    %c0_21 = arith.constant 0 : index
    %30 = vector.load %arg2[%c2, %c0_20, %c0_21] : memref<9x128x128xbf16, #tpu.memory_space<vmem>>, vector<1x128x128xbf16>
    %31 = vector.shape_cast %30 : vector<1x128x128xbf16> to vector<128x128xbf16>
    %cst_22 = arith.constant dense<0.000000e+00> : vector<64x128xf32>
    %32 = tpu.matmul %29, %31, %cst_22 {dimension_numbers = #tpu.dot_dimension_numbers<[1], [0], [0], [1], [0, 0, 1, 1], [], []>} : vector<64x128xbf16>, vector<128x128xbf16>, vector<64x128xf32> -> vector<64x128xf32>
    %33 = arith.addf %27, %32 : vector<64x128xf32>
    %34 = vector.extract_strided_slice %14 {offsets = [1, 0, 0], sizes = [8, 8, 128], strides = [1, 1, 1]} : vector<10x10x128xbf16> to vector<8x8x128xbf16>
    %35 = vector.shape_cast %34 : vector<8x8x128xbf16> to vector<64x128xbf16>
    %c3 = arith.constant 3 : index
    %c0_23 = arith.constant 0 : index
    %c0_24 = arith.constant 0 : index
    %36 = vector.load %arg2[%c3, %c0_23, %c0_24] : memref<9x128x128xbf16, #tpu.memory_space<vmem>>, vector<1x128x128xbf16>
    %37 = vector.shape_cast %36 : vector<1x128x128xbf16> to vector<128x128xbf16>
    %cst_25 = arith.constant dense<0.000000e+00> : vector<64x128xf32>
    %38 = tpu.matmul %35, %37, %cst_25 {dimension_numbers = #tpu.dot_dimension_numbers<[1], [0], [0], [1], [0, 0, 1, 1], [], []>} : vector<64x128xbf16>, vector<128x128xbf16>, vector<64x128xf32> -> vector<64x128xf32>
    %39 = arith.addf %33, %38 : vector<64x128xf32>
    %40 = vector.extract_strided_slice %14 {offsets = [1, 1, 0], sizes = [8, 8, 128], strides = [1, 1, 1]} : vector<10x10x128xbf16> to vector<8x8x128xbf16>
    %41 = vector.shape_cast %40 : vector<8x8x128xbf16> to vector<64x128xbf16>
    %c4 = arith.constant 4 : index
    %c0_26 = arith.constant 0 : index
    %c0_27 = arith.constant 0 : index
    %42 = vector.load %arg2[%c4, %c0_26, %c0_27] : memref<9x128x128xbf16, #tpu.memory_space<vmem>>, vector<1x128x128xbf16>
    %43 = vector.shape_cast %42 : vector<1x128x128xbf16> to vector<128x128xbf16>
    %cst_28 = arith.constant dense<0.000000e+00> : vector<64x128xf32>
    %44 = tpu.matmul %41, %43, %cst_28 {dimension_numbers = #tpu.dot_dimension_numbers<[1], [0], [0], [1], [0, 0, 1, 1], [], []>} : vector<64x128xbf16>, vector<128x128xbf16>, vector<64x128xf32> -> vector<64x128xf32>
    %45 = arith.addf %39, %44 : vector<64x128xf32>
    %46 = vector.extract_strided_slice %14 {offsets = [1, 2, 0], sizes = [8, 8, 128], strides = [1, 1, 1]} : vector<10x10x128xbf16> to vector<8x8x128xbf16>
    %47 = vector.shape_cast %46 : vector<8x8x128xbf16> to vector<64x128xbf16>
    %c5 = arith.constant 5 : index
    %c0_29 = arith.constant 0 : index
    %c0_30 = arith.constant 0 : index
    %48 = vector.load %arg2[%c5, %c0_29, %c0_30] : memref<9x128x128xbf16, #tpu.memory_space<vmem>>, vector<1x128x128xbf16>
    %49 = vector.shape_cast %48 : vector<1x128x128xbf16> to vector<128x128xbf16>
    %cst_31 = arith.constant dense<0.000000e+00> : vector<64x128xf32>
    %50 = tpu.matmul %47, %49, %cst_31 {dimension_numbers = #tpu.dot_dimension_numbers<[1], [0], [0], [1], [0, 0, 1, 1], [], []>} : vector<64x128xbf16>, vector<128x128xbf16>, vector<64x128xf32> -> vector<64x128xf32>
    %51 = arith.addf %45, %50 : vector<64x128xf32>
    %52 = vector.extract_strided_slice %14 {offsets = [2, 0, 0], sizes = [8, 8, 128], strides = [1, 1, 1]} : vector<10x10x128xbf16> to vector<8x8x128xbf16>
    %53 = vector.shape_cast %52 : vector<8x8x128xbf16> to vector<64x128xbf16>
    %c6 = arith.constant 6 : index
    %c0_32 = arith.constant 0 : index
    %c0_33 = arith.constant 0 : index
    %54 = vector.load %arg2[%c6, %c0_32, %c0_33] : memref<9x128x128xbf16, #tpu.memory_space<vmem>>, vector<1x128x128xbf16>
    %55 = vector.shape_cast %54 : vector<1x128x128xbf16> to vector<128x128xbf16>
    %cst_34 = arith.constant dense<0.000000e+00> : vector<64x128xf32>
    %56 = tpu.matmul %53, %55, %cst_34 {dimension_numbers = #tpu.dot_dimension_numbers<[1], [0], [0], [1], [0, 0, 1, 1], [], []>} : vector<64x128xbf16>, vector<128x128xbf16>, vector<64x128xf32> -> vector<64x128xf32>
    %57 = arith.addf %51, %56 : vector<64x128xf32>
    %58 = vector.extract_strided_slice %14 {offsets = [2, 1, 0], sizes = [8, 8, 128], strides = [1, 1, 1]} : vector<10x10x128xbf16> to vector<8x8x128xbf16>
    %59 = vector.shape_cast %58 : vector<8x8x128xbf16> to vector<64x128xbf16>
    %c7 = arith.constant 7 : index
    %c0_35 = arith.constant 0 : index
    %c0_36 = arith.constant 0 : index
    %60 = vector.load %arg2[%c7, %c0_35, %c0_36] : memref<9x128x128xbf16, #tpu.memory_space<vmem>>, vector<1x128x128xbf16>
    %61 = vector.shape_cast %60 : vector<1x128x128xbf16> to vector<128x128xbf16>
    %cst_37 = arith.constant dense<0.000000e+00> : vector<64x128xf32>
    %62 = tpu.matmul %59, %61, %cst_37 {dimension_numbers = #tpu.dot_dimension_numbers<[1], [0], [0], [1], [0, 0, 1, 1], [], []>} : vector<64x128xbf16>, vector<128x128xbf16>, vector<64x128xf32> -> vector<64x128xf32>
    %63 = arith.addf %57, %62 : vector<64x128xf32>
    %64 = vector.extract_strided_slice %14 {offsets = [2, 2, 0], sizes = [8, 8, 128], strides = [1, 1, 1]} : vector<10x10x128xbf16> to vector<8x8x128xbf16>
    %65 = vector.shape_cast %64 : vector<8x8x128xbf16> to vector<64x128xbf16>
    %c8 = arith.constant 8 : index
    %c0_38 = arith.constant 0 : index
    %c0_39 = arith.constant 0 : index
    %66 = vector.load %arg2[%c8, %c0_38, %c0_39] : memref<9x128x128xbf16, #tpu.memory_space<vmem>>, vector<1x128x128xbf16>
    %67 = vector.shape_cast %66 : vector<1x128x128xbf16> to vector<128x128xbf16>
    %cst_40 = arith.constant dense<0.000000e+00> : vector<64x128xf32>
    %68 = tpu.matmul %65, %67, %cst_40 {dimension_numbers = #tpu.dot_dimension_numbers<[1], [0], [0], [1], [0, 0, 1, 1], [], []>} : vector<64x128xbf16>, vector<128x128xbf16>, vector<64x128xf32> -> vector<64x128xf32>
    %69 = arith.addf %63, %68 : vector<64x128xf32>
    %70 = vector.shape_cast %69 : vector<64x128xf32> to vector<8x8x128xf32>
    %71 = arith.truncf %70 : vector<8x8x128xf32> to vector<8x8x128xbf16>
    %c0_41 = arith.constant 0 : index
    %c0_42 = arith.constant 0 : index
    %c0_43 = arith.constant 0 : index
    %c0_44 = arith.constant 0 : index
    %72 = vector.load %arg6[%c0_41, %c0_42, %c0_43, %c0_44] : memref<1x8x8x128xbf16, #tpu.memory_space<vmem>>, vector<1x8x8x128xbf16>
    %73 = vector.shape_cast %72 : vector<1x8x8x128xbf16> to vector<8x8x128xbf16>
    %74 = vector.shape_cast %71 : vector<8x8x128xbf16> to vector<1x8x8x128xbf16>
    tpu.vector_store %arg6[%c0_41, %c0_42, %c0_43, %c0_44], %74 {strides = array<i32>} : memref<1x8x8x128xbf16, #tpu.memory_space<vmem>>, vector<1x8x8x128xbf16>,
    %cst_45 = arith.constant dense<0.000000e+00> : vector<128xf32>
    %75 = vector.multi_reduction <add>, %69, %cst_45 [0] : vector<64x128xf32> to vector<128xf32>
    %76 = vector.shape_cast %75 : vector<128xf32> to vector<1x128xf32>
    %c0_46 = arith.constant 0 : index
    %c0_47 = arith.constant 0 : index
    %c0_48 = arith.constant 0 : index
    %77 = vector.load %arg7[%c0_46, %c0_47, %c0_48] : memref<1x1x128xf32, #tpu.memory_space<vmem>>, vector<1x1x128xf32>
    %78 = vector.shape_cast %77 : vector<1x1x128xf32> to vector<1x128xf32>
    %79 = vector.shape_cast %76 : vector<1x128xf32> to vector<1x1x128xf32>
    tpu.vector_store %arg7[%c0_46, %c0_47, %c0_48], %79 {strides = array<i32>} : memref<1x1x128xf32, #tpu.memory_space<vmem>>, vector<1x1x128xf32>,
    %80 = arith.mulf %69, %69 : vector<64x128xf32>
    %cst_49 = arith.constant dense<0.000000e+00> : vector<128xf32>
    %81 = vector.multi_reduction <add>, %80, %cst_49 [0] : vector<64x128xf32> to vector<128xf32>
    %82 = vector.shape_cast %81 : vector<128xf32> to vector<1x128xf32>
    %c0_50 = arith.constant 0 : index
    %c0_51 = arith.constant 0 : index
    %c0_52 = arith.constant 0 : index
    %83 = vector.load %arg8[%c0_50, %c0_51, %c0_52] : memref<1x1x128xf32, #tpu.memory_space<vmem>>, vector<1x1x128xf32>
    %84 = vector.shape_cast %83 : vector<1x1x128xf32> to vector<1x128xf32>
    %85 = vector.shape_cast %82 : vector<1x128xf32> to vector<1x1x128xf32>
    tpu.vector_store %arg8[%c0_50, %c0_51, %c0_52], %85 {strides = array<i32>} : memref<1x1x128xf32, #tpu.memory_space<vmem>>, vector<1x1x128xf32>,
    return
  }
  func.func @transform_0(%arg0: i32) -> (i32, i32, i32, i32) {
    %c0_i32 = arith.constant 0 : i32
    %c0_i32_0 = arith.constant 0 : i32
    %c0_i32_1 = arith.constant 0 : i32
    %c0_i32_2 = arith.constant 0 : i32
    return %arg0, %c0_i32, %c0_i32_0, %c0_i32_1 : i32, i32, i32, i32
  }
  func.func @transform_1(%arg0: i32) -> (i32, i32, i32) {
    %c0_i32 = arith.constant 0 : i32
    %c0_i32_0 = arith.constant 0 : i32
    %c0_i32_1 = arith.constant 0 : i32
    %c0_i32_2 = arith.constant 0 : i32
    return %c0_i32, %c0_i32_0, %c0_i32_1 : i32, i32, i32
  }
  func.func @transform_2(%arg0: i32) -> (i32, i32, i32) {
    %c0_i32 = arith.constant 0 : i32
    %c0_i32_0 = arith.constant 0 : i32
    %c0_i32_1 = arith.constant 0 : i32
    %c0_i32_2 = arith.constant 0 : i32
    return %c0_i32, %c0_i32_0, %c0_i32_1 : i32, i32, i32
  }
  func.func @transform_3(%arg0: i32) -> (i32, i32, i32) {
    %c0_i32 = arith.constant 0 : i32
    %c0_i32_0 = arith.constant 0 : i32
    %c0_i32_1 = arith.constant 0 : i32
    %c0_i32_2 = arith.constant 0 : i32
    return %c0_i32, %c0_i32_0, %c0_i32_1 : i32, i32, i32
  }
  func.func @transform_4(%arg0: i32) -> (i32, i32, i32) {
    %c0_i32 = arith.constant 0 : i32
    %c0_i32_0 = arith.constant 0 : i32
    %c0_i32_1 = arith.constant 0 : i32
    %c0_i32_2 = arith.constant 0 : i32
    return %c0_i32, %c0_i32_0, %c0_i32_1 : i32, i32, i32
  }
  func.func @transform_5(%arg0: i32) -> (i32, i32, i32, i32) {
    %c0_i32 = arith.constant 0 : i32
    %c0_i32_0 = arith.constant 0 : i32
    %c0_i32_1 = arith.constant 0 : i32
    %c0_i32_2 = arith.constant 0 : i32
    return %arg0, %c0_i32, %c0_i32_0, %c0_i32_1 : i32, i32, i32, i32
  }
  func.func @transform_6(%arg0: i32) -> (i32, i32, i32) {
    %c0_i32 = arith.constant 0 : i32
    %c0_i32_0 = arith.constant 0 : i32
    %c0_i32_1 = arith.constant 0 : i32
    return %arg0, %c0_i32, %c0_i32_0 : i32, i32, i32
  }
  func.func @transform_7(%arg0: i32) -> (i32, i32, i32) {
    %c0_i32 = arith.constant 0 : i32
    %c0_i32_0 = arith.constant 0 : i32
    %c0_i32_1 = arith.constant 0 : i32
    return %arg0, %c0_i32, %c0_i32_0 : i32, i32, i32
  }
}

module attributes {stable_mosaic.version = 11 : i64} {
  func.func @_bn_add_relu_kernel(%arg0: i32, %arg1: memref<64x512xf32, #tpu.memory_space<vmem>>, %arg2: memref<1x512xf32, #tpu.memory_space<vmem>>, %arg3: memref<1x512xf32, #tpu.memory_space<vmem>>, %arg4: memref<64x512xf32, #tpu.memory_space<vmem>>, %arg5: memref<1x512xf32, #tpu.memory_space<vmem>>, %arg6: memref<1x512xf32, #tpu.memory_space<vmem>>, %arg7: memref<64x512xf32, #tpu.memory_space<vmem>>) attributes {dimension_semantics = [#tpu.dimension_semantics<parallel>], iteration_bounds = array<i64: 2>, scalar_prefetch = 0 : i64, scratch_operands = 0 : i64, tpu.core_type = #tpu.core_type<tc>, window_params = [{transform_indices = @transform_0, window_bounds = array<i64: 64, 512>}, {pipeline_mode = #tpu.pipeline_mode<synchronous>, transform_indices = @transform_1, window_bounds = array<i64: 1, 512>}, {pipeline_mode = #tpu.pipeline_mode<synchronous>, transform_indices = @transform_2, window_bounds = array<i64: 1, 512>}, {transform_indices = @transform_3, window_bounds = array<i64: 64, 512>}, {pipeline_mode = #tpu.pipeline_mode<synchronous>, transform_indices = @transform_4, window_bounds = array<i64: 1, 512>}, {pipeline_mode = #tpu.pipeline_mode<synchronous>, transform_indices = @transform_5, window_bounds = array<i64: 1, 512>}, {transform_indices = @transform_6, window_bounds = array<i64: 64, 512>}]} {
    %c0 = arith.constant 0 : index
    %c0_0 = arith.constant 0 : index
    %0 = vector.load %arg1[%c0, %c0_0] : memref<64x512xf32, #tpu.memory_space<vmem>>, vector<64x512xf32>
    %c0_1 = arith.constant 0 : index
    %c0_2 = arith.constant 0 : index
    %1 = vector.load %arg2[%c0_1, %c0_2] : memref<1x512xf32, #tpu.memory_space<vmem>>, vector<1x512xf32>
    %2 = vector.broadcast %1 : vector<1x512xf32> to vector<64x512xf32>
    %3 = arith.mulf %0, %2 : vector<64x512xf32>
    %c0_3 = arith.constant 0 : index
    %c0_4 = arith.constant 0 : index
    %4 = vector.load %arg3[%c0_3, %c0_4] : memref<1x512xf32, #tpu.memory_space<vmem>>, vector<1x512xf32>
    %5 = vector.broadcast %4 : vector<1x512xf32> to vector<64x512xf32>
    %6 = arith.addf %3, %5 : vector<64x512xf32>
    %c0_5 = arith.constant 0 : index
    %c0_6 = arith.constant 0 : index
    %7 = vector.load %arg4[%c0_5, %c0_6] : memref<64x512xf32, #tpu.memory_space<vmem>>, vector<64x512xf32>
    %c0_7 = arith.constant 0 : index
    %c0_8 = arith.constant 0 : index
    %8 = vector.load %arg5[%c0_7, %c0_8] : memref<1x512xf32, #tpu.memory_space<vmem>>, vector<1x512xf32>
    %9 = vector.broadcast %8 : vector<1x512xf32> to vector<64x512xf32>
    %10 = arith.mulf %7, %9 : vector<64x512xf32>
    %c0_9 = arith.constant 0 : index
    %c0_10 = arith.constant 0 : index
    %11 = vector.load %arg6[%c0_9, %c0_10] : memref<1x512xf32, #tpu.memory_space<vmem>>, vector<1x512xf32>
    %12 = vector.broadcast %11 : vector<1x512xf32> to vector<64x512xf32>
    %13 = arith.addf %10, %12 : vector<64x512xf32>
    %14 = arith.addf %6, %13 : vector<64x512xf32>
    %cst = arith.constant 0.000000e+00 : f32
    %15 = vector.broadcast %cst : f32 to vector<64x512xf32>
    %16 = arith.maximumf %14, %15 : vector<64x512xf32>
    %c0_11 = arith.constant 0 : index
    %c0_12 = arith.constant 0 : index
    %17 = vector.load %arg7[%c0_11, %c0_12] : memref<64x512xf32, #tpu.memory_space<vmem>>, vector<64x512xf32>
    tpu.vector_store %arg7[%c0_11, %c0_12], %16 {strides = array<i32>} : memref<64x512xf32, #tpu.memory_space<vmem>>, vector<64x512xf32>,
    return
  }
  func.func @transform_0(%arg0: i32) -> (i32, i32) {
    %c0_i32 = arith.constant 0 : i32
    %c0_i32_0 = arith.constant 0 : i32
    return %arg0, %c0_i32 : i32, i32
  }
  func.func @transform_1(%arg0: i32) -> (i32, i32) {
    %c0_i32 = arith.constant 0 : i32
    %c0_i32_0 = arith.constant 0 : i32
    %c0_i32_1 = arith.constant 0 : i32
    return %c0_i32, %c0_i32_0 : i32, i32
  }
  func.func @transform_2(%arg0: i32) -> (i32, i32) {
    %c0_i32 = arith.constant 0 : i32
    %c0_i32_0 = arith.constant 0 : i32
    %c0_i32_1 = arith.constant 0 : i32
    return %c0_i32, %c0_i32_0 : i32, i32
  }
  func.func @transform_3(%arg0: i32) -> (i32, i32) {
    %c0_i32 = arith.constant 0 : i32
    %c0_i32_0 = arith.constant 0 : i32
    return %arg0, %c0_i32 : i32, i32
  }
  func.func @transform_4(%arg0: i32) -> (i32, i32) {
    %c0_i32 = arith.constant 0 : i32
    %c0_i32_0 = arith.constant 0 : i32
    %c0_i32_1 = arith.constant 0 : i32
    return %c0_i32, %c0_i32_0 : i32, i32
  }
  func.func @transform_5(%arg0: i32) -> (i32, i32) {
    %c0_i32 = arith.constant 0 : i32
    %c0_i32_0 = arith.constant 0 : i32
    %c0_i32_1 = arith.constant 0 : i32
    return %c0_i32, %c0_i32_0 : i32, i32
  }
  func.func @transform_6(%arg0: i32) -> (i32, i32) {
    %c0_i32 = arith.constant 0 : i32
    %c0_i32_0 = arith.constant 0 : i32
    return %arg0, %c0_i32 : i32, i32
  }
}

</mosaic_0001>

<bundles_post_ra>
// kernel: fwd.9
= control target key start
LH: loop header
LB: loop body
LE: loop exit
PB: predicated region body
PF: predicated region fallthrough
CT: control target
= control target key end

     0   :  { %s1721_s21 = smov 0   ;;  %s1723_s22 = smov 0   ;;  %s1997_s0 = inlined_call_operand.vmem [shape: bf16[512,256], index: 0, kind: input, shape index: {}]   ;;  %s1998_s1 = inlined_call_operand.vmem [shape: bf16[256,128], index: 1, kind: input, shape index: {}]   ;;  %s1999_s2 = inlined_call_operand.vmem [shape: f32[1,256], index: 2, kind: input, shape index: {}]   ;;  %s2000_s3 = inlined_call_operand.vmem [shape: f32[1,256], index: 3, kind: input, shape index: {}]   ;;  %s2001_s4 = inlined_call_operand.vmem [shape: bf16[512,128], index: 4, kind: output, shape index: {0}]   ;;  %s2002_s5 = inlined_call_operand.vmem [shape: f32[2,1,128], index: 5, kind: output, shape index: {1}]   ;;  %s2003_s6 = inlined_call_operand.vmem [shape: f32[2,1,128], index: 6, kind: output, shape index: {2}]  }
   0x1   :  { %s1725_s23 = smov 0  }
   0x2 LB: > { %s36_s2 = sadd.s32 1, %s1680_s22  ;;  %p1278_p0 = scmp.ge.s32.totalorder %s1684_s23, 1  ;;  %s1684_s23 = sphi %s1725_s23, %s17_s23   ;;  %s1680_s22 = sphi %s1723_s22, %s2005_s22   ;;  %s1676_s21 = sphi %s1721_s21, %s2004_s21  }
   0x3   : > { %p38_p1 = scmp.ge.s32.totalorder %s36_s2, 2  ;;  %p287_p2 = scmp.lt.s32.totalorder %s1684_s23, 3 }
   0x5   : > { %s2007_s2 = smov (%p38_p1, %s36_s2), 0  ;;  %p288_p3 = pnand %p1278_p0, %p287_p2 }
   0x6   : > { %s1279_s11 = sshll.u32 (!%p288_p3), %s1676_s21, 5  ;;  %p393_p5 = scmp.lt.s32.totalorder (!%p288_p3), %s1676_s21, 1 }
   0x7   : > { %291 = sbr.rel (%p288_p3) target bundleno = 342 (0x156), region = 36  ;;  %p355_p4 = scmp.lt.s32.totalorder (!%p288_p3), %s1279_s11, 63 }
   0xc   : > { %v1518_v0 = vld [vmem:[%s1998_s1 + $0x38] sm:$0xff]  ;;  %v1517_v2 = vld [vmem:[%s1998_s1 + $0x30] sm:$0xff]  ;;  %v1516_v4 = vld [vmem:[%s1998_s1 + $0x28] sm:$0xff]  ;;  %s2009_s11 = smov (!%p355_p4, %s1279_s11), 63  ;;  %s2011_s21 = smov (!%p393_p5, %s1676_s21), 1 }
   0xd   : > { %v1526_v1 = vld [vmem:[%s1998_s1 + $0x78] sm:$0xff]  ;;  %725 = vmatpush.bf16.msra.mxu0 %v1518_v0  ;;  %v1525_v3 = vld [vmem:[%s1998_s1 + $0x70] sm:$0xff]  ;;  %1622 = vmatpush.bf16.msra.mxu2 %v1518_v0  ;;  %v1524_v5 = vld [vmem:[%s1998_s1 + $0x68] sm:$0xff]  ;;  %s1478_s26 = sshll.u32 %s2009_s11, 3  ;;  %s1283_s15 = sshll.u32 %s2009_s11, 2 }
   0xe   : > { %814 = vmatpush.bf16.msra.mxu1 %v1526_v1  ;;  %1630 = vmatpush.bf16.msra.mxu3 %v1526_v1  ;;  %v1515_v6 = vld [vmem:[%s1998_s1 + $0x20] sm:$0xff]  ;;  %v1514_v8 = vld [vmem:[%s1998_s1 + $0x18] sm:$0xff]  ;;  %v1513_v10 = vld [vmem:[%s1998_s1 + $0x10] sm:$0xff]  ;;  %s1790_s9 = scalar_lea.vmem %s1997_s0, %s1478_s26  ;;  %s1866_s18 = scalar_lea.vmem %s2001_s4, %s1283_s15 }
   0xf   : > { %v1523_v7 = vld [vmem:[%s1998_s1 + $0x60] sm:$0xff]  ;;  %v1522_v9 = vld [vmem:[%s1998_s1 + $0x58] sm:$0xff]  ;;  %v1521_v11 = vld [vmem:[%s1998_s1 + $0x50] sm:$0xff]  ;;  %s398_s20 = scalar_lea.vmem %s2002_s5, %s2011_s21  ;;  %s404_s25 = scalar_lea.vmem %s2003_s6, %s2011_s21 }
  0x10   : > { %v1512_v12 = vld [vmem:[%s1998_s1 + $0x8] sm:$0xff]  ;;  %v1511_v14 = vld [vmem:[%s1998_s1] sm:$0xff]  ;;  %v1294_v28 = vld [vmem:[%s1790_s9 + $0x10] sm:$0xf] }
  0x11   : > { %726 = vmatpush.bf16.msra.mxu0 %v1517_v2  ;;  %1623 = vmatpush.bf16.msra.mxu2 %v1517_v2  ;;  %v1520_v13 = vld [vmem:[%s1998_s1 + $0x48] sm:$0xff]  ;;  %v1519_v15 = vld [vmem:[%s1998_s1 + $0x40] sm:$0xff]  ;;  %v1482_v29 = vld [vmem:[%s1790_s9 + $0x14] sm:$0xf0] }
  0x12   : > { %815 = vmatpush.bf16.msra.mxu1 %v1525_v3  ;;  %1631 = vmatpush.bf16.msra.mxu3 %v1525_v3  ;;  %v1286_v16 = vld [vmem:[%s1790_s9] sm:$0xf]  ;;  %v1480_v17 = vld [vmem:[%s1790_s9 + $0x4] sm:$0xf0]  ;;  %v1479_v18 = vld [vmem:[%s1790_s9 + $0x4] sm:$0xf]  ;;  %v1295_v36 = vor.u32 %v1482_v29, %v1294_v28 }
  0x13   : > { %v1288_v19 = vld [vmem:[%s1790_s9 + $0x8] sm:$0xf0]  ;;  %v1350_v20 = vld [vmem:[%s1790_s9 + $0x80] sm:$0xf]  ;;  %v1496_v21 = vld [vmem:[%s1790_s9 + $0x84] sm:$0xf0]  ;;  %v1287_v24 = vor.u32 %v1480_v17, %v1286_v16 }
  0x14   : > { %v1495_v22 = vld [vmem:[%s1790_s9 + $0x84] sm:$0xf]  ;;  %v1352_v23 = vld [vmem:[%s1790_s9 + $0x88] sm:$0xf0]  ;;  %v1291_v25 = vor.u32 %v1479_v18, %v1288_v19  ;;  %v1351_v26 = vor.u32 %v1496_v21, %v1350_v20  ;;  %v1481_v30 = vld [vmem:[%s1790_s9 + $0x14] sm:$0xf] }
  0x15   : > { %727 = vmatpush.bf16.msra.mxu0 %v1516_v4  ;;  %1624 = vmatpush.bf16.msra.mxu2 %v1516_v4  ;;  %v1355_v27 = vor.u32 %v1495_v22, %v1352_v23  ;;  %v1296_v31 = vld [vmem:[%s1790_s9 + $0x18] sm:$0xf0]  ;;  %v1358_v32 = vld [vmem:[%s1790_s9 + $0x90] sm:$0xf]  ;;  %v1498_v33 = vld [vmem:[%s1790_s9 + $0x94] sm:$0xf0] }
  0x16   : > { %816 = vmatpush.bf16.msra.mxu1 %v1524_v5  ;;  %1632 = vmatpush.bf16.msra.mxu3 %v1524_v5  ;;  %v1497_v34 = vld [vmem:[%s1790_s9 + $0x94] sm:$0xf]  ;;  %v1360_v35 = vld [vmem:[%s1790_s9 + $0x98] sm:$0xf0]  ;;  %v1299_v37 = vor.u32 %v1481_v30, %v1296_v31  ;;  %v1359_v38 = vor.u32 %v1498_v33, %v1358_v32  ;;  %v1302_v40 = vld [vmem:[%s1790_s9 + $0x20] sm:$0xf] }
  0x17   : > { %v1363_v39 = vor.u32 %v1497_v34, %v1360_v35  ;;  %v1484_v41 = vld [vmem:[%s1790_s9 + $0x24] sm:$0xf0]  ;;  %v1483_v42 = vld [vmem:[%s1790_s9 + $0x24] sm:$0xf]  ;;  %v1304_v43 = vld [vmem:[%s1790_s9 + $0x28] sm:$0xf0] }
  0x18   : > { %v1366_v44 = vld [vmem:[%s1790_s9 + $0xa0] sm:$0xf]  ;;  %v1500_v45 = vld [vmem:[%s1790_s9 + $0xa4] sm:$0xf0]  ;;  %v1499_v46 = vld [vmem:[%s1790_s9 + $0xa4] sm:$0xf]  ;;  %v1303_v48 = vor.u32 %v1484_v41, %v1302_v40  ;;  %v1307_v49 = vor.u32 %v1483_v42, %v1304_v43 }
  0x19   : > { %728 = vmatpush.bf16.msra.mxu0 %v1515_v6  ;;  %1625 = vmatpush.bf16.msra.mxu2 %v1515_v6  ;;  %v1368_v47 = vld [vmem:[%s1790_s9 + $0xa8] sm:$0xf0]  ;;  %v1367_v50 = vor.u32 %v1500_v45, %v1366_v44  ;;  %v1310_v52 = vld [vmem:[%s1790_s9 + $0x30] sm:$0xf]  ;;  %v1486_v53 = vld [vmem:[%s1790_s9 + $0x34] sm:$0xf0] }
  0x1a   : > { %817 = vmatpush.bf16.msra.mxu1 %v1523_v7  ;;  %1633 = vmatpush.bf16.msra.mxu3 %v1523_v7  ;;  %v1371_v51 = vor.u32 %v1499_v46, %v1368_v47  ;;  %v1485_v54 = vld [vmem:[%s1790_s9 + $0x34] sm:$0xf]  ;;  %v1312_v55 = vld [vmem:[%s1790_s9 + $0x38] sm:$0xf0]  ;;  %v1374_v56 = vld [vmem:[%s1790_s9 + $0xb0] sm:$0xf]  ;;  %v1311_v60 = vor.u32 %v1486_v53, %v1310_v52 }
  0x1b   : > { %v1502_v57 = vld [vmem:[%s1790_s9 + $0xb4] sm:$0xf0]  ;;  %v1501_v58 = vld [vmem:[%s1790_s9 + $0xb4] sm:$0xf]  ;;  %v1376_v59 = vld [vmem:[%s1790_s9 + $0xb8] sm:$0xf0]  ;;  %v1315_v61 = vor.u32 %v1485_v54, %v1312_v55 }
  0x1c   : > { %v1375_v62 = vor.u32 %v1502_v57, %v1374_v56  ;;  %v1379_v63 = vor.u32 %v1501_v58, %v1376_v59  ;;  %v1318_v0 = vld [vmem:[%s1790_s9 + $0x40] sm:$0xf]  ;;  %v1488_v1 = vld [vmem:[%s1790_s9 + $0x44] sm:$0xf0]  ;;  %v1487_v2 = vld [vmem:[%s1790_s9 + $0x44] sm:$0xf] }
  0x1d   : > { %729 = vmatpush.bf16.msra.mxu0 %v1514_v8  ;;  %1626 = vmatpush.bf16.msra.mxu2 %v1514_v8  ;;  %v1320_v3 = vld [vmem:[%s1790_s9 + $0x48] sm:$0xf0]  ;;  %v1382_v4 = vld [vmem:[%s1790_s9 + $0xc0] sm:$0xf]  ;;  %v1504_v5 = vld [vmem:[%s1790_s9 + $0xc4] sm:$0xf0]  ;;  %v1319_v8 = vor.u32 %v1488_v1, %v1318_v0 }
  0x1e   : > { %818 = vmatpush.bf16.msra.mxu1 %v1522_v9  ;;  %1634 = vmatpush.bf16.msra.mxu3 %v1522_v9  ;;  %v1503_v6 = vld [vmem:[%s1790_s9 + $0xc4] sm:$0xf]  ;;  %v1384_v7 = vld [vmem:[%s1790_s9 + $0xc8] sm:$0xf0]  ;;  %v1323_v9 = vor.u32 %v1487_v2, %v1320_v3  ;;  %v1390_v16 = vld [vmem:[%s1790_s9 + $0xd0] sm:$0xf] }
  0x1f   : > { %v1506_v17 = vld [vmem:[%s1790_s9 + $0xd4] sm:$0xf0]  ;;  %v1505_v18 = vld [vmem:[%s1790_s9 + $0xd4] sm:$0xf]  ;;  %v1392_v19 = vld [vmem:[%s1790_s9 + $0xd8] sm:$0xf0] }
  0x20   : > { %v1391_v22 = vor.u32 %v1506_v17, %v1390_v16  ;;  %v1395_v23 = vor.u32 %v1505_v18, %v1392_v19  ;;  %v1398_v28 = vld [vmem:[%s1790_s9 + $0xe0] sm:$0xf]  ;;  %v1508_v29 = vld [vmem:[%s1790_s9 + $0xe4] sm:$0xf0]  ;;  %v1507_v30 = vld [vmem:[%s1790_s9 + $0xe4] sm:$0xf] }
  0x21   : > { %730 = vmatpush.bf16.msra.mxu0 %v1513_v10  ;;  %1627 = vmatpush.bf16.msra.mxu2 %v1513_v10  ;;  %v1383_v10 = vor.u32 %v1504_v5, %v1382_v4  ;;  %v1400_v31 = vld [vmem:[%s1790_s9 + $0xe8] sm:$0xf0]  ;;  %v1399_v34 = vor.u32 %v1508_v29, %v1398_v28  ;;  %v1406_v40 = vld [vmem:[%s1790_s9 + $0xf0] sm:$0xf]  ;;  %v1510_v41 = vld [vmem:[%s1790_s9 + $0xf4] sm:$0xf0] }
  0x22   : > { %819 = vmatpush.bf16.msra.mxu1 %v1521_v11  ;;  %1635 = vmatpush.bf16.msra.mxu3 %v1521_v11  ;;  %v1387_v11 = vor.u32 %v1503_v6, %v1384_v7  ;;  %v1403_v35 = vor.u32 %v1507_v30, %v1400_v31  ;;  %v1509_v42 = vld [vmem:[%s1790_s9 + $0xf4] sm:$0xf]  ;;  %v1408_v43 = vld [vmem:[%s1790_s9 + $0xf8] sm:$0xf0]  ;;  %v1407_v46 = vor.u32 %v1510_v41, %v1406_v40 }
  0x23   : > { %v1411_v47 = vor.u32 %v1509_v42, %v1408_v43 }
  0x25   : > { %731 = vmatpush.bf16.msra.mxu0 %v1512_v12  ;;  %1628 = vmatpush.bf16.msra.mxu2 %v1512_v12  ;;  %v1326_v12 = vld [vmem:[%s1790_s9 + $0x50] sm:$0xf] }
  0x26   : > { %820 = vmatpush.bf16.msra.mxu1 %v1520_v13  ;;  %1636 = vmatpush.bf16.msra.mxu3 %v1520_v13  ;;  %v1490_v13 = vld [vmem:[%s1790_s9 + $0x54] sm:$0xf0] }
  0x27   : > { %v1327_v20 = vor.u32 %v1490_v13, %v1326_v12 }
  0x29   : > { %732 = vmatpush.bf16.msra.mxu0 %v1511_v14  ;;  %1629 = vmatpush.bf16.msra.mxu2 %v1511_v14  ;;  %v1489_v14 = vld [vmem:[%s1790_s9 + $0x54] sm:$0xf] }
  0x2a   : > { %821 = vmatpush.bf16.msra.mxu1 %v1519_v15  ;;  %1637 = vmatpush.bf16.msra.mxu3 %v1519_v15  ;;  %v1328_v15 = vld [vmem:[%s1790_s9 + $0x58] sm:$0xf0] }
  0x2b   : > { %v1331_v21 = vor.u32 %v1489_v14, %v1328_v15 }
  0x2c   : > { %733 = vmatmul.bf16.vlgmr.msra.gmra.mxu0 %v1287_v24  ;;  %773 = vmatmul.bf16.vlgmr.msra.gmra.mxu2 %v1351_v26  ;;  %v1334_v24 = vld [vmem:[%s1790_s9 + $0x60] sm:$0xf]  ;;  %v1491_v26 = vld [vmem:[%s1790_s9 + $0x64] sm:$0xf] }
  0x2d   : > { %822 = vmatmul.bf16.vlgmr.msra.gmra.mxu1 %v1291_v25  ;;  %862 = vmatmul.bf16.vlgmr.msra.gmra.mxu3 %v1355_v27  ;;  %v1492_v25 = vld [vmem:[%s1790_s9 + $0x64] sm:$0xf0]  ;;  %v1336_v27 = vld [vmem:[%s1790_s9 + $0x68] sm:$0xf0] }
  0x2e   : > { %v1335_v32 = vor.u32 %v1492_v25, %v1334_v24  ;;  %v1339_v33 = vor.u32 %v1491_v26, %v1336_v27 }
  0x3c   : > { %738 = vmatmul.bf16.gmra.mxu0 %v1295_v36  ;;  %778 = vmatmul.bf16.gmra.mxu2 %v1359_v38  ;;  %v1342_v36 = vld [vmem:[%s1790_s9 + $0x70] sm:$0xf]  ;;  %v1493_v38 = vld [vmem:[%s1790_s9 + $0x74] sm:$0xf] }
  0x3d   : > { %827 = vmatmul.bf16.gmra.mxu1 %v1299_v37  ;;  %867 = vmatmul.bf16.gmra.mxu3 %v1363_v39  ;;  %v1494_v37 = vld [vmem:[%s1790_s9 + $0x74] sm:$0xf0]  ;;  %v1344_v39 = vld [vmem:[%s1790_s9 + $0x78] sm:$0xf0] }
  0x3e   : > { %v1343_v44 = vor.u32 %v1494_v37, %v1342_v36  ;;  %v1347_v45 = vor.u32 %v1493_v38, %v1344_v39 }
  0x4c   : > { %743 = vmatmul.bf16.gmra.mxu0 %v1303_v48  ;;  %783 = vmatmul.bf16.gmra.mxu2 %v1367_v50 }
  0x4d   : > { %832 = vmatmul.bf16.gmra.mxu1 %v1307_v49  ;;  %872 = vmatmul.bf16.gmra.mxu3 %v1371_v51 }
  0x5c   : > { %748 = vmatmul.bf16.gmra.mxu0 %v1311_v60  ;;  %788 = vmatmul.bf16.gmra.mxu2 %v1375_v62 }
  0x5d   : > { %837 = vmatmul.bf16.gmra.mxu1 %v1315_v61  ;;  %877 = vmatmul.bf16.gmra.mxu3 %v1379_v63 }
  0x6c   : > { %753 = vmatmul.bf16.gmra.mxu0 %v1319_v8  ;;  %793 = vmatmul.bf16.gmra.mxu2 %v1383_v10 }
  0x6d   : > { %842 = vmatmul.bf16.gmra.mxu1 %v1323_v9  ;;  %882 = vmatmul.bf16.gmra.mxu3 %v1387_v11 }
  0x7c   : > { %758 = vmatmul.bf16.gmra.mxu0 %v1327_v20  ;;  %798 = vmatmul.bf16.gmra.mxu2 %v1391_v22 }
  0x7d   : > { %847 = vmatmul.bf16.gmra.mxu1 %v1331_v21  ;;  %887 = vmatmul.bf16.gmra.mxu3 %v1395_v23 }
  0x8c   : > { %763 = vmatmul.bf16.gmra.mxu0 %v1335_v32  ;;  %803 = vmatmul.bf16.gmra.mxu2 %v1399_v34 }
  0x8d   : > { %852 = vmatmul.bf16.gmra.mxu1 %v1339_v33  ;;  %892 = vmatmul.bf16.gmra.mxu3 %v1403_v35 }
  0x9c   : > { %768 = vmatmul.bf16.gmra.mxu0 %v1343_v44  ;;  %808 = vmatmul.bf16.gmra.mxu2 %v1407_v46 }
  0x9d   : > { %857 = vmatmul.bf16.gmra.mxu1 %v1347_v45  ;;  %897 = vmatmul.bf16.gmra.mxu3 %v1411_v47 }
  0xa9   : > { %v734_v48 = vpop.f32.mrf.mxu0 }
  0xaa   : > { %v823_v49 = vpop.f32.mrf.mxu1 }
  0xab   : > { %v824_v50 = vadd.f32 %v823_v49, %v734_v48 }
  0xad   : > { %v1005_v56 = vmul.f32 %v824_v50, %v824_v50 }
  0xaf   : > { %v774_v51 = vpop.f32.mrf.mxu2 }
  0xb0   : > { %v863_v52 = vpop.f32.mrf.mxu3 }
  0xb1   : > { %v736_v53 = vpop.f32.mrf.mxu0  ;;  %v1869_v61 = vadd.f32 %v863_v52, %v774_v51 }
  0xb2   : > { %v825_v54 = vpop.f32.mrf.mxu1 }
  0xb3   : > { %v826_v55 = vadd.f32 %v825_v54, %v736_v53 }
  0xb5   : > { %v1530_v57 = vpack.c.bf16 %v826_v55, %v824_v50  ;;  %v967_v58 = vadd.f32 %v826_v55, %v824_v50  ;;  %v1006_v59 = vmul.f32 %v826_v55, %v826_v55 }
  0xb7   : > { %1531 = vst [vmem:[%s1866_s18] sm:$0xff] %v1530_v57   ;;  %v1037_v60 = vadd.f32 %v1006_v59, %v1005_v56  ;;  %v776_v62 = vpop.f32.mrf.mxu2 }
  0xb8   : > { %v865_v63 = vpop.f32.mrf.mxu3 }
  0xb9   : > { %v739_v0 = vpop.f32.mrf.mxu0  ;;  %v1871_v2 = vadd.f32 %v865_v63, %v776_v62 }
  0xba   : > { %v828_v1 = vpop.f32.mrf.mxu1 }
  0xbb   : > { %v829_v3 = vadd.f32 %v828_v1, %v739_v0  ;;  %v1570_v4 = vpack.c.bf16 %v1871_v2, %v1869_v61 }
  0xbd   : > { %v968_v5 = vadd.f32 %v967_v58, %v829_v3  ;;  %v1007_v6 = vmul.f32 %v829_v3, %v829_v3  ;;  %1614 = vst [vmem:[%s1866_s18 + $0x40] sm:$0xff] %v1570_v4  }
  0xbf   : > { %v1038_v7 = vadd.f32 %v1037_v60, %v1007_v6  ;;  %v779_v8 = vpop.f32.mrf.mxu2 }
  0xc0   : > { %v868_v9 = vpop.f32.mrf.mxu3 }
  0xc1   : > { %v741_v10 = vpop.f32.mrf.mxu0  ;;  %v1881_v17 = vadd.f32 %v868_v9, %v779_v8 }
  0xc2   : > { %v830_v11 = vpop.f32.mrf.mxu1 }
  0xc3   : > { %v831_v12 = vadd.f32 %v830_v11, %v741_v10 }
  0xc5   : > { %v1535_v13 = vpack.c.bf16 %v831_v12, %v829_v3  ;;  %v1876_v14 = vadd.f32 %v968_v5, %v831_v12  ;;  %v1008_v15 = vmul.f32 %v831_v12, %v831_v12 }
  0xc7   : > { %1607 = vst [vmem:[%s1866_s18 + $0x8] sm:$0xff] %v1535_v13   ;;  %v1879_v16 = vadd.f32 %v1038_v7, %v1008_v15  ;;  %v781_v18 = vpop.f32.mrf.mxu2 }
  0xc8   : > { %v870_v19 = vpop.f32.mrf.mxu3 }
  0xc9   : > { %v744_v20 = vpop.f32.mrf.mxu0  ;;  %v1883_v22 = vadd.f32 %v870_v19, %v781_v18 }
  0xca   : > { %v833_v21 = vpop.f32.mrf.mxu1 }
  0xcb   : > { %v1575_v23 = vpack.c.bf16 %v1883_v22, %v1881_v17  ;;  %v834_v28 = vadd.f32 %v833_v21, %v744_v20 }
  0xcd   : > { %1615 = vst [vmem:[%s1866_s18 + $0x48] sm:$0xff] %v1575_v23   ;;  %v1009_v20 = vmul.f32 %v834_v28, %v834_v28 }
  0xcf   : > { %v784_v24 = vpop.f32.mrf.mxu2 }
  0xd0   : > { %v873_v25 = vpop.f32.mrf.mxu3 }
  0xd1   : > { %v746_v26 = vpop.f32.mrf.mxu0  ;;  %v1892_v31 = vadd.f32 %v873_v25, %v784_v24  ;;  %v970_v24 = vadd.f32 %v1876_v14, %v834_v28  ;;  %v1040_v25 = vadd.f32 %v1879_v16, %v1009_v20 }
  0xd2   : > { %v835_v27 = vpop.f32.mrf.mxu1 }
  0xd3   : > { %v1888_v29 = vadd.f32 %v835_v27, %v746_v26 }
  0xd5   : > { %v1540_v30 = vpack.c.bf16 %v1888_v29, %v834_v28  ;;  %v1010_v23 = vmul.f32 %v1888_v29, %v1888_v29  ;;  %v971_v26 = vadd.f32 %v970_v24, %v1888_v29 }
  0xd7   : > { %1608 = vst [vmem:[%s1866_s18 + $0x10] sm:$0xff] %v1540_v30   ;;  %v786_v32 = vpop.f32.mrf.mxu2 }
  0xd8   : > { %v875_v33 = vpop.f32.mrf.mxu3 }
  0xd9   : > { %v749_v34 = vpop.f32.mrf.mxu0  ;;  %v1894_v36 = vadd.f32 %v875_v33, %v786_v32  ;;  %v1041_v33 = vadd.f32 %v1040_v25, %v1010_v23 }
  0xda   : > { %v838_v35 = vpop.f32.mrf.mxu1 }
  0xdb   : > { %v1580_v37 = vpack.c.bf16 %v1894_v36, %v1892_v31  ;;  %v839_v42 = vadd.f32 %v838_v35, %v749_v34 }
  0xdd   : > { %1616 = vst [vmem:[%s1866_s18 + $0x50] sm:$0xff] %v1580_v37   ;;  %v1011_v27 = vmul.f32 %v839_v42, %v839_v42  ;;  %v972_v37 = vadd.f32 %v971_v26, %v839_v42  ;;  %v1021_v26 = vmul.f32 %v1869_v61, %v1869_v61 }
  0xdf   : > { %v789_v38 = vpop.f32.mrf.mxu2 }
  0xe0   : > { %v878_v39 = vpop.f32.mrf.mxu3 }
  0xe1   : > { %v751_v40 = vpop.f32.mrf.mxu0  ;;  %v1900_v45 = vadd.f32 %v878_v39, %v789_v38 }
  0xe2   : > { %v840_v41 = vpop.f32.mrf.mxu1 }
  0xe3   : > { %v841_v43 = vadd.f32 %v840_v41, %v751_v40  ;;  %v1042_v41 = vadd.f32 %v1041_v33, %v1011_v27  ;;  %v1022_v33 = vmul.f32 %v1871_v2, %v1871_v2 }
  0xe5   : > { %v1545_v44 = vpack.c.bf16 %v841_v43, %v839_v42  ;;  %v1012_v38 = vmul.f32 %v841_v43, %v841_v43 }
  0xe7   : > { %1609 = vst [vmem:[%s1866_s18 + $0x18] sm:$0xff] %v1545_v44   ;;  %v791_v46 = vpop.f32.mrf.mxu2  ;;  %v973_v44 = vadd.f32 %v972_v37, %v841_v43  ;;  %v1043_v14 = vadd.f32 %v1042_v41, %v1012_v38 }
  0xe8   : > { %v880_v47 = vpop.f32.mrf.mxu3 }
  0xe9   : > { %v754_v48 = vpop.f32.mrf.mxu0  ;;  %v1902_v50 = vadd.f32 %v880_v47, %v791_v46 }
  0xea   : > { %v843_v49 = vpop.f32.mrf.mxu1 }
  0xeb   : > { %v1585_v51 = vpack.c.bf16 %v1902_v50, %v1900_v45  ;;  %v844_v56 = vadd.f32 %v843_v49, %v754_v48 }
  0xed   : > { %1617 = vst [vmem:[%s1866_s18 + $0x58] sm:$0xff] %v1585_v51   ;;  %v1013_v46 = vmul.f32 %v844_v56, %v844_v56  ;;  %v974_v28 = vadd.f32 %v973_v44, %v844_v56 }
  0xef   : > { %v794_v52 = vpop.f32.mrf.mxu2  ;;  %v1044_v48 = vadd.f32 %v1043_v14, %v1013_v46 }
  0xf0   : > { %v883_v53 = vpop.f32.mrf.mxu3 }
  0xf1   : > { %v756_v54 = vpop.f32.mrf.mxu0  ;;  %v1908_v59 = vadd.f32 %v883_v53, %v794_v52 }
  0xf2   : > { %v845_v55 = vpop.f32.mrf.mxu1 }
  0xf3   : > { %v846_v57 = vadd.f32 %v845_v55, %v756_v54 }
  0xf5   : > { %v1550_v58 = vpack.c.bf16 %v846_v57, %v844_v56  ;;  %v1014_v16 = vmul.f32 %v846_v57, %v846_v57  ;;  %v975_v49 = vadd.f32 %v974_v28, %v846_v57 }
  0xf7   : > { %1610 = vst [vmem:[%s1866_s18 + $0x20] sm:$0xff] %v1550_v58   ;;  %v796_v60 = vpop.f32.mrf.mxu2  ;;  %v1045_v58 = vadd.f32 %v1044_v48, %v1014_v16  ;;  %v1026_v48 = vmul.f32 %v1894_v36, %v1894_v36 }
  0xf8   : > { %v885_v62 = vpop.f32.mrf.mxu3 }
  0xf9   : > { %v759_v63 = vpop.f32.mrf.mxu0  ;;  %v1910_v1 = vadd.f32 %v885_v62, %v796_v60 }
  0xfa   : > { %v848_v0 = vpop.f32.mrf.mxu1 }
  0xfb   : > { %v1590_v3 = vpack.c.bf16 %v1910_v1, %v1908_v59  ;;  %v849_v8 = vadd.f32 %v848_v0, %v759_v63 }
  0xfd   : > { %1618 = vst [vmem:[%s1866_s18 + $0x60] sm:$0xff] %v1590_v3   ;;  %v1015_v51 = vmul.f32 %v849_v8, %v849_v8  ;;  %v976_v43 = vadd.f32 %v975_v49, %v849_v8 }
  0xff   : > { %v799_v4 = vpop.f32.mrf.mxu2  ;;  %v1046_v62 = vadd.f32 %v1045_v58, %v1015_v51  ;;  %v1027_v51 = vmul.f32 %v1900_v45, %v1900_v45 }
 0x100   : > { %v888_v5 = vpop.f32.mrf.mxu3 }
 0x101   : > { %v761_v6 = vpop.f32.mrf.mxu0  ;;  %v1916_v11 = vadd.f32 %v888_v5, %v799_v4 }
 0x102   : > { %v850_v7 = vpop.f32.mrf.mxu1 }
 0x103   : > { %v851_v9 = vadd.f32 %v850_v7, %v761_v6 }
 0x105   : > { %v1555_v10 = vpack.c.bf16 %v851_v9, %v849_v8  ;;  %v1016_v60 = vmul.f32 %v851_v9, %v851_v9  ;;  %v977_v63 = vadd.f32 %v976_v43, %v851_v9 }
 0x107   : > { %1611 = vst [vmem:[%s1866_s18 + $0x28] sm:$0xff] %v1555_v10   ;;  %v801_v12 = vpop.f32.mrf.mxu2  ;;  %v1047_v4 = vadd.f32 %v1046_v62, %v1016_v60 }
 0x108   : > { %v890_v13 = vpop.f32.mrf.mxu3 }
 0x109   : > { %v764_v15 = vpop.f32.mrf.mxu0  ;;  %v1918_v19 = vadd.f32 %v890_v13, %v801_v12 }
 0x10a   : > { %v853_v18 = vpop.f32.mrf.mxu1 }
 0x10b   : > { %v1595_v21 = vpack.c.bf16 %v1918_v19, %v1916_v11  ;;  %v854_v39 = vadd.f32 %v853_v18, %v764_v15 }
 0x10d   : > { %1619 = vst [vmem:[%s1866_s18 + $0x68] sm:$0xff] %v1595_v21   ;;  %v1017_v0 = vmul.f32 %v854_v39, %v854_v39  ;;  %v978_v57 = vadd.f32 %v977_v63, %v854_v39 }
 0x10f   : > { %v804_v30 = vpop.f32.mrf.mxu2  ;;  %v1048_v6 = vadd.f32 %v1047_v4, %v1017_v0 }
 0x110   : > { %v893_v32 = vpop.f32.mrf.mxu3 }
 0x111   : > { %v766_v34 = vpop.f32.mrf.mxu0  ;;  %v1929_v29 = vadd.f32 %v893_v32, %v804_v30 }
 0x112   : > { %v855_v35 = vpop.f32.mrf.mxu1 }
 0x113   : > { %v856_v40 = vadd.f32 %v855_v35, %v766_v34  ;;  %v1033_v4 = vmul.f32 %v1929_v29, %v1929_v29 }
 0x115   : > { %v1560_v47 = vpack.c.bf16 %v856_v40, %v854_v39  ;;  %v1018_v5 = vmul.f32 %v856_v40, %v856_v40  ;;  %v979_v7 = vadd.f32 %v978_v57, %v856_v40  ;;  %v1023_v40 = vmul.f32 %v1881_v17, %v1881_v17 }
 0x117   : > { %1612 = vst [vmem:[%s1866_s18 + $0x30] sm:$0xff] %v1560_v47   ;;  %v806_v52 = vpop.f32.mrf.mxu2  ;;  %v1049_v18 = vadd.f32 %v1048_v6, %v1018_v5 }
 0x118   : > { %v895_v53 = vpop.f32.mrf.mxu3 }
 0x119   : > { %v769_v42 = vpop.f32.mrf.mxu0  ;;  %v1931_v55 = vadd.f32 %v895_v53, %v806_v52  ;;  %v1028_v53 = vmul.f32 %v1902_v50, %v1902_v50 }
 0x11a   : > { %v858_v54 = vpop.f32.mrf.mxu1 }
 0x11b   : > { %v1600_v56 = vpack.c.bf16 %v1931_v55, %v1929_v29  ;;  %v859_v3 = vadd.f32 %v858_v54, %v769_v42 }
 0x11d   : > { %1620 = vst [vmem:[%s1866_s18 + $0x70] sm:$0xff] %v1600_v56   ;;  %v1019_v10 = vmul.f32 %v859_v3, %v859_v3  ;;  %v980_v20 = vadd.f32 %v979_v7, %v859_v3 }
 0x11f   : > { %v809_v12 = vpop.f32.mrf.mxu2  ;;  %v1050_v23 = vadd.f32 %v1049_v18, %v1019_v10 }
 0x120   : > { %v898_v13 = vpop.f32.mrf.mxu3 }
 0x121   : > { %v771_v15 = vpop.f32.mrf.mxu0  ;;  %v899_v32 = vadd.f32 %v898_v13, %v809_v12 }
 0x122   : > { %v860_v8 = vpop.f32.mrf.mxu1 }
 0x123   : > { %v861_v21 = vadd.f32 %v860_v8, %v771_v15  ;;  %v1035_v10 = vmul.f32 %v899_v32, %v899_v32 }
 0x125   : > { %v1565_v24 = vpack.c.bf16 %v861_v21, %v859_v3  ;;  %v981_v9 = vadd.f32 %v980_v20, %v861_v21  ;;  %v1020_v25 = vmul.f32 %v861_v21, %v861_v21 }
 0x127   : > { %1613 = vst [vmem:[%s1866_s18 + $0x38] sm:$0xff] %v1565_v24   ;;  %v982_v27 = vadd.f32 %v981_v9, %v1869_v61  ;;  %v1051_v30 = vadd.f32 %v1050_v23, %v1020_v25  ;;  %v811_v37 = vpop.f32.mrf.mxu2  ;;  %v1024_v61 = vmul.f32 %v1883_v22, %v1883_v22 }
 0x128   : > { %v900_v38 = vpop.f32.mrf.mxu3 }
 0x129   : > { %v983_v34 = vadd.f32 %v982_v27, %v1871_v2  ;;  %v1052_v35 = vadd.f32 %v1051_v30, %v1021_v26  ;;  %v901_v39 = vadd.f32 %v900_v38, %v811_v37  ;;  %v1025_v2 = vmul.f32 %v1892_v31, %v1892_v31 }
 0x12b   : > { %v984_v41 = vadd.f32 %v983_v34, %v1881_v17  ;;  %v1053_v44 = vadd.f32 %v1052_v35, %v1022_v33  ;;  %v1605_v46 = vpack.c.bf16 %v901_v39, %v899_v32  ;;  %v1036_v13 = vmul.f32 %v901_v39, %v901_v39 }
 0x12d   : > { %v985_v47 = vadd.f32 %v984_v41, %v1883_v22  ;;  %v1054_v14 = vadd.f32 %v1053_v44, %v1023_v40  ;;  %1621 = vst [vmem:[%s1866_s18 + $0x78] sm:$0xff] %v1605_v46  }
 0x12f   : > { %v986_v28 = vadd.f32 %v985_v47, %v1892_v31  ;;  %v1055_v16 = vadd.f32 %v1054_v14, %v1024_v61  ;;  %v1029_v31 = vmul.f32 %v1908_v59, %v1908_v59 }
 0x131   : > { %v987_v17 = vadd.f32 %v986_v28, %v1894_v36  ;;  %v1056_v49 = vadd.f32 %v1055_v16, %v1025_v2  ;;  %v1030_v36 = vmul.f32 %v1910_v1, %v1910_v1 }
 0x133   : > { %v1057_v52 = vadd.f32 %v1056_v49, %v1026_v48  ;;  %v988_v22 = vadd.f32 %v987_v17, %v1900_v45  ;;  %v1031_v45 = vmul.f32 %v1916_v11, %v1916_v11 }
 0x135   : > { %v989_v42 = vadd.f32 %v988_v22, %v1902_v50  ;;  %v1058_v54 = vadd.f32 %v1057_v52, %v1027_v51  ;;  %v1032_v50 = vmul.f32 %v1918_v19, %v1918_v19 }
 0x137   : > { %v990_v58 = vadd.f32 %v989_v42, %v1908_v59  ;;  %v1059_v43 = vadd.f32 %v1058_v54, %v1028_v53 }
 0x139   : > { %v991_v60 = vadd.f32 %v990_v58, %v1910_v1  ;;  %v1060_v56 = vadd.f32 %v1059_v43, %v1029_v31 }
 0x13b   : > { %v992_v62 = vadd.f32 %v991_v60, %v1916_v11  ;;  %v1061_v63 = vadd.f32 %v1060_v56, %v1030_v36  ;;  %v1034_v11 = vmul.f32 %v1931_v55, %v1931_v55 }
 0x13d   : > { %v993_v0 = vadd.f32 %v992_v62, %v1918_v19  ;;  %v1062_v59 = vadd.f32 %v1061_v63, %v1031_v45 }
 0x13f   : > { %v994_v3 = vadd.f32 %v993_v0, %v1929_v29  ;;  %v1063_v1 = vadd.f32 %v1062_v59, %v1032_v50 }
 0x141   : > { %v1064_v57 = vadd.f32 %v1063_v1, %v1033_v4  ;;  %v995_v5 = vadd.f32 %v994_v3, %v1931_v55 }
 0x143   : > { %v1065_v6 = vadd.f32 %v1064_v57, %v1034_v11  ;;  %v996_v7 = vadd.f32 %v995_v5, %v899_v32 }
 0x145   : > { %v1066_v12 = vadd.f32 %v1065_v6, %v1035_v10  ;;  %v997_v19 = vadd.f32 %v996_v7, %v901_v39 }
 0x147   : > { %v998_v15 = vrot.slane %v997_v19, 4  ;;  %v1067_v8 = vadd.f32 %v1066_v12, %v1036_v13 }
 0x149   : > { %v999_v18 = vadd.f32 %v998_v15, %v997_v19  ;;  %v1068_v20 = vrot.slane %v1067_v8, 4 }
 0x14b   : > { %v1000_v29 = vrot.slane %v999_v18, 2  ;;  %v1069_v21 = vadd.f32 %v1068_v20, %v1067_v8 }
 0x14d   : > { %v1001_v23 = vadd.f32 %v1000_v29, %v999_v18  ;;  %v1070_v24 = vrot.slane %v1069_v21, 2 }
 0x14f   : > { %v1002_v9 = vrot.slane %v1001_v23, 1  ;;  %v1071_v25 = vadd.f32 %v1070_v24, %v1069_v21 }
 0x151   : > { %v1003_v55 = vadd.f32 %v1002_v9, %v1001_v23  ;;  %v1072_v26 = vrot.slane %v1071_v25, 1 }
 0x153   : > { %1004 = vst [vmem:[%s398_s20] sm:$0x1] %v1003_v55  ;;  %v1073_v27 = vadd.f32 %v1072_v26, %v1071_v25 }
 0x155   : > { %1074 = vst [vmem:[%s404_s25] sm:$0x1] %v1073_v27 }
 0x156 PF: > { %s17_s23 = sadd.s32 1, %s1684_s23   ;;  %s2004_s21 = smov %s1680_s22 }
 0x157   : > { %p14_p6 = scmp.ge.s32.totalorder %s17_s23, 4   ;;  %s2005_s22 = smov %s2007_s2 }
 0x159   :  { %16 = sbr.rel (!%p14_p6) target bundleno = 2 (0x2), region = 99 }

// kernel: fwd.11
= control target key start
LH: loop header
LB: loop body
LE: loop exit
PB: predicated region body
PF: predicated region fallthrough
CT: control target
= control target key end

     0   :  { %s1474_s21 = smov 0   ;;  %s1476_s22 = smov 0   ;;  %s1805_s0 = inlined_call_operand.vmem [shape: bf16[128,128], index: 0, kind: input, shape index: {}]   ;;  %s1806_s1 = inlined_call_operand.vmem [shape: bf16[128,512], index: 1, kind: input, shape index: {}]   ;;  %s1807_s2 = inlined_call_operand.vmem [shape: f32[1,128], index: 2, kind: input, shape index: {}]   ;;  %s1808_s3 = inlined_call_operand.vmem [shape: f32[1,128], index: 3, kind: input, shape index: {}]   ;;  %s1809_s4 = inlined_call_operand.vmem [shape: f32[128,512], index: 4, kind: output, shape index: {0}]   ;;  %s1810_s5 = inlined_call_operand.vmem [shape: f32[2,1,512], index: 5, kind: output, shape index: {1}]   ;;  %s1811_s6 = inlined_call_operand.vmem [shape: f32[2,1,512], index: 6, kind: output, shape index: {2}]  }
   0x1   :  { %s1478_s23 = smov 0  }
   0x2 LB: > { %s36_s24 = sadd.s32 1, %s1433_s22  ;;  %p1199_p0 = scmp.ge.s32.totalorder %s1437_s23, 1  ;;  %s1437_s23 = sphi %s1478_s23, %s17_s23   ;;  %s1433_s22 = sphi %s1476_s22, %s1813_s22   ;;  %s1429_s21 = sphi %s1474_s21, %s1812_s21  }
   0x3   : > { %p38_p1 = scmp.ge.s32.totalorder %s36_s24, 2  ;;  %p283_p2 = scmp.lt.s32.totalorder %s1437_s23, 3 }
   0x5   : > { %s1815_s24 = smov (%p38_p1, %s36_s24), 0  ;;  %p284_p3 = pnand %p1199_p0, %p283_p2 }
   0x6   : > { %s1200_s11 = sshll.u32 (!%p284_p3), %s1429_s21, 3  ;;  %p393_p5 = scmp.lt.s32.totalorder (!%p284_p3), %s1429_s21, 1 }
   0x7   : > { %287 = sbr.rel (%p284_p3) target bundleno = 257 (0x101), region = 36  ;;  %p354_p4 = scmp.lt.s32.totalorder (!%p284_p3), %s1200_s11, 15 }
   0xc   : > { %v1321_v0 = vld [vmem:[%s1806_s1 + $0xe0] sm:$0xf]  ;;  %v1368_v1 = vld [vmem:[%s1806_s1 + $0xec] sm:$0xf0]  ;;  %v1366_v2 = vld [vmem:[%s1806_s1 + $0xe4] sm:$0xf] }
   0xd   : > { %v1322_v3 = vor.u32 %v1368_v1, %v1321_v0  ;;  %v1323_v4 = vld [vmem:[%s1806_s1 + $0xf0] sm:$0xf0]  ;;  %v1329_v5 = vld [vmem:[%s1806_s1 + $0xe8] sm:$0xf]  ;;  %v1369_v6 = vld [vmem:[%s1806_s1 + $0xf4] sm:$0xf0] }
   0xe   : > { %v1326_v7 = vor.u32 %v1366_v2, %v1323_v4  ;;  %v1330_v8 = vor.u32 %v1369_v6, %v1329_v5  ;;  %v1367_v9 = vld [vmem:[%s1806_s1 + $0xec] sm:$0xf]  ;;  %v1331_v10 = vld [vmem:[%s1806_s1 + $0xf8] sm:$0xf0]  ;;  %v1305_v11 = vld [vmem:[%s1806_s1 + $0xc0] sm:$0xf] }
   0xf   : > { %654 = vmatpush.bf16.msra.mxu0 %v1322_v3  ;;  %v1334_v12 = vor.u32 %v1367_v9, %v1331_v10  ;;  %v1364_v13 = vld [vmem:[%s1806_s1 + $0xcc] sm:$0xf0]  ;;  %v1362_v14 = vld [vmem:[%s1806_s1 + $0xc4] sm:$0xf]  ;;  %v1307_v15 = vld [vmem:[%s1806_s1 + $0xd0] sm:$0xf0] }
  0x10   : > { %683 = vmatpush.bf16.msra.mxu1 %v1326_v7  ;;  %712 = vmatpush.bf16.msra.mxu2 %v1330_v8  ;;  %v1306_v16 = vor.u32 %v1364_v13, %v1305_v11  ;;  %v1310_v17 = vor.u32 %v1362_v14, %v1307_v15  ;;  %v1313_v18 = vld [vmem:[%s1806_s1 + $0xc8] sm:$0xf]  ;;  %v1365_v19 = vld [vmem:[%s1806_s1 + $0xd4] sm:$0xf0]  ;;  %v1363_v20 = vld [vmem:[%s1806_s1 + $0xcc] sm:$0xf] }
  0x11   : > { %741 = vmatpush.bf16.msra.mxu3 %v1334_v12  ;;  %v1314_v21 = vor.u32 %v1365_v19, %v1313_v18  ;;  %v1315_v22 = vld [vmem:[%s1806_s1 + $0xd8] sm:$0xf0]  ;;  %v1289_v23 = vld [vmem:[%s1806_s1 + $0xa0] sm:$0xf]  ;;  %v1360_v24 = vld [vmem:[%s1806_s1 + $0xac] sm:$0xf0] }
  0x12   : > { %v1318_v25 = vor.u32 %v1363_v20, %v1315_v22  ;;  %v1358_v26 = vld [vmem:[%s1806_s1 + $0xa4] sm:$0xf]  ;;  %v1291_v27 = vld [vmem:[%s1806_s1 + $0xb0] sm:$0xf0]  ;;  %v1297_v28 = vld [vmem:[%s1806_s1 + $0xa8] sm:$0xf]  ;;  %v1290_v29 = vor.u32 %v1360_v24, %v1289_v23 }
  0x13   : > { %655 = vmatpush.bf16.msra.mxu0 %v1306_v16  ;;  %v1361_v30 = vld [vmem:[%s1806_s1 + $0xb4] sm:$0xf0]  ;;  %v1359_v31 = vld [vmem:[%s1806_s1 + $0xac] sm:$0xf]  ;;  %v1299_v32 = vld [vmem:[%s1806_s1 + $0xb8] sm:$0xf0]  ;;  %v1294_v33 = vor.u32 %v1358_v26, %v1291_v27 }
  0x14   : > { %684 = vmatpush.bf16.msra.mxu1 %v1310_v17  ;;  %713 = vmatpush.bf16.msra.mxu2 %v1314_v21  ;;  %v1298_v34 = vor.u32 %v1361_v30, %v1297_v28  ;;  %v1273_v35 = vld [vmem:[%s1806_s1 + $0x80] sm:$0xf]  ;;  %v1356_v36 = vld [vmem:[%s1806_s1 + $0x8c] sm:$0xf0]  ;;  %v1354_v37 = vld [vmem:[%s1806_s1 + $0x84] sm:$0xf]  ;;  %v1302_v38 = vor.u32 %v1359_v31, %v1299_v32 }
  0x15   : > { %742 = vmatpush.bf16.msra.mxu3 %v1318_v25  ;;  %v1275_v39 = vld [vmem:[%s1806_s1 + $0x90] sm:$0xf0]  ;;  %v1281_v40 = vld [vmem:[%s1806_s1 + $0x88] sm:$0xf]  ;;  %v1357_v41 = vld [vmem:[%s1806_s1 + $0x94] sm:$0xf0]  ;;  %v1274_v44 = vor.u32 %v1356_v36, %v1273_v35 }
  0x16   : > { %v1355_v42 = vld [vmem:[%s1806_s1 + $0x8c] sm:$0xf]  ;;  %v1283_v43 = vld [vmem:[%s1806_s1 + $0x98] sm:$0xf0]  ;;  %v1278_v45 = vor.u32 %v1354_v37, %v1275_v39  ;;  %v1282_v46 = vor.u32 %v1357_v41, %v1281_v40  ;;  %v1257_v47 = vld [vmem:[%s1806_s1 + $0x60] sm:$0xf] }
  0x17   : > { %656 = vmatpush.bf16.msra.mxu0 %v1290_v29  ;;  %v1352_v48 = vld [vmem:[%s1806_s1 + $0x6c] sm:$0xf0]  ;;  %v1350_v49 = vld [vmem:[%s1806_s1 + $0x64] sm:$0xf]  ;;  %v1286_v50 = vor.u32 %v1355_v42, %v1283_v43  ;;  %v1259_v51 = vld [vmem:[%s1806_s1 + $0x70] sm:$0xf0] }
  0x18   : > { %685 = vmatpush.bf16.msra.mxu1 %v1294_v33  ;;  %714 = vmatpush.bf16.msra.mxu2 %v1298_v34  ;;  %v1265_v52 = vld [vmem:[%s1806_s1 + $0x68] sm:$0xf]  ;;  %v1353_v53 = vld [vmem:[%s1806_s1 + $0x74] sm:$0xf0]  ;;  %v1351_v54 = vld [vmem:[%s1806_s1 + $0x6c] sm:$0xf]  ;;  %v1258_v56 = vor.u32 %v1352_v48, %v1257_v47  ;;  %v1262_v57 = vor.u32 %v1350_v49, %v1259_v51 }
  0x19   : > { %743 = vmatpush.bf16.msra.mxu3 %v1302_v38  ;;  %v1267_v55 = vld [vmem:[%s1806_s1 + $0x78] sm:$0xf0]  ;;  %v1266_v58 = vor.u32 %v1353_v53, %v1265_v52  ;;  %v1241_v59 = vld [vmem:[%s1806_s1 + $0x40] sm:$0xf]  ;;  %v1348_v60 = vld [vmem:[%s1806_s1 + $0x4c] sm:$0xf0] }
  0x1a   : > { %v1346_v61 = vld [vmem:[%s1806_s1 + $0x44] sm:$0xf]  ;;  %v1270_v62 = vor.u32 %v1351_v54, %v1267_v55  ;;  %v1243_v63 = vld [vmem:[%s1806_s1 + $0x50] sm:$0xf0]  ;;  %v1249_v0 = vld [vmem:[%s1806_s1 + $0x48] sm:$0xf]  ;;  %v1242_v4 = vor.u32 %v1348_v60, %v1241_v59 }
  0x1b   : > { %657 = vmatpush.bf16.msra.mxu0 %v1274_v44  ;;  %v1349_v1 = vld [vmem:[%s1806_s1 + $0x54] sm:$0xf0]  ;;  %v1347_v2 = vld [vmem:[%s1806_s1 + $0x4c] sm:$0xf]  ;;  %v1251_v3 = vld [vmem:[%s1806_s1 + $0x58] sm:$0xf0]  ;;  %v1246_v8 = vor.u32 %v1346_v61, %v1243_v63 }
  0x1c   : > { %686 = vmatpush.bf16.msra.mxu1 %v1278_v45  ;;  %715 = vmatpush.bf16.msra.mxu2 %v1282_v46  ;;  %v1225_v5 = vld [vmem:[%s1806_s1 + $0x20] sm:$0xf]  ;;  %v1344_v6 = vld [vmem:[%s1806_s1 + $0x2c] sm:$0xf0]  ;;  %v1342_v7 = vld [vmem:[%s1806_s1 + $0x24] sm:$0xf]  ;;  %v1250_v9 = vor.u32 %v1349_v1, %v1249_v0  ;;  %v1254_v13 = vor.u32 %v1347_v2, %v1251_v3 }
  0x1d   : > { %744 = vmatpush.bf16.msra.mxu3 %v1286_v50  ;;  %v1227_v10 = vld [vmem:[%s1806_s1 + $0x30] sm:$0xf0]  ;;  %v1233_v11 = vld [vmem:[%s1806_s1 + $0x28] sm:$0xf]  ;;  %v1345_v12 = vld [vmem:[%s1806_s1 + $0x34] sm:$0xf0]  ;;  %v1226_v16 = vor.u32 %v1344_v6, %v1225_v5 }
  0x1e   : > { %v1343_v14 = vld [vmem:[%s1806_s1 + $0x2c] sm:$0xf]  ;;  %v1235_v15 = vld [vmem:[%s1806_s1 + $0x38] sm:$0xf0]  ;;  %v1209_v17 = vld [vmem:[%s1806_s1] sm:$0xf]  ;;  %v1230_v18 = vor.u32 %v1342_v7, %v1227_v10  ;;  %v1234_v19 = vor.u32 %v1345_v12, %v1233_v11 }
  0x1f   : > { %658 = vmatpush.bf16.msra.mxu0 %v1258_v56  ;;  %v1340_v20 = vld [vmem:[%s1806_s1 + $0xc] sm:$0xf0]  ;;  %v1338_v21 = vld [vmem:[%s1806_s1 + $0x4] sm:$0xf]  ;;  %s1817_s11 = smov (!%p354_p4, %s1200_s11), 15  ;;  %v1238_v22 = vor.u32 %v1343_v14, %v1235_v15  ;;  %s1819_s21 = smov (!%p393_p5, %s1429_s21), 1 }
  0x20   : > { %687 = vmatpush.bf16.msra.mxu1 %v1262_v57  ;;  %716 = vmatpush.bf16.msra.mxu2 %v1266_v58  ;;  %v1211_v23 = vld [vmem:[%s1806_s1 + $0x10] sm:$0xf0]  ;;  %v1217_v24 = vld [vmem:[%s1806_s1 + $0x8] sm:$0xf]  ;;  %v1341_v25 = vld [vmem:[%s1806_s1 + $0x14] sm:$0xf0]  ;;  %v1210_v28 = vor.u32 %v1340_v20, %v1209_v17 }
  0x21   : > { %745 = vmatpush.bf16.msra.mxu3 %v1270_v62  ;;  %v1339_v26 = vld [vmem:[%s1806_s1 + $0xc] sm:$0xf]  ;;  %v1219_v27 = vld [vmem:[%s1806_s1 + $0x18] sm:$0xf0]  ;;  %s1201_s10 = sshll.u32 %s1817_s11, 2  ;;  %v1214_v30 = vor.u32 %v1338_v21, %v1211_v23  ;;  %v1218_v31 = vor.u32 %v1341_v25, %v1217_v24  ;;  %s1337_s19 = sshll.u32 %s1817_s11, 5 }
  0x22   : > { %s1693_s14 = scalar_lea.vmem %s1805_s0, %s1201_s10  ;;  %v1413_v29 = vld [vmem:[%s1807_s2] ss:$0 sm:$0xff]  ;;  %v1222_v33 = vor.u32 %v1339_v26, %v1219_v27  ;;  %s1709_s26 = scalar_lea.vmem %s1809_s4, %s1337_s19  ;;  %vm861_vm0 = vcmask 1040384   ;;  %vm863_vm1 = vcmask 1042434   ;;  %vm865_vm2 = vcmask 1041408  }
  0x23   : > { %659 = vmatpush.bf16.msra.mxu0 %v1242_v4  ;;  %v1371_v32 = vld [vmem:[%s1693_s14] sm:$0xff]   ;;  %v1386_v39 = vld [vmem:[%s1693_s14 + $0x8] sm:$0xff]   ;;  %v1387_v53 = vld [vmem:[%s1693_s14 + $0x10] sm:$0xff]   ;;  %s1205_s11 = sshll.u32 %s1819_s21, 2 }
  0x24   : > { %688 = vmatpush.bf16.msra.mxu1 %v1246_v8  ;;  %717 = vmatpush.bf16.msra.mxu2 %v1250_v9  ;;  %v1372_v34 = vunpack.c.l.bf16 %v1371_v32  ;;  %v1373_v35 = vunpack.c.h.bf16 %v1371_v32  ;;  %v1414_v36 = vld [vmem:[%s1808_s3] ss:$0 sm:$0xff]  ;;  %v1376_v44 = vunpack.c.l.bf16 %v1386_v39  ;;  %v1377_v45 = vunpack.c.h.bf16 %v1386_v39  ;;  %v1388_v63 = vld [vmem:[%s1693_s14 + $0x18] sm:$0xff]   ;;  %s399_s29 = scalar_lea.vmem %s1810_s5, %s1205_s11  ;;  %s408_s7 = scalar_lea.vmem %s1811_s6, %s1205_s11 }
  0x25   : > { %746 = vmatpush.bf16.msra.mxu3 %v1254_v13  ;;  %v1380_v55 = vunpack.c.l.bf16 %v1387_v53  ;;  %v1381_v56 = vunpack.c.h.bf16 %v1387_v53  ;;  %v1384_v1 = vunpack.c.l.bf16 %v1388_v63  ;;  %v1385_v2 = vunpack.c.h.bf16 %v1388_v63 }
  0x26   : > { %v430_v37 = vmul.f32 %v1413_v29, %v1372_v34  ;;  %v431_v38 = vmul.f32 %v1413_v29, %v1373_v35  ;;  %v432_v47 = vmul.f32 %v1413_v29, %v1376_v44  ;;  %v433_v48 = vmul.f32 %v1413_v29, %v1377_v45 }
  0x27   : > { %660 = vmatpush.bf16.msra.mxu0 %v1226_v16  ;;  %v434_v57 = vmul.f32 %v1413_v29, %v1380_v55  ;;  %v435_v58 = vmul.f32 %v1413_v29, %v1381_v56  ;;  %v436_v3 = vmul.f32 %v1413_v29, %v1384_v1  ;;  %v437_v4 = vmul.f32 %v1413_v29, %v1385_v2 }
  0x28   : > { %689 = vmatpush.bf16.msra.mxu1 %v1230_v18  ;;  %718 = vmatpush.bf16.msra.mxu2 %v1234_v19  ;;  %v442_v40 = vadd.f32 %v1414_v36, %v430_v37  ;;  %v443_v41 = vadd.f32 %v1414_v36, %v431_v38  ;;  %v444_v49 = vadd.f32 %v1414_v36, %v432_v47 }
  0x29   : > { %747 = vmatpush.bf16.msra.mxu3 %v1238_v22  ;;  %v445_v50 = vadd.f32 %v1414_v36, %v433_v48  ;;  %v446_v59 = vadd.f32 %v1414_v36, %v434_v57  ;;  %v447_v60 = vadd.f32 %v1414_v36, %v435_v58  ;;  %v448_v5 = vadd.f32 %v1414_v36, %v436_v3 }
  0x2a   : > { %v450_v42 = vmax.f32 %v442_v40, 0.0  ;;  %v451_v43 = vmax.f32 %v443_v41, 0.0  ;;  %v452_v51 = vmax.f32 %v444_v49, 0.0  ;;  %v449_v6 = vadd.f32 %v1414_v36, %v437_v4 }
  0x2b   : > { %661 = vmatpush.bf16.msra.mxu0 %v1210_v28  ;;  %v453_v52 = vmax.f32 %v445_v50, 0.0  ;;  %v454_v61 = vmax.f32 %v446_v59, 0.0  ;;  %v455_v62 = vmax.f32 %v447_v60, 0.0  ;;  %v456_v7 = vmax.f32 %v448_v5, 0.0 }
  0x2c   : > { %690 = vmatpush.bf16.msra.mxu1 %v1214_v30  ;;  %719 = vmatpush.bf16.msra.mxu2 %v1218_v31  ;;  %v458_v46 = vpack.c.bf16 %v451_v43, %v450_v42  ;;  %v457_v8 = vmax.f32 %v449_v6, 0.0 }
  0x2d   : > { %748 = vmatpush.bf16.msra.mxu3 %v1222_v33  ;;  %v459_v54 = vpack.c.bf16 %v453_v52, %v452_v51  ;;  %v460_v0 = vpack.c.bf16 %v455_v62, %v454_v61 }
  0x2e   : > { %662 = vmatmul.bf16.vlgmr.msra.gmra.mxu0 %v458_v46  ;;  %v461_v9 = vpack.c.bf16 %v457_v8, %v456_v7 }
  0x2f   : > { %691 = vmatmul.bf16.vlgmr.msra.gmra.mxu1 %v458_v46  ;;  %720 = vmatmul.bf16.vlgmr.msra.gmra.mxu2 %v458_v46 }
  0x30   : > { %749 = vmatmul.bf16.vlgmr.msra.gmra.mxu3 %v458_v46 }
  0x3e   : > { %667 = vmatmul.bf16.gmra.mxu0 %v459_v54 }
  0x3f   : > { %696 = vmatmul.bf16.gmra.mxu1 %v459_v54  ;;  %725 = vmatmul.bf16.gmra.mxu2 %v459_v54 }
  0x40   : > { %754 = vmatmul.bf16.gmra.mxu3 %v459_v54 }
  0x4e   : > { %672 = vmatmul.bf16.gmra.mxu0 %v460_v0 }
  0x4f   : > { %701 = vmatmul.bf16.gmra.mxu1 %v460_v0  ;;  %730 = vmatmul.bf16.gmra.mxu2 %v460_v0 }
  0x50   : > { %759 = vmatmul.bf16.gmra.mxu3 %v460_v0 }
  0x5e   : > { %677 = vmatmul.bf16.gmra.mxu0 %v461_v9 }
  0x5f   : > { %706 = vmatmul.bf16.gmra.mxu1 %v461_v9  ;;  %735 = vmatmul.bf16.gmra.mxu2 %v461_v9 }
  0x60   : > { %764 = vmatmul.bf16.gmra.mxu3 %v461_v9 }
  0xab   : > { %v663_v10 = vpop.f32.mrf.mxu0 }
  0xac   : > { %v692_v11 = vpop.f32.mrf.mxu1  ;;  %770 = vst [vmem:[%s1709_s26] sm:$0xff] %v663_v10  ;;  %v873_v30 = vmul.f32 %v663_v10, %v663_v10 }
  0xad   : > { %771 = vst [vmem:[%s1709_s26 + $0x8] sm:$0xff] %v692_v11  ;;  %v874_v35 = vmul.f32 %v692_v11, %v692_v11 }
  0xb2   : > { %v721_v12 = vpop.f32.mrf.mxu2 }
  0xb3   : > { %v750_v13 = vpop.f32.mrf.mxu3  ;;  %772 = vst [vmem:[%s1709_s26 + $0x10] sm:$0xff] %v721_v12  ;;  %v665_v14 = vpop.f32.mrf.mxu0  ;;  %v875_v36 = vmul.f32 %v721_v12, %v721_v12 }
  0xb4   : > { %v694_v15 = vpop.f32.mrf.mxu1  ;;  %773 = vst [vmem:[%s1709_s26 + $0x18] sm:$0xff] %v750_v13  ;;  %v877_v31 = vmul.f32 %v665_v14, %v665_v14  ;;  %v876_v37 = vmul.f32 %v750_v13, %v750_v13  ;;  %v802_v40 = vadd.f32 %v665_v14, %v663_v10 }
  0xb5   : > { %774 = vst [vmem:[%s1709_s26 + $0x20] sm:$0xff] %v665_v14  ;;  %v878_v32 = vmul.f32 %v694_v15, %v694_v15  ;;  %v815_v41 = vadd.f32 %v694_v15, %v692_v11 }
  0xb6   : > { %775 = vst [vmem:[%s1709_s26 + $0x28] sm:$0xff] %v694_v15  ;;  %v905_v44 = vadd.f32 %v877_v31, %v873_v30 }
  0xb7   : > { %v918_v45 = vadd.f32 %v878_v32, %v874_v35 }
  0xba   : > { %v723_v16 = vpop.f32.mrf.mxu2 }
  0xbb   : > { %v752_v17 = vpop.f32.mrf.mxu3  ;;  %776 = vst [vmem:[%s1709_s26 + $0x30] sm:$0xff] %v723_v16  ;;  %v668_v18 = vpop.f32.mrf.mxu0  ;;  %v879_v38 = vmul.f32 %v723_v16, %v723_v16  ;;  %v828_v46 = vadd.f32 %v723_v16, %v721_v12 }
  0xbc   : > { %v697_v19 = vpop.f32.mrf.mxu1  ;;  %777 = vst [vmem:[%s1709_s26 + $0x38] sm:$0xff] %v752_v17  ;;  %v880_v39 = vmul.f32 %v752_v17, %v752_v17  ;;  %v881_v42 = vmul.f32 %v668_v18, %v668_v18  ;;  %v841_v47 = vadd.f32 %v752_v17, %v750_v13  ;;  %v803_v48 = vadd.f32 %v802_v40, %v668_v18 }
  0xbd   : > { %778 = vst [vmem:[%s1709_s26 + $0x40] sm:$0xff] %v668_v18  ;;  %v882_v43 = vmul.f32 %v697_v19, %v697_v19  ;;  %v816_v49 = vadd.f32 %v815_v41, %v697_v19  ;;  %v931_v52 = vadd.f32 %v879_v38, %v875_v36 }
  0xbe   : > { %779 = vst [vmem:[%s1709_s26 + $0x48] sm:$0xff] %v697_v19  ;;  %v944_v53 = vadd.f32 %v880_v39, %v876_v37  ;;  %v906_v56 = vadd.f32 %v905_v44, %v881_v42 }
  0xbf   : > { %v919_v57 = vadd.f32 %v918_v45, %v882_v43 }
  0xc2   : > { %v726_v20 = vpop.f32.mrf.mxu2 }
  0xc3   : > { %v755_v21 = vpop.f32.mrf.mxu3  ;;  %780 = vst [vmem:[%s1709_s26 + $0x50] sm:$0xff] %v726_v20  ;;  %v670_v22 = vpop.f32.mrf.mxu0  ;;  %v883_v50 = vmul.f32 %v726_v20, %v726_v20  ;;  %v829_v58 = vadd.f32 %v828_v46, %v726_v20 }
  0xc4   : > { %v699_v23 = vpop.f32.mrf.mxu1  ;;  %781 = vst [vmem:[%s1709_s26 + $0x58] sm:$0xff] %v755_v21  ;;  %v884_v51 = vmul.f32 %v755_v21, %v755_v21  ;;  %v885_v54 = vmul.f32 %v670_v22, %v670_v22  ;;  %v842_v59 = vadd.f32 %v841_v47, %v755_v21  ;;  %v804_v62 = vadd.f32 %v803_v48, %v670_v22 }
  0xc5   : > { %782 = vst [vmem:[%s1709_s26 + $0x60] sm:$0xff] %v670_v22  ;;  %v886_v55 = vmul.f32 %v699_v23, %v699_v23  ;;  %v817_v63 = vadd.f32 %v816_v49, %v699_v23  ;;  %v932_v4 = vadd.f32 %v931_v52, %v883_v50 }
  0xc6   : > { %783 = vst [vmem:[%s1709_s26 + $0x68] sm:$0xff] %v699_v23  ;;  %v945_v5 = vadd.f32 %v944_v53, %v884_v51  ;;  %v907_v8 = vadd.f32 %v906_v56, %v885_v54 }
  0xc7   : > { %v920_v9 = vadd.f32 %v919_v57, %v886_v55 }
  0xca   : > { %v1725_v24 = vpop.f32.mrf.mxu2 }
  0xcb   : > { %v1727_v25 = vpop.f32.mrf.mxu3  ;;  %784 = vst [vmem:[%s1709_s26 + $0x70] sm:$0xff] %v1725_v24  ;;  %v673_v26 = vpop.f32.mrf.mxu0  ;;  %v887_v6 = vmul.f32 %v1725_v24, %v1725_v24  ;;  %v830_v12 = vadd.f32 %v829_v58, %v1725_v24 }
  0xcc   : > { %v702_v27 = vpop.f32.mrf.mxu1  ;;  %785 = vst [vmem:[%s1709_s26 + $0x78] sm:$0xff] %v1727_v25  ;;  %v889_v0 = vmul.f32 %v673_v26, %v673_v26  ;;  %v888_v7 = vmul.f32 %v1727_v25, %v1727_v25  ;;  %v843_v13 = vadd.f32 %v842_v59, %v1727_v25  ;;  %v805_v14 = vadd.f32 %v804_v62, %v673_v26 }
  0xcd   : > { %786 = vst [vmem:[%s1709_s26 + $0x80] sm:$0xff] %v673_v26  ;;  %v890_v1 = vmul.f32 %v702_v27, %v702_v27  ;;  %v818_v15 = vadd.f32 %v817_v63, %v702_v27  ;;  %v933_v20 = vadd.f32 %v932_v4, %v887_v6 }
  0xce   : > { %787 = vst [vmem:[%s1709_s26 + $0x88] sm:$0xff] %v702_v27  ;;  %v908_v16 = vadd.f32 %v907_v8, %v889_v0  ;;  %v946_v21 = vadd.f32 %v945_v5, %v888_v7 }
  0xcf   : > { %v921_v17 = vadd.f32 %v920_v9, %v890_v1 }
  0xd2   : > { %v1735_v28 = vpop.f32.mrf.mxu2 }
  0xd3   : > { %v1737_v29 = vpop.f32.mrf.mxu3  ;;  %788 = vst [vmem:[%s1709_s26 + $0x90] sm:$0xff] %v1735_v28  ;;  %v675_v33 = vpop.f32.mrf.mxu0  ;;  %v891_v30 = vmul.f32 %v1735_v28, %v1735_v28  ;;  %v831_v27 = vadd.f32 %v830_v12, %v1735_v28 }
  0xd4   : > { %v704_v34 = vpop.f32.mrf.mxu1  ;;  %789 = vst [vmem:[%s1709_s26 + $0x98] sm:$0xff] %v1737_v29  ;;  %v893_v10 = vmul.f32 %v675_v33, %v675_v33  ;;  %v806_v22 = vadd.f32 %v805_v14, %v675_v33  ;;  %v892_v24 = vmul.f32 %v1737_v29, %v1737_v29  ;;  %v844_v31 = vadd.f32 %v843_v13, %v1737_v29 }
  0xd5   : > { %790 = vst [vmem:[%s1709_s26 + $0xa0] sm:$0xff] %v675_v33  ;;  %v894_v11 = vmul.f32 %v704_v34, %v704_v34  ;;  %v819_v23 = vadd.f32 %v818_v15, %v704_v34  ;;  %v934_v44 = vadd.f32 %v933_v20, %v891_v30 }
  0xd6   : > { %791 = vst [vmem:[%s1709_s26 + $0xa8] sm:$0xff] %v704_v34  ;;  %v909_v25 = vadd.f32 %v908_v16, %v893_v10  ;;  %v947_v45 = vadd.f32 %v946_v21, %v892_v24 }
  0xd7   : > { %v922_v26 = vadd.f32 %v921_v17, %v894_v11 }
  0xda   : > { %v1745_v60 = vpop.f32.mrf.mxu2 }
  0xdb   : > { %v1747_v61 = vpop.f32.mrf.mxu3  ;;  %792 = vst [vmem:[%s1709_s26 + $0xb0] sm:$0xff] %v1745_v60  ;;  %v678_v2 = vpop.f32.mrf.mxu0  ;;  %v895_v33 = vmul.f32 %v1745_v60, %v1745_v60  ;;  %v832_v52 = vadd.f32 %v831_v27, %v1745_v60 }
  0xdc   : > { %v707_v3 = vpop.f32.mrf.mxu1  ;;  %793 = vst [vmem:[%s1709_s26 + $0xb8] sm:$0xff] %v1747_v61  ;;  %v897_v18 = vmul.f32 %v678_v2, %v678_v2  ;;  %v807_v32 = vadd.f32 %v806_v22, %v678_v2  ;;  %v896_v34 = vmul.f32 %v1747_v61, %v1747_v61  ;;  %v845_v54 = vadd.f32 %v844_v31, %v1747_v61 }
  0xdd   : > { %794 = vst [vmem:[%s1709_s26 + $0xc0] sm:$0xff] %v678_v2  ;;  %v898_v19 = vmul.f32 %v707_v3, %v707_v3  ;;  %v820_v35 = vadd.f32 %v819_v23, %v707_v3  ;;  %v935_v53 = vadd.f32 %v934_v44, %v895_v33 }
  0xde   : > { %795 = vst [vmem:[%s1709_s26 + $0xc8] sm:$0xff] %v707_v3  ;;  %v910_v38 = vadd.f32 %v909_v25, %v897_v18  ;;  %v948_v55 = vadd.f32 %v947_v45, %v896_v34 }
  0xdf   : > { %v923_v39 = vadd.f32 %v922_v26, %v898_v19 }
  0xe2   : > { %v736_v36 = vpop.f32.mrf.mxu2 }
  0xe3   : > { %v765_v37 = vpop.f32.mrf.mxu3  ;;  %796 = vst [vmem:[%s1709_s26 + $0xd0] sm:$0xff] %v736_v36  ;;  %v680_v40 = vpop.f32.mrf.mxu0  ;;  %v899_v46 = vmul.f32 %v736_v36, %v736_v36  ;;  %v833_v62 = vadd.f32 %v832_v52, %v736_v36 }
  0xe4   : > { %v709_v41 = vpop.f32.mrf.mxu1  ;;  %797 = vst [vmem:[%s1709_s26 + $0xd8] sm:$0xff] %v765_v37  ;;  %v808_v28 = vadd.f32 %v807_v32, %v680_v40  ;;  %v901_v29 = vmul.f32 %v680_v40, %v680_v40  ;;  %v900_v47 = vmul.f32 %v765_v37, %v765_v37  ;;  %v846_v0 = vadd.f32 %v845_v54, %v765_v37 }
  0xe5   : > { %v821_v42 = vadd.f32 %v820_v35, %v709_v41  ;;  %v902_v43 = vmul.f32 %v709_v41, %v709_v41  ;;  %798 = vst [vmem:[%s1709_s26 + $0xe0] sm:$0xff] %v680_v40  ;;  %v936_v63 = vadd.f32 %v935_v53, %v899_v46 }
  0xe6   : > { %v809_v48 = vrot.slane %v808_v28, 4  ;;  %v911_v49 = vadd.f32 %v910_v38, %v901_v29  ;;  %799 = vst [vmem:[%s1709_s26 + $0xe8] sm:$0xff] %v709_v41  ;;  %v949_v1 = vadd.f32 %v948_v55, %v900_v47 }
  0xe7   : > { %v822_v50 = vrot.slane %v821_v42, 4  ;;  %v924_v51 = vadd.f32 %v923_v39, %v902_v43  ;;  %v868_v43 = vlaneseq }
  0xe8   : > { %v810_v56 = vadd.f32 %v809_v48, %v808_v28  ;;  %v912_v57 = vrot.slane %v911_v49, 4 }
  0xe9   : > { %v823_v58 = vadd.f32 %v822_v50, %v821_v42  ;;  %v925_v59 = vrot.slane %v924_v51, 4  ;;  %vm870_vm3 = vcmp.lt.s32.totalorder %v868_v43, 512 }
  0xea   : > { %v913_v2 = vadd.f32 %v912_v57, %v911_v49  ;;  %v738_v5 = vpop.f32.mrf.mxu2  ;;  %v811_v9 = vrot.slane %v810_v56, 2 }
  0xeb   : > { %v824_v3 = vrot.slane %v823_v58, 2  ;;  %v926_v4 = vadd.f32 %v925_v59, %v924_v51  ;;  %v767_v6 = vpop.f32.mrf.mxu3  ;;  %800 = vst [vmem:[%s1709_s26 + $0xf0] sm:$0xff] %v738_v5  ;;  %v834_v60 = vadd.f32 %v833_v62, %v738_v5  ;;  %v903_v7 = vmul.f32 %v738_v5, %v738_v5 }
  0xec   : > { %v847_v61 = vadd.f32 %v846_v0, %v767_v6  ;;  %v904_v8 = vmul.f32 %v767_v6, %v767_v6  ;;  %801 = vst [vmem:[%s1709_s26 + $0xf8] sm:$0xff] %v767_v6  ;;  %v914_v16 = vrot.slane %v913_v2, 2  ;;  %v812_v23 = vadd.f32 %v811_v9, %v810_v56 }
  0xed   : > { %v825_v10 = vadd.f32 %v824_v3, %v823_v58  ;;  %v927_v11 = vrot.slane %v926_v4, 2  ;;  %v835_v12 = vrot.slane %v834_v60, 4  ;;  %v937_v13 = vadd.f32 %v936_v63, %v903_v7 }
  0xee   : > { %v848_v14 = vrot.slane %v847_v61, 4  ;;  %v950_v15 = vadd.f32 %v949_v1, %v904_v8  ;;  %v915_v31 = vadd.f32 %v914_v16, %v913_v2  ;;  %v813_v34 = vrot.slane %v812_v23, 1 }
  0xef   : > { %v826_v17 = vrot.slane %v825_v10, 1  ;;  %v928_v18 = vadd.f32 %v927_v11, %v926_v4  ;;  %v836_v19 = vadd.f32 %v835_v12, %v834_v60  ;;  %v938_v20 = vrot.slane %v937_v13, 4 }
  0xf0   : > { %v849_v21 = vadd.f32 %v848_v14, %v847_v61  ;;  %v951_v22 = vrot.slane %v950_v15, 4  ;;  %v916_v29 = vrot.slane %v915_v31, 1  ;;  %v814_v48 = vadd.f32 %v813_v34, %v812_v23 }
  0xf1   : > { %v929_v30 = vrot.slane %v928_v18, 1  ;;  %v837_v24 = vrot.slane %v836_v19, 2  ;;  %v939_v25 = vadd.f32 %v938_v20, %v937_v13  ;;  %v827_v32 = vadd.f32 %v826_v17, %v825_v10 }
  0xf2   : > { %v850_v26 = vrot.slane %v849_v21, 2  ;;  %v952_v27 = vadd.f32 %v951_v22, %v950_v15  ;;  %v917_v54 = vadd.f32 %v916_v29, %v915_v31 }
  0xf3   : > { %v838_v35 = vadd.f32 %v837_v24, %v836_v19  ;;  %v940_v36 = vrot.slane %v939_v25, 2  ;;  %v930_v38 = vadd.f32 %v929_v30, %v928_v18  ;;  %v858_v42 = vrot.slane %v827_v32, 7 }
  0xf4   : > { %v851_v37 = vadd.f32 %v850_v26, %v849_v21  ;;  %v953_v33 = vrot.slane %v952_v27, 2 }
  0xf5   : > { %v839_v39 = vrot.slane %v838_v35, 1  ;;  %v941_v40 = vadd.f32 %v940_v36, %v939_v25  ;;  %v961_v49 = vrot.slane %v930_v38, 7  ;;  %v862_v55 = vsel %vm861_vm0, %v814_v48, %v858_v42 }
  0xf6   : > { %v852_v41 = vrot.slane %v851_v37, 1  ;;  %v954_v28 = vadd.f32 %v953_v33, %v952_v27 }
  0xf7   : > { %v840_v44 = vadd.f32 %v839_v39, %v838_v35  ;;  %v942_v45 = vrot.slane %v941_v40, 1  ;;  %v964_v62 = vsel %vm861_vm0, %v917_v54, %v961_v49 }
  0xf8   : > { %v853_v46 = vadd.f32 %v852_v41, %v851_v37  ;;  %v955_v47 = vrot.slane %v954_v28, 1 }
  0xf9   : > { %v859_v50 = vrot.slane %v840_v44, 6  ;;  %v943_v51 = vadd.f32 %v942_v45, %v941_v40 }
  0xfa   : > { %v860_v52 = vrot.slane %v853_v46, 5  ;;  %v956_v53 = vadd.f32 %v955_v47, %v954_v28 }
  0xfb   : > { %v962_v56 = vrot.slane %v943_v51, 6 }
  0xfc   : > { %v864_v57 = vsel %vm863_vm1, %v859_v50, %v860_v52  ;;  %v963_v58 = vrot.slane %v956_v53, 5 }
  0xfd   : > { %v866_v59 = vsel %vm865_vm2, %v862_v55, %v864_v57 }
  0xfe   : > { %872 = vst.msk [vmem:[%s399_s29] sm:$0xf] %vm870_vm3, %v866_v59  ;;  %v965_v63 = vsel %vm863_vm1, %v962_v56, %v963_v58 }
  0xff   : > { %v966_v0 = vsel %vm865_vm2, %v964_v62, %v965_v63 }
 0x100   : > { %968 = vst.msk [vmem:[%s408_s7] sm:$0xf] %vm870_vm3, %v966_v0 }
 0x101 PF: > { %s17_s23 = sadd.s32 1, %s1437_s23   ;;  %s1812_s21 = smov %s1433_s22 }
 0x102   : > { %p14_p6 = scmp.ge.s32.totalorder %s17_s23, 4   ;;  %s1813_s22 = smov %s1815_s24 }
 0x104   :  { %16 = sbr.rel (!%p14_p6) target bundleno = 2 (0x2), region = 99 }

// kernel: fwd.10
= control target key start
LH: loop header
LB: loop body
LE: loop exit
PB: predicated region body
PF: predicated region fallthrough
CT: control target
= control target key end

     0   :  { %s2397_s21 = smov 0   ;;  %s2399_s22 = smov 0   ;;  %s3052_s0 = inlined_call_operand.vmem [shape: bf16[128,1152], index: 0, kind: input, shape index: {}]   ;;  %s3053_s1 = inlined_call_operand.vmem [shape: bf16[1152,128], index: 1, kind: input, shape index: {}]   ;;  %s3054_s2 = inlined_call_operand.vmem [shape: f32[1,1152], index: 2, kind: input, shape index: {}]   ;;  %s3055_s3 = inlined_call_operand.vmem [shape: f32[1,1152], index: 3, kind: input, shape index: {}]   ;;  %s3056_s4 = inlined_call_operand.vmem [shape: bf16[128,128], index: 4, kind: output, shape index: {0}]   ;;  %s3057_s5 = inlined_call_operand.vmem [shape: f32[2,1,128], index: 5, kind: output, shape index: {1}]   ;;  %s3058_s6 = inlined_call_operand.vmem [shape: f32[2,1,128], index: 6, kind: output, shape index: {2}]  }
   0x1   :  { %s2401_s23 = smov 0  }
   0x2 LB: > { %s36_s24 = sadd.s32 1, %s2356_s22  ;;  %p1905_p0 = scmp.ge.s32.totalorder %s2360_s23, 1  ;;  %s2360_s23 = sphi %s2401_s23, %s17_s23   ;;  %s2356_s22 = sphi %s2399_s22, %s3060_s22   ;;  %s2352_s21 = sphi %s2397_s21, %s3059_s21  }
   0x3   : > { %p38_p1 = scmp.ge.s32.totalorder %s36_s24, 2  ;;  %p287_p2 = scmp.lt.s32.totalorder %s2360_s23, 3 }
   0x5   : > { %s3062_s24 = smov (%p38_p1, %s36_s24), 0  ;;  %p288_p3 = pnand %p1905_p0, %p287_p2 }
   0x6   : > { %s1906_s27 = sshll.u32 (!%p288_p3), %s2352_s21, 3  ;;  %p393_p5 = scmp.lt.s32.totalorder (!%p288_p3), %s2352_s21, 1 }
   0x7   : > { %291 = sbr.rel (%p288_p3) target bundleno = 347 (0x15b), region = 36  ;;  %p355_p4 = scmp.lt.s32.totalorder (!%p288_p3), %s1906_s27, 15 }
   0xc   : > { %v2207_v0 = vld [vmem:[%s3053_s1 + $0x38] sm:$0xff]  ;;  %v2206_v2 = vld [vmem:[%s3053_s1 + $0x30] sm:$0xff]  ;;  %s3064_s27 = smov (!%p355_p4, %s1906_s27), 15  ;;  %v2205_v6 = vld [vmem:[%s3053_s1 + $0x28] sm:$0xff]  ;;  %s3066_s21 = smov (!%p393_p5, %s2352_s21), 1 }
   0xd   : > { %v2223_v1 = vld [vmem:[%s3053_s1 + $0xb8] sm:$0xff]  ;;  %2295 = vmatpush.bf16.msra.mxu1 %v2207_v0  ;;  %1389 = vmatpush.bf16.msra.mxu0 %v2207_v0  ;;  %v2222_v3 = vld [vmem:[%s3053_s1 + $0xb0] sm:$0xff]  ;;  %s2311_s14 = smul.u32 36, %s3064_s27  ;;  %v2221_v7 = vld [vmem:[%s3053_s1 + $0xa8] sm:$0xff]  ;;  %s398_s17 = scalar_lea.vmem %s3057_s5, %s3066_s21 }
   0xe   : > { %1447 = vmatpush.bf16.msra.mxu2 %v2223_v1  ;;  %v2231_v4 = vld [vmem:[%s3053_s1 + $0xf8] sm:$0xff]  ;;  %v2230_v5 = vld [vmem:[%s3053_s1 + $0xf0] sm:$0xff]  ;;  %v2204_v8 = vld [vmem:[%s3053_s1 + $0x20] sm:$0xff]  ;;  %s404_s20 = scalar_lea.vmem %s3058_s6, %s3066_s21 }
   0xf   : > { %1476 = vmatpush.bf16.msra.mxu3 %v2231_v4  ;;  %s2448_s25 = scalar_lea.vmem %s3052_s0, %s2311_s14  ;;  %v2229_v9 = vld [vmem:[%s3053_s1 + $0xe8] sm:$0xff]  ;;  %v2465_v12 = vld [vmem:[%s3054_s2] sm:$0xff]  ;;  %v2203_v27 = vld [vmem:[%s3053_s1 + $0x18] sm:$0xff] }
  0x10   : > { %v2457_v10 = vld [vmem:[%s2448_s25 + $0x90] sm:$0xff]  ;;  %v2468_v13 = vld [vmem:[%s2448_s25] sm:$0xff]  ;;  %v406_v15 = vld [vmem:[%s2448_s25 + $0x8] sm:$0xff]  ;;  %v2481_v20 = vperm.slane %v2465_v12, 0  ;;  %v2494_v26 = vperm.slane %v2465_v12, 2  ;;  %v2526_v45 = vperm.slane %v2465_v12, 3 }
  0x11   : > { %2296 = vmatpush.bf16.msra.mxu1 %v2206_v2  ;;  %1390 = vmatpush.bf16.msra.mxu0 %v2206_v2  ;;  %v2460_v11 = vld [vmem:[%s2448_s25 + $0xb4] sm:$0xff]  ;;  %v2471_v14 = vld [vmem:[%s2448_s25 + $0x24] sm:$0xff]  ;;  %v411_v17 = vld [vmem:[%s2448_s25 + $0x2c] sm:$0xff]  ;;  %v481_v18 = vunpack.c.l.bf16 %v2457_v10  ;;  %v445_v23 = vunpack.c.l.bf16 %v2468_v13  ;;  %v447_v25 = vunpack.c.l.bf16 %v406_v15  ;;  %v448_v41 = vunpack.c.h.bf16 %v406_v15 }
  0x12   : > { %1448 = vmatpush.bf16.msra.mxu2 %v2222_v3  ;;  %v2220_v16 = vld [vmem:[%s3053_s1 + $0xa0] sm:$0xff]  ;;  %v490_v19 = vunpack.c.l.bf16 %v2460_v11  ;;  %v454_v24 = vunpack.c.l.bf16 %v2471_v14  ;;  %v456_v28 = vunpack.c.l.bf16 %v411_v17  ;;  %v2219_v29 = vld [vmem:[%s3053_s1 + $0x98] sm:$0xff]  ;;  %v2202_v38 = vld [vmem:[%s3053_s1 + $0x10] sm:$0xff]  ;;  %v457_v42 = vunpack.c.h.bf16 %v411_v17 }
  0x13   : > { %1477 = vmatpush.bf16.msra.mxu3 %v2230_v5  ;;  %v2486_v21 = vld [vmem:[%s3055_s3] sm:$0xff]  ;;  %v575_v30 = vmul.f32 %v2481_v20, %v481_v18  ;;  %v539_v33 = vmul.f32 %v2481_v20, %v445_v23  ;;  %v2227_v35 = vld [vmem:[%s3053_s1 + $0xd8] sm:$0xff]  ;;  %v541_v36 = vmul.f32 %v2494_v26, %v447_v25  ;;  %v2218_v40 = vld [vmem:[%s3053_s1 + $0x90] sm:$0xff]  ;;  %v542_v53 = vmul.f32 %v2526_v45, %v448_v41 }
  0x14   : > { %v2228_v22 = vld [vmem:[%s3053_s1 + $0xe0] sm:$0xff]  ;;  %v584_v31 = vmul.f32 %v2481_v20, %v490_v19  ;;  %v2505_v32 = vperm.slane %v2486_v21, 0  ;;  %v548_v34 = vmul.f32 %v2481_v20, %v454_v24  ;;  %v2514_v37 = vperm.slane %v2486_v21, 2  ;;  %v2226_v49 = vld [vmem:[%s3053_s1 + $0xd0] sm:$0xff]  ;;  %v2201_v51 = vld [vmem:[%s3053_s1 + $0x8] sm:$0xff] }
  0x15   : > { %2297 = vmatpush.bf16.msra.mxu1 %v2205_v6  ;;  %1391 = vmatpush.bf16.msra.mxu0 %v2205_v6  ;;  %v550_v39 = vmul.f32 %v2494_v26, %v456_v28  ;;  %v2535_v50 = vperm.slane %v2486_v21, 3  ;;  %v551_v54 = vmul.f32 %v2526_v45, %v457_v42  ;;  %v2217_v55 = vld [vmem:[%s3053_s1 + $0x88] sm:$0xff]  ;;  %v2550_v61 = vld [vmem:[%s2448_s25 + $0xd8] sm:$0xff]  ;;  %v2200_v2 = vld [vmem:[%s3053_s1] sm:$0xff] }
  0x16   : > { %1449 = vmatpush.bf16.msra.mxu2 %v2221_v7  ;;  %v669_v43 = vadd.f32 %v2505_v32, %v575_v30  ;;  %v678_v44 = vadd.f32 %v2505_v32, %v584_v31  ;;  %v633_v46 = vadd.f32 %v2505_v32, %v539_v33  ;;  %v642_v47 = vadd.f32 %v2505_v32, %v548_v34  ;;  %v2225_v58 = vld [vmem:[%s3053_s1 + $0xc8] sm:$0xff]  ;;  %v2553_v62 = vld [vmem:[%s2448_s25 + $0xfc] sm:$0xff]  ;;  %v2214_v33 = vld [vmem:[%s3053_s1 + $0x70] sm:$0xff] }
  0x17   : > { %1478 = vmatpush.bf16.msra.mxu3 %v2229_v9  ;;  %v635_v48 = vadd.f32 %v2514_v37, %v541_v36  ;;  %v644_v52 = vadd.f32 %v2514_v37, %v550_v39  ;;  %v2556_v63 = vld [vmem:[%s2448_s25 + $0x48] sm:$0xff]  ;;  %v636_v0 = vadd.f32 %v2535_v50, %v542_v53  ;;  %v645_v1 = vadd.f32 %v2535_v50, %v551_v54  ;;  %v2215_v3 = vld [vmem:[%s3053_s1 + $0x78] sm:$0xff]  ;;  %v2216_v7 = vld [vmem:[%s3053_s1 + $0x80] sm:$0xff] }
  0x18   : > { %v741_v56 = vmax.f32 %v669_v43, 0.0  ;;  %v750_v57 = vmax.f32 %v678_v44, 0.0  ;;  %v705_v59 = vmax.f32 %v633_v46, 0.0  ;;  %v714_v60 = vmax.f32 %v642_v47, 0.0  ;;  %v2567_v6 = vld [vmem:[%s2448_s25 + $0x6c] sm:$0xff]  ;;  %v421_v9 = vld [vmem:[%s2448_s25 + $0x74] sm:$0xff] }
  0x19   : > { %2298 = vmatpush.bf16.msra.mxu1 %v2204_v8  ;;  %1392 = vmatpush.bf16.msra.mxu0 %v2204_v8  ;;  %v707_v4 = vmax.f32 %v635_v48, 0.0  ;;  %v716_v5 = vmax.f32 %v644_v52, 0.0  ;;  %v416_v8 = vld [vmem:[%s2448_s25 + $0x50] sm:$0xff]  ;;  %v499_v17 = vunpack.c.l.bf16 %v2550_v61  ;;  %v508_v18 = vunpack.c.l.bf16 %v2553_v62  ;;  %v2255_v19 = vld [vmem:[%s3053_s1 + $0x1b8] sm:$0xff]  ;;  %v2213_v48 = vld [vmem:[%s3053_s1 + $0x68] sm:$0xff] }
  0x1a   : > { %1450 = vmatpush.bf16.msra.mxu2 %v2220_v16  ;;  %v795_v15 = vpack.c.bf16 %v750_v57, %v741_v56  ;;  %v2239_v16 = vld [vmem:[%s3053_s1 + $0x138] sm:$0xff]  ;;  %v777_v23 = vpack.c.bf16 %v714_v60, %v705_v59  ;;  %v472_v24 = vunpack.c.l.bf16 %v2567_v6  ;;  %v708_v25 = vmax.f32 %v636_v0, 0.0  ;;  %v2253_v53 = vld [vmem:[%s3053_s1 + $0x1a8] sm:$0xff]  ;;  %v2212_v60 = vld [vmem:[%s3053_s1 + $0x60] sm:$0xff] }
  0x1b   : > { %1479 = vmatpush.bf16.msra.mxu3 %v2228_v22  ;;  %v463_v22 = vunpack.c.l.bf16 %v2556_v63  ;;  %v779_v28 = vpack.c.bf16 %v716_v5, %v707_v4  ;;  %v465_v30 = vunpack.c.l.bf16 %v416_v8  ;;  %v474_v31 = vunpack.c.l.bf16 %v421_v9  ;;  %v2263_v34 = vld [vmem:[%s3053_s1 + $0x1f8] sm:$0xff] }
  0x1c   : > { %v593_v36 = vmul.f32 %v2481_v20, %v499_v17  ;;  %v566_v41 = vmul.f32 %v2481_v20, %v472_v24  ;;  %v466_v43 = vunpack.c.h.bf16 %v416_v8  ;;  %v475_v44 = vunpack.c.h.bf16 %v421_v9  ;;  %v2640_v9 = vld [vmem:[%s2448_s25 + $0x10] sm:$0xff]  ;;  %v431_v24 = vld [vmem:[%s2448_s25 + $0xbc] sm:$0xff] }
  0x1d   : > { %2299 = vmatpush.bf16.msra.mxu1 %v2203_v27  ;;  %1393 = vmatpush.bf16.msra.mxu0 %v2203_v27  ;;  %v717_v27 = vmax.f32 %v645_v1, 0.0  ;;  %v557_v39 = vmul.f32 %v2481_v20, %v463_v22  ;;  %v559_v46 = vmul.f32 %v2494_v26, %v465_v30  ;;  %v568_v47 = vmul.f32 %v2494_v26, %v474_v31  ;;  %v2643_v17 = vld [vmem:[%s2448_s25 + $0x34] sm:$0xff] }
  0x1e   : > { %1451 = vmatpush.bf16.msra.mxu2 %v2219_v29  ;;  %v2224_v29 = vld [vmem:[%s3053_s1 + $0xc0] sm:$0xff]  ;;  %v560_v56 = vmul.f32 %v2526_v45, %v466_v43  ;;  %v569_v57 = vmul.f32 %v2526_v45, %v475_v44  ;;  %v2650_v22 = vperm.slane %v2465_v12, 1  ;;  %v2676_v44 = vperm.slane %v2486_v21, 4 }
  0x1f   : > { %1480 = vmatpush.bf16.msra.mxu3 %v2227_v35  ;;  %v2238_v35 = vld [vmem:[%s3053_s1 + $0x130] sm:$0xff]  ;;  %v780_v42 = vpack.c.bf16 %v717_v27, %v708_v25  ;;  %v651_v54 = vadd.f32 %v2505_v32, %v557_v39  ;;  %v662_v59 = vadd.f32 %v2514_v37, %v568_v47  ;;  %v455_v25 = vunpack.c.h.bf16 %v2471_v14 }
  0x20   : > { %v663_v8 = vadd.f32 %v2535_v50, %v569_v57  ;;  %v492_v14 = vunpack.c.l.bf16 %v431_v24  ;;  %v2250_v57 = vld [vmem:[%s3053_s1 + $0x190] sm:$0xff] }
  0x21   : > { %2300 = vmatpush.bf16.msra.mxu1 %v2202_v38  ;;  %1394 = vmatpush.bf16.msra.mxu0 %v2202_v38  ;;  %v602_v38 = vmul.f32 %v2481_v20, %v508_v18  ;;  %v2237_v20 = vld [vmem:[%s3053_s1 + $0x128] sm:$0xff]  ;;  %v723_v4 = vmax.f32 %v651_v54, 0.0  ;;  %v446_v18 = vunpack.c.h.bf16 %v2468_v13  ;;  %v449_v13 = vunpack.c.l.bf16 %v2640_v9 }
  0x22   : > { %1452 = vmatpush.bf16.msra.mxu2 %v2218_v40  ;;  %v2254_v40 = vld [vmem:[%s3053_s1 + $0x1b0] sm:$0xff]  ;;  %v482_v54 = vunpack.c.h.bf16 %v2457_v10 }
  0x23   : > { %1481 = vmatpush.bf16.msra.mxu3 %v2226_v49  ;;  %v2262_v49 = vld [vmem:[%s3053_s1 + $0x1f0] sm:$0xff]  ;;  %v696_v52 = vadd.f32 %v2505_v32, %v602_v38  ;;  %v540_v39 = vmul.f32 %v2650_v22, %v446_v18 }
  0x24   : > { %v2210_v38 = vld [vmem:[%s3053_s1 + $0x50] sm:$0xff] }
  0x25   : > { %2301 = vmatpush.bf16.msra.mxu1 %v2201_v51  ;;  %1395 = vmatpush.bf16.msra.mxu0 %v2201_v51  ;;  %v687_v51 = vadd.f32 %v2505_v32, %v593_v36  ;;  %v768_v1 = vmax.f32 %v696_v52, 0.0  ;;  %v586_v52 = vmul.f32 %v2494_v26, %v492_v14  ;;  %v464_v14 = vunpack.c.h.bf16 %v2556_v63 }
  0x26   : > { %1453 = vmatpush.bf16.msra.mxu2 %v2217_v55  ;;  %v660_v55 = vadd.f32 %v2505_v32, %v566_v41  ;;  %v2261_v32 = vld [vmem:[%s3053_s1 + $0x1e8] sm:$0xff]  ;;  %v2234_v41 = vld [vmem:[%s3053_s1 + $0x110] sm:$0xff] }
  0x27   : > { %1482 = vmatpush.bf16.msra.mxu3 %v2225_v58  ;;  %v653_v58 = vadd.f32 %v2514_v37, %v559_v46  ;;  %v759_v0 = vmax.f32 %v687_v51, 0.0 }
  0x28   : > { %v732_v5 = vmax.f32 %v660_v55, 0.0  ;;  %v2209_v55 = vld [vmem:[%s3053_s1 + $0x48] sm:$0xff] }
  0x29   : > { %2302 = vmatpush.bf16.msra.mxu1 %v2200_v2  ;;  %1396 = vmatpush.bf16.msra.mxu0 %v2200_v2  ;;  %v2236_v2 = vld [vmem:[%s3053_s1 + $0x120] sm:$0xff]  ;;  %v804_v27 = vpack.c.bf16 %v768_v1, %v759_v0  ;;  %v576_v0 = vmul.f32 %v2650_v22, %v482_v54  ;;  %v2750_v54 = vld [vmem:[%s3053_s1 + $0x230] sm:$0xff] }
  0x2a   : > { %1454 = vmatpush.bf16.msra.mxu2 %v2216_v7  ;;  %v654_v7 = vadd.f32 %v2535_v50, %v560_v56  ;;  %v786_v30 = vpack.c.bf16 %v732_v5, %v723_v4  ;;  %v680_v5 = vadd.f32 %v2514_v37, %v586_v52 }
  0x2b   : > { %1483 = vmatpush.bf16.msra.mxu3 %v2224_v29  ;;  %v2660_v29 = vperm.slane %v2465_v12, 4 }
  0x2c   : > { %1407 = vmatmul.bf16.vlgmr.msra.gmra.mxu1 %v795_v15  ;;  %1397 = vmatmul.bf16.vlgmr.msra.gmra.mxu0 %v777_v23  ;;  %v725_v15 = vmax.f32 %v653_v58, 0.0  ;;  %v426_v23 = vld [vmem:[%s2448_s25 + $0x98] sm:$0xff]  ;;  %v726_v31 = vmax.f32 %v654_v7, 0.0  ;;  %v491_v58 = vunpack.c.h.bf16 %v2460_v11 }
  0x2d   : > { %1418 = vmatpush.bf16.msrb.mxu1 %v2215_v3  ;;  %1505 = vmatpush.bf16.msrb.mxu0 %v2239_v16  ;;  %v2252_v3 = vld [vmem:[%s3053_s1 + $0x1a0] sm:$0xff]  ;;  %v734_v16 = vmax.f32 %v662_v59, 0.0  ;;  %v483_v36 = vunpack.c.l.bf16 %v426_v23  ;;  %v543_v43 = vmul.f32 %v2660_v29, %v449_v13  ;;  %v2233_v59 = vld [vmem:[%s3053_s1 + $0x108] sm:$0xff] }
  0x2e   : > { %1563 = vmatpush.bf16.msrb.mxu2 %v2255_v19  ;;  %1484 = vmatmul.bf16.vlgmr.msra.gmra.mxu3 %v780_v42  ;;  %v2211_v19 = vld [vmem:[%s3053_s1 + $0x58] sm:$0xff]  ;;  %v549_v42 = vmul.f32 %v2650_v22, %v455_v25 }
  0x2f   : > { %1455 = vmatmul.bf16.vlgmr.msra.gmra.mxu2 %v779_v28  ;;  %1592 = vmatpush.bf16.msrb.mxu3 %v2263_v34  ;;  %v2235_v28 = vld [vmem:[%s3053_s1 + $0x118] sm:$0xff]  ;;  %v458_v34 = vunpack.c.l.bf16 %v2643_v17  ;;  %v577_v51 = vmul.f32 %v2494_v26, %v483_v36 }
  0x30   : > { %v2733_v36 = vld [vmem:[%s2448_s25 + $0x7c] sm:$0xff] }
  0x31   : > { %1419 = vmatpush.bf16.msrb.mxu1 %v2214_v33  ;;  %1506 = vmatpush.bf16.msrb.mxu0 %v2238_v35  ;;  %v735_v33 = vmax.f32 %v663_v8, 0.0  ;;  %v788_v35 = vpack.c.bf16 %v734_v16, %v725_v15  ;;  %v552_v47 = vmul.f32 %v2660_v29, %v458_v34  ;;  %v671_v4 = vadd.f32 %v2514_v37, %v577_v51  ;;  %v2208_v8 = vld [vmem:[%s3053_s1 + $0x40] sm:$0xff] }
  0x32   : > { %1564 = vmatpush.bf16.msrb.mxu2 %v2254_v40  ;;  %v2668_v40 = vperm.slane %v2486_v21, 1 }
  0x33   : > { %1593 = vmatpush.bf16.msrb.mxu3 %v2262_v49  ;;  %v789_v46 = vpack.c.bf16 %v735_v33, %v726_v31  ;;  %v484_v49 = vunpack.c.h.bf16 %v426_v23  ;;  %v646_v1 = vadd.f32 %v2676_v44, %v552_v47  ;;  %v2232_v23 = vld [vmem:[%s3053_s1 + $0x100] sm:$0xff]  ;;  %v2730_v31 = vld [vmem:[%s2448_s25 + $0x58] sm:$0xff]  ;;  %v743_v34 = vmax.f32 %v671_v4, 0.0 }
  0x34   : > { %v634_v56 = vadd.f32 %v2668_v40, %v540_v39  ;;  %v643_v10 = vadd.f32 %v2668_v40, %v549_v42  ;;  %v670_v7 = vadd.f32 %v2668_v40, %v576_v0  ;;  %v441_v39 = vld [vmem:[%s2448_s25 + $0x104] sm:$0xff]  ;;  %v467_v47 = vunpack.c.l.bf16 %v2730_v31 }
  0x35   : > { %1420 = vmatpush.bf16.msrb.mxu1 %v2213_v48  ;;  %1507 = vmatpush.bf16.msrb.mxu0 %v2237_v20  ;;  %v2251_v48 = vld [vmem:[%s3053_s1 + $0x198] sm:$0xff]  ;;  %v493_v20 = vunpack.c.h.bf16 %v431_v24  ;;  %v578_v11 = vmul.f32 %v2526_v45, %v484_v49 }
  0x36   : > { %1565 = vmatpush.bf16.msrb.mxu2 %v2253_v53  ;;  %v2260_v53 = vld [vmem:[%s3053_s1 + $0x1e0] sm:$0xff]  ;;  %v706_v16 = vmax.f32 %v634_v56, 0.0  ;;  %v715_v18 = vmax.f32 %v643_v10, 0.0  ;;  %v742_v25 = vmax.f32 %v670_v7, 0.0  ;;  %v2245_v56 = vld [vmem:[%s3053_s1 + $0x168] sm:$0xff] }
  0x37   : > { %1594 = vmatpush.bf16.msrb.mxu3 %v2261_v32  ;;  %v2259_v32 = vld [vmem:[%s3053_s1 + $0x1d8] sm:$0xff]  ;;  %v672_v13 = vadd.f32 %v2535_v50, %v578_v11  ;;  %v2768_v11 = vld [vmem:[%s3053_s1 + $0x228] sm:$0xff] }
  0x38   : > { %v778_v42 = vpack.c.bf16 %v715_v18, %v706_v16 }
  0x39   : > { %1421 = vmatpush.bf16.msrb.mxu1 %v2212_v60  ;;  %1508 = vmatpush.bf16.msrb.mxu0 %v2236_v2  ;;  %v637_v60 = vadd.f32 %v2676_v44, %v543_v43  ;;  %v587_v2 = vmul.f32 %v2526_v45, %v493_v20  ;;  %v2246_v43 = vld [vmem:[%s3053_s1 + $0x170] sm:$0xff]  ;;  %v744_v49 = vmax.f32 %v672_v13, 0.0  ;;  %v476_v20 = vunpack.c.l.bf16 %v2733_v36 }
  0x3a   : > { %1566 = vmatpush.bf16.msrb.mxu2 %v2252_v3  ;;  %v585_v3 = vmul.f32 %v2650_v22, %v491_v58  ;;  %v2249_v58 = vld [vmem:[%s3053_s1 + $0x188] sm:$0xff] }
  0x3b   : > { %1595 = vmatpush.bf16.msrb.mxu3 %v2260_v53  ;;  %v709_v24 = vmax.f32 %v637_v60, 0.0  ;;  %v510_v53 = vunpack.c.l.bf16 %v441_v39  ;;  %v570_v10 = vmul.f32 %v2660_v29, %v476_v20  ;;  %v2242_v20 = vld [vmem:[%s3053_s1 + $0x150] sm:$0xff] }
  0x3c   : > { %1412 = vmatmul.bf16.gmra.mxu1 %v804_v27  ;;  %1402 = vmatmul.bf16.gmra.mxu0 %v786_v30  ;;  %v679_v15 = vadd.f32 %v2668_v40, %v585_v3  ;;  %v718_v27 = vmax.f32 %v646_v1, 0.0  ;;  %v681_v30 = vadd.f32 %v2535_v50, %v587_v2  ;;  %v2258_v2 = vld [vmem:[%s3053_s1 + $0x1d0] sm:$0xff]  ;;  %v500_v3 = vunpack.c.h.bf16 %v2550_v61  ;;  %v2257_v61 = vld [vmem:[%s3053_s1 + $0x1c8] sm:$0xff] }
  0x3d   : > { %1422 = vmatpush.bf16.msrb.mxu1 %v2211_v19  ;;  %1509 = vmatpush.bf16.msrb.mxu0 %v2235_v28  ;;  %v2247_v19 = vld [vmem:[%s3053_s1 + $0x178] sm:$0xff]  ;;  %v604_v1 = vmul.f32 %v2494_v26, %v510_v53  ;;  %v664_v18 = vadd.f32 %v2676_v44, %v570_v10 }
  0x3e   : > { %1567 = vmatpush.bf16.msrb.mxu2 %v2251_v48  ;;  %1489 = vmatmul.bf16.gmra.mxu3 %v789_v46  ;;  %v2725_v28 = vld [vmem:[%s3053_s1 + $0x238] sm:$0xff]  ;;  %v751_v33 = vmax.f32 %v679_v15, 0.0  ;;  %v473_v46 = vunpack.c.h.bf16 %v2567_v6  ;;  %v781_v48 = vpack.c.bf16 %v718_v27, %v709_v24  ;;  %v753_v63 = vmax.f32 %v681_v30, 0.0  ;;  %v2244_v15 = vld [vmem:[%s3053_s1 + $0x160] sm:$0xff] }
  0x3f   : > { %1460 = vmatmul.bf16.gmra.mxu2 %v788_v35  ;;  %1596 = vmatpush.bf16.msrb.mxu3 %v2259_v32  ;;  %v752_v35 = vmax.f32 %v680_v5, 0.0  ;;  %v511_v32 = vunpack.c.h.bf16 %v441_v39  ;;  %v509_v5 = vunpack.c.h.bf16 %v2553_v62  ;;  %v594_v16 = vmul.f32 %v2650_v22, %v500_v3  ;;  %v2798_v27 = vld [vmem:[%s3053_s1 + $0x220] sm:$0xff] }
  0x40   : > { %v567_v6 = vmul.f32 %v2650_v22, %v473_v46  ;;  %v2808_v39 = vld [vmem:[%s2448_s25 + $0xa0] sm:$0xff] }
  0x41   : > { %1423 = vmatpush.bf16.msrb.mxu1 %v2210_v38  ;;  %1510 = vmatpush.bf16.msrb.mxu0 %v2234_v41  ;;  %v436_v38 = vld [vmem:[%s2448_s25 + $0xe0] sm:$0xff]  ;;  %v2738_v41 = vpack.c.bf16 %v751_v33, %v742_v25  ;;  %v797_v51 = vpack.c.bf16 %v752_v35, %v743_v34  ;;  %v698_v25 = vadd.f32 %v2514_v37, %v604_v1  ;;  %v736_v35 = vmax.f32 %v664_v18, 0.0 }
  0x42   : > { %1568 = vmatpush.bf16.msrb.mxu2 %v2250_v57  ;;  %v501_v52 = vunpack.c.l.bf16 %v436_v38  ;;  %v561_v57 = vmul.f32 %v2660_v29, %v467_v47  ;;  %v502_v60 = vunpack.c.h.bf16 %v436_v38  ;;  %v661_v7 = vadd.f32 %v2668_v40, %v567_v6  ;;  %v408_v47 = vld [vmem:[%s2448_s25 + $0x18] sm:$0xff] }
  0x43   : > { %1597 = vmatpush.bf16.msrb.mxu3 %v2258_v2  ;;  %v688_v13 = vadd.f32 %v2668_v40, %v594_v16  ;;  %v770_v46 = vmax.f32 %v698_v25, 0.0  ;;  %v451_v6 = vunpack.c.l.bf16 %v408_v47  ;;  %v2842_v2 = vperm.slane %v2465_v12, 7  ;;  %v2240_v16 = vld [vmem:[%s3053_s1 + $0x140] sm:$0xff] }
  0x44   : > { %v595_v0 = vmul.f32 %v2494_v26, %v501_v52  ;;  %v2248_v26 = vld [vmem:[%s3053_s1 + $0x180] sm:$0xff]  ;;  %v596_v62 = vmul.f32 %v2526_v45, %v502_v60 }
  0x45   : > { %1424 = vmatpush.bf16.msrb.mxu1 %v2209_v55  ;;  %1511 = vmatpush.bf16.msrb.mxu0 %v2233_v59  ;;  %v558_v55 = vmul.f32 %v2650_v22, %v464_v14  ;;  %v798_v59 = vpack.c.bf16 %v753_v63, %v744_v49  ;;  %v760_v34 = vmax.f32 %v688_v13, 0.0  ;;  %v485_v63 = vunpack.c.l.bf16 %v2808_v39 }
  0x46   : > { %1569 = vmatpush.bf16.msrb.mxu2 %v2249_v58  ;;  %v689_v24 = vadd.f32 %v2514_v37, %v595_v0  ;;  %v2243_v37 = vld [vmem:[%s3053_s1 + $0x158] sm:$0xff]  ;;  %v690_v14 = vadd.f32 %v2535_v50, %v596_v62  ;;  %v450_v58 = vunpack.c.h.bf16 %v2640_v9  ;;  %v2256_v9 = vld [vmem:[%s3053_s1 + $0x1c0] sm:$0xff] }
  0x47   : > { %v652_v4 = vadd.f32 %v2668_v40, %v558_v55  ;;  %1598 = vmatpush.bf16.msrb.mxu3 %v2257_v61  ;;  %v579_v10 = vmul.f32 %v2660_v29, %v485_v63  ;;  %v2267_v0 = vld [vmem:[%s3053_s1 + $0x218] sm:$0xff] }
  0x49   : > { %1425 = vmatpush.bf16.msrb.mxu1 %v2208_v8  ;;  %1512 = vmatpush.bf16.msrb.mxu0 %v2232_v23  ;;  %v655_v8 = vadd.f32 %v2676_v44, %v561_v57  ;;  %v603_v23 = vmul.f32 %v2650_v22, %v509_v5  ;;  %v724_v30 = vmax.f32 %v652_v4, 0.0  ;;  %v733_v22 = vmax.f32 %v661_v7, 0.0  ;;  %v2266_v7 = vld [vmem:[%s3053_s1 + $0x210] sm:$0xff] }
  0x4a   : > { %1570 = vmatpush.bf16.msrb.mxu2 %v2248_v26  ;;  %v2826_v57 = vperm.slane %v2465_v12, 6  ;;  %v2847_v26 = vperm.slane %v2486_v21, 6  ;;  %v2850_v5 = vperm.slane %v2465_v12, 5 }
  0x4b   : > { %v727_v33 = vmax.f32 %v655_v8, 0.0  ;;  %1599 = vmatpush.bf16.msrb.mxu3 %v2256_v9  ;;  %v2856_v8 = vperm.slane %v2486_v21, 5 }
  0x4c   : > { %1426 = vmatmul.bf16.vlgmr.msrb.gmra.mxu1 %v778_v42  ;;  %1513 = vmatmul.bf16.vlgmr.msrb.gmra.mxu0 %v781_v48  ;;  %v413_v48 = vld [vmem:[%s2448_s25 + $0x3c] sm:$0xff]  ;;  %v545_v3 = vmul.f32 %v2826_v57, %v451_v6  ;;  %v544_v12 = vmul.f32 %v2850_v5, %v450_v58 }
  0x4d   : > { %1534 = vmatpush.bf16.msra.mxu1 %v2247_v19  ;;  %1621 = vmatpush.bf16.msra.mxu0 %v2725_v28  ;;  %v605_v19 = vmul.f32 %v2526_v45, %v511_v32  ;;  %v697_v45 = vadd.f32 %v2668_v40, %v603_v23  ;;  %v2811_v40 = vld [vmem:[%s2448_s25 + $0xc4] sm:$0xff]  ;;  %v790_v52 = vpack.c.bf16 %v736_v35, %v727_v33  ;;  %v461_v1 = vunpack.c.h.bf16 %v413_v48 }
  0x4e   : > { %1494 = vmatmul.bf16.gmra.mxu3 %v798_v59  ;;  %2303 = vmatpush.bf16.msra.mxu2 %v2725_v28  ;;  %v762_v28 = vmax.f32 %v690_v14, 0.0  ;;  %v459_v59 = vunpack.c.h.bf16 %v2643_v17  ;;  %v452_v17 = vunpack.c.h.bf16 %v408_v47  ;;  %v638_v13 = vadd.f32 %v2856_v8, %v544_v12  ;;  %v2880_v33 = vld [vmem:[%s2448_s25 + $0xe8] sm:$0xff]  ;;  %v409_v12 = vld [vmem:[%s2448_s25 + $0x20] sm:$0xf] }
  0x4f   : > { %1465 = vmatmul.bf16.gmra.mxu2 %v797_v51  ;;  %v699_v38 = vadd.f32 %v2535_v50, %v605_v19  ;;  %v769_v42 = vmax.f32 %v697_v45, 0.0  ;;  %v494_v50 = vunpack.c.l.bf16 %v2811_v40  ;;  %v787_v51 = vpack.c.bf16 %v733_v22, %v724_v30 }
  0x50   : > { %v546_v18 = vmul.f32 %v2842_v2, %v452_v17  ;;  %v555_v62 = vmul.f32 %v2842_v2, %v461_v1  ;;  %v2868_v19 = vperm.slane %v2486_v21, 7  ;;  %v553_v23 = vmul.f32 %v2850_v5, %v459_v59 }
  0x51   : > { %1535 = vmatpush.bf16.msra.mxu1 %v2246_v43  ;;  %1622 = vmatpush.bf16.msra.mxu0 %v2750_v54  ;;  %v761_v43 = vmax.f32 %v689_v24, 0.0  ;;  %v2817_v49 = vpack.c.bf16 %v769_v42, %v760_v34  ;;  %v771_v53 = vmax.f32 %v699_v38, 0.0  ;;  %v588_v60 = vmul.f32 %v2660_v29, %v494_v50  ;;  %v2885_v42 = vld [vmem:[%s2448_s25 + $0x10c] sm:$0xff] }
  0x52   : > { %2304 = vmatpush.bf16.msra.mxu2 %v2750_v54  ;;  %v2241_v54 = vld [vmem:[%s3053_s1 + $0x148] sm:$0xff]  ;;  %v639_v24 = vadd.f32 %v2847_v26, %v545_v3  ;;  %v647_v45 = vadd.f32 %v2856_v8, %v553_v23  ;;  %v710_v30 = vmax.f32 %v638_v13, 0.0  ;;  %v649_v34 = vadd.f32 %v2868_v19, %v555_v62 }
  0x53   : > { %v806_v55 = vpack.c.bf16 %v770_v46, %v761_v43  ;;  %v807_v32 = vpack.c.bf16 %v771_v53, %v762_v28  ;;  %v682_v61 = vadd.f32 %v2676_v44, %v588_v60  ;;  %v418_v43 = vld [vmem:[%s2448_s25 + $0x60] sm:$0xff]  ;;  %v512_v63 = vunpack.c.l.bf16 %v2885_v42  ;;  %v433_v13 = vld [vmem:[%s2448_s25 + $0xcc] sm:$0xff] }
  0x54   : > { %v719_v35 = vmax.f32 %v647_v45, 0.0  ;;  %v711_v14 = vmax.f32 %v639_v24, 0.0  ;;  %v423_v46 = vld [vmem:[%s2448_s25 + $0x84] sm:$0xff]  ;;  %v470_v58 = vunpack.c.h.bf16 %v418_v43  ;;  %v453_v45 = vunpack.c.l.bf16 %v409_v12 }
  0x55   : > { %1536 = vmatpush.bf16.msra.mxu1 %v2245_v56  ;;  %1623 = vmatpush.bf16.msra.mxu0 %v2768_v11  ;;  %v460_v56 = vunpack.c.l.bf16 %v413_v48  ;;  %v754_v22 = vmax.f32 %v682_v61, 0.0  ;;  %v503_v48 = vunpack.c.l.bf16 %v2880_v33  ;;  %v478_v28 = vunpack.c.l.bf16 %v423_v46 }
  0x56   : > { %2305 = vmatpush.bf16.msra.mxu2 %v2768_v11  ;;  %v2265_v11 = vld [vmem:[%s3053_s1 + $0x208] sm:$0xff]  ;;  %v2889_v47 = vpack.c.bf16 %v719_v35, %v710_v30  ;;  %v479_v59 = vunpack.c.h.bf16 %v423_v46  ;;  %v564_v9 = vmul.f32 %v2842_v2, %v470_v58  ;;  %v495_v58 = vunpack.c.h.bf16 %v2811_v40 }
  0x57   : > { %v554_v4 = vmul.f32 %v2826_v57, %v460_v56  ;;  %v597_v53 = vmul.f32 %v2660_v29, %v503_v48  ;;  %v2264_v56 = vld [vmem:[%s3053_s1 + $0x200] sm:$0xff]  ;;  %v572_v60 = vmul.f32 %v2826_v57, %v478_v28  ;;  %v2924_v30 = vld [vmem:[%s3054_s2 + $0x8] ss:$0 sm:$0xff] }
  0x58   : > { %v573_v17 = vmul.f32 %v2842_v2, %v479_v59  ;;  %v658_v61 = vadd.f32 %v2868_v19, %v564_v9  ;;  %v2931_v48 = vld [vmem:[%s3055_s3 + $0x8] ss:$0 sm:$0xff] }
  0x59   : > { %1537 = vmatpush.bf16.msra.mxu1 %v2244_v15  ;;  %1624 = vmatpush.bf16.msra.mxu0 %v2798_v27  ;;  %v673_v15 = vadd.f32 %v2676_v44, %v579_v10  ;;  %v648_v25 = vadd.f32 %v2847_v26, %v554_v4 }
  0x5a   : > { %2306 = vmatpush.bf16.msra.mxu2 %v2798_v27 }
  0x5b   : > { %v745_v21 = vmax.f32 %v673_v15, 0.0  ;;  %v720_v38 = vmax.f32 %v648_v25, 0.0  ;;  %v428_v25 = vld [vmem:[%s2448_s25 + $0xa8] sm:$0xff] }
  0x5c   : > { %1431 = vmatmul.bf16.gmra.mxu1 %v787_v51  ;;  %1518 = vmatmul.bf16.gmra.mxu0 %v790_v52  ;;  %v469_v52 = vunpack.c.l.bf16 %v418_v43  ;;  %v547_v43 = vmul.f32 %v2924_v30, %v453_v45 }
  0x5d   : > { %1538 = vmatpush.bf16.msra.mxu1 %v2243_v37  ;;  %1625 = vmatpush.bf16.msra.mxu0 %v2267_v0  ;;  %v640_v37 = vadd.f32 %v2868_v19, %v546_v18  ;;  %v799_v27 = vpack.c.bf16 %v754_v22, %v745_v21  ;;  %v783_v51 = vpack.c.bf16 %v720_v38, %v711_v14  ;;  %v414_v18 = vld [vmem:[%s2448_s25 + $0x44] sm:$0xf]  ;;  %v487_v14 = vunpack.c.l.bf16 %v428_v25 }
  0x5e   : > { %1499 = vmatmul.bf16.gmra.mxu3 %v807_v32  ;;  %2307 = vmatpush.bf16.msra.mxu2 %v2267_v0  ;;  %v563_v10 = vmul.f32 %v2826_v57, %v469_v52  ;;  %v468_v32 = vunpack.c.h.bf16 %v2730_v31  ;;  %v462_v21 = vunpack.c.l.bf16 %v414_v18  ;;  %v496_v38 = vunpack.c.l.bf16 %v433_v13 }
  0x5f   : > { %1470 = vmatmul.bf16.gmra.mxu2 %v806_v55  ;;  %v712_v50 = vmax.f32 %v640_v37, 0.0  ;;  %v606_v55 = vmul.f32 %v2660_v29, %v512_v63  ;;  %v730_v37 = vmax.f32 %v658_v61, 0.0  ;;  %v488_v63 = vunpack.c.h.bf16 %v428_v25 }
  0x60   : > { %v562_v29 = vmul.f32 %v2850_v5, %v468_v32  ;;  %v657_v31 = vadd.f32 %v2847_v26, %v563_v10  ;;  %v556_v46 = vmul.f32 %v2924_v30, %v462_v21  ;;  %v641_v52 = vadd.f32 %v2931_v48, %v547_v43 }
  0x61   : > { %1539 = vmatpush.bf16.msra.mxu1 %v2242_v20  ;;  %1626 = vmatpush.bf16.msra.mxu0 %v2266_v7  ;;  %v721_v20 = vmax.f32 %v649_v34, 0.0  ;;  %v700_v0 = vadd.f32 %v2676_v44, %v606_v55  ;;  %v504_v43 = vunpack.c.h.bf16 %v2880_v33 }
  0x62   : > { %2308 = vmatpush.bf16.msra.mxu2 %v2266_v7  ;;  %v656_v3 = vadd.f32 %v2856_v8, %v562_v29  ;;  %v729_v23 = vmax.f32 %v657_v31, 0.0  ;;  %v650_v28 = vadd.f32 %v2931_v48, %v556_v46  ;;  %v713_v59 = vmax.f32 %v641_v52, 0.0  ;;  %v443_v31 = vld [vmem:[%s2448_s25 + $0x114] sm:$0xff] }
  0x63   : > { %v784_v6 = vpack.c.bf16 %v721_v20, %v712_v50  ;;  %v772_v15 = vmax.f32 %v700_v0, 0.0  ;;  %v497_v50 = vunpack.c.h.bf16 %v433_v13  ;;  %v581_v20 = vmul.f32 %v2826_v57, %v487_v14 }
  0x64   : > { %v722_v10 = vmax.f32 %v650_v28, 0.0  ;;  %v589_v0 = vmul.f32 %v2850_v5, %v495_v58  ;;  %v514_v18 = vunpack.c.l.bf16 %v443_v31  ;;  %v515_v45 = vunpack.c.h.bf16 %v443_v31 }
  0x65   : > { %1540 = vmatpush.bf16.msra.mxu1 %v2241_v54  ;;  %1627 = vmatpush.bf16.msra.mxu0 %v2265_v11  ;;  %v691_v54 = vadd.f32 %v2676_v44, %v597_v53  ;;  %v728_v44 = vmax.f32 %v656_v3, 0.0  ;;  %v582_v53 = vmul.f32 %v2842_v2, %v488_v63  ;;  %v675_v55 = vadd.f32 %v2847_v26, %v581_v20  ;;  %v429_v20 = vld [vmem:[%s2448_s25 + $0xb0] sm:$0xf] }
  0x66   : > { %2309 = vmatpush.bf16.msra.mxu2 %v2265_v11  ;;  %v683_v40 = vadd.f32 %v2856_v8, %v589_v0  ;;  %v513_v46 = vunpack.c.h.bf16 %v2885_v42  ;;  %v598_v52 = vmul.f32 %v2850_v5, %v504_v43 }
  0x67   : > { %v763_v7 = vmax.f32 %v691_v54, 0.0  ;;  %v424_v54 = vld [vmem:[%s2448_s25 + $0x8c] sm:$0xf]  ;;  %v747_v9 = vmax.f32 %v675_v55, 0.0 }
  0x68   : > { %v755_v61 = vmax.f32 %v683_v40, 0.0  ;;  %v692_v33 = vadd.f32 %v2856_v8, %v598_v52 }
  0x69   : > { %1541 = vmatpush.bf16.msra.mxu1 %v2240_v16  ;;  %1628 = vmatpush.bf16.msra.mxu0 %v2264_v56  ;;  %v667_v16 = vadd.f32 %v2868_v19, %v573_v17  ;;  %v808_v22 = vpack.c.bf16 %v772_v15, %v763_v7 }
  0x6a   : > { %2310 = vmatpush.bf16.msra.mxu2 %v2264_v56  ;;  %v486_v56 = vunpack.c.h.bf16 %v2808_v39 }
  0x6b   : > { %v739_v34 = vmax.f32 %v667_v16, 0.0 }
  0x6c   : > { %1436 = vmatmul.bf16.gmra.mxu1 %v2738_v41  ;;  %1523 = vmatmul.bf16.gmra.mxu0 %v799_v27  ;;  %v477_v41 = vunpack.c.h.bf16 %v2733_v36  ;;  %v666_v36 = vadd.f32 %v2847_v26, %v572_v60  ;;  %v676_v60 = vadd.f32 %v2868_v19, %v582_v53  ;;  %v580_v29 = vmul.f32 %v2850_v5, %v486_v56 }
  0x6d   : > { %v793_v27 = vpack.c.bf16 %v739_v34, %v730_v37 }
  0x6e   : > { %1600 = vmatmul.bf16.vlgmr.msrb.gmra.mxu3 %v784_v6  ;;  %v571_v1 = vmul.f32 %v2850_v5, %v477_v41  ;;  %v738_v24 = vmax.f32 %v666_v36, 0.0  ;;  %v419_v41 = vld [vmem:[%s2448_s25 + $0x68] sm:$0xf]  ;;  %v674_v39 = vadd.f32 %v2856_v8, %v580_v29  ;;  %v785_v36 = vpack.c.bf16 %v722_v10, %v713_v59 }
  0x6f   : > { %1571 = vmatmul.bf16.vlgmr.msrb.gmra.mxu2 %v783_v51  ;;  %v590_v51 = vmul.f32 %v2826_v57, %v496_v38  ;;  %v471_v3 = vunpack.c.l.bf16 %v419_v41  ;;  %v748_v7 = vmax.f32 %v676_v60, 0.0 }
  0x70   : > { %v665_v4 = vadd.f32 %v2856_v8, %v571_v1  ;;  %v792_v35 = vpack.c.bf16 %v738_v24, %v729_v23  ;;  %v438_v1 = vld [vmem:[%s2448_s25 + $0xf0] sm:$0xff]  ;;  %v746_v15 = vmax.f32 %v674_v39, 0.0 }
  0x71   : > { %v684_v6 = vadd.f32 %v2847_v26, %v590_v51  ;;  %v505_v12 = vunpack.c.l.bf16 %v438_v1  ;;  %v565_v23 = vmul.f32 %v2924_v30, %v471_v3  ;;  %v506_v13 = vunpack.c.h.bf16 %v438_v1  ;;  %v434_v51 = vld [vmem:[%s2448_s25 + $0xd4] sm:$0xf] }
  0x72   : > { %v737_v62 = vmax.f32 %v665_v4, 0.0  ;;  %v480_v4 = vunpack.c.l.bf16 %v424_v54  ;;  %v498_v56 = vunpack.c.l.bf16 %v434_v51 }
  0x73   : > { %v756_v17 = vmax.f32 %v684_v6, 0.0  ;;  %v599_v21 = vmul.f32 %v2826_v57, %v505_v12  ;;  %v659_v37 = vadd.f32 %v2931_v48, %v565_v23  ;;  %v489_v6 = vunpack.c.l.bf16 %v429_v20 }
  0x74   : > { %v2919_v11 = vpack.c.bf16 %v737_v62, %v728_v44  ;;  %v2954_v62 = vpack.c.bf16 %v755_v61, %v746_v15  ;;  %v574_v24 = vmul.f32 %v2924_v30, %v480_v4  ;;  %v592_v0 = vmul.f32 %v2924_v30, %v498_v56 }
  0x75   : > { %v801_v16 = vpack.c.bf16 %v756_v17, %v747_v9  ;;  %v693_v14 = vadd.f32 %v2847_v26, %v599_v21  ;;  %v583_v29 = vmul.f32 %v2924_v30, %v489_v6 }
  0x76   : > { %v668_v34 = vadd.f32 %v2931_v48, %v574_v24  ;;  %v686_v1 = vadd.f32 %v2931_v48, %v592_v0 }
  0x77   : > { %v765_v28 = vmax.f32 %v693_v14, 0.0  ;;  %v677_v17 = vadd.f32 %v2931_v48, %v583_v29 }
  0x78   : > { %v758_v40 = vmax.f32 %v686_v1, 0.0 }
  0x79   : > { %v749_v39 = vmax.f32 %v677_v17, 0.0 }
  0x7b   : > { %v803_v4 = vpack.c.bf16 %v758_v40, %v749_v39 }
  0x7c   : > { %1441 = vmatmul.bf16.gmra.mxu1 %v2817_v49  ;;  %1528 = vmatmul.bf16.gmra.mxu0 %v808_v22  ;;  %v591_v49 = vmul.f32 %v2842_v2, %v497_v50  ;;  %v608_v22 = vmul.f32 %v2826_v57, %v514_v18  ;;  %v731_v57 = vmax.f32 %v659_v37, 0.0 }
  0x7e   : > { %1605 = vmatmul.bf16.gmra.mxu3 %v793_v27  ;;  %v685_v32 = vadd.f32 %v2868_v19, %v591_v49  ;;  %v702_v38 = vadd.f32 %v2847_v26, %v608_v22  ;;  %v740_v27 = vmax.f32 %v668_v34, 0.0  ;;  %v439_v49 = vld [vmem:[%s2448_s25 + $0xf8] sm:$0xf]  ;;  %v444_v26 = vld [vmem:[%s2448_s25 + $0x11c] sm:$0xf]  ;;  %s1909_s25 = sshll.u32 %s3064_s27, 2 }
  0x7f   : > { %1576 = vmatmul.bf16.gmra.mxu2 %v792_v35  ;;  %v600_v35 = vmul.f32 %v2842_v2, %v506_v13  ;;  %v516_v41 = vunpack.c.l.bf16 %v444_v26  ;;  %s3018_s15 = scalar_lea.vmem %s3056_s4, %s1909_s25 }
  0x80   : > { %v757_v44 = vmax.f32 %v685_v32, 0.0  ;;  %v774_v53 = vmax.f32 %v702_v38, 0.0  ;;  %v794_v55 = vpack.c.bf16 %v740_v27, %v731_v57  ;;  %v507_v32 = vunpack.c.l.bf16 %v439_v49 }
  0x81   : > { %v694_v63 = vadd.f32 %v2868_v19, %v600_v35  ;;  %v610_v9 = vmul.f32 %v2924_v30, %v516_v41 }
  0x82   : > { %v802_v25 = vpack.c.bf16 %v757_v44, %v748_v7  ;;  %v810_v60 = vpack.c.bf16 %v774_v53, %v765_v28 }
  0x83   : > { %v766_v58 = vmax.f32 %v694_v63, 0.0 }
  0x8c   : > { %1542 = vmatmul.bf16.vlgmr.msra.gmra.mxu1 %v2889_v47  ;;  %1629 = vmatmul.bf16.vlgmr.msra.gmra.mxu0 %v785_v36  ;;  %v609_v47 = vmul.f32 %v2842_v2, %v515_v45  ;;  %v607_v2 = vmul.f32 %v2850_v5, %v513_v46 }
  0x8e   : > { %1610 = vmatmul.bf16.gmra.mxu3 %v802_v25  ;;  %v703_v50 = vadd.f32 %v2868_v19, %v609_v47  ;;  %v701_v42 = vadd.f32 %v2856_v8, %v607_v2  ;;  %v764_v19 = vmax.f32 %v692_v33, 0.0  ;;  %v601_v8 = vmul.f32 %v2924_v30, %v507_v32 }
  0x8f   : > { %1581 = vmatmul.bf16.gmra.mxu2 %v801_v16 }
  0x90   : > { %v775_v59 = vmax.f32 %v703_v50, 0.0  ;;  %v773_v10 = vmax.f32 %v701_v42, 0.0  ;;  %v695_v31 = vadd.f32 %v2931_v48, %v601_v8 }
  0x92   : > { %v809_v54 = vpack.c.bf16 %v773_v10, %v764_v19  ;;  %v811_v5 = vpack.c.bf16 %v775_v59, %v766_v58  ;;  %v767_v36 = vmax.f32 %v695_v31, 0.0 }
  0x9c   : > { %1547 = vmatmul.bf16.gmra.mxu1 %v2919_v11  ;;  %1634 = vmatmul.bf16.gmra.mxu0 %v794_v55  ;;  %v704_v11 = vadd.f32 %v2931_v48, %v610_v9 }
  0x9e   : > { %1615 = vmatmul.bf16.gmra.mxu3 %v811_v5  ;;  %v776_v3 = vmax.f32 %v704_v11, 0.0 }
  0x9f   : > { %1586 = vmatmul.bf16.gmra.mxu2 %v810_v60 }
  0xa0   : > { %v812_v15 = vpack.c.bf16 %v776_v3, %v767_v36 }
  0xa9   : > { %v1408_v7 = vpop.f32.mrf.mxu1  ;;  %v1398_v44 = vpop.f32.mrf.mxu0 }
  0xac   : > { %1552 = vmatmul.bf16.gmra.mxu1 %v2954_v62  ;;  %1639 = vmatmul.bf16.gmra.mxu0 %v803_v4 }
  0xaf   : > { %1644 = vmatmul.bf16.vlgmr.msra.gmra.mxu2 %v812_v15 }
  0xb1   : > { %v1410_v61 = vpop.f32.mrf.mxu1  ;;  %v1400_v16 = vpop.f32.mrf.mxu0 }
  0xb2   : > { %v1456_v30 = vpop.f32.mrf.mxu2  ;;  %v1485_v12 = vpop.f32.mrf.mxu3 }
  0xb9   : > { %v1413_v23 = vpop.f32.mrf.mxu1  ;;  %v1403_v24 = vpop.f32.mrf.mxu0 }
  0xba   : > { %v1458_v18 = vpop.f32.mrf.mxu2  ;;  %v2989_v48 = vpop.f32.mrf.mxu3 }
  0xbc   : > { %1557 = vmatmul.bf16.gmra.mxu1 %v809_v54 }
  0xc1   : > { %v1415_v13 = vpop.f32.mrf.mxu1  ;;  %v1405_v45 = vpop.f32.mrf.mxu0 }
  0xc2   : > { %v1461_v25 = vpop.f32.mrf.mxu2  ;;  %v1490_v21 = vpop.f32.mrf.mxu3 }
  0xc9   : > { %v1427_v37 = vpop.f32.mrf.mxu1  ;;  %v1514_v34 = vpop.f32.mrf.mxu0 }
  0xca   : > { %v1463_v22 = vpop.f32.mrf.mxu2  ;;  %v1428_v62 = vadd.f32 %v1427_v37, %v1398_v44  ;;  %v2991_v47 = vpop.f32.mrf.mxu3 }
  0xcc   : > { %v1457_v35 = vadd.f32 %v1456_v30, %v1428_v62 }
  0xce   : > { %v1486_v14 = vadd.f32 %v1485_v12, %v1457_v35 }
  0xd0   : > { %v1515_v38 = vadd.f32 %v1514_v34, %v1486_v14 }
  0xd1   : > { %v1429_v46 = vpop.f32.mrf.mxu1  ;;  %v1516_v57 = vpop.f32.mrf.mxu0 }
  0xd2   : > { %v1466_v43 = vpop.f32.mrf.mxu2  ;;  %v1430_v27 = vadd.f32 %v1429_v46, %v1400_v16  ;;  %v1495_v50 = vpop.f32.mrf.mxu3 }
  0xd4   : > { %v1459_v63 = vadd.f32 %v1458_v18, %v1430_v27 }
  0xd9   : > { %v1432_v51 = vpop.f32.mrf.mxu1  ;;  %v1519_v52 = vpop.f32.mrf.mxu0 }
  0xda   : > { %v1468_v20 = vpop.f32.mrf.mxu2  ;;  %v1433_v2 = vadd.f32 %v1432_v51, %v1403_v24  ;;  %v2993_v33 = vpop.f32.mrf.mxu3  ;;  %v1488_v24 = vadd.f32 %v2989_v48, %v1459_v63 }
  0xdc   : > { %v1462_v28 = vadd.f32 %v1461_v25, %v1433_v2 }
  0xde   : > { %v1491_v53 = vadd.f32 %v1490_v21, %v1462_v28 }
  0xe0   : > { %v1520_v49 = vadd.f32 %v1519_v52, %v1491_v53 }
  0xe1   : > { %v1434_v42 = vpop.f32.mrf.mxu1  ;;  %v1521_v55 = vpop.f32.mrf.mxu0 }
  0xe2   : > { %v1471_v26 = vpop.f32.mrf.mxu2  ;;  %v1435_v6 = vadd.f32 %v1434_v42, %v1405_v45  ;;  %v2995_v60 = vpop.f32.mrf.mxu3 }
  0xe4   : > { %v1464_v56 = vadd.f32 %v1463_v22, %v1435_v6 }
  0xe9   : > { %v1437_v59 = vpop.f32.mrf.mxu1  ;;  %v1524_v19 = vpop.f32.mrf.mxu0 }
  0xea   : > { %v1473_v58 = vpop.f32.mrf.mxu2  ;;  %v1438_v10 = vadd.f32 %v1437_v59, %v1408_v7  ;;  %v3003_v17 = vpop.f32.mrf.mxu3 }
  0xec   : > { %v1467_v32 = vadd.f32 %v1466_v43, %v1438_v10 }
  0xee   : > { %v1496_v41 = vadd.f32 %v1495_v50, %v1467_v32 }
  0xf0   : > { %v2997_v54 = vadd.f32 %v1524_v19, %v1496_v41 }
  0xf1   : > { %v1439_v29 = vpop.f32.mrf.mxu1  ;;  %v2999_v0 = vpop.f32.mrf.mxu0 }
  0xf2   : > { %v1572_v5 = vpop.f32.mrf.mxu2  ;;  %v1440_v8 = vadd.f32 %v1439_v29, %v1410_v61  ;;  %v1601_v36 = vpop.f32.mrf.mxu3 }
  0xf4   : > { %v3001_v9 = vadd.f32 %v1468_v20, %v1440_v8  ;;  %v1493_v20 = vadd.f32 %v2991_v47, %v1464_v56 }
  0xf9   : > { %v1442_v31 = vpop.f32.mrf.mxu1  ;;  %v3005_v11 = vpop.f32.mrf.mxu0 }
  0xfa   : > { %v1574_v1 = vpop.f32.mrf.mxu2  ;;  %v1443_v39 = vadd.f32 %v1442_v31, %v1413_v23  ;;  %v1603_v30 = vpop.f32.mrf.mxu3  ;;  %v1517_v23 = vadd.f32 %v1516_v57, %v1488_v24 }
  0xfc   : > { %v3007_v40 = vadd.f32 %v1471_v26, %v1443_v39  ;;  %v1522_v26 = vadd.f32 %v1521_v55, %v1493_v20 }
 0x101   : > { %v1444_v4 = vpop.f32.mrf.mxu1  ;;  %v3009_v7 = vpop.f32.mrf.mxu0 }
 0x102   : > { %v1577_v3 = vpop.f32.mrf.mxu2  ;;  %v1445_v44 = vadd.f32 %v1444_v4, %v1415_v13  ;;  %v1606_v34 = vpop.f32.mrf.mxu3 }
 0x104   : > { %v3011_v15 = vadd.f32 %v1473_v58, %v1445_v44 }
 0x109   : > { %v1543_v61 = vpop.f32.mrf.mxu1  ;;  %v1630_v16 = vpop.f32.mrf.mxu0 }
 0x10a   : > { %v1544_v12 = vadd.f32 %v1543_v61, %v1515_v38  ;;  %v1579_v18 = vpop.f32.mrf.mxu2  ;;  %v1608_v2 = vpop.f32.mrf.mxu3 }
 0x10c   : > { %v1573_v25 = vadd.f32 %v1572_v5, %v1544_v12 }
 0x10e   : > { %v1602_v45 = vadd.f32 %v1601_v36, %v1573_v25  ;;  %v1498_v36 = vadd.f32 %v2993_v33, %v3001_v9 }
 0x110   : > { %v1631_v35 = vadd.f32 %v1630_v16, %v1602_v45 }
 0x111   : > { %v1545_v21 = vpop.f32.mrf.mxu1  ;;  %v1632_v22 = vpop.f32.mrf.mxu0 }
 0x112   : > { %v1546_v37 = vadd.f32 %v1545_v21, %v1517_v23  ;;  %v1582_v13 = vpop.f32.mrf.mxu2  ;;  %v1680_v46 = vmul.f32 %v1631_v35, %v1631_v35 }
 0x114   : > { %v1575_v62 = vadd.f32 %v1574_v1, %v1546_v37 }
 0x116   : > { %v1604_v14 = vadd.f32 %v1603_v30, %v1575_v62  ;;  %v1527_v30 = vadd.f32 %v2999_v0, %v1498_v36 }
 0x118   : > { %v1633_v43 = vadd.f32 %v1632_v22, %v1604_v14 }
 0x119   : > { %v1548_v48 = vpop.f32.mrf.mxu1  ;;  %v1635_v38 = vpop.f32.mrf.mxu0 }
 0x11a   : > { %v2275_v57 = vpack.c.bf16 %v1633_v43, %v1631_v35  ;;  %v1666_v27 = vadd.f32 %v1633_v43, %v1631_v35  ;;  %v1681_v63 = vmul.f32 %v1633_v43, %v1633_v43  ;;  %v1549_v50 = vadd.f32 %v1548_v48, %v1520_v49  ;;  %v1584_v53 = vpop.f32.mrf.mxu2  ;;  %v1611_v49 = vpop.f32.mrf.mxu3 }
 0x11b   : > { %v1503_v43 = vadd.f32 %v3003_v17, %v3011_v15 }
 0x11c   : > { %2276 = vst [vmem:[%s3018_s15] sm:$0xff] %v2275_v57   ;;  %v1688_v51 = vadd.f32 %v1681_v63, %v1680_v46  ;;  %v1578_v52 = vadd.f32 %v1577_v3, %v1549_v50 }
 0x11e   : > { %v1607_v28 = vadd.f32 %v1606_v34, %v1578_v52 }
 0x120   : > { %v1636_v42 = vadd.f32 %v1635_v38, %v1607_v28  ;;  %v1532_v38 = vadd.f32 %v3009_v7, %v1503_v43 }
 0x121   : > { %v1550_v6 = vpop.f32.mrf.mxu1  ;;  %v1637_v58 = vpop.f32.mrf.mxu0 }
 0x122   : > { %v1667_v59 = vadd.f32 %v1666_v27, %v1636_v42  ;;  %v1682_v19 = vmul.f32 %v1636_v42, %v1636_v42  ;;  %v1551_v10 = vadd.f32 %v1550_v6, %v1522_v26  ;;  %v1587_v47 = vpop.f32.mrf.mxu2  ;;  %v1613_v16 = vpop.f32.mrf.mxu3 }
 0x124   : > { %v1689_v32 = vadd.f32 %v1688_v51, %v1682_v19  ;;  %v1580_v41 = vadd.f32 %v1579_v18, %v1551_v10 }
 0x126   : > { %v1609_v5 = vadd.f32 %v1608_v2, %v1580_v41 }
 0x128   : > { %v1638_v29 = vadd.f32 %v1637_v58, %v1609_v5 }
 0x129   : > { %v1553_v56 = vpop.f32.mrf.mxu1  ;;  %v1640_v55 = vpop.f32.mrf.mxu0 }
 0x12a   : > { %v2280_v8 = vpack.c.bf16 %v1638_v29, %v1636_v42  ;;  %v1668_v1 = vadd.f32 %v1667_v59, %v1638_v29  ;;  %v1683_v31 = vmul.f32 %v1638_v29, %v1638_v29  ;;  %v1554_v39 = vadd.f32 %v1553_v56, %v2997_v54  ;;  %v1589_v23 = vpop.f32.mrf.mxu2  ;;  %v1616_v14 = vpop.f32.mrf.mxu3 }
 0x12b   : > { %v1501_v54 = vadd.f32 %v2995_v60, %v3007_v40 }
 0x12c   : > { %2292 = vst [vmem:[%s3018_s15 + $0x8] sm:$0xff] %v2280_v8   ;;  %v1690_v3 = vadd.f32 %v1689_v32, %v1683_v31  ;;  %v1583_v4 = vadd.f32 %v1582_v13, %v1554_v39 }
 0x12d   : > { %v1530_v22 = vadd.f32 %v3005_v11, %v1501_v54 }
 0x12e   : > { %v1612_v44 = vadd.f32 %v1611_v49, %v1583_v4 }
 0x130   : > { %v1641_v61 = vadd.f32 %v1640_v55, %v1612_v44 }
 0x131   : > { %v1555_v12 = vpop.f32.mrf.mxu1  ;;  %v1642_v33 = vpop.f32.mrf.mxu0 }
 0x132   : > { %v1669_v18 = vadd.f32 %v1668_v1, %v1641_v61  ;;  %v1684_v24 = vmul.f32 %v1641_v61, %v1641_v61  ;;  %v1556_v25 = vadd.f32 %v1555_v12, %v1527_v30  ;;  %v1645_v60 = vpop.f32.mrf.mxu2  ;;  %v1618_v52 = vpop.f32.mrf.mxu3 }
 0x134   : > { %v1691_v45 = vadd.f32 %v1690_v3, %v1684_v24  ;;  %v1585_v21 = vadd.f32 %v1584_v53, %v1556_v25 }
 0x136   : > { %v1614_v9 = vadd.f32 %v1613_v16, %v1585_v21 }
 0x138   : > { %v1643_v37 = vadd.f32 %v1642_v33, %v1614_v9 }
 0x139   : > { %v1558_v34 = vpop.f32.mrf.mxu1 }
 0x13a   : > { %v2285_v0 = vpack.c.bf16 %v1643_v37, %v1641_v61  ;;  %v1670_v62 = vadd.f32 %v1669_v18, %v1643_v37  ;;  %v1685_v35 = vmul.f32 %v1643_v37, %v1643_v37  ;;  %v1559_v13 = vadd.f32 %v1558_v34, %v1530_v22  ;;  %v1647_v17 = vpop.f32.mrf.mxu2 }
 0x13c   : > { %2293 = vst [vmem:[%s3018_s15 + $0x10] sm:$0xff] %v2285_v0   ;;  %v1692_v46 = vadd.f32 %v1691_v45, %v1685_v35  ;;  %v1588_v48 = vadd.f32 %v1587_v47, %v1559_v13 }
 0x13e   : > { %v1617_v40 = vadd.f32 %v1616_v14, %v1588_v48 }
 0x140   : > { %v1646_v57 = vadd.f32 %v1645_v60, %v1617_v40 }
 0x141   : > { %v1560_v11 = vpop.f32.mrf.mxu1 }
 0x142   : > { %v1671_v27 = vadd.f32 %v1670_v62, %v1646_v57  ;;  %v1686_v63 = vmul.f32 %v1646_v57, %v1646_v57  ;;  %v1561_v50 = vadd.f32 %v1560_v11, %v1532_v38 }
 0x144   : > { %v1693_v20 = vadd.f32 %v1692_v46, %v1686_v63  ;;  %v1590_v51 = vadd.f32 %v1589_v23, %v1561_v50 }
 0x146   : > { %v1619_v2 = vadd.f32 %v1618_v52, %v1590_v51 }
 0x148   : > { %v1648_v15 = vadd.f32 %v1647_v17, %v1619_v2 }
 0x14a   : > { %v2290_v28 = vpack.c.bf16 %v1648_v15, %v1646_v57  ;;  %v1672_v53 = vadd.f32 %v1671_v27, %v1648_v15  ;;  %v1687_v26 = vmul.f32 %v1648_v15, %v1648_v15 }
 0x14c   : > { %2294 = vst [vmem:[%s3018_s15 + $0x18] sm:$0xff] %v2290_v28   ;;  %v1673_v42 = vrot.slane %v1672_v53, 4  ;;  %v1694_v6 = vadd.f32 %v1693_v20, %v1687_v26 }
 0x14e   : > { %v1674_v7 = vadd.f32 %v1673_v42, %v1672_v53  ;;  %v1695_v58 = vrot.slane %v1694_v6, 4 }
 0x150   : > { %v1675_v59 = vrot.slane %v1674_v7, 2  ;;  %v1696_v19 = vadd.f32 %v1695_v58, %v1694_v6 }
 0x152   : > { %v1676_v10 = vadd.f32 %v1675_v59, %v1674_v7  ;;  %v1697_v32 = vrot.slane %v1696_v19, 2 }
 0x154   : > { %v1677_v41 = vrot.slane %v1676_v10, 1  ;;  %v1698_v5 = vadd.f32 %v1697_v32, %v1696_v19 }
 0x156   : > { %v1678_v49 = vadd.f32 %v1677_v41, %v1676_v10  ;;  %v1699_v29 = vrot.slane %v1698_v5, 1 }
 0x158   : > { %1679 = vst [vmem:[%s398_s17] sm:$0x1] %v1678_v49  ;;  %v1700_v47 = vadd.f32 %v1699_v29, %v1698_v5 }
 0x15a   : > { %1701 = vst [vmem:[%s404_s20] sm:$0x1] %v1700_v47 }
 0x15b PF: > { %s17_s23 = sadd.s32 1, %s2360_s23   ;;  %s3059_s21 = smov %s2356_s22 }
 0x15c   : > { %p14_p6 = scmp.ge.s32.totalorder %s17_s23, 4   ;;  %s3060_s22 = smov %s3062_s24 }
 0x15e   :  { %16 = sbr.rel (!%p14_p6) target bundleno = 2 (0x2), region = 99 }

// kernel: fwd.13
= control target key start
LH: loop header
LB: loop body
LE: loop exit
PB: predicated region body
PF: predicated region fallthrough
CT: control target
= control target key end

     0   :  { %s753_s21 = smov 0   ;;  %s1052_s0 = inlined_call_operand.vmem [shape: f32[128,512], index: 0, kind: input, shape index: {}]   ;;  %s1053_s1 = inlined_call_operand.vmem [shape: f32[1,512], index: 1, kind: input, shape index: {}]   ;;  %s1054_s2 = inlined_call_operand.vmem [shape: f32[1,512], index: 2, kind: input, shape index: {}]   ;;  %s1055_s3 = inlined_call_operand.vmem [shape: f32[128,512], index: 3, kind: input, shape index: {}]   ;;  %s1056_s4 = inlined_call_operand.vmem [shape: f32[1,512], index: 4, kind: input, shape index: {}]   ;;  %s1057_s5 = inlined_call_operand.vmem [shape: f32[1,512], index: 5, kind: input, shape index: {}]   ;;  %s1058_s6 = inlined_call_operand.vmem [shape: f32[128,512], index: 6, kind: output, shape index: {}]  }
   0x1 LB: > { %s683_s22 = sadd.s32 4294967295, %s716_s21   ;;  %p687_p0 = scmp.ge.s32.totalorder %s716_s21, 1  ;;  %s716_s21 = sphi %s753_s21, %s16_s21  }
   0x2   : > { %p226_p1 = scmp.lt.s32.totalorder %s716_s21, 3 }
   0x4   : > { %p227_p2 = pnand %p687_p0, %p226_p1 }
   0x5   : > { %s688_s23 = sshll.u32 (!%p227_p2), %s683_s22, 3 }
   0x6   : > { %230 = sbr.rel (%p227_p2) target bundleno = 70 (0x46), region = 44  ;;  %p265_p3 = scmp.lt.s32.totalorder (!%p227_p2), %s688_s23, 15 }
   0xb   : > { %v317_v0 = vld [vmem:[%s1053_s1] sm:$0xf]  ;;  %s1060_s23 = smov (!%p265_p3, %s688_s23), 15 }
   0xc   : > { %v433_v1 = vld [vmem:[%s1056_s4] sm:$0xf]  ;;  %v773_v4 = vperm.slane %v317_v0, 0  ;;  %v777_v6 = vperm.slane %v317_v0, 1  ;;  %s779_s8 = sshll.u32 %s1060_s23, 5  ;;  %v785_v9 = vperm.slane %v317_v0, 2 }
   0xd   : > { %v359_v2 = vld [vmem:[%s1054_s2] sm:$0xf]  ;;  %v775_v5 = vperm.slane %v433_v1, 0  ;;  %v783_v8 = vperm.slane %v433_v1, 1  ;;  %v787_v10 = vperm.slane %v433_v1, 2  ;;  %s793_s11 = scalar_lea.vmem %s1052_s0, %s779_s8  ;;  %s799_s14 = scalar_lea.vmem %s1055_s3, %s779_s8  ;;  %v807_v14 = vperm.slane %v317_v0, 3 }
   0xe   : > { %v475_v3 = vld [vmem:[%s1057_s5] sm:$0xf]  ;;  %v781_v7 = vperm.slane %v359_v2, 0  ;;  %v803_v12 = vperm.slane %v359_v2, 1  ;;  %v286_v17 = vld [vmem:[%s793_s11 + $0x8] sm:$0xff]  ;;  %v812_v18 = vperm.slane %v359_v2, 2  ;;  %s852_s17 = scalar_lea.vmem %s1058_s6, %s779_s8 }
   0xf   : > { %v801_v11 = vperm.slane %v475_v3, 0  ;;  %v805_v13 = vperm.slane %v475_v3, 1  ;;  %v285_v15 = vld [vmem:[%s793_s11] sm:$0xff]  ;;  %v814_v19 = vperm.slane %v475_v3, 2  ;;  %v816_v20 = vperm.slane %v433_v1, 3  ;;  %v402_v24 = vld [vmem:[%s799_s14 + $0x8] sm:$0xff] }
  0x10   : > { %v401_v16 = vld [vmem:[%s799_s14] sm:$0xff]  ;;  %v327_v21 = vmul.f32 %v773_v4, %v285_v15  ;;  %v328_v23 = vmul.f32 %v777_v6, %v286_v17  ;;  %v287_v25 = vld [vmem:[%s793_s11 + $0x10] sm:$0xff]  ;;  %v824_v27 = vperm.slane %v359_v2, 3  ;;  %v444_v28 = vmul.f32 %v783_v8, %v402_v24  ;;  %v288_v31 = vld [vmem:[%s793_s11 + $0x18] sm:$0xff] }
  0x11   : > { %v443_v22 = vmul.f32 %v775_v5, %v401_v16  ;;  %v403_v26 = vld [vmem:[%s799_s14 + $0x10] sm:$0xff]  ;;  %v329_v29 = vmul.f32 %v785_v9, %v287_v25  ;;  %v404_v32 = vld [vmem:[%s799_s14 + $0x18] sm:$0xff]  ;;  %v831_v33 = vperm.slane %v475_v3, 3  ;;  %v289_v34 = vld [vmem:[%s793_s11 + $0x20] sm:$0xff]  ;;  %v330_v38 = vmul.f32 %v807_v14, %v288_v31 }
  0x12   : > { %v445_v30 = vmul.f32 %v787_v10, %v403_v26  ;;  %v369_v35 = vadd.f32 %v781_v7, %v327_v21  ;;  %v370_v37 = vadd.f32 %v803_v12, %v328_v23  ;;  %v405_v39 = vld [vmem:[%s799_s14 + $0x20] sm:$0xff]  ;;  %v290_v40 = vld [vmem:[%s793_s11 + $0x28] sm:$0xff]  ;;  %v486_v41 = vadd.f32 %v805_v13, %v444_v28  ;;  %v291_v54 = vld [vmem:[%s793_s11 + $0x30] sm:$0xff] }
  0x13   : > { %v485_v36 = vadd.f32 %v801_v11, %v443_v22  ;;  %v371_v42 = vadd.f32 %v812_v18, %v329_v29  ;;  %v446_v44 = vmul.f32 %v816_v20, %v404_v32  ;;  %v406_v45 = vld [vmem:[%s799_s14 + $0x28] sm:$0xff]  ;;  %v372_v47 = vadd.f32 %v824_v27, %v330_v38  ;;  %v407_v55 = vld [vmem:[%s799_s14 + $0x30] sm:$0xff]  ;;  %v292_v60 = vld [vmem:[%s793_s11 + $0x38] sm:$0xff] }
  0x14   : > { %v487_v43 = vadd.f32 %v814_v19, %v445_v30  ;;  %v331_v48 = vmul.f32 %v773_v4, %v289_v34  ;;  %v447_v49 = vmul.f32 %v775_v5, %v405_v39  ;;  %v518_v50 = vadd.f32 %v486_v41, %v370_v37  ;;  %v408_v61 = vld [vmem:[%s799_s14 + $0x38] sm:$0xff]  ;;  %v293_v62 = vld [vmem:[%s793_s11 + $0x40] sm:$0xff]  ;;  %v294_v26 = vld [vmem:[%s793_s11 + $0x48] sm:$0xff] }
  0x15   : > { %v517_v46 = vadd.f32 %v485_v36, %v369_v35  ;;  %v488_v52 = vadd.f32 %v831_v33, %v446_v44  ;;  %v332_v53 = vmul.f32 %v777_v6, %v290_v40  ;;  %v448_v59 = vmul.f32 %v783_v8, %v406_v45  ;;  %v409_v21 = vld [vmem:[%s799_s14 + $0x40] sm:$0xff]  ;;  %v410_v28 = vld [vmem:[%s799_s14 + $0x48] sm:$0xff]  ;;  %v295_v34 = vld [vmem:[%s793_s11 + $0x50] sm:$0xff] }
  0x16   : > { %v519_v51 = vadd.f32 %v487_v43, %v371_v42  ;;  %v373_v57 = vadd.f32 %v781_v7, %v331_v48  ;;  %v489_v58 = vadd.f32 %v801_v11, %v447_v49  ;;  %v550_v63 = vmax.f32 %v518_v50, 0.0  ;;  %v411_v35 = vld [vmem:[%s799_s14 + $0x50] sm:$0xff]  ;;  %v296_v40 = vld [vmem:[%s793_s11 + $0x58] sm:$0xff]  ;;  %v297_v50 = vld [vmem:[%s793_s11 + $0x60] sm:$0xff] }
  0x17   : > { %v549_v56 = vmax.f32 %v517_v46, 0.0  ;;  %v520_v1 = vadd.f32 %v488_v52, %v372_v47  ;;  %v374_v2 = vadd.f32 %v803_v12, %v332_v53  ;;  %v490_v15 = vadd.f32 %v805_v13, %v448_v59  ;;  %v412_v49 = vld [vmem:[%s799_s14 + $0x58] sm:$0xff] }
  0x18   : > { %v551_v0 = vmax.f32 %v519_v51, 0.0  ;;  %v521_v3 = vadd.f32 %v489_v58, %v373_v57  ;;  %v333_v16 = vmul.f32 %v785_v9, %v291_v54  ;;  %v449_v17 = vmul.f32 %v787_v10, %v407_v55  ;;  %582 = vst [vmem:[%s852_s17 + $0x8] sm:$0xff] %v550_v63  ;;  %v413_v55 = vld [vmem:[%s799_s14 + $0x60] sm:$0xff] }
  0x19   : > { %581 = vst [vmem:[%s852_s17] sm:$0xff] %v549_v56  ;;  %v552_v22 = vmax.f32 %v520_v1, 0.0  ;;  %v334_v23 = vmul.f32 %v807_v14, %v292_v60  ;;  %v450_v24 = vmul.f32 %v816_v20, %v408_v61  ;;  %v335_v25 = vmul.f32 %v773_v4, %v293_v62  ;;  %v298_v56 = vld [vmem:[%s793_s11 + $0x68] sm:$0xff] }
  0x1a   : > { %583 = vst [vmem:[%s852_s17 + $0x10] sm:$0xff] %v551_v0  ;;  %v553_v29 = vmax.f32 %v521_v3, 0.0  ;;  %v522_v30 = vadd.f32 %v490_v15, %v374_v2  ;;  %v375_v31 = vadd.f32 %v812_v18, %v333_v16  ;;  %v491_v32 = vadd.f32 %v814_v19, %v449_v17  ;;  %v414_v61 = vld [vmem:[%s799_s14 + $0x68] sm:$0xff]  ;;  %v299_v2 = vld [vmem:[%s793_s11 + $0x70] sm:$0xff] }
  0x1b   : > { %584 = vst [vmem:[%s852_s17 + $0x18] sm:$0xff] %v552_v22  ;;  %v376_v36 = vadd.f32 %v824_v27, %v334_v23  ;;  %v492_v37 = vadd.f32 %v831_v33, %v450_v24  ;;  %v377_v38 = vadd.f32 %v781_v7, %v335_v25  ;;  %v451_v39 = vmul.f32 %v775_v5, %v409_v21  ;;  %v415_v21 = vld [vmem:[%s799_s14 + $0x70] sm:$0xff]  ;;  %v300_v22 = vld [vmem:[%s793_s11 + $0x78] sm:$0xff] }
  0x1c   : > { %585 = vst [vmem:[%s852_s17 + $0x20] sm:$0xff] %v553_v29  ;;  %v554_v41 = vmax.f32 %v522_v30, 0.0  ;;  %v523_v42 = vadd.f32 %v491_v32, %v375_v31  ;;  %v336_v43 = vmul.f32 %v777_v6, %v294_v26  ;;  %v452_v44 = vmul.f32 %v783_v8, %v410_v28  ;;  %v416_v28 = vld [vmem:[%s799_s14 + $0x78] sm:$0xff]  ;;  %v301_v29 = vld [vmem:[%s793_s11 + $0x80] sm:$0xff] }
  0x1d   : > { %v524_v45 = vadd.f32 %v492_v37, %v376_v36  ;;  %v493_v46 = vadd.f32 %v801_v11, %v451_v39  ;;  %v337_v47 = vmul.f32 %v785_v9, %v295_v34  ;;  %v453_v48 = vmul.f32 %v787_v10, %v411_v35  ;;  %v417_v39 = vld [vmem:[%s799_s14 + $0x80] sm:$0xff] }
  0x1e   : > { %586 = vst [vmem:[%s852_s17 + $0x28] sm:$0xff] %v554_v41  ;;  %v555_v51 = vmax.f32 %v523_v42, 0.0  ;;  %v378_v52 = vadd.f32 %v803_v12, %v336_v43  ;;  %v494_v53 = vadd.f32 %v805_v13, %v452_v44  ;;  %v338_v54 = vmul.f32 %v807_v14, %v296_v40  ;;  %v302_v44 = vld [vmem:[%s793_s11 + $0x88] sm:$0xff] }
  0x1f   : > { %v556_v57 = vmax.f32 %v524_v45, 0.0  ;;  %v525_v58 = vadd.f32 %v493_v46, %v377_v38  ;;  %v379_v59 = vadd.f32 %v812_v18, %v337_v47  ;;  %v495_v60 = vadd.f32 %v814_v19, %v453_v48  ;;  %v418_v45 = vld [vmem:[%s799_s14 + $0x88] sm:$0xff] }
  0x20   : > { %587 = vst [vmem:[%s852_s17 + $0x30] sm:$0xff] %v555_v51  ;;  %v526_v62 = vadd.f32 %v494_v53, %v378_v52  ;;  %v380_v63 = vadd.f32 %v824_v27, %v338_v54  ;;  %v454_v0 = vmul.f32 %v816_v20, %v412_v49  ;;  %v339_v1 = vmul.f32 %v773_v4, %v297_v50  ;;  %v303_v50 = vld [vmem:[%s793_s11 + $0x90] sm:$0xff] }
  0x21   : > { %588 = vst [vmem:[%s852_s17 + $0x38] sm:$0xff] %v556_v57  ;;  %v557_v3 = vmax.f32 %v525_v58, 0.0  ;;  %v527_v15 = vadd.f32 %v495_v60, %v379_v59  ;;  %v455_v16 = vmul.f32 %v775_v5, %v413_v55  ;;  %v340_v17 = vmul.f32 %v777_v6, %v298_v56  ;;  %v419_v51 = vld [vmem:[%s799_s14 + $0x90] sm:$0xff]  ;;  %v304_v56 = vld [vmem:[%s793_s11 + $0x98] sm:$0xff] }
  0x22   : > { %v558_v23 = vmax.f32 %v526_v62, 0.0  ;;  %v496_v24 = vadd.f32 %v831_v33, %v454_v0  ;;  %v381_v25 = vadd.f32 %v781_v7, %v339_v1  ;;  %v456_v26 = vmul.f32 %v783_v8, %v414_v61  ;;  %v420_v1 = vld [vmem:[%s799_s14 + $0x98] sm:$0xff] }
  0x23   : > { %589 = vst [vmem:[%s852_s17 + $0x40] sm:$0xff] %v557_v3  ;;  %v559_v30 = vmax.f32 %v527_v15, 0.0  ;;  %v497_v31 = vadd.f32 %v801_v11, %v455_v16  ;;  %v382_v32 = vadd.f32 %v803_v12, %v340_v17  ;;  %v341_v34 = vmul.f32 %v785_v9, %v299_v2  ;;  %v305_v2 = vld [vmem:[%s793_s11 + $0xa0] sm:$0xff] }
  0x24   : > { %590 = vst [vmem:[%s852_s17 + $0x48] sm:$0xff] %v558_v23  ;;  %v528_v35 = vadd.f32 %v496_v24, %v380_v63  ;;  %v498_v36 = vadd.f32 %v805_v13, %v456_v26  ;;  %v457_v37 = vmul.f32 %v787_v10, %v415_v21  ;;  %v342_v38 = vmul.f32 %v807_v14, %v300_v22  ;;  %v421_v21 = vld [vmem:[%s799_s14 + $0xa0] sm:$0xff]  ;;  %v306_v22 = vld [vmem:[%s793_s11 + $0xa8] sm:$0xff] }
  0x25   : > { %591 = vst [vmem:[%s852_s17 + $0x50] sm:$0xff] %v559_v30  ;;  %v529_v40 = vadd.f32 %v497_v31, %v381_v25  ;;  %v383_v41 = vadd.f32 %v812_v18, %v341_v34  ;;  %v458_v42 = vmul.f32 %v816_v20, %v416_v28  ;;  %v343_v43 = vmul.f32 %v773_v4, %v301_v29  ;;  %v422_v28 = vld [vmem:[%s799_s14 + $0xa8] sm:$0xff]  ;;  %v307_v34 = vld [vmem:[%s793_s11 + $0xb0] sm:$0xff] }
  0x26   : > { %v560_v46 = vmax.f32 %v528_v35, 0.0  ;;  %v530_v47 = vadd.f32 %v498_v36, %v382_v32  ;;  %v499_v48 = vadd.f32 %v814_v19, %v457_v37  ;;  %v384_v49 = vadd.f32 %v824_v27, %v342_v38 }
  0x27   : > { %v561_v52 = vmax.f32 %v529_v40, 0.0  ;;  %v500_v53 = vadd.f32 %v831_v33, %v458_v42  ;;  %v385_v54 = vadd.f32 %v781_v7, %v343_v43  ;;  %v459_v55 = vmul.f32 %v775_v5, %v417_v39  ;;  %v423_v39 = vld [vmem:[%s799_s14 + $0xb0] sm:$0xff]  ;;  %v308_v40 = vld [vmem:[%s793_s11 + $0xb8] sm:$0xff] }
  0x28   : > { %592 = vst [vmem:[%s852_s17 + $0x58] sm:$0xff] %v560_v46  ;;  %v562_v57 = vmax.f32 %v530_v47, 0.0  ;;  %v531_v58 = vadd.f32 %v499_v48, %v383_v41  ;;  %v344_v59 = vmul.f32 %v777_v6, %v302_v44  ;;  %v460_v60 = vmul.f32 %v783_v8, %v418_v45  ;;  %v424_v45 = vld [vmem:[%s799_s14 + $0xb8] sm:$0xff]  ;;  %v309_v46 = vld [vmem:[%s793_s11 + $0xc0] sm:$0xff] }
  0x29   : > { %593 = vst [vmem:[%s852_s17 + $0x60] sm:$0xff] %v561_v52  ;;  %v532_v61 = vadd.f32 %v500_v53, %v384_v49  ;;  %v501_v62 = vadd.f32 %v801_v11, %v459_v55  ;;  %v345_v63 = vmul.f32 %v785_v9, %v303_v50  ;;  %v461_v0 = vmul.f32 %v787_v10, %v419_v51  ;;  %v425_v55 = vld [vmem:[%s799_s14 + $0xc0] sm:$0xff] }
  0x2a   : > { %594 = vst [vmem:[%s852_s17 + $0x68] sm:$0xff] %v562_v57  ;;  %v563_v3 = vmax.f32 %v531_v58, 0.0  ;;  %v386_v15 = vadd.f32 %v803_v12, %v344_v59  ;;  %v502_v16 = vadd.f32 %v805_v13, %v460_v60  ;;  %v346_v17 = vmul.f32 %v807_v14, %v304_v56  ;;  %v310_v60 = vld [vmem:[%s793_s11 + $0xc8] sm:$0xff] }
  0x2b   : > { %v564_v23 = vmax.f32 %v532_v61, 0.0  ;;  %v533_v24 = vadd.f32 %v501_v62, %v385_v54  ;;  %v387_v25 = vadd.f32 %v812_v18, %v345_v63  ;;  %v503_v26 = vadd.f32 %v814_v19, %v461_v0  ;;  %v426_v61 = vld [vmem:[%s799_s14 + $0xc8] sm:$0xff] }
  0x2c   : > { %595 = vst [vmem:[%s852_s17 + $0x70] sm:$0xff] %v563_v3  ;;  %v534_v29 = vadd.f32 %v502_v16, %v386_v15  ;;  %v388_v30 = vadd.f32 %v824_v27, %v346_v17  ;;  %v462_v31 = vmul.f32 %v816_v20, %v420_v1  ;;  %v347_v32 = vmul.f32 %v773_v4, %v305_v2  ;;  %v311_v2 = vld [vmem:[%s793_s11 + $0xd0] sm:$0xff] }
  0x2d   : > { %596 = vst [vmem:[%s852_s17 + $0x78] sm:$0xff] %v564_v23  ;;  %v565_v35 = vmax.f32 %v533_v24, 0.0  ;;  %v535_v36 = vadd.f32 %v503_v26, %v387_v25  ;;  %v463_v37 = vmul.f32 %v775_v5, %v421_v21  ;;  %v348_v38 = vmul.f32 %v777_v6, %v306_v22  ;;  %v427_v3 = vld [vmem:[%s799_s14 + $0xd0] sm:$0xff]  ;;  %v312_v22 = vld [vmem:[%s793_s11 + $0xd8] sm:$0xff] }
  0x2e   : > { %v566_v41 = vmax.f32 %v534_v29, 0.0  ;;  %v504_v42 = vadd.f32 %v831_v33, %v462_v31  ;;  %v389_v43 = vadd.f32 %v781_v7, %v347_v32  ;;  %v464_v44 = vmul.f32 %v783_v8, %v422_v28  ;;  %v428_v32 = vld [vmem:[%s799_s14 + $0xd8] sm:$0xff] }
  0x2f   : > { %597 = vst [vmem:[%s852_s17 + $0x80] sm:$0xff] %v565_v35  ;;  %v567_v47 = vmax.f32 %v535_v36, 0.0  ;;  %v505_v48 = vadd.f32 %v801_v11, %v463_v37  ;;  %v390_v49 = vadd.f32 %v803_v12, %v348_v38  ;;  %v349_v50 = vmul.f32 %v785_v9, %v307_v34  ;;  %v313_v34 = vld [vmem:[%s793_s11 + $0xe0] sm:$0xff] }
  0x30   : > { %598 = vst [vmem:[%s852_s17 + $0x88] sm:$0xff] %v566_v41  ;;  %v536_v51 = vadd.f32 %v504_v42, %v388_v30  ;;  %v506_v52 = vadd.f32 %v805_v13, %v464_v44  ;;  %v465_v53 = vmul.f32 %v787_v10, %v423_v39  ;;  %v350_v54 = vmul.f32 %v807_v14, %v308_v40  ;;  %v429_v39 = vld [vmem:[%s799_s14 + $0xe0] sm:$0xff]  ;;  %v314_v40 = vld [vmem:[%s793_s11 + $0xe8] sm:$0xff] }
  0x31   : > { %599 = vst [vmem:[%s852_s17 + $0x90] sm:$0xff] %v567_v47  ;;  %v537_v56 = vadd.f32 %v505_v48, %v389_v43  ;;  %v391_v57 = vadd.f32 %v812_v18, %v349_v50  ;;  %v466_v58 = vmul.f32 %v816_v20, %v424_v45  ;;  %v351_v59 = vmul.f32 %v773_v4, %v309_v46  ;;  %v430_v45 = vld [vmem:[%s799_s14 + $0xe8] sm:$0xff]  ;;  %v315_v50 = vld [vmem:[%s793_s11 + $0xf0] sm:$0xff] }
  0x32   : > { %v568_v62 = vmax.f32 %v536_v51, 0.0  ;;  %v538_v63 = vadd.f32 %v506_v52, %v390_v49  ;;  %v507_v0 = vadd.f32 %v814_v19, %v465_v53  ;;  %v392_v1 = vadd.f32 %v824_v27, %v350_v54 }
  0x33   : > { %v569_v15 = vmax.f32 %v537_v56, 0.0  ;;  %v508_v16 = vadd.f32 %v831_v33, %v466_v58  ;;  %v393_v17 = vadd.f32 %v781_v7, %v351_v59  ;;  %v467_v21 = vmul.f32 %v775_v5, %v425_v55  ;;  %v431_v55 = vld [vmem:[%s799_s14 + $0xf0] sm:$0xff]  ;;  %v316_v56 = vld [vmem:[%s793_s11 + $0xf8] sm:$0xff] }
  0x34   : > { %600 = vst [vmem:[%s852_s17 + $0x98] sm:$0xff] %v568_v62  ;;  %v570_v23 = vmax.f32 %v538_v63, 0.0  ;;  %v539_v24 = vadd.f32 %v507_v0, %v391_v57  ;;  %v352_v25 = vmul.f32 %v777_v6, %v310_v60  ;;  %v468_v26 = vmul.f32 %v783_v8, %v426_v61 }
  0x35   : > { %601 = vst [vmem:[%s852_s17 + $0xa0] sm:$0xff] %v569_v15  ;;  %v540_v28 = vadd.f32 %v508_v16, %v392_v1  ;;  %v509_v29 = vadd.f32 %v801_v11, %v467_v21  ;;  %v353_v30 = vmul.f32 %v785_v9, %v311_v2  ;;  %v469_v31 = vmul.f32 %v787_v10, %v427_v3 }
  0x36   : > { %602 = vst [vmem:[%s852_s17 + $0xa8] sm:$0xff] %v570_v23  ;;  %v571_v35 = vmax.f32 %v539_v24, 0.0  ;;  %v394_v36 = vadd.f32 %v803_v12, %v352_v25  ;;  %v510_v37 = vadd.f32 %v805_v13, %v468_v26  ;;  %v354_v38 = vmul.f32 %v807_v14, %v312_v22 }
  0x37   : > { %v572_v41 = vmax.f32 %v540_v28, 0.0  ;;  %v541_v42 = vadd.f32 %v509_v29, %v393_v17  ;;  %v395_v43 = vadd.f32 %v812_v18, %v353_v30  ;;  %v511_v44 = vadd.f32 %v814_v19, %v469_v31 }
  0x38   : > { %603 = vst [vmem:[%s852_s17 + $0xb0] sm:$0xff] %v571_v35  ;;  %v542_v46 = vadd.f32 %v510_v37, %v394_v36  ;;  %v396_v47 = vadd.f32 %v824_v27, %v354_v38  ;;  %v470_v48 = vmul.f32 %v816_v20, %v428_v32  ;;  %v355_v49 = vmul.f32 %v773_v4, %v313_v34  ;;  %v432_v4 = vld [vmem:[%s799_s14 + $0xf8] sm:$0xff] }
  0x39   : > { %604 = vst [vmem:[%s852_s17 + $0xb8] sm:$0xff] %v572_v41  ;;  %v573_v51 = vmax.f32 %v541_v42, 0.0  ;;  %v543_v52 = vadd.f32 %v511_v44, %v395_v43  ;;  %v471_v53 = vmul.f32 %v775_v5, %v429_v39  ;;  %v356_v54 = vmul.f32 %v777_v6, %v314_v40 }
  0x3a   : > { %v574_v57 = vmax.f32 %v542_v46, 0.0  ;;  %v512_v58 = vadd.f32 %v831_v33, %v470_v48  ;;  %v397_v59 = vadd.f32 %v781_v7, %v355_v49  ;;  %v472_v60 = vmul.f32 %v783_v8, %v430_v45 }
  0x3b   : > { %605 = vst [vmem:[%s852_s17 + $0xc0] sm:$0xff] %v573_v51  ;;  %v575_v61 = vmax.f32 %v543_v52, 0.0  ;;  %v513_v62 = vadd.f32 %v801_v11, %v471_v53  ;;  %v398_v63 = vadd.f32 %v803_v12, %v356_v54  ;;  %v357_v5 = vmul.f32 %v785_v9, %v315_v50 }
  0x3c   : > { %606 = vst [vmem:[%s852_s17 + $0xc8] sm:$0xff] %v574_v57  ;;  %v544_v6 = vadd.f32 %v512_v58, %v396_v47  ;;  %v514_v0 = vadd.f32 %v805_v13, %v472_v60  ;;  %v473_v1 = vmul.f32 %v787_v10, %v431_v55  ;;  %v358_v7 = vmul.f32 %v807_v14, %v316_v56 }
  0x3d   : > { %607 = vst [vmem:[%s852_s17 + $0xd0] sm:$0xff] %v575_v61  ;;  %v545_v8 = vadd.f32 %v513_v62, %v397_v59  ;;  %v399_v2 = vadd.f32 %v812_v18, %v357_v5  ;;  %v474_v11 = vmul.f32 %v816_v20, %v432_v4 }
  0x3e   : > { %v576_v9 = vmax.f32 %v544_v6, 0.0  ;;  %v546_v12 = vadd.f32 %v514_v0, %v398_v63  ;;  %v515_v3 = vadd.f32 %v814_v19, %v473_v1  ;;  %v400_v13 = vadd.f32 %v824_v27, %v358_v7 }
  0x3f   : > { %v577_v15 = vmax.f32 %v545_v8, 0.0  ;;  %v516_v10 = vadd.f32 %v831_v33, %v474_v11 }
  0x40   : > { %608 = vst [vmem:[%s852_s17 + $0xd8] sm:$0xff] %v576_v9  ;;  %v578_v14 = vmax.f32 %v546_v12, 0.0  ;;  %v547_v16 = vadd.f32 %v515_v3, %v399_v2 }
  0x41   : > { %609 = vst [vmem:[%s852_s17 + $0xe0] sm:$0xff] %v577_v15  ;;  %v548_v17 = vadd.f32 %v516_v10, %v400_v13 }
  0x42   : > { %610 = vst [vmem:[%s852_s17 + $0xe8] sm:$0xff] %v578_v14  ;;  %v579_v18 = vmax.f32 %v547_v16, 0.0 }
  0x43   : > { %v580_v21 = vmax.f32 %v548_v17, 0.0 }
  0x44   : > { %611 = vst [vmem:[%s852_s17 + $0xf0] sm:$0xff] %v579_v18 }
  0x45   : > { %612 = vst [vmem:[%s852_s17 + $0xf8] sm:$0xff] %v580_v21 }
  0x46 PF: > { %s16_s21 = sadd.s32 1, %s716_s21  }
  0x47   : > { %p13_p4 = scmp.ge.s32.totalorder %s16_s21, 4  }
  0x49   :  { %15 = sbr.rel (!%p13_p4) target bundleno = 1 (0x1), region = 77 }

// kernel: fwd.12
= control target key start
LH: loop header
LB: loop body
LE: loop exit
PB: predicated region body
PF: predicated region fallthrough
CT: control target
= control target key end

     0   :  { %s1980_s21 = smov 0   ;;  %s1982_s22 = smov 0   ;;  %s2506_s0 = inlined_call_operand.vmem [shape: bf16[128,256], index: 0, kind: input, shape index: {}]   ;;  %s2507_s1 = inlined_call_operand.vmem [shape: bf16[256,512], index: 1, kind: input, shape index: {}]   ;;  %s2508_s2 = inlined_call_operand.vmem [shape: f32[1,256], index: 2, kind: input, shape index: {}]   ;;  %s2509_s3 = inlined_call_operand.vmem [shape: f32[1,256], index: 3, kind: input, shape index: {}]   ;;  %s2510_s4 = inlined_call_operand.vmem [shape: f32[128,512], index: 4, kind: output, shape index: {0}]   ;;  %s2511_s5 = inlined_call_operand.vmem [shape: f32[2,1,512], index: 5, kind: output, shape index: {1}]   ;;  %s2512_s6 = inlined_call_operand.vmem [shape: f32[2,1,512], index: 6, kind: output, shape index: {2}]  }
   0x1   :  { %s1984_s23 = smov 0  }
   0x2 LB: > { %s36_s2 = sadd.s32 1, %s1939_s22  ;;  %p1524_p0 = scmp.ge.s32.totalorder %s1943_s23, 1  ;;  %s1943_s23 = sphi %s1984_s23, %s17_s23   ;;  %s1939_s22 = sphi %s1982_s22, %s2514_s22   ;;  %s1935_s21 = sphi %s1980_s21, %s2513_s21  }
   0x3   : > { %p38_p1 = scmp.ge.s32.totalorder %s36_s2, 2  ;;  %p290_p2 = scmp.lt.s32.totalorder %s1943_s23, 3 }
   0x5   : > { %s2516_s2 = smov (%p38_p1, %s36_s2), 0  ;;  %p291_p3 = pnand %p1524_p0, %p290_p2 }
   0x6   : > { %s1525_s19 = sshll.u32 (!%p291_p3), %s1935_s21, 3  ;;  %p411_p5 = scmp.lt.s32.totalorder (!%p291_p3), %s1935_s21, 1 }
   0x7   : > { %294 = sbr.rel (%p291_p3) target bundleno = 323 (0x143), region = 36  ;;  %p366_p4 = scmp.lt.s32.totalorder (!%p291_p3), %s1525_s19, 15 }
   0xc   : > { %v1679_v0 = vld [vmem:[%s2507_s1 + $0xe0] sm:$0xf]  ;;  %v1863_v1 = vld [vmem:[%s2507_s1 + $0xec] sm:$0xf0]  ;;  %v1861_v5 = vld [vmem:[%s2507_s1 + $0xe4] sm:$0xf] }
   0xd   : > { %v1807_v2 = vld [vmem:[%s2507_s1 + $0x1e0] sm:$0xf]  ;;  %v1680_v3 = vor.u32 %v1863_v1, %v1679_v0  ;;  %v1895_v4 = vld [vmem:[%s2507_s1 + $0x1ec] sm:$0xf0]  ;;  %v1681_v6 = vld [vmem:[%s2507_s1 + $0xf0] sm:$0xf0] }
   0xe   : > { %v1808_v7 = vor.u32 %v1895_v4, %v1807_v2  ;;  %v1684_v8 = vor.u32 %v1861_v5, %v1681_v6  ;;  %v1893_v9 = vld [vmem:[%s2507_s1 + $0x1e4] sm:$0xf]  ;;  %v1809_v10 = vld [vmem:[%s2507_s1 + $0x1f0] sm:$0xf0]  ;;  %v1663_v11 = vld [vmem:[%s2507_s1 + $0xc0] sm:$0xf] }
   0xf   : > { %860 = vmatpush.bf16.msra.mxu0 %v1680_v3  ;;  %v1812_v12 = vor.u32 %v1893_v9, %v1809_v10  ;;  %v1859_v13 = vld [vmem:[%s2507_s1 + $0xcc] sm:$0xf0]  ;;  %v1791_v14 = vld [vmem:[%s2507_s1 + $0x1c0] sm:$0xf]  ;;  %v1857_v18 = vld [vmem:[%s2507_s1 + $0xc4] sm:$0xf] }
  0x10   : > { %v1891_v15 = vld [vmem:[%s2507_s1 + $0x1cc] sm:$0xf0]  ;;  %889 = vmatpush.bf16.msra.mxu1 %v1808_v7  ;;  %918 = vmatpush.bf16.msra.mxu2 %v1684_v8  ;;  %v1664_v16 = vor.u32 %v1859_v13, %v1663_v11  ;;  %v1665_v19 = vld [vmem:[%s2507_s1 + $0xd0] sm:$0xf0]  ;;  %v1889_v20 = vld [vmem:[%s2507_s1 + $0x1c4] sm:$0xf] }
  0x11   : > { %v1792_v17 = vor.u32 %v1891_v15, %v1791_v14  ;;  %947 = vmatpush.bf16.msra.mxu3 %v1812_v12  ;;  %v1668_v21 = vor.u32 %v1857_v18, %v1665_v19  ;;  %v1793_v22 = vld [vmem:[%s2507_s1 + $0x1d0] sm:$0xf0]  ;;  %v1647_v23 = vld [vmem:[%s2507_s1 + $0xa0] sm:$0xf]  ;;  %v1855_v24 = vld [vmem:[%s2507_s1 + $0xac] sm:$0xf0] }
  0x12   : > { %v1796_v25 = vor.u32 %v1889_v20, %v1793_v22  ;;  %v1775_v26 = vld [vmem:[%s2507_s1 + $0x1a0] sm:$0xf]  ;;  %v1887_v27 = vld [vmem:[%s2507_s1 + $0x1ac] sm:$0xf0]  ;;  %v1853_v28 = vld [vmem:[%s2507_s1 + $0xa4] sm:$0xf]  ;;  %v1648_v29 = vor.u32 %v1855_v24, %v1647_v23 }
  0x13   : > { %861 = vmatpush.bf16.msra.mxu0 %v1664_v16  ;;  %v1649_v30 = vld [vmem:[%s2507_s1 + $0xb0] sm:$0xf0]  ;;  %v1885_v31 = vld [vmem:[%s2507_s1 + $0x1a4] sm:$0xf]  ;;  %v1776_v33 = vor.u32 %v1887_v27, %v1775_v26  ;;  %v1631_v35 = vld [vmem:[%s2507_s1 + $0x80] sm:$0xf] }
  0x14   : > { %v1777_v32 = vld [vmem:[%s2507_s1 + $0x1b0] sm:$0xf0]  ;;  %890 = vmatpush.bf16.msra.mxu1 %v1792_v17  ;;  %919 = vmatpush.bf16.msra.mxu2 %v1668_v21  ;;  %v1652_v34 = vor.u32 %v1853_v28, %v1649_v30  ;;  %v1851_v36 = vld [vmem:[%s2507_s1 + $0x8c] sm:$0xf0]  ;;  %v1759_v37 = vld [vmem:[%s2507_s1 + $0x180] sm:$0xf] }
  0x15   : > { %948 = vmatpush.bf16.msra.mxu3 %v1796_v25  ;;  %v1780_v38 = vor.u32 %v1885_v31, %v1777_v32  ;;  %v1883_v39 = vld [vmem:[%s2507_s1 + $0x18c] sm:$0xf0]  ;;  %v1849_v40 = vld [vmem:[%s2507_s1 + $0x84] sm:$0xf]  ;;  %v1633_v41 = vld [vmem:[%s2507_s1 + $0x90] sm:$0xf0]  ;;  %v1632_v44 = vor.u32 %v1851_v36, %v1631_v35 }
  0x16   : > { %v1881_v42 = vld [vmem:[%s2507_s1 + $0x184] sm:$0xf]  ;;  %v1761_v43 = vld [vmem:[%s2507_s1 + $0x190] sm:$0xf0]  ;;  %v1760_v45 = vor.u32 %v1883_v39, %v1759_v37  ;;  %v1636_v46 = vor.u32 %v1849_v40, %v1633_v41  ;;  %v1615_v47 = vld [vmem:[%s2507_s1 + $0x60] sm:$0xf] }
  0x17   : > { %862 = vmatpush.bf16.msra.mxu0 %v1648_v29  ;;  %v1847_v48 = vld [vmem:[%s2507_s1 + $0x6c] sm:$0xf0]  ;;  %v1743_v49 = vld [vmem:[%s2507_s1 + $0x160] sm:$0xf]  ;;  %v1764_v50 = vor.u32 %v1881_v42, %v1761_v43  ;;  %v1845_v52 = vld [vmem:[%s2507_s1 + $0x64] sm:$0xf] }
  0x18   : > { %891 = vmatpush.bf16.msra.mxu1 %v1776_v33  ;;  %920 = vmatpush.bf16.msra.mxu2 %v1652_v34  ;;  %v1879_v51 = vld [vmem:[%s2507_s1 + $0x16c] sm:$0xf0]  ;;  %v1617_v53 = vld [vmem:[%s2507_s1 + $0x70] sm:$0xf0]  ;;  %v1877_v54 = vld [vmem:[%s2507_s1 + $0x164] sm:$0xf]  ;;  %v1616_v56 = vor.u32 %v1847_v48, %v1615_v47 }
  0x19   : > { %949 = vmatpush.bf16.msra.mxu3 %v1780_v38  ;;  %v1745_v55 = vld [vmem:[%s2507_s1 + $0x170] sm:$0xf0]  ;;  %v1744_v57 = vor.u32 %v1879_v51, %v1743_v49  ;;  %v1620_v58 = vor.u32 %v1845_v52, %v1617_v53  ;;  %v1599_v59 = vld [vmem:[%s2507_s1 + $0x40] sm:$0xf]  ;;  %v1843_v60 = vld [vmem:[%s2507_s1 + $0x4c] sm:$0xf0] }
  0x1a   : > { %v1727_v61 = vld [vmem:[%s2507_s1 + $0x140] sm:$0xf]  ;;  %v1748_v62 = vor.u32 %v1877_v54, %v1745_v55  ;;  %v1875_v63 = vld [vmem:[%s2507_s1 + $0x14c] sm:$0xf0]  ;;  %v1841_v0 = vld [vmem:[%s2507_s1 + $0x44] sm:$0xf]  ;;  %v1600_v4 = vor.u32 %v1843_v60, %v1599_v59 }
  0x1b   : > { %863 = vmatpush.bf16.msra.mxu0 %v1632_v44  ;;  %v1601_v1 = vld [vmem:[%s2507_s1 + $0x50] sm:$0xf0]  ;;  %v1873_v2 = vld [vmem:[%s2507_s1 + $0x144] sm:$0xf]  ;;  %v1583_v5 = vld [vmem:[%s2507_s1 + $0x20] sm:$0xf]  ;;  %v1728_v6 = vor.u32 %v1875_v63, %v1727_v61 }
  0x1c   : > { %892 = vmatpush.bf16.msra.mxu1 %v1760_v45  ;;  %921 = vmatpush.bf16.msra.mxu2 %v1636_v46  ;;  %v1729_v3 = vld [vmem:[%s2507_s1 + $0x150] sm:$0xf0]  ;;  %v1604_v7 = vor.u32 %v1841_v0, %v1601_v1  ;;  %v1839_v8 = vld [vmem:[%s2507_s1 + $0x2c] sm:$0xf0]  ;;  %v1711_v9 = vld [vmem:[%s2507_s1 + $0x120] sm:$0xf] }
  0x1d   : > { %950 = vmatpush.bf16.msra.mxu3 %v1764_v50  ;;  %v1871_v10 = vld [vmem:[%s2507_s1 + $0x12c] sm:$0xf0]  ;;  %v1732_v11 = vor.u32 %v1873_v2, %v1729_v3  ;;  %v1837_v12 = vld [vmem:[%s2507_s1 + $0x24] sm:$0xf]  ;;  %v1585_v13 = vld [vmem:[%s2507_s1 + $0x30] sm:$0xf0]  ;;  %v1584_v16 = vor.u32 %v1839_v8, %v1583_v5 }
  0x1e   : > { %v1869_v14 = vld [vmem:[%s2507_s1 + $0x124] sm:$0xf]  ;;  %v1713_v15 = vld [vmem:[%s2507_s1 + $0x130] sm:$0xf0]  ;;  %v1567_v17 = vld [vmem:[%s2507_s1] sm:$0xf]  ;;  %v1712_v20 = vor.u32 %v1871_v10, %v1711_v9  ;;  %v1588_v21 = vor.u32 %v1837_v12, %v1585_v13 }
  0x1f   : > { %864 = vmatpush.bf16.msra.mxu0 %v1616_v56  ;;  %v1835_v18 = vld [vmem:[%s2507_s1 + $0xc] sm:$0xf0]  ;;  %v1695_v19 = vld [vmem:[%s2507_s1 + $0x100] sm:$0xf]  ;;  %v1833_v23 = vld [vmem:[%s2507_s1 + $0x4] sm:$0xf]  ;;  %v1716_v24 = vor.u32 %v1869_v14, %v1713_v15 }
  0x20   : > { %893 = vmatpush.bf16.msra.mxu1 %v1744_v57  ;;  %922 = vmatpush.bf16.msra.mxu2 %v1620_v58  ;;  %v1867_v22 = vld [vmem:[%s2507_s1 + $0x10c] sm:$0xf0]  ;;  %s2518_s19 = smov (!%p366_p4, %s1525_s19), 15  ;;  %v1569_v25 = vld [vmem:[%s2507_s1 + $0x10] sm:$0xf0]  ;;  %v1568_v30 = vor.u32 %v1835_v18, %v1567_v17  ;;  %vm1183_vm0 = vcmask 1040384  }
  0x21   : > { %951 = vmatpush.bf16.msra.mxu3 %v1748_v62  ;;  %v1865_v26 = vld [vmem:[%s2507_s1 + $0x104] sm:$0xf]  ;;  %v1697_v27 = vld [vmem:[%s2507_s1 + $0x110] sm:$0xf0]  ;;  %s1823_s18 = sshll.u32 %s2518_s19, 3  ;;  %v1696_v34 = vor.u32 %v1867_v22, %v1695_v19  ;;  %v1572_v35 = vor.u32 %v1833_v23, %v1569_v25  ;;  %s2520_s21 = smov (!%p411_p5, %s1935_s21), 1 }
  0x22   : > { %v1862_v28 = vld [vmem:[%s2507_s1 + $0xec] sm:$0xf]  ;;  %v1689_v29 = vld [vmem:[%s2507_s1 + $0xf8] sm:$0xf0]  ;;  %s2205_s28 = scalar_lea.vmem %s2506_s0, %s1823_s18  ;;  %v1687_v33 = vld [vmem:[%s2507_s1 + $0xe8] sm:$0xf]  ;;  %v1700_v39 = vor.u32 %v1865_v26, %v1697_v27 }
  0x23   : > { %865 = vmatpush.bf16.msra.mxu0 %v1600_v4  ;;  %v1894_v31 = vld [vmem:[%s2507_s1 + $0x1ec] sm:$0xf]  ;;  %v1817_v32 = vld [vmem:[%s2507_s1 + $0x1f8] sm:$0xf0]  ;;  %v1535_v36 = vld [vmem:[%s2205_s28] sm:$0xf]  ;;  %v1692_v41 = vor.u32 %v1862_v28, %v1689_v29 }
  0x24   : > { %894 = vmatpush.bf16.msra.mxu1 %v1728_v6  ;;  %923 = vmatpush.bf16.msra.mxu2 %v1604_v7  ;;  %v1826_v37 = vld [vmem:[%s2205_s28 + $0x4] sm:$0xf0]  ;;  %v1825_v38 = vld [vmem:[%s2205_s28 + $0x4] sm:$0xf]  ;;  %v1537_v40 = vld [vmem:[%s2205_s28 + $0x8] sm:$0xf0]  ;;  %v1820_v45 = vor.u32 %v1894_v31, %v1817_v32 }
  0x25   : > { %952 = vmatpush.bf16.msra.mxu3 %v1732_v11  ;;  %v1864_v42 = vld [vmem:[%s2507_s1 + $0xf4] sm:$0xf0]  ;;  %v1815_v43 = vld [vmem:[%s2507_s1 + $0x1e8] sm:$0xf]  ;;  %v2226_v44 = vor.u32 %v1826_v37, %v1535_v36  ;;  %v1858_v47 = vld [vmem:[%s2507_s1 + $0xcc] sm:$0xf]  ;;  %v2237_v49 = vor.u32 %v1825_v38, %v1537_v40 }
  0x26   : > { %v1896_v46 = vld [vmem:[%s2507_s1 + $0x1f4] sm:$0xf0]  ;;  %v1673_v48 = vld [vmem:[%s2507_s1 + $0xd8] sm:$0xf0]  ;;  %v1890_v50 = vld [vmem:[%s2507_s1 + $0x1cc] sm:$0xf]  ;;  %v1688_v52 = vor.u32 %v1864_v42, %v1687_v33 }
  0x27   : > { %866 = vmatpush.bf16.msra.mxu0 %v1584_v16  ;;  %v1801_v51 = vld [vmem:[%s2507_s1 + $0x1d8] sm:$0xf0]  ;;  %v1816_v53 = vor.u32 %v1896_v46, %v1815_v43  ;;  %v1676_v54 = vor.u32 %v1858_v47, %v1673_v48  ;;  %v1671_v55 = vld [vmem:[%s2507_s1 + $0xc8] sm:$0xf]  ;;  %v1860_v56 = vld [vmem:[%s2507_s1 + $0xd4] sm:$0xf0] }
  0x28   : > { %895 = vmatpush.bf16.msra.mxu1 %v1712_v20  ;;  %924 = vmatpush.bf16.msra.mxu2 %v1588_v21  ;;  %v1799_v57 = vld [vmem:[%s2507_s1 + $0x1c8] sm:$0xf]  ;;  %v1804_v58 = vor.u32 %v1890_v50, %v1801_v51  ;;  %v1892_v59 = vld [vmem:[%s2507_s1 + $0x1d4] sm:$0xf0]  ;;  %v1854_v60 = vld [vmem:[%s2507_s1 + $0xac] sm:$0xf]  ;;  %v1672_v0 = vor.u32 %v1860_v56, %v1671_v55 }
  0x29   : > { %953 = vmatpush.bf16.msra.mxu3 %v1716_v24  ;;  %v1657_v61 = vld [vmem:[%s2507_s1 + $0xb8] sm:$0xf0]  ;;  %v1886_v62 = vld [vmem:[%s2507_s1 + $0x1ac] sm:$0xf]  ;;  %v1800_v1 = vor.u32 %v1892_v59, %v1799_v57  ;;  %v1655_v3 = vld [vmem:[%s2507_s1 + $0xa8] sm:$0xf] }
  0x2a   : > { %v1785_v63 = vld [vmem:[%s2507_s1 + $0x1b8] sm:$0xf0]  ;;  %v1660_v2 = vor.u32 %v1854_v60, %v1657_v61  ;;  %v1856_v4 = vld [vmem:[%s2507_s1 + $0xb4] sm:$0xf0]  ;;  %v1783_v5 = vld [vmem:[%s2507_s1 + $0x1a8] sm:$0xf] }
  0x2b   : > { %867 = vmatpush.bf16.msra.mxu0 %v1568_v30  ;;  %v1788_v6 = vor.u32 %v1886_v62, %v1785_v63  ;;  %v1888_v7 = vld [vmem:[%s2507_s1 + $0x1b4] sm:$0xf0]  ;;  %v1850_v8 = vld [vmem:[%s2507_s1 + $0x8c] sm:$0xf]  ;;  %v1641_v9 = vld [vmem:[%s2507_s1 + $0x98] sm:$0xf0]  ;;  %v1656_v12 = vor.u32 %v1856_v4, %v1655_v3 }
  0x2c   : > { %896 = vmatpush.bf16.msra.mxu1 %v1696_v34  ;;  %925 = vmatpush.bf16.msra.mxu2 %v1572_v35  ;;  %v1882_v10 = vld [vmem:[%s2507_s1 + $0x18c] sm:$0xf]  ;;  %v1769_v11 = vld [vmem:[%s2507_s1 + $0x198] sm:$0xf0]  ;;  %v1543_v13 = vld [vmem:[%s2205_s28 + $0x10] sm:$0xf]  ;;  %v1784_v14 = vor.u32 %v1888_v7, %v1783_v5  ;;  %v1644_v15 = vor.u32 %v1850_v8, %v1641_v9 }
  0x2d   : > { %954 = vmatpush.bf16.msra.mxu3 %v1700_v39  ;;  %v1639_v16 = vld [vmem:[%s2507_s1 + $0x88] sm:$0xf]  ;;  %v1852_v17 = vld [vmem:[%s2507_s1 + $0x94] sm:$0xf0]  ;;  %v1772_v19 = vor.u32 %v1882_v10, %v1769_v11  ;;  %v1846_v21 = vld [vmem:[%s2507_s1 + $0x6c] sm:$0xf] }
  0x2e   : > { %868 = vmatmul.bf16.vlgmr.msra.gmra.mxu0 %v2226_v44  ;;  %v1767_v18 = vld [vmem:[%s2507_s1 + $0x188] sm:$0xf]  ;;  %v1884_v20 = vld [vmem:[%s2507_s1 + $0x194] sm:$0xf0]  ;;  %v1625_v22 = vld [vmem:[%s2507_s1 + $0x78] sm:$0xf0]  ;;  %v1640_v28 = vor.u32 %v1852_v17, %v1639_v16 }
  0x2f   : > { %897 = vmatmul.bf16.vlgmr.msra.gmra.mxu1 %v2237_v49  ;;  %926 = vmatmul.bf16.vlgmr.msra.gmra.mxu2 %v2226_v44  ;;  %v1828_v23 = vld [vmem:[%s2205_s28 + $0x14] sm:$0xf0]  ;;  %v1878_v24 = vld [vmem:[%s2507_s1 + $0x16c] sm:$0xf]  ;;  %v1753_v25 = vld [vmem:[%s2507_s1 + $0x178] sm:$0xf0]  ;;  %v1768_v29 = vor.u32 %v1884_v20, %v1767_v18  ;;  %v1628_v30 = vor.u32 %v1846_v21, %v1625_v22 }
  0x30   : > { %1034 = vmatpush.bf16.msrb.mxu2 %v1692_v41  ;;  %955 = vmatmul.bf16.vlgmr.msra.gmra.mxu3 %v2237_v49  ;;  %v1827_v26 = vld [vmem:[%s2205_s28 + $0x14] sm:$0xf]  ;;  %v1545_v27 = vld [vmem:[%s2205_s28 + $0x18] sm:$0xf0]  ;;  %v1623_v31 = vld [vmem:[%s2507_s1 + $0x68] sm:$0xf]  ;;  %v2334_v34 = vor.u32 %v1828_v23, %v1543_v13  ;;  %v1756_v35 = vor.u32 %v1878_v24, %v1753_v25 }
  0x31   : > { %1063 = vmatpush.bf16.msrb.mxu3 %v1820_v45  ;;  %976 = vmatpush.bf16.msrb.mxu0 %v1688_v52  ;;  %v1848_v32 = vld [vmem:[%s2507_s1 + $0x74] sm:$0xf0]  ;;  %v1751_v33 = vld [vmem:[%s2507_s1 + $0x168] sm:$0xf]  ;;  %v1842_v37 = vld [vmem:[%s2507_s1 + $0x4c] sm:$0xf]  ;;  %v2345_v39 = vor.u32 %v1827_v26, %v1545_v27 }
  0x32   : > { %1005 = vmatpush.bf16.msrb.mxu1 %v1816_v53  ;;  %v1880_v36 = vld [vmem:[%s2507_s1 + $0x174] sm:$0xf0]  ;;  %v1609_v38 = vld [vmem:[%s2507_s1 + $0x58] sm:$0xf0]  ;;  %v1874_v40 = vld [vmem:[%s2507_s1 + $0x14c] sm:$0xf]  ;;  %v1624_v42 = vor.u32 %v1848_v32, %v1623_v31 }
  0x33   : > { %v1737_v41 = vld [vmem:[%s2507_s1 + $0x158] sm:$0xf0]  ;;  %v1752_v43 = vor.u32 %v1880_v36, %v1751_v33  ;;  %v1612_v45 = vor.u32 %v1842_v37, %v1609_v38  ;;  %v1607_v46 = vld [vmem:[%s2507_s1 + $0x48] sm:$0xf]  ;;  %v1844_v47 = vld [vmem:[%s2507_s1 + $0x54] sm:$0xf0] }
  0x34   : > { %1035 = vmatpush.bf16.msrb.mxu2 %v1676_v54  ;;  %v1740_v48 = vor.u32 %v1874_v40, %v1737_v41  ;;  %v1735_v50 = vld [vmem:[%s2507_s1 + $0x148] sm:$0xf]  ;;  %v1876_v51 = vld [vmem:[%s2507_s1 + $0x154] sm:$0xf0]  ;;  %v1608_v52 = vor.u32 %v1844_v47, %v1607_v46  ;;  %v1838_v53 = vld [vmem:[%s2507_s1 + $0x2c] sm:$0xf] }
  0x35   : > { %1064 = vmatpush.bf16.msrb.mxu3 %v1804_v58  ;;  %977 = vmatpush.bf16.msrb.mxu0 %v1672_v0  ;;  %v1593_v54 = vld [vmem:[%s2507_s1 + $0x38] sm:$0xf0]  ;;  %v1870_v55 = vld [vmem:[%s2507_s1 + $0x12c] sm:$0xf]  ;;  %v1736_v56 = vor.u32 %v1876_v51, %v1735_v50  ;;  %v1591_v59 = vld [vmem:[%s2507_s1 + $0x28] sm:$0xf] }
  0x36   : > { %1006 = vmatpush.bf16.msrb.mxu1 %v1800_v1  ;;  %v1596_v57 = vor.u32 %v1838_v53, %v1593_v54  ;;  %v1721_v58 = vld [vmem:[%s2507_s1 + $0x138] sm:$0xf0]  ;;  %v1840_v60 = vld [vmem:[%s2507_s1 + $0x34] sm:$0xf0]  ;;  %v1719_v62 = vld [vmem:[%s2507_s1 + $0x128] sm:$0xf] }
  0x37   : > { %v1724_v61 = vor.u32 %v1870_v55, %v1721_v58  ;;  %v1872_v63 = vld [vmem:[%s2507_s1 + $0x134] sm:$0xf0]  ;;  %v1834_v0 = vld [vmem:[%s2507_s1 + $0xc] sm:$0xf]  ;;  %v1577_v1 = vld [vmem:[%s2507_s1 + $0x18] sm:$0xf0]  ;;  %v1592_v4 = vor.u32 %v1840_v60, %v1591_v59 }
  0x38   : > { %1036 = vmatpush.bf16.msrb.mxu2 %v1660_v2  ;;  %v1866_v2 = vld [vmem:[%s2507_s1 + $0x10c] sm:$0xf]  ;;  %v1705_v3 = vld [vmem:[%s2507_s1 + $0x118] sm:$0xf0]  ;;  %v1720_v5 = vor.u32 %v1872_v63, %v1719_v62  ;;  %v1575_v7 = vld [vmem:[%s2507_s1 + $0x8] sm:$0xf] }
  0x39   : > { %1065 = vmatpush.bf16.msrb.mxu3 %v1788_v6  ;;  %978 = vmatpush.bf16.msrb.mxu0 %v1656_v12  ;;  %v1580_v6 = vor.u32 %v1834_v0, %v1577_v1  ;;  %v1836_v8 = vld [vmem:[%s2507_s1 + $0x14] sm:$0xf0]  ;;  %v1708_v9 = vor.u32 %v1866_v2, %v1705_v3  ;;  %v1703_v10 = vld [vmem:[%s2507_s1 + $0x108] sm:$0xf]  ;;  %v1551_v12 = vld [vmem:[%s2205_s28 + $0x20] sm:$0xf] }
  0x3a   : > { %1007 = vmatpush.bf16.msrb.mxu1 %v1784_v14  ;;  %v1868_v11 = vld [vmem:[%s2507_s1 + $0x114] sm:$0xf0]  ;;  %v1830_v13 = vld [vmem:[%s2205_s28 + $0x24] sm:$0xf0]  ;;  %v1829_v14 = vld [vmem:[%s2205_s28 + $0x24] sm:$0xf]  ;;  %v1576_v16 = vor.u32 %v1836_v8, %v1575_v7 }
  0x3b   : > { %v1704_v17 = vor.u32 %v1868_v11, %v1703_v10  ;;  %v1552_v18 = vor.u32 %v1830_v13, %v1551_v12  ;;  %v1559_v20 = vld [vmem:[%s2205_s28 + $0x30] sm:$0xf]  ;;  %v1832_v21 = vld [vmem:[%s2205_s28 + $0x34] sm:$0xf0]  ;;  %v1831_v22 = vld [vmem:[%s2205_s28 + $0x34] sm:$0xf] }
  0x3c   : > { %1037 = vmatpush.bf16.msrb.mxu2 %v1644_v15  ;;  %v1553_v15 = vld [vmem:[%s2205_s28 + $0x28] sm:$0xf0]  ;;  %v1561_v23 = vld [vmem:[%s2205_s28 + $0x38] sm:$0xf0]  ;;  %v1560_v24 = vor.u32 %v1832_v21, %v1559_v20  ;;  %s1824_s28 = sshll.u32 %s2518_s19, 5  ;;  %s1531_s19 = sshll.u32 %s2520_s21, 2 }
  0x3d   : > { %1066 = vmatpush.bf16.msrb.mxu3 %v1772_v19  ;;  %979 = vmatpush.bf16.msrb.mxu0 %v1640_v28  ;;  %v1556_v19 = vor.u32 %v1829_v14, %v1553_v15  ;;  %v1564_v25 = vor.u32 %v1831_v22, %v1561_v23  ;;  %s2437_s11 = scalar_lea.vmem %s2510_s4, %s1824_s28  ;;  %vm1185_vm1 = vcmask 1042434   ;;  %vm1187_vm2 = vcmask 1041408   ;;  %s417_s14 = scalar_lea.vmem %s2511_s5, %s1531_s19 }
  0x3e   : > { %1008 = vmatpush.bf16.msrb.mxu1 %v1768_v29  ;;  %873 = vmatmul.bf16.gmra.mxu0 %v2334_v34  ;;  %s426_s17 = scalar_lea.vmem %s2512_s6, %s1531_s19 }
  0x3f   : > { %902 = vmatmul.bf16.gmra.mxu1 %v2345_v39  ;;  %931 = vmatmul.bf16.gmra.mxu2 %v2334_v34 }
  0x40   : > { %1038 = vmatpush.bf16.msrb.mxu2 %v1628_v30  ;;  %960 = vmatmul.bf16.gmra.mxu3 %v2345_v39 }
  0x41   : > { %1067 = vmatpush.bf16.msrb.mxu3 %v1756_v35  ;;  %980 = vmatpush.bf16.msrb.mxu0 %v1624_v42 }
  0x42   : > { %1009 = vmatpush.bf16.msrb.mxu1 %v1752_v43 }
  0x44   : > { %1039 = vmatpush.bf16.msrb.mxu2 %v1612_v45 }
  0x45   : > { %1068 = vmatpush.bf16.msrb.mxu3 %v1740_v48  ;;  %981 = vmatpush.bf16.msrb.mxu0 %v1608_v52 }
  0x46   : > { %1010 = vmatpush.bf16.msrb.mxu1 %v1736_v56 }
  0x48   : > { %1040 = vmatpush.bf16.msrb.mxu2 %v1596_v57 }
  0x49   : > { %1069 = vmatpush.bf16.msrb.mxu3 %v1724_v61  ;;  %982 = vmatpush.bf16.msrb.mxu0 %v1592_v4 }
  0x4a   : > { %1011 = vmatpush.bf16.msrb.mxu1 %v1720_v5 }
  0x4c   : > { %1041 = vmatpush.bf16.msrb.mxu2 %v1580_v6 }
  0x4d   : > { %1070 = vmatpush.bf16.msrb.mxu3 %v1708_v9  ;;  %983 = vmatpush.bf16.msrb.mxu0 %v1576_v16 }
  0x4e   : > { %1012 = vmatpush.bf16.msrb.mxu1 %v1704_v17  ;;  %878 = vmatmul.bf16.gmra.mxu0 %v1552_v18 }
  0x4f   : > { %907 = vmatmul.bf16.gmra.mxu1 %v1556_v19  ;;  %936 = vmatmul.bf16.gmra.mxu2 %v1552_v18 }
  0x50   : > { %965 = vmatmul.bf16.gmra.mxu3 %v1556_v19 }
  0x5e   : > { %883 = vmatmul.bf16.gmra.mxu0 %v1560_v24 }
  0x5f   : > { %912 = vmatmul.bf16.gmra.mxu1 %v1564_v25  ;;  %941 = vmatmul.bf16.gmra.mxu2 %v1560_v24 }
  0x60   : > { %970 = vmatmul.bf16.gmra.mxu3 %v1564_v25 }
  0x6e   : > { %984 = vmatmul.bf16.vlgmr.msrb.gmra.mxu0 %v2226_v44 }
  0x6f   : > { %1013 = vmatmul.bf16.vlgmr.msrb.gmra.mxu1 %v2237_v49  ;;  %1042 = vmatmul.bf16.vlgmr.msrb.gmra.mxu2 %v2226_v44 }
  0x70   : > { %1071 = vmatmul.bf16.vlgmr.msrb.gmra.mxu3 %v2237_v49 }
  0x7e   : > { %989 = vmatmul.bf16.gmra.mxu0 %v2334_v34 }
  0x7f   : > { %1018 = vmatmul.bf16.gmra.mxu1 %v2345_v39  ;;  %1047 = vmatmul.bf16.gmra.mxu2 %v2334_v34 }
  0x80   : > { %1076 = vmatmul.bf16.gmra.mxu3 %v2345_v39 }
  0x8e   : > { %994 = vmatmul.bf16.gmra.mxu0 %v1552_v18 }
  0x8f   : > { %1023 = vmatmul.bf16.gmra.mxu1 %v1556_v19  ;;  %1052 = vmatmul.bf16.gmra.mxu2 %v1552_v18 }
  0x90   : > { %1081 = vmatmul.bf16.gmra.mxu3 %v1556_v19 }
  0x9e   : > { %999 = vmatmul.bf16.gmra.mxu0 %v1560_v24 }
  0x9f   : > { %1028 = vmatmul.bf16.gmra.mxu1 %v1564_v25  ;;  %1057 = vmatmul.bf16.gmra.mxu2 %v1560_v24 }
  0xa0   : > { %1086 = vmatmul.bf16.gmra.mxu3 %v1564_v25 }
  0xab   : > { %v869_v44 = vpop.f32.mrf.mxu0 }
  0xac   : > { %v898_v49 = vpop.f32.mrf.mxu1 }
  0xad   : > { %v899_v26 = vadd.f32 %v898_v49, %v869_v44 }
  0xaf   : > { %1092 = vst [vmem:[%s2437_s11] sm:$0xff] %v899_v26  ;;  %v1195_v33 = vmul.f32 %v899_v26, %v899_v26 }
  0xb2   : > { %v927_v27 = vpop.f32.mrf.mxu2 }
  0xb3   : > { %v956_v28 = vpop.f32.mrf.mxu3  ;;  %v871_v29 = vpop.f32.mrf.mxu0 }
  0xb4   : > { %v957_v30 = vadd.f32 %v956_v28, %v927_v27  ;;  %v900_v31 = vpop.f32.mrf.mxu1 }
  0xb5   : > { %v901_v32 = vadd.f32 %v900_v31, %v871_v29 }
  0xb6   : > { %1093 = vst [vmem:[%s2437_s11 + $0x8] sm:$0xff] %v957_v30  ;;  %v1196_v43 = vmul.f32 %v957_v30, %v957_v30 }
  0xb7   : > { %1096 = vst [vmem:[%s2437_s11 + $0x20] sm:$0xff] %v901_v32  ;;  %v1124_v34 = vadd.f32 %v901_v32, %v899_v26  ;;  %v1199_v35 = vmul.f32 %v901_v32, %v901_v32 }
  0xb9   : > { %v1227_v36 = vadd.f32 %v1199_v35, %v1195_v33 }
  0xba   : > { %v929_v37 = vpop.f32.mrf.mxu2 }
  0xbb   : > { %v958_v38 = vpop.f32.mrf.mxu3  ;;  %v874_v39 = vpop.f32.mrf.mxu0 }
  0xbc   : > { %v959_v40 = vadd.f32 %v958_v38, %v929_v37  ;;  %v903_v41 = vpop.f32.mrf.mxu1 }
  0xbd   : > { %v904_v42 = vadd.f32 %v903_v41, %v874_v39 }
  0xbe   : > { %1097 = vst [vmem:[%s2437_s11 + $0x28] sm:$0xff] %v959_v40  ;;  %v1137_v45 = vadd.f32 %v959_v40, %v957_v30  ;;  %v1200_v46 = vmul.f32 %v959_v40, %v959_v40 }
  0xbf   : > { %1100 = vst [vmem:[%s2437_s11 + $0x40] sm:$0xff] %v904_v42  ;;  %v1125_v47 = vadd.f32 %v1124_v34, %v904_v42  ;;  %v1203_v48 = vmul.f32 %v904_v42, %v904_v42 }
  0xc0   : > { %v1240_v50 = vadd.f32 %v1200_v46, %v1196_v43 }
  0xc1   : > { %v1228_v51 = vadd.f32 %v1227_v36, %v1203_v48 }
  0xc2   : > { %v932_v52 = vpop.f32.mrf.mxu2 }
  0xc3   : > { %v961_v53 = vpop.f32.mrf.mxu3  ;;  %v876_v54 = vpop.f32.mrf.mxu0 }
  0xc4   : > { %v962_v55 = vadd.f32 %v961_v53, %v932_v52  ;;  %v905_v56 = vpop.f32.mrf.mxu1 }
  0xc5   : > { %v906_v57 = vadd.f32 %v905_v56, %v876_v54 }
  0xc6   : > { %1101 = vst [vmem:[%s2437_s11 + $0x48] sm:$0xff] %v962_v55  ;;  %v1138_v58 = vadd.f32 %v1137_v45, %v962_v55  ;;  %v1204_v59 = vmul.f32 %v962_v55, %v962_v55 }
  0xc7   : > { %1104 = vst [vmem:[%s2437_s11 + $0x60] sm:$0xff] %v906_v57  ;;  %v1126_v60 = vadd.f32 %v1125_v47, %v906_v57  ;;  %v1207_v61 = vmul.f32 %v906_v57, %v906_v57 }
  0xc8   : > { %v1241_v62 = vadd.f32 %v1240_v50, %v1204_v59 }
  0xc9   : > { %v1229_v63 = vadd.f32 %v1228_v51, %v1207_v61 }
  0xca   : > { %v934_v0 = vpop.f32.mrf.mxu2 }
  0xcb   : > { %v963_v1 = vpop.f32.mrf.mxu3  ;;  %v879_v2 = vpop.f32.mrf.mxu0 }
  0xcc   : > { %v964_v3 = vadd.f32 %v963_v1, %v934_v0  ;;  %v908_v4 = vpop.f32.mrf.mxu1 }
  0xcd   : > { %v909_v5 = vadd.f32 %v908_v4, %v879_v2 }
  0xce   : > { %1105 = vst [vmem:[%s2437_s11 + $0x68] sm:$0xff] %v964_v3  ;;  %v1139_v6 = vadd.f32 %v1138_v58, %v964_v3  ;;  %v1208_v7 = vmul.f32 %v964_v3, %v964_v3 }
  0xcf   : > { %1108 = vst [vmem:[%s2437_s11 + $0x80] sm:$0xff] %v909_v5  ;;  %v1127_v8 = vadd.f32 %v1126_v60, %v909_v5  ;;  %v1211_v9 = vmul.f32 %v909_v5, %v909_v5 }
  0xd0   : > { %v1242_v10 = vadd.f32 %v1241_v62, %v1208_v7 }
  0xd1   : > { %v1230_v11 = vadd.f32 %v1229_v63, %v1211_v9 }
  0xd2   : > { %v937_v12 = vpop.f32.mrf.mxu2 }
  0xd3   : > { %v966_v13 = vpop.f32.mrf.mxu3  ;;  %v881_v14 = vpop.f32.mrf.mxu0 }
  0xd4   : > { %v967_v15 = vadd.f32 %v966_v13, %v937_v12  ;;  %v910_v16 = vpop.f32.mrf.mxu1 }
  0xd5   : > { %v911_v17 = vadd.f32 %v910_v16, %v881_v14 }
  0xd6   : > { %1109 = vst [vmem:[%s2437_s11 + $0x88] sm:$0xff] %v967_v15  ;;  %v1140_v18 = vadd.f32 %v1139_v6, %v967_v15  ;;  %v1212_v19 = vmul.f32 %v967_v15, %v967_v15 }
  0xd7   : > { %1112 = vst [vmem:[%s2437_s11 + $0xa0] sm:$0xff] %v911_v17  ;;  %v1128_v20 = vadd.f32 %v1127_v8, %v911_v17  ;;  %v1215_v21 = vmul.f32 %v911_v17, %v911_v17 }
  0xd8   : > { %v1243_v22 = vadd.f32 %v1242_v10, %v1212_v19 }
  0xd9   : > { %v1231_v23 = vadd.f32 %v1230_v11, %v1215_v21 }
  0xda   : > { %v939_v24 = vpop.f32.mrf.mxu2 }
  0xdb   : > { %v968_v25 = vpop.f32.mrf.mxu3  ;;  %v884_v44 = vpop.f32.mrf.mxu0 }
  0xdc   : > { %v969_v49 = vadd.f32 %v968_v25, %v939_v24  ;;  %v913_v26 = vpop.f32.mrf.mxu1 }
  0xdd   : > { %v914_v27 = vadd.f32 %v913_v26, %v884_v44 }
  0xde   : > { %1113 = vst [vmem:[%s2437_s11 + $0xa8] sm:$0xff] %v969_v49  ;;  %v1141_v28 = vadd.f32 %v1140_v18, %v969_v49  ;;  %v1216_v29 = vmul.f32 %v969_v49, %v969_v49 }
  0xdf   : > { %1116 = vst [vmem:[%s2437_s11 + $0xc0] sm:$0xff] %v914_v27  ;;  %v1129_v30 = vadd.f32 %v1128_v20, %v914_v27  ;;  %v1219_v31 = vmul.f32 %v914_v27, %v914_v27 }
  0xe0   : > { %v1244_v32 = vadd.f32 %v1243_v22, %v1216_v29 }
  0xe1   : > { %v1232_v33 = vadd.f32 %v1231_v23, %v1219_v31 }
  0xe2   : > { %v942_v34 = vpop.f32.mrf.mxu2 }
  0xe3   : > { %v971_v35 = vpop.f32.mrf.mxu3  ;;  %v886_v36 = vpop.f32.mrf.mxu0 }
  0xe4   : > { %v972_v37 = vadd.f32 %v971_v35, %v942_v34  ;;  %v915_v38 = vpop.f32.mrf.mxu1 }
  0xe5   : > { %v916_v39 = vadd.f32 %v915_v38, %v886_v36 }
  0xe6   : > { %1117 = vst [vmem:[%s2437_s11 + $0xc8] sm:$0xff] %v972_v37  ;;  %v1142_v40 = vadd.f32 %v1141_v28, %v972_v37  ;;  %v1220_v41 = vmul.f32 %v972_v37, %v972_v37 }
  0xe7   : > { %1120 = vst [vmem:[%s2437_s11 + $0xe0] sm:$0xff] %v916_v39  ;;  %v1130_v42 = vadd.f32 %v1129_v30, %v916_v39  ;;  %v1223_v43 = vmul.f32 %v916_v39, %v916_v39 }
  0xe8   : > { %v1245_v45 = vadd.f32 %v1244_v32, %v1220_v41 }
  0xe9   : > { %v1131_v46 = vrot.slane %v1130_v42, 4  ;;  %v1233_v47 = vadd.f32 %v1232_v33, %v1223_v43 }
  0xea   : > { %v944_v48 = vpop.f32.mrf.mxu2 }
  0xeb   : > { %v1234_v50 = vrot.slane %v1233_v47, 4  ;;  %v973_v51 = vpop.f32.mrf.mxu3  ;;  %v985_v52 = vpop.f32.mrf.mxu0  ;;  %v1132_v53 = vadd.f32 %v1131_v46, %v1130_v42 }
  0xec   : > { %v974_v54 = vadd.f32 %v973_v51, %v944_v48  ;;  %v1014_v55 = vpop.f32.mrf.mxu1 }
  0xed   : > { %v2454_v56 = vadd.f32 %v1014_v55, %v985_v52  ;;  %v1235_v57 = vadd.f32 %v1234_v50, %v1233_v47  ;;  %v1133_v60 = vrot.slane %v1132_v53, 2 }
  0xee   : > { %1121 = vst [vmem:[%s2437_s11 + $0xe8] sm:$0xff] %v974_v54  ;;  %v1143_v58 = vadd.f32 %v1142_v40, %v974_v54  ;;  %v1224_v59 = vmul.f32 %v974_v54, %v974_v54 }
  0xef   : > { %1094 = vst [vmem:[%s2437_s11 + $0x10] sm:$0xff] %v2454_v56  ;;  %v1236_v63 = vrot.slane %v1235_v57, 2  ;;  %v1134_v5 = vadd.f32 %v1133_v60, %v1132_v53  ;;  %v1197_v53 = vmul.f32 %v2454_v56, %v2454_v56 }
  0xf0   : > { %v1144_v61 = vrot.slane %v1143_v58, 4  ;;  %v1246_v62 = vadd.f32 %v1245_v45, %v1224_v59 }
  0xf1   : > { %v1237_v11 = vadd.f32 %v1236_v63, %v1235_v57  ;;  %v1135_v14 = vrot.slane %v1134_v5, 1 }
  0xf2   : > { %v1145_v0 = vadd.f32 %v1144_v61, %v1143_v58  ;;  %v1247_v1 = vrot.slane %v1246_v62, 4  ;;  %v1043_v2 = vpop.f32.mrf.mxu2 }
  0xf3   : > { %v1072_v3 = vpop.f32.mrf.mxu3  ;;  %v987_v4 = vpop.f32.mrf.mxu0  ;;  %v1238_v17 = vrot.slane %v1237_v11, 1  ;;  %v1136_v23 = vadd.f32 %v1135_v14, %v1134_v5 }
  0xf4   : > { %v1146_v6 = vrot.slane %v1145_v0, 2  ;;  %v1248_v7 = vadd.f32 %v1247_v1, %v1246_v62  ;;  %v2459_v8 = vadd.f32 %v1072_v3, %v1043_v2  ;;  %v1016_v9 = vpop.f32.mrf.mxu1 }
  0xf5   : > { %v1017_v10 = vadd.f32 %v1016_v9, %v987_v4  ;;  %v1239_v27 = vadd.f32 %v1238_v17, %v1237_v11 }
  0xf6   : > { %v1147_v12 = vadd.f32 %v1146_v6, %v1145_v0  ;;  %v1249_v13 = vrot.slane %v1248_v7, 2  ;;  %1095 = vst [vmem:[%s2437_s11 + $0x18] sm:$0xff] %v2459_v8 }
  0xf7   : > { %1098 = vst [vmem:[%s2437_s11 + $0x30] sm:$0xff] %v1017_v10  ;;  %v1201_v51 = vmul.f32 %v1017_v10, %v1017_v10  ;;  %v1150_v54 = vadd.f32 %v1017_v10, %v2454_v56  ;;  %v1198_v56 = vmul.f32 %v2459_v8, %v2459_v8 }
  0xf8   : > { %v1148_v15 = vrot.slane %v1147_v12, 1  ;;  %v1250_v16 = vadd.f32 %v1249_v13, %v1248_v7 }
  0xf9   : > { %v1253_v61 = vadd.f32 %v1201_v51, %v1197_v53 }
  0xfa   : > { %v1149_v18 = vadd.f32 %v1148_v15, %v1147_v12  ;;  %v1251_v19 = vrot.slane %v1250_v16, 1  ;;  %v1045_v20 = vpop.f32.mrf.mxu2 }
  0xfb   : > { %v1074_v21 = vpop.f32.mrf.mxu3  ;;  %v990_v22 = vpop.f32.mrf.mxu0 }
  0xfc   : > { %v1180_v24 = vrot.slane %v1149_v18, 7  ;;  %v1252_v25 = vadd.f32 %v1251_v19, %v1250_v16  ;;  %v1075_v44 = vadd.f32 %v1074_v21, %v1045_v20  ;;  %v1019_v49 = vpop.f32.mrf.mxu1 }
  0xfd   : > { %v1020_v26 = vadd.f32 %v1019_v49, %v990_v22 }
  0xfe   : > { %v2464_v28 = vsel %vm1183_vm0, %v1136_v23, %v1180_v24  ;;  %v1283_v29 = vrot.slane %v1252_v25, 7  ;;  %1099 = vst [vmem:[%s2437_s11 + $0x38] sm:$0xff] %v1075_v44  ;;  %v1202_v4 = vmul.f32 %v1075_v44, %v1075_v44  ;;  %v1163_v9 = vadd.f32 %v1075_v44, %v2459_v8 }
  0xff   : > { %1102 = vst [vmem:[%s2437_s11 + $0x50] sm:$0xff] %v1020_v26  ;;  %v1205_v55 = vmul.f32 %v1020_v26, %v1020_v26  ;;  %v1151_v62 = vadd.f32 %v1150_v54, %v1020_v26 }
 0x100   : > { %v2468_v30 = vsel %vm1183_vm0, %v1239_v27, %v1283_v29  ;;  %v1266_v17 = vadd.f32 %v1202_v4, %v1198_v56 }
 0x101   : > { %v1254_v1 = vadd.f32 %v1253_v61, %v1205_v55 }
 0x102   : > { %v1048_v31 = vpop.f32.mrf.mxu2 }
 0x103   : > { %v1077_v32 = vpop.f32.mrf.mxu3  ;;  %v992_v33 = vpop.f32.mrf.mxu0 }
 0x104   : > { %v1078_v34 = vadd.f32 %v1077_v32, %v1048_v31  ;;  %v1021_v35 = vpop.f32.mrf.mxu1 }
 0x105   : > { %v1022_v36 = vadd.f32 %v1021_v35, %v992_v33 }
 0x106   : > { %1103 = vst [vmem:[%s2437_s11 + $0x58] sm:$0xff] %v1078_v34  ;;  %v1206_v10 = vmul.f32 %v1078_v34, %v1078_v34  ;;  %v1164_v18 = vadd.f32 %v1163_v9, %v1078_v34 }
 0x107   : > { %1106 = vst [vmem:[%s2437_s11 + $0x70] sm:$0xff] %v1022_v36  ;;  %v1209_v63 = vmul.f32 %v1022_v36, %v1022_v36  ;;  %v1152_v2 = vadd.f32 %v1151_v62, %v1022_v36 }
 0x108   : > { %v1267_v25 = vadd.f32 %v1266_v17, %v1206_v10 }
 0x109   : > { %v1255_v5 = vadd.f32 %v1254_v1, %v1209_v63 }
 0x10a   : > { %v1050_v37 = vpop.f32.mrf.mxu2 }
 0x10b   : > { %v1079_v38 = vpop.f32.mrf.mxu3  ;;  %v995_v39 = vpop.f32.mrf.mxu0 }
 0x10c   : > { %v1080_v40 = vadd.f32 %v1079_v38, %v1050_v37  ;;  %v1024_v41 = vpop.f32.mrf.mxu1 }
 0x10d   : > { %v1025_v42 = vadd.f32 %v1024_v41, %v995_v39 }
 0x10e   : > { %1107 = vst [vmem:[%s2437_s11 + $0x78] sm:$0xff] %v1080_v40  ;;  %v1210_v19 = vmul.f32 %v1080_v40, %v1080_v40  ;;  %v1165_v49 = vadd.f32 %v1164_v18, %v1080_v40 }
 0x10f   : > { %1110 = vst [vmem:[%s2437_s11 + $0x90] sm:$0xff] %v1025_v42  ;;  %v1213_v3 = vmul.f32 %v1025_v42, %v1025_v42  ;;  %v1153_v6 = vadd.f32 %v1152_v2, %v1025_v42 }
 0x110   : > { %v1268_v29 = vadd.f32 %v1267_v25, %v1210_v19 }
 0x111   : > { %v1256_v12 = vadd.f32 %v1255_v5, %v1213_v3  ;;  %v1190_v5 = vlaneseq }
 0x112   : > { %v1053_v43 = vpop.f32.mrf.mxu2 }
 0x113   : > { %v1082_v45 = vpop.f32.mrf.mxu3  ;;  %v997_v46 = vpop.f32.mrf.mxu0  ;;  %vm1192_vm3 = vcmp.lt.s32.totalorder %v1190_v5, 512 }
 0x114   : > { %v1083_v47 = vadd.f32 %v1082_v45, %v1053_v43  ;;  %v1026_v48 = vpop.f32.mrf.mxu1 }
 0x115   : > { %v1027_v50 = vadd.f32 %v1026_v48, %v997_v46 }
 0x116   : > { %1111 = vst [vmem:[%s2437_s11 + $0x98] sm:$0xff] %v1083_v47  ;;  %v1214_v8 = vmul.f32 %v1083_v47, %v1083_v47  ;;  %v1166_v31 = vadd.f32 %v1165_v49, %v1083_v47 }
 0x117   : > { %1114 = vst [vmem:[%s2437_s11 + $0xb0] sm:$0xff] %v1027_v50  ;;  %v1217_v7 = vmul.f32 %v1027_v50, %v1027_v50  ;;  %v1154_v13 = vadd.f32 %v1153_v6, %v1027_v50 }
 0x118   : > { %v1269_v35 = vadd.f32 %v1268_v29, %v1214_v8 }
 0x119   : > { %v1257_v22 = vadd.f32 %v1256_v12, %v1217_v7 }
 0x11a   : > { %v1055_v52 = vpop.f32.mrf.mxu2 }
 0x11b   : > { %v1084_v57 = vpop.f32.mrf.mxu3  ;;  %v1000_v58 = vpop.f32.mrf.mxu0 }
 0x11c   : > { %v1085_v59 = vadd.f32 %v1084_v57, %v1055_v52  ;;  %v1029_v60 = vpop.f32.mrf.mxu1 }
 0x11d   : > { %v1030_v0 = vadd.f32 %v1029_v60, %v1000_v58 }
 0x11e   : > { %1115 = vst [vmem:[%s2437_s11 + $0xb8] sm:$0xff] %v1085_v59  ;;  %v1218_v32 = vmul.f32 %v1085_v59, %v1085_v59  ;;  %v1167_v36 = vadd.f32 %v1166_v31, %v1085_v59 }
 0x11f   : > { %1118 = vst [vmem:[%s2437_s11 + $0xd0] sm:$0xff] %v1030_v0  ;;  %v1221_v14 = vmul.f32 %v1030_v0, %v1030_v0  ;;  %v1155_v23 = vadd.f32 %v1154_v13, %v1030_v0 }
 0x120   : > { %v1270_v42 = vadd.f32 %v1269_v35, %v1218_v32 }
 0x121   : > { %v1258_v44 = vadd.f32 %v1257_v22, %v1221_v14 }
 0x122   : > { %v1058_v11 = vpop.f32.mrf.mxu2 }
 0x123   : > { %v1087_v15 = vpop.f32.mrf.mxu3  ;;  %v1002_v16 = vpop.f32.mrf.mxu0 }
 0x124   : > { %v1088_v20 = vadd.f32 %v1087_v15, %v1058_v11  ;;  %v1031_v21 = vpop.f32.mrf.mxu1 }
 0x125   : > { %v1032_v24 = vadd.f32 %v1031_v21, %v1002_v16 }
 0x126   : > { %1119 = vst [vmem:[%s2437_s11 + $0xd8] sm:$0xff] %v1088_v20  ;;  %v1222_v37 = vmul.f32 %v1088_v20, %v1088_v20  ;;  %v1168_v43 = vadd.f32 %v1167_v36, %v1088_v20 }
 0x127   : > { %1122 = vst [vmem:[%s2437_s11 + $0xf0] sm:$0xff] %v1032_v24  ;;  %v1156_v26 = vadd.f32 %v1155_v23, %v1032_v24  ;;  %v1225_v27 = vmul.f32 %v1032_v24, %v1032_v24 }
 0x128   : > { %v1271_v50 = vadd.f32 %v1270_v42, %v1222_v37 }
 0x129   : > { %v1157_v33 = vrot.slane %v1156_v26, 4  ;;  %v1259_v34 = vadd.f32 %v1258_v44, %v1225_v27 }
 0x12a   : > { %v1060_v38 = vpop.f32.mrf.mxu2 }
 0x12b   : > { %v1158_v39 = vadd.f32 %v1157_v33, %v1156_v26  ;;  %v1260_v41 = vrot.slane %v1259_v34, 4  ;;  %v1089_v40 = vpop.f32.mrf.mxu3 }
 0x12c   : > { %v1090_v45 = vadd.f32 %v1089_v40, %v1060_v38 }
 0x12d   : > { %v1159_v46 = vrot.slane %v1158_v39, 2  ;;  %v1261_v48 = vadd.f32 %v1260_v41, %v1259_v34 }
 0x12e   : > { %1123 = vst [vmem:[%s2437_s11 + $0xf8] sm:$0xff] %v1090_v45  ;;  %v1169_v47 = vadd.f32 %v1168_v43, %v1090_v45  ;;  %v1226_v51 = vmul.f32 %v1090_v45, %v1090_v45 }
 0x12f   : > { %v1262_v52 = vrot.slane %v1261_v48, 2  ;;  %v1160_v53 = vadd.f32 %v1159_v46, %v1158_v39 }
 0x130   : > { %v1170_v54 = vrot.slane %v1169_v47, 4  ;;  %v1272_v55 = vadd.f32 %v1271_v50, %v1226_v51 }
 0x131   : > { %v1263_v57 = vadd.f32 %v1262_v52, %v1261_v48  ;;  %v1161_v60 = vrot.slane %v1160_v53, 1 }
 0x132   : > { %v1171_v58 = vadd.f32 %v1170_v54, %v1169_v47  ;;  %v1273_v59 = vrot.slane %v1272_v55, 4 }
 0x133   : > { %v1264_v63 = vrot.slane %v1263_v57, 1  ;;  %v1162_v2 = vadd.f32 %v1161_v60, %v1160_v53 }
 0x134   : > { %v1172_v61 = vrot.slane %v1171_v58, 2  ;;  %v1274_v62 = vadd.f32 %v1273_v59, %v1272_v55 }
 0x135   : > { %v1265_v6 = vadd.f32 %v1264_v63, %v1263_v57  ;;  %v1181_v9 = vrot.slane %v1162_v2, 6 }
 0x136   : > { %v1173_v0 = vadd.f32 %v1172_v61, %v1171_v58  ;;  %v1275_v1 = vrot.slane %v1274_v62, 2 }
 0x137   : > { %v1284_v12 = vrot.slane %v1265_v6, 6 }
 0x138   : > { %v1174_v3 = vrot.slane %v1173_v0, 1  ;;  %v1276_v4 = vadd.f32 %v1275_v1, %v1274_v62 }
 0x13a   : > { %v1175_v7 = vadd.f32 %v1174_v3, %v1173_v0  ;;  %v1277_v56 = vrot.slane %v1276_v4, 1 }
 0x13c   : > { %v1182_v10 = vrot.slane %v1175_v7, 5  ;;  %v1278_v11 = vadd.f32 %v1277_v56, %v1276_v4 }
 0x13e   : > { %v1186_v13 = vsel %vm1185_vm1, %v1181_v9, %v1182_v10  ;;  %v1285_v14 = vrot.slane %v1278_v11, 5 }
 0x13f   : > { %v1188_v15 = vsel %vm1187_vm2, %v2464_v28, %v1186_v13 }
 0x140   : > { %1194 = vst.msk [vmem:[%s417_s14] sm:$0xf] %vm1192_vm3, %v1188_v15  ;;  %v1287_v16 = vsel %vm1185_vm1, %v1284_v12, %v1285_v14 }
 0x141   : > { %v1288_v17 = vsel %vm1187_vm2, %v2468_v30, %v1287_v16 }
 0x142   : > { %1290 = vst.msk [vmem:[%s426_s17] sm:$0xf] %vm1192_vm3, %v1288_v17 }
 0x143 PF: > { %s17_s23 = sadd.s32 1, %s1943_s23   ;;  %s2513_s21 = smov %s1939_s22 }
 0x144   : > { %p14_p6 = scmp.ge.s32.totalorder %s17_s23, 4   ;;  %s2514_s22 = smov %s2516_s2 }
 0x146   :  { %16 = sbr.rel (!%p14_p6) target bundleno = 2 (0x2), region = 99 }

// kernel: fwd.14
= control target key start
LH: loop header
LB: loop body
LE: loop exit
PB: predicated region body
PF: predicated region fallthrough
CT: control target
= control target key end

     0   :  { %s1483_s21 = smov 0   ;;  %s1485_s22 = smov 0   ;;  %s1667_s0 = inlined_call_operand.vmem [shape: bf16[128,512], index: 0, kind: input, shape index: {}]   ;;  %s1668_s1 = inlined_call_operand.vmem [shape: bf16[512,128], index: 1, kind: input, shape index: {}]   ;;  %s1669_s2 = inlined_call_operand.vmem [shape: f32[1,512], index: 2, kind: input, shape index: {}]   ;;  %s1670_s3 = inlined_call_operand.vmem [shape: f32[1,512], index: 3, kind: input, shape index: {}]   ;;  %s1671_s4 = inlined_call_operand.vmem [shape: bf16[128,128], index: 4, kind: output, shape index: {0}]   ;;  %s1672_s5 = inlined_call_operand.vmem [shape: f32[2,1,128], index: 5, kind: output, shape index: {1}]   ;;  %s1673_s6 = inlined_call_operand.vmem [shape: f32[2,1,128], index: 6, kind: output, shape index: {2}]  }
   0x1   :  { %s1487_s23 = smov 0  }
   0x2 LB: > { %s36_s2 = sadd.s32 1, %s1442_s22  ;;  %p1128_p0 = scmp.ge.s32.totalorder %s1446_s23, 1  ;;  %s1446_s23 = sphi %s1487_s23, %s17_s23   ;;  %s1442_s22 = sphi %s1485_s22, %s1675_s22   ;;  %s1438_s21 = sphi %s1483_s21, %s1674_s21  }
   0x3   : > { %p38_p1 = scmp.ge.s32.totalorder %s36_s2, 2  ;;  %p287_p2 = scmp.lt.s32.totalorder %s1446_s23, 3 }
   0x5   : > { %s1677_s2 = smov (%p38_p1, %s36_s2), 0  ;;  %p288_p3 = pnand %p1128_p0, %p287_p2 }
   0x6   : > { %s1129_s25 = sshll.u32 (!%p288_p3), %s1438_s21, 3  ;;  %p393_p5 = scmp.lt.s32.totalorder (!%p288_p3), %s1438_s21, 1 }
   0x7   : > { %291 = sbr.rel (%p288_p3) target bundleno = 255 (0xff), region = 36  ;;  %p355_p4 = scmp.lt.s32.totalorder (!%p288_p3), %s1129_s25, 15 }
   0xc   : > { %v1352_v0 = vld [vmem:[%s1668_s1 + $0x38] sm:$0xff]  ;;  %v1351_v4 = vld [vmem:[%s1668_s1 + $0x30] sm:$0xff]  ;;  %v1350_v8 = vld [vmem:[%s1668_s1 + $0x28] sm:$0xff]  ;;  %s1679_s25 = smov (!%p355_p4, %s1129_s25), 15  ;;  %s1681_s21 = smov (!%p393_p5, %s1438_s21), 1 }
   0xd   : > { %v1360_v1 = vld [vmem:[%s1668_s1 + $0x78] sm:$0xff]  ;;  %757 = vmatpush.bf16.msra.mxu0 %v1352_v0  ;;  %v1359_v5 = vld [vmem:[%s1668_s1 + $0x70] sm:$0xff]  ;;  %v1358_v9 = vld [vmem:[%s1668_s1 + $0x68] sm:$0xff]  ;;  %s1328_s29 = sshll.u32 %s1679_s25, 4  ;;  %s1133_s28 = sshll.u32 %s1679_s25, 2 }
   0xe   : > { %v1368_v2 = vld [vmem:[%s1668_s1 + $0xb8] sm:$0xff]  ;;  %786 = vmatpush.bf16.msra.mxu1 %v1360_v1  ;;  %v1367_v6 = vld [vmem:[%s1668_s1 + $0xb0] sm:$0xff]  ;;  %v1366_v10 = vld [vmem:[%s1668_s1 + $0xa8] sm:$0xff]  ;;  %s1588_s12 = scalar_lea.vmem %s1667_s0, %s1328_s29  ;;  %s1644_s7 = scalar_lea.vmem %s1671_s4, %s1133_s28 }
   0xf   : > { %v1376_v3 = vld [vmem:[%s1668_s1 + $0xf8] sm:$0xff]  ;;  %815 = vmatpush.bf16.msra.mxu2 %v1368_v2  ;;  %v1375_v7 = vld [vmem:[%s1668_s1 + $0xf0] sm:$0xff]  ;;  %v1374_v11 = vld [vmem:[%s1668_s1 + $0xe8] sm:$0xff]  ;;  %s398_s9 = scalar_lea.vmem %s1672_s5, %s1681_s21 }
  0x10   : > { %844 = vmatpush.bf16.msra.mxu3 %v1376_v3  ;;  %v1349_v12 = vld [vmem:[%s1668_s1 + $0x20] sm:$0xff]  ;;  %v1348_v16 = vld [vmem:[%s1668_s1 + $0x18] sm:$0xff]  ;;  %v1347_v20 = vld [vmem:[%s1668_s1 + $0x10] sm:$0xff] }
  0x11   : > { %758 = vmatpush.bf16.msra.mxu0 %v1351_v4  ;;  %v1357_v13 = vld [vmem:[%s1668_s1 + $0x60] sm:$0xff]  ;;  %v1356_v17 = vld [vmem:[%s1668_s1 + $0x58] sm:$0xff]  ;;  %v1355_v21 = vld [vmem:[%s1668_s1 + $0x50] sm:$0xff] }
  0x12   : > { %787 = vmatpush.bf16.msra.mxu1 %v1359_v5  ;;  %v1365_v14 = vld [vmem:[%s1668_s1 + $0xa0] sm:$0xff]  ;;  %v1364_v18 = vld [vmem:[%s1668_s1 + $0x98] sm:$0xff]  ;;  %v1363_v22 = vld [vmem:[%s1668_s1 + $0x90] sm:$0xff] }
  0x13   : > { %816 = vmatpush.bf16.msra.mxu2 %v1367_v6  ;;  %v1373_v15 = vld [vmem:[%s1668_s1 + $0xe0] sm:$0xff]  ;;  %v1372_v19 = vld [vmem:[%s1668_s1 + $0xd8] sm:$0xff]  ;;  %v1371_v23 = vld [vmem:[%s1668_s1 + $0xd0] sm:$0xff] }
  0x14   : > { %845 = vmatpush.bf16.msra.mxu3 %v1375_v7  ;;  %v1346_v24 = vld [vmem:[%s1668_s1 + $0x8] sm:$0xff]  ;;  %v1345_v28 = vld [vmem:[%s1668_s1] sm:$0xff]  ;;  %v1331_v33 = vld [vmem:[%s1588_s12 + $0xc] sm:$0xf0] }
  0x15   : > { %759 = vmatpush.bf16.msra.mxu0 %v1350_v8  ;;  %v1354_v25 = vld [vmem:[%s1668_s1 + $0x48] sm:$0xff]  ;;  %v1353_v29 = vld [vmem:[%s1668_s1 + $0x40] sm:$0xff]  ;;  %v1138_v35 = vld [vmem:[%s1588_s12 + $0x10] sm:$0xf0] }
  0x16   : > { %788 = vmatpush.bf16.msra.mxu1 %v1358_v9  ;;  %v1362_v26 = vld [vmem:[%s1668_s1 + $0x88] sm:$0xff]  ;;  %v1361_v30 = vld [vmem:[%s1668_s1 + $0x80] sm:$0xff]  ;;  %v1332_v37 = vld [vmem:[%s1588_s12 + $0x14] sm:$0xf0] }
  0x17   : > { %817 = vmatpush.bf16.msra.mxu2 %v1366_v10  ;;  %v1370_v27 = vld [vmem:[%s1668_s1 + $0xc8] sm:$0xff]  ;;  %v1369_v31 = vld [vmem:[%s1668_s1 + $0xc0] sm:$0xff]  ;;  %v1146_v39 = vld [vmem:[%s1588_s12 + $0x18] sm:$0xf0] }
  0x18   : > { %846 = vmatpush.bf16.msra.mxu3 %v1374_v11  ;;  %v1136_v32 = vld [vmem:[%s1588_s12] sm:$0xf]  ;;  %v1329_v34 = vld [vmem:[%s1588_s12 + $0x4] sm:$0xf]  ;;  %v1144_v36 = vld [vmem:[%s1588_s12 + $0x8] sm:$0xf] }
  0x19   : > { %760 = vmatpush.bf16.msra.mxu0 %v1349_v12  ;;  %v1330_v38 = vld [vmem:[%s1588_s12 + $0xc] sm:$0xf]  ;;  %v1137_v40 = vor.u32 %v1331_v33, %v1136_v32  ;;  %v1141_v41 = vor.u32 %v1329_v34, %v1138_v35  ;;  %v1145_v42 = vor.u32 %v1332_v37, %v1144_v36  ;;  %v1152_v44 = vld [vmem:[%s1588_s12 + $0x20] sm:$0xf]  ;;  %v1335_v45 = vld [vmem:[%s1588_s12 + $0x2c] sm:$0xf0] }
  0x1a   : > { %789 = vmatpush.bf16.msra.mxu1 %v1357_v13  ;;  %v1149_v43 = vor.u32 %v1330_v38, %v1146_v39  ;;  %v1333_v46 = vld [vmem:[%s1588_s12 + $0x24] sm:$0xf]  ;;  %v1154_v47 = vld [vmem:[%s1588_s12 + $0x30] sm:$0xf0]  ;;  %v1160_v48 = vld [vmem:[%s1588_s12 + $0x28] sm:$0xf]  ;;  %v1153_v52 = vor.u32 %v1335_v45, %v1152_v44 }
  0x1b   : > { %818 = vmatpush.bf16.msra.mxu2 %v1365_v14  ;;  %v1336_v49 = vld [vmem:[%s1588_s12 + $0x34] sm:$0xf0]  ;;  %v1334_v50 = vld [vmem:[%s1588_s12 + $0x2c] sm:$0xf]  ;;  %v1162_v51 = vld [vmem:[%s1588_s12 + $0x38] sm:$0xf0]  ;;  %v1157_v53 = vor.u32 %v1333_v46, %v1154_v47 }
  0x1c   : > { %847 = vmatpush.bf16.msra.mxu3 %v1373_v15  ;;  %v1161_v54 = vor.u32 %v1336_v49, %v1160_v48  ;;  %v1165_v55 = vor.u32 %v1334_v50, %v1162_v51  ;;  %v1168_v56 = vld [vmem:[%s1588_s12 + $0x40] sm:$0xf]  ;;  %v1339_v57 = vld [vmem:[%s1588_s12 + $0x4c] sm:$0xf0]  ;;  %v1337_v58 = vld [vmem:[%s1588_s12 + $0x44] sm:$0xf] }
  0x1d   : > { %761 = vmatpush.bf16.msra.mxu0 %v1348_v16  ;;  %v1170_v59 = vld [vmem:[%s1588_s12 + $0x50] sm:$0xf0]  ;;  %v1176_v60 = vld [vmem:[%s1588_s12 + $0x48] sm:$0xf]  ;;  %v1340_v61 = vld [vmem:[%s1588_s12 + $0x54] sm:$0xf0]  ;;  %v1169_v0 = vor.u32 %v1339_v57, %v1168_v56 }
  0x1e   : > { %790 = vmatpush.bf16.msra.mxu1 %v1356_v17  ;;  %v1338_v62 = vld [vmem:[%s1588_s12 + $0x4c] sm:$0xf]  ;;  %v1178_v63 = vld [vmem:[%s1588_s12 + $0x58] sm:$0xf0]  ;;  %v1173_v1 = vor.u32 %v1337_v58, %v1170_v59  ;;  %v1177_v2 = vor.u32 %v1340_v61, %v1176_v60  ;;  %v1184_v4 = vld [vmem:[%s1588_s12 + $0x60] sm:$0xf] }
  0x1f   : > { %819 = vmatpush.bf16.msra.mxu2 %v1364_v18  ;;  %v1181_v3 = vor.u32 %v1338_v62, %v1178_v63  ;;  %v1343_v5 = vld [vmem:[%s1588_s12 + $0x6c] sm:$0xf0]  ;;  %v1341_v6 = vld [vmem:[%s1588_s12 + $0x64] sm:$0xf]  ;;  %v1186_v7 = vld [vmem:[%s1588_s12 + $0x70] sm:$0xf0] }
  0x20   : > { %848 = vmatpush.bf16.msra.mxu3 %v1372_v19  ;;  %v1192_v8 = vld [vmem:[%s1588_s12 + $0x68] sm:$0xf]  ;;  %v1344_v9 = vld [vmem:[%s1588_s12 + $0x74] sm:$0xf0]  ;;  %v1342_v10 = vld [vmem:[%s1588_s12 + $0x6c] sm:$0xf]  ;;  %v1185_v12 = vor.u32 %v1343_v5, %v1184_v4  ;;  %v1189_v13 = vor.u32 %v1341_v6, %v1186_v7 }
  0x21   : > { %762 = vmatpush.bf16.msra.mxu0 %v1347_v20  ;;  %v1194_v11 = vld [vmem:[%s1588_s12 + $0x78] sm:$0xf0]  ;;  %v1193_v14 = vor.u32 %v1344_v9, %v1192_v8  ;;  %s404_s12 = scalar_lea.vmem %s1673_s6, %s1681_s21 }
  0x22   : > { %791 = vmatpush.bf16.msra.mxu1 %v1355_v21  ;;  %v1197_v15 = vor.u32 %v1342_v10, %v1194_v11 }
  0x23   : > { %820 = vmatpush.bf16.msra.mxu2 %v1363_v22 }
  0x24   : > { %849 = vmatpush.bf16.msra.mxu3 %v1371_v23 }
  0x25   : > { %763 = vmatpush.bf16.msra.mxu0 %v1346_v24 }
  0x26   : > { %792 = vmatpush.bf16.msra.mxu1 %v1354_v25 }
  0x27   : > { %821 = vmatpush.bf16.msra.mxu2 %v1362_v26 }
  0x28   : > { %850 = vmatpush.bf16.msra.mxu3 %v1370_v27 }
  0x29   : > { %764 = vmatpush.bf16.msra.mxu0 %v1345_v28 }
  0x2a   : > { %793 = vmatpush.bf16.msra.mxu1 %v1353_v29 }
  0x2b   : > { %822 = vmatpush.bf16.msra.mxu2 %v1361_v30 }
  0x2c   : > { %851 = vmatpush.bf16.msra.mxu3 %v1369_v31  ;;  %765 = vmatmul.bf16.vlgmr.msra.gmra.mxu0 %v1137_v40 }
  0x2d   : > { %794 = vmatmul.bf16.vlgmr.msra.gmra.mxu1 %v1141_v41 }
  0x2e   : > { %823 = vmatmul.bf16.vlgmr.msra.gmra.mxu2 %v1145_v42 }
  0x2f   : > { %852 = vmatmul.bf16.vlgmr.msra.gmra.mxu3 %v1149_v43 }
  0x3c   : > { %770 = vmatmul.bf16.gmra.mxu0 %v1153_v52 }
  0x3d   : > { %799 = vmatmul.bf16.gmra.mxu1 %v1157_v53 }
  0x3e   : > { %828 = vmatmul.bf16.gmra.mxu2 %v1161_v54 }
  0x3f   : > { %857 = vmatmul.bf16.gmra.mxu3 %v1165_v55 }
  0x4c   : > { %775 = vmatmul.bf16.gmra.mxu0 %v1169_v0 }
  0x4d   : > { %804 = vmatmul.bf16.gmra.mxu1 %v1173_v1 }
  0x4e   : > { %833 = vmatmul.bf16.gmra.mxu2 %v1177_v2 }
  0x4f   : > { %862 = vmatmul.bf16.gmra.mxu3 %v1181_v3 }
  0x5c   : > { %780 = vmatmul.bf16.gmra.mxu0 %v1185_v12 }
  0x5d   : > { %809 = vmatmul.bf16.gmra.mxu1 %v1189_v13 }
  0x5e   : > { %838 = vmatmul.bf16.gmra.mxu2 %v1193_v14 }
  0x5f   : > { %867 = vmatmul.bf16.gmra.mxu3 %v1197_v15 }
  0xa9   : > { %v766_v16 = vpop.f32.mrf.mxu0 }
  0xaa   : > { %v795_v17 = vpop.f32.mrf.mxu1 }
  0xab   : > { %v796_v22 = vadd.f32 %v795_v17, %v766_v16 }
  0xb1   : > { %v824_v18 = vpop.f32.mrf.mxu2  ;;  %v768_v20 = vpop.f32.mrf.mxu0 }
  0xb2   : > { %v853_v19 = vpop.f32.mrf.mxu3  ;;  %v797_v21 = vpop.f32.mrf.mxu1  ;;  %v825_v23 = vadd.f32 %v824_v18, %v796_v22 }
  0xb3   : > { %v798_v24 = vadd.f32 %v797_v21, %v768_v20 }
  0xb4   : > { %v854_v30 = vadd.f32 %v853_v19, %v825_v23 }
  0xb6   : > { %v903_v3 = vmul.f32 %v854_v30, %v854_v30 }
  0xb9   : > { %v826_v25 = vpop.f32.mrf.mxu2  ;;  %v771_v28 = vpop.f32.mrf.mxu0 }
  0xba   : > { %v855_v26 = vpop.f32.mrf.mxu3  ;;  %v827_v27 = vadd.f32 %v826_v25, %v798_v24  ;;  %v800_v29 = vpop.f32.mrf.mxu1 }
  0xbb   : > { %v801_v37 = vadd.f32 %v800_v29, %v771_v28 }
  0xbc   : > { %v856_v31 = vadd.f32 %v855_v26, %v827_v27 }
  0xbe   : > { %v1380_v32 = vpack.c.bf16 %v856_v31, %v854_v30  ;;  %v904_v0 = vmul.f32 %v856_v31, %v856_v31  ;;  %v889_v4 = vadd.f32 %v856_v31, %v854_v30 }
  0xc0   : > { %1381 = vst [vmem:[%s1644_s7] sm:$0xff] %v1380_v32   ;;  %v911_v7 = vadd.f32 %v904_v0, %v903_v3 }
  0xc1   : > { %v829_v33 = vpop.f32.mrf.mxu2  ;;  %v773_v35 = vpop.f32.mrf.mxu0 }
  0xc2   : > { %v858_v34 = vpop.f32.mrf.mxu3  ;;  %v802_v36 = vpop.f32.mrf.mxu1  ;;  %v830_v38 = vadd.f32 %v829_v33, %v801_v37 }
  0xc3   : > { %v803_v39 = vadd.f32 %v802_v36, %v773_v35 }
  0xc4   : > { %v859_v45 = vadd.f32 %v858_v34, %v830_v38 }
  0xc6   : > { %v905_v5 = vmul.f32 %v859_v45, %v859_v45  ;;  %v890_v8 = vadd.f32 %v889_v4, %v859_v45 }
  0xc8   : > { %v912_v12 = vadd.f32 %v911_v7, %v905_v5 }
  0xc9   : > { %v831_v40 = vpop.f32.mrf.mxu2  ;;  %v776_v43 = vpop.f32.mrf.mxu0 }
  0xca   : > { %v860_v41 = vpop.f32.mrf.mxu3  ;;  %v832_v42 = vadd.f32 %v831_v40, %v803_v39  ;;  %v805_v44 = vpop.f32.mrf.mxu1 }
  0xcb   : > { %v806_v52 = vadd.f32 %v805_v44, %v776_v43 }
  0xcc   : > { %v861_v46 = vadd.f32 %v860_v41, %v832_v42 }
  0xce   : > { %v1385_v47 = vpack.c.bf16 %v861_v46, %v859_v45  ;;  %v906_v9 = vmul.f32 %v861_v46, %v861_v46  ;;  %v891_v13 = vadd.f32 %v890_v8, %v861_v46 }
  0xd0   : > { %1397 = vst [vmem:[%s1644_s7 + $0x8] sm:$0xff] %v1385_v47   ;;  %v913_v16 = vadd.f32 %v912_v12, %v906_v9 }
  0xd1   : > { %v834_v48 = vpop.f32.mrf.mxu2  ;;  %v778_v50 = vpop.f32.mrf.mxu0 }
  0xd2   : > { %v863_v49 = vpop.f32.mrf.mxu3  ;;  %v807_v51 = vpop.f32.mrf.mxu1  ;;  %v835_v53 = vadd.f32 %v834_v48, %v806_v52 }
  0xd3   : > { %v808_v54 = vadd.f32 %v807_v51, %v778_v50 }
  0xd4   : > { %v864_v60 = vadd.f32 %v863_v49, %v835_v53 }
  0xd6   : > { %v907_v14 = vmul.f32 %v864_v60, %v864_v60  ;;  %v892_v17 = vadd.f32 %v891_v13, %v864_v60 }
  0xd8   : > { %v914_v21 = vadd.f32 %v913_v16, %v907_v14 }
  0xd9   : > { %v836_v55 = vpop.f32.mrf.mxu2  ;;  %v781_v58 = vpop.f32.mrf.mxu0 }
  0xda   : > { %v865_v56 = vpop.f32.mrf.mxu3  ;;  %v837_v57 = vadd.f32 %v836_v55, %v808_v54  ;;  %v810_v59 = vpop.f32.mrf.mxu1 }
  0xdb   : > { %v811_v63 = vadd.f32 %v810_v59, %v781_v58 }
  0xdc   : > { %v866_v61 = vadd.f32 %v865_v56, %v837_v57 }
  0xde   : > { %v1390_v62 = vpack.c.bf16 %v866_v61, %v864_v60  ;;  %v908_v18 = vmul.f32 %v866_v61, %v866_v61  ;;  %v893_v22 = vadd.f32 %v892_v17, %v866_v61 }
  0xe0   : > { %1398 = vst [vmem:[%s1644_s7 + $0x10] sm:$0xff] %v1390_v62   ;;  %v915_v26 = vadd.f32 %v914_v21, %v908_v18 }
  0xe1   : > { %v839_v1 = vpop.f32.mrf.mxu2  ;;  %v783_v10 = vpop.f32.mrf.mxu0 }
  0xe2   : > { %v868_v2 = vpop.f32.mrf.mxu3  ;;  %v840_v6 = vadd.f32 %v839_v1, %v811_v63  ;;  %v812_v11 = vpop.f32.mrf.mxu1 }
  0xe3   : > { %v813_v19 = vadd.f32 %v812_v11, %v783_v10 }
  0xe4   : > { %v869_v15 = vadd.f32 %v868_v2, %v840_v6 }
  0xe6   : > { %v909_v23 = vmul.f32 %v869_v15, %v869_v15  ;;  %v894_v27 = vadd.f32 %v893_v22, %v869_v15 }
  0xe8   : > { %v916_v29 = vadd.f32 %v915_v26, %v909_v23 }
  0xe9   : > { %v841_v20 = vpop.f32.mrf.mxu2 }
  0xea   : > { %v842_v24 = vadd.f32 %v841_v20, %v813_v19  ;;  %v870_v25 = vpop.f32.mrf.mxu3 }
  0xec   : > { %v871_v28 = vadd.f32 %v870_v25, %v842_v24 }
  0xee   : > { %v1395_v30 = vpack.c.bf16 %v871_v28, %v869_v15  ;;  %v895_v31 = vadd.f32 %v894_v27, %v871_v28  ;;  %v910_v32 = vmul.f32 %v871_v28, %v871_v28 }
  0xf0   : > { %1399 = vst [vmem:[%s1644_s7 + $0x18] sm:$0xff] %v1395_v30   ;;  %v896_v33 = vrot.slane %v895_v31, 4  ;;  %v917_v34 = vadd.f32 %v916_v29, %v910_v32 }
  0xf2   : > { %v897_v35 = vadd.f32 %v896_v33, %v895_v31  ;;  %v918_v36 = vrot.slane %v917_v34, 4 }
  0xf4   : > { %v898_v37 = vrot.slane %v897_v35, 2  ;;  %v919_v38 = vadd.f32 %v918_v36, %v917_v34 }
  0xf6   : > { %v899_v39 = vadd.f32 %v898_v37, %v897_v35  ;;  %v920_v40 = vrot.slane %v919_v38, 2 }
  0xf8   : > { %v900_v41 = vrot.slane %v899_v39, 1  ;;  %v921_v42 = vadd.f32 %v920_v40, %v919_v38 }
  0xfa   : > { %v901_v43 = vadd.f32 %v900_v41, %v899_v39  ;;  %v922_v44 = vrot.slane %v921_v42, 1 }
  0xfc   : > { %902 = vst [vmem:[%s398_s9] sm:$0x1] %v901_v43  ;;  %v923_v45 = vadd.f32 %v922_v44, %v921_v42 }
  0xfe   : > { %924 = vst [vmem:[%s404_s12] sm:$0x1] %v923_v45 }
  0xff PF: > { %s17_s23 = sadd.s32 1, %s1446_s23   ;;  %s1674_s21 = smov %s1442_s22 }
 0x100   : > { %p14_p6 = scmp.ge.s32.totalorder %s17_s23, 4   ;;  %s1675_s22 = smov %s1677_s2 }
 0x102   :  { %16 = sbr.rel (!%p14_p6) target bundleno = 2 (0x2), region = 99 }

// kernel: fwd.17
= control target key start
LH: loop header
LB: loop body
LE: loop exit
PB: predicated region body
PF: predicated region fallthrough
CT: control target
= control target key end

     0   :  { %11 = vsyncpa [#allocation3], 0  ;;  %s1232_s0 = inlined_call_operand.vmem [shape: f32[128,512], index: 0, kind: input, shape index: {}]   ;;  %s1233_s1 = inlined_call_operand.vmem [shape: f32[1,512], index: 1, kind: input, shape index: {}]   ;;  %s1234_s2 = inlined_call_operand.vmem [shape: f32[1,512], index: 2, kind: input, shape index: {}]   ;;  %s1235_s3 = inlined_call_operand.vmem [shape: f32[128,512], index: 3, kind: input, shape index: {}]   ;;  %s1236_s4 = inlined_call_operand.vmem [shape: f32[1,512], index: 4, kind: input, shape index: {}]   ;;  %s1237_s5 = inlined_call_operand.vmem [shape: f32[1,512], index: 5, kind: input, shape index: {}]   ;;  %s1238_s6 = inlined_call_operand.hbm [shape: f32[128,512], index: 6, kind: output, shape index: {}]  }
   0x1   :  { %13 = vsyncpa [#allocation3 + $0x1], 0  ;;  %s863_s21 = smov 0   ;;  %s865_s22 = smov 0  }
   0x2   :  { %s867_s23 = smov 0   ;;  %s869_s24 = smov 0  }
   0x3 LB: > { %s884_s25 = sadd.s32 4294967295, %s824_s24   ;;  %s700_s26 = sadd.s32 4294967294, %s824_s24   ;;  %s824_s24 = sphi %s869_s24, %s1244_s24   ;;  %s820_s23 = sphi %s867_s23, %s1243_s23   ;;  %s816_s22 = sphi %s865_s22, %s1242_s22   ;;  %s812_s21 = sphi %s863_s21, %s1241_s21  }
   0x4   : > { %s888_s27 = sadd.s32 1, %s824_s24   ;;  %s162_s28 = sadd.s32 1, %s820_s23 }
   0x5   : > { %s159_s29 = ssub.s32 %s824_s24, %s888_s27  ;;  %p172_p0 = scmp.ne.s32.totalorder %s820_s23, %s816_s22 }
   0x6   : > { %p160_p1 = scmp.eq.s32.totalorder %s159_s29, 0  ;;  %p173_p2 = scmp.eq.s32.totalorder %s884_s25, 1 }
   0x7   : > { %p178_p3 = scmp.ne.s32.totalorder %s816_s22, %s812_s21  ;;  %p179_p4 = scmp.eq.s32.totalorder %s700_s26, 1 }
   0x8   : > { %s899_s30 = scalar_select %p160_p1, %s820_s23, %s162_s28  }
   0x9   : > { %p901_p5 = por %p173_p2, %p172_p0  ;;  %p905_p6 = por %p179_p4, %p178_p3 }
   0xa   : > { %p703_p7 = scmp.ge.s32.totalorder %s824_s24, 1  ;;  %p229_p8 = scmp.lt.s32.totalorder %s824_s24, 3 }
   0xc   : > { %p230_p9 = pnand %p703_p7, %p229_p8 }
   0xd   : > { %s705_s9 = sshll.u32 (!%p230_p9), %s884_s25, 3  ;;  %s263_s18 = sand.u32 (!%p230_p9), 1, %s816_s22  }
   0xe   : > { %233 = sbr.rel (%p230_p9) target bundleno = 81 (0x51), region = 44  ;;  %p267_p10 = scmp.lt.s32.totalorder (!%p230_p9), %s705_s9, 15 }
   0xf   : > { %s984_s11 = sshll.u32 (!%p230_p9), %s263_s18, 8  ;;  %s720_s13 = sshll.u32 (!%p230_p9), %s884_s25, 8 }
  0x10   : > { %s1012_s12 = scalar_lea.vmem (!%p230_p9), [#allocation2], %s984_s11  ;;  %s622_s15 = scalar_lea.hbm (!%p230_p9), %s1238_s6, %s720_s13 }
  0x11   : > { %s623_s16 = sshll.u32 (!%p230_p9), %s1012_s12, 4  ;;  %s625_s17 = sshll.u32 (!%p230_p9), %s622_s15, 4  ;;  %s624_s16 = int_to_ptr.vmem [resolvable:$true] %s623_s16  ;;  %s626_s17 = int_to_ptr.hbm [resolvable:$true] %s625_s17 }
  0x12   : > { %s776_s20 = sshra.s32 (!%p230_p9), %s626_s17, 4  ;;  %s782_s10 = scalar_lea.hbm (!%p230_p9), %s1238_s6, 512  ;;  %s777_s20 = int_to_ptr.hbm [resolvable:$true] %s776_s20 }
  0x13   : > { %v313_v0 = vld [vmem:[%s1233_s1] sm:$0xf]  ;;  %s1246_s9 = smov (!%p267_p10, %s705_s9), 15  ;;  %s778_s26 = scalar_lea.hbm %s777_s20, 256 }
  0x14   : > { %v429_v1 = vld [vmem:[%s1236_s4] sm:$0xf]  ;;  %v924_v4 = vperm.slane %v313_v0, 0  ;;  %v928_v6 = vperm.slane %v313_v0, 1  ;;  %s717_s19 = sshll.u32 %s1246_s9, 5  ;;  %v935_v9 = vperm.slane %v313_v0, 2  ;;  %p779_p11 = scmp.ne.s32.totalorder %s777_s20, %s778_s26 }
  0x15   : > { %v355_v2 = vld [vmem:[%s1234_s2] sm:$0xf]  ;;  %v926_v5 = vperm.slane %v429_v1, 0  ;;  %v933_v8 = vperm.slane %v429_v1, 1  ;;  %v937_v10 = vperm.slane %v429_v1, 2  ;;  %s942_s28 = scalar_lea.vmem %s1232_s0, %s717_s19  ;;  %s947_s9 = scalar_lea.vmem %s1235_s3, %s717_s19  ;;  %v955_v14 = vperm.slane %v313_v0, 3 }
  0x16   : > { %v471_v3 = vld [vmem:[%s1237_s5] sm:$0xf]  ;;  %v931_v7 = vperm.slane %v355_v2, 0  ;;  %v951_v12 = vperm.slane %v355_v2, 1  ;;  %v282_v17 = vld [vmem:[%s942_s28 + $0x8] sm:$0xff]  ;;  %v960_v18 = vperm.slane %v355_v2, 2  ;;  %p780_p12 = pnand %p779_p11, %p901_p5  ;;  %p783_p0 = scmp.lt.s32.totalorder %s777_s20, %s1238_s6 }
  0x17   : > { %v949_v11 = vperm.slane %v471_v3, 0  ;;  %v953_v13 = vperm.slane %v471_v3, 1  ;;  %v281_v15 = vld [vmem:[%s942_s28] sm:$0xff]  ;;  %v962_v19 = vperm.slane %v471_v3, 2  ;;  %v964_v20 = vperm.slane %v429_v1, 3  ;;  %v398_v24 = vld [vmem:[%s947_s9 + $0x8] sm:$0xff]  ;;  %p784_p1 = scmp.lt.s32.totalorder %s782_s10, %s778_s26 }
  0x18   : > { %v397_v16 = vld [vmem:[%s947_s9] sm:$0xff]  ;;  %v323_v21 = vmul.f32 %v924_v4, %v281_v15  ;;  %v324_v23 = vmul.f32 %v928_v6, %v282_v17  ;;  %v283_v25 = vld [vmem:[%s942_s28 + $0x10] sm:$0xff]  ;;  %v972_v27 = vperm.slane %v355_v2, 3  ;;  %v440_v28 = vmul.f32 %v933_v8, %v398_v24  ;;  %v284_v31 = vld [vmem:[%s942_s28 + $0x18] sm:$0xff]  ;;  %s610_s19 = scalar_lea.sflag [#allocation3], %s263_s18  ;;  %p781_p13 = pneg %p780_p12 }
  0x19   : > { %v439_v22 = vmul.f32 %v926_v5, %v397_v16  ;;  %v399_v26 = vld [vmem:[%s947_s9 + $0x10] sm:$0xff]  ;;  %v325_v29 = vmul.f32 %v935_v9, %v283_v25  ;;  %v400_v32 = vld [vmem:[%s947_s9 + $0x18] sm:$0xff]  ;;  %v979_v33 = vperm.slane %v471_v3, 3  ;;  %v285_v34 = vld [vmem:[%s942_s28 + $0x20] sm:$0xff]  ;;  %v326_v38 = vmul.f32 %v955_v14, %v284_v31  ;;  %p785_p2 = por %p784_p1, %p783_p0 }
  0x1a   : > { %v441_v30 = vmul.f32 %v937_v10, %v399_v26  ;;  %v365_v35 = vadd.f32 %v931_v7, %v323_v21  ;;  %v366_v37 = vadd.f32 %v951_v12, %v324_v23  ;;  %v401_v39 = vld [vmem:[%s947_s9 + $0x20] sm:$0xff]  ;;  %v286_v40 = vld [vmem:[%s942_s28 + $0x28] sm:$0xff]  ;;  %v482_v41 = vadd.f32 %v953_v13, %v440_v28  ;;  %v287_v54 = vld [vmem:[%s942_s28 + $0x30] sm:$0xff] }
  0x1b   : > { %v481_v36 = vadd.f32 %v949_v11, %v439_v22  ;;  %v367_v42 = vadd.f32 %v960_v18, %v325_v29  ;;  %v442_v44 = vmul.f32 %v964_v20, %v400_v32  ;;  %v402_v45 = vld [vmem:[%s947_s9 + $0x28] sm:$0xff]  ;;  %v368_v47 = vadd.f32 %v972_v27, %v326_v38  ;;  %v403_v55 = vld [vmem:[%s947_s9 + $0x30] sm:$0xff]  ;;  %v288_v60 = vld [vmem:[%s942_s28 + $0x38] sm:$0xff]  ;;  %p786_p3 = pnand %p785_p2, %p781_p13 }
  0x1c   : > { %v483_v43 = vadd.f32 %v962_v19, %v441_v30  ;;  %v327_v48 = vmul.f32 %v924_v4, %v285_v34  ;;  %v443_v49 = vmul.f32 %v926_v5, %v401_v39  ;;  %v514_v50 = vadd.f32 %v482_v41, %v366_v37  ;;  %v404_v61 = vld [vmem:[%s947_s9 + $0x38] sm:$0xff]  ;;  %v289_v62 = vld [vmem:[%s942_s28 + $0x40] sm:$0xff]  ;;  %v290_v26 = vld [vmem:[%s942_s28 + $0x48] sm:$0xff] }
  0x1d   : > { %v513_v46 = vadd.f32 %v481_v36, %v365_v35  ;;  %v484_v52 = vadd.f32 %v979_v33, %v442_v44  ;;  %v328_v53 = vmul.f32 %v928_v6, %v286_v40  ;;  %v444_v59 = vmul.f32 %v933_v8, %v402_v45  ;;  %v405_v21 = vld [vmem:[%s947_s9 + $0x40] sm:$0xff]  ;;  %v406_v28 = vld [vmem:[%s947_s9 + $0x48] sm:$0xff]  ;;  %v291_v34 = vld [vmem:[%s942_s28 + $0x50] sm:$0xff] }
  0x1e   : > { %v515_v51 = vadd.f32 %v483_v43, %v367_v42  ;;  %v369_v57 = vadd.f32 %v931_v7, %v327_v48  ;;  %v485_v58 = vadd.f32 %v949_v11, %v443_v49  ;;  %v546_v63 = vmax.f32 %v514_v50, 0.0  ;;  %v407_v35 = vld [vmem:[%s947_s9 + $0x50] sm:$0xff]  ;;  %v292_v40 = vld [vmem:[%s942_s28 + $0x58] sm:$0xff]  ;;  %v293_v50 = vld [vmem:[%s942_s28 + $0x60] sm:$0xff] }
  0x1f   : > { %v545_v56 = vmax.f32 %v513_v46, 0.0  ;;  %v516_v1 = vadd.f32 %v484_v52, %v368_v47  ;;  %v370_v2 = vadd.f32 %v951_v12, %v328_v53  ;;  %v486_v15 = vadd.f32 %v953_v13, %v444_v59  ;;  %v408_v49 = vld [vmem:[%s947_s9 + $0x58] sm:$0xff] }
  0x20   : > { %v547_v0 = vmax.f32 %v515_v51, 0.0  ;;  %v517_v3 = vadd.f32 %v485_v58, %v369_v57  ;;  %v329_v16 = vmul.f32 %v935_v9, %v287_v54  ;;  %v445_v17 = vmul.f32 %v937_v10, %v403_v55  ;;  %578 = vst [vmem:[%s1012_s12 + $0x8] sm:$0xff] %v546_v63  ;;  %v409_v55 = vld [vmem:[%s947_s9 + $0x60] sm:$0xff] }
  0x21   : > { %577 = vst [vmem:[%s1012_s12] sm:$0xff] %v545_v56  ;;  %v548_v22 = vmax.f32 %v516_v1, 0.0  ;;  %v330_v23 = vmul.f32 %v955_v14, %v288_v60  ;;  %v446_v24 = vmul.f32 %v964_v20, %v404_v61  ;;  %v331_v25 = vmul.f32 %v924_v4, %v289_v62  ;;  %v294_v56 = vld [vmem:[%s942_s28 + $0x68] sm:$0xff] }
  0x22   : > { %579 = vst [vmem:[%s1012_s12 + $0x10] sm:$0xff] %v547_v0  ;;  %v549_v29 = vmax.f32 %v517_v3, 0.0  ;;  %v518_v30 = vadd.f32 %v486_v15, %v370_v2  ;;  %v371_v31 = vadd.f32 %v960_v18, %v329_v16  ;;  %v487_v32 = vadd.f32 %v962_v19, %v445_v17  ;;  %v410_v61 = vld [vmem:[%s947_s9 + $0x68] sm:$0xff]  ;;  %v295_v2 = vld [vmem:[%s942_s28 + $0x70] sm:$0xff] }
  0x23   : > { %580 = vst [vmem:[%s1012_s12 + $0x18] sm:$0xff] %v548_v22  ;;  %v372_v36 = vadd.f32 %v972_v27, %v330_v23  ;;  %v488_v37 = vadd.f32 %v979_v33, %v446_v24  ;;  %v373_v38 = vadd.f32 %v931_v7, %v331_v25  ;;  %v447_v39 = vmul.f32 %v926_v5, %v405_v21  ;;  %v411_v21 = vld [vmem:[%s947_s9 + $0x70] sm:$0xff]  ;;  %v296_v22 = vld [vmem:[%s942_s28 + $0x78] sm:$0xff] }
  0x24   : > { %581 = vst [vmem:[%s1012_s12 + $0x20] sm:$0xff] %v549_v29  ;;  %v550_v41 = vmax.f32 %v518_v30, 0.0  ;;  %v519_v42 = vadd.f32 %v487_v32, %v371_v31  ;;  %v332_v43 = vmul.f32 %v928_v6, %v290_v26  ;;  %v448_v44 = vmul.f32 %v933_v8, %v406_v28  ;;  %v412_v28 = vld [vmem:[%s947_s9 + $0x78] sm:$0xff]  ;;  %v297_v29 = vld [vmem:[%s942_s28 + $0x80] sm:$0xff] }
  0x25   : > { %v520_v45 = vadd.f32 %v488_v37, %v372_v36  ;;  %v489_v46 = vadd.f32 %v949_v11, %v447_v39  ;;  %v333_v47 = vmul.f32 %v935_v9, %v291_v34  ;;  %v449_v48 = vmul.f32 %v937_v10, %v407_v35  ;;  %v413_v39 = vld [vmem:[%s947_s9 + $0x80] sm:$0xff] }
  0x26   : > { %582 = vst [vmem:[%s1012_s12 + $0x28] sm:$0xff] %v550_v41  ;;  %v551_v51 = vmax.f32 %v519_v42, 0.0  ;;  %v374_v52 = vadd.f32 %v951_v12, %v332_v43  ;;  %v490_v53 = vadd.f32 %v953_v13, %v448_v44  ;;  %v334_v54 = vmul.f32 %v955_v14, %v292_v40  ;;  %v298_v44 = vld [vmem:[%s942_s28 + $0x88] sm:$0xff] }
  0x27   : > { %v552_v57 = vmax.f32 %v520_v45, 0.0  ;;  %v521_v58 = vadd.f32 %v489_v46, %v373_v38  ;;  %v375_v59 = vadd.f32 %v960_v18, %v333_v47  ;;  %v491_v60 = vadd.f32 %v962_v19, %v449_v48  ;;  %v414_v45 = vld [vmem:[%s947_s9 + $0x88] sm:$0xff] }
  0x28   : > { %583 = vst [vmem:[%s1012_s12 + $0x30] sm:$0xff] %v551_v51  ;;  %v522_v62 = vadd.f32 %v490_v53, %v374_v52  ;;  %v376_v63 = vadd.f32 %v972_v27, %v334_v54  ;;  %v450_v0 = vmul.f32 %v964_v20, %v408_v49  ;;  %v335_v1 = vmul.f32 %v924_v4, %v293_v50  ;;  %v299_v50 = vld [vmem:[%s942_s28 + $0x90] sm:$0xff] }
  0x29   : > { %584 = vst [vmem:[%s1012_s12 + $0x38] sm:$0xff] %v552_v57  ;;  %v553_v3 = vmax.f32 %v521_v58, 0.0  ;;  %v523_v15 = vadd.f32 %v491_v60, %v375_v59  ;;  %v451_v16 = vmul.f32 %v926_v5, %v409_v55  ;;  %v336_v17 = vmul.f32 %v928_v6, %v294_v56  ;;  %v415_v51 = vld [vmem:[%s947_s9 + $0x90] sm:$0xff]  ;;  %v300_v56 = vld [vmem:[%s942_s28 + $0x98] sm:$0xff] }
  0x2a   : > { %v554_v23 = vmax.f32 %v522_v62, 0.0  ;;  %v492_v24 = vadd.f32 %v979_v33, %v450_v0  ;;  %v377_v25 = vadd.f32 %v931_v7, %v335_v1  ;;  %v452_v26 = vmul.f32 %v933_v8, %v410_v61  ;;  %v416_v1 = vld [vmem:[%s947_s9 + $0x98] sm:$0xff] }
  0x2b   : > { %585 = vst [vmem:[%s1012_s12 + $0x40] sm:$0xff] %v553_v3  ;;  %v555_v30 = vmax.f32 %v523_v15, 0.0  ;;  %v493_v31 = vadd.f32 %v949_v11, %v451_v16  ;;  %v378_v32 = vadd.f32 %v951_v12, %v336_v17  ;;  %v337_v34 = vmul.f32 %v935_v9, %v295_v2  ;;  %v301_v2 = vld [vmem:[%s942_s28 + $0xa0] sm:$0xff] }
  0x2c   : > { %586 = vst [vmem:[%s1012_s12 + $0x48] sm:$0xff] %v554_v23  ;;  %v524_v35 = vadd.f32 %v492_v24, %v376_v63  ;;  %v494_v36 = vadd.f32 %v953_v13, %v452_v26  ;;  %v453_v37 = vmul.f32 %v937_v10, %v411_v21  ;;  %v338_v38 = vmul.f32 %v955_v14, %v296_v22  ;;  %v417_v21 = vld [vmem:[%s947_s9 + $0xa0] sm:$0xff]  ;;  %v302_v22 = vld [vmem:[%s942_s28 + $0xa8] sm:$0xff] }
  0x2d   : > { %587 = vst [vmem:[%s1012_s12 + $0x50] sm:$0xff] %v555_v30  ;;  %v525_v40 = vadd.f32 %v493_v31, %v377_v25  ;;  %v379_v41 = vadd.f32 %v960_v18, %v337_v34  ;;  %v454_v42 = vmul.f32 %v964_v20, %v412_v28  ;;  %v339_v43 = vmul.f32 %v924_v4, %v297_v29  ;;  %v418_v28 = vld [vmem:[%s947_s9 + $0xa8] sm:$0xff]  ;;  %v303_v34 = vld [vmem:[%s942_s28 + $0xb0] sm:$0xff] }
  0x2e   : > { %v556_v46 = vmax.f32 %v524_v35, 0.0  ;;  %v526_v47 = vadd.f32 %v494_v36, %v378_v32  ;;  %v495_v48 = vadd.f32 %v962_v19, %v453_v37  ;;  %v380_v49 = vadd.f32 %v972_v27, %v338_v38 }
  0x2f   : > { %v557_v52 = vmax.f32 %v525_v40, 0.0  ;;  %v496_v53 = vadd.f32 %v979_v33, %v454_v42  ;;  %v381_v54 = vadd.f32 %v931_v7, %v339_v43  ;;  %v455_v55 = vmul.f32 %v926_v5, %v413_v39  ;;  %v419_v39 = vld [vmem:[%s947_s9 + $0xb0] sm:$0xff]  ;;  %v304_v40 = vld [vmem:[%s942_s28 + $0xb8] sm:$0xff] }
  0x30   : > { %588 = vst [vmem:[%s1012_s12 + $0x58] sm:$0xff] %v556_v46  ;;  %v558_v57 = vmax.f32 %v526_v47, 0.0  ;;  %v527_v58 = vadd.f32 %v495_v48, %v379_v41  ;;  %v340_v59 = vmul.f32 %v928_v6, %v298_v44  ;;  %v456_v60 = vmul.f32 %v933_v8, %v414_v45  ;;  %v420_v45 = vld [vmem:[%s947_s9 + $0xb8] sm:$0xff]  ;;  %v305_v46 = vld [vmem:[%s942_s28 + $0xc0] sm:$0xff] }
  0x31   : > { %589 = vst [vmem:[%s1012_s12 + $0x60] sm:$0xff] %v557_v52  ;;  %v528_v61 = vadd.f32 %v496_v53, %v380_v49  ;;  %v497_v62 = vadd.f32 %v949_v11, %v455_v55  ;;  %v341_v63 = vmul.f32 %v935_v9, %v299_v50  ;;  %v457_v0 = vmul.f32 %v937_v10, %v415_v51  ;;  %v421_v55 = vld [vmem:[%s947_s9 + $0xc0] sm:$0xff] }
  0x32   : > { %590 = vst [vmem:[%s1012_s12 + $0x68] sm:$0xff] %v558_v57  ;;  %v559_v3 = vmax.f32 %v527_v58, 0.0  ;;  %v382_v15 = vadd.f32 %v951_v12, %v340_v59  ;;  %v498_v16 = vadd.f32 %v953_v13, %v456_v60  ;;  %v342_v17 = vmul.f32 %v955_v14, %v300_v56  ;;  %v306_v60 = vld [vmem:[%s942_s28 + $0xc8] sm:$0xff] }
  0x33   : > { %v560_v23 = vmax.f32 %v528_v61, 0.0  ;;  %v529_v24 = vadd.f32 %v497_v62, %v381_v54  ;;  %v383_v25 = vadd.f32 %v960_v18, %v341_v63  ;;  %v499_v26 = vadd.f32 %v962_v19, %v457_v0  ;;  %v422_v61 = vld [vmem:[%s947_s9 + $0xc8] sm:$0xff] }
  0x34   : > { %591 = vst [vmem:[%s1012_s12 + $0x70] sm:$0xff] %v559_v3  ;;  %v530_v29 = vadd.f32 %v498_v16, %v382_v15  ;;  %v384_v30 = vadd.f32 %v972_v27, %v342_v17  ;;  %v458_v31 = vmul.f32 %v964_v20, %v416_v1  ;;  %v343_v32 = vmul.f32 %v924_v4, %v301_v2  ;;  %v307_v2 = vld [vmem:[%s942_s28 + $0xd0] sm:$0xff] }
  0x35   : > { %592 = vst [vmem:[%s1012_s12 + $0x78] sm:$0xff] %v560_v23  ;;  %v561_v35 = vmax.f32 %v529_v24, 0.0  ;;  %v531_v36 = vadd.f32 %v499_v26, %v383_v25  ;;  %v459_v37 = vmul.f32 %v926_v5, %v417_v21  ;;  %v344_v38 = vmul.f32 %v928_v6, %v302_v22  ;;  %v423_v3 = vld [vmem:[%s947_s9 + $0xd0] sm:$0xff]  ;;  %v308_v22 = vld [vmem:[%s942_s28 + $0xd8] sm:$0xff] }
  0x36   : > { %v562_v41 = vmax.f32 %v530_v29, 0.0  ;;  %v500_v42 = vadd.f32 %v979_v33, %v458_v31  ;;  %v385_v43 = vadd.f32 %v931_v7, %v343_v32  ;;  %v460_v44 = vmul.f32 %v933_v8, %v418_v28  ;;  %v424_v32 = vld [vmem:[%s947_s9 + $0xd8] sm:$0xff] }
  0x37   : > { %593 = vst [vmem:[%s1012_s12 + $0x80] sm:$0xff] %v561_v35  ;;  %v563_v47 = vmax.f32 %v531_v36, 0.0  ;;  %v501_v48 = vadd.f32 %v949_v11, %v459_v37  ;;  %v386_v49 = vadd.f32 %v951_v12, %v344_v38  ;;  %v345_v50 = vmul.f32 %v935_v9, %v303_v34  ;;  %v309_v34 = vld [vmem:[%s942_s28 + $0xe0] sm:$0xff] }
  0x38   : > { %594 = vst [vmem:[%s1012_s12 + $0x88] sm:$0xff] %v562_v41  ;;  %v532_v51 = vadd.f32 %v500_v42, %v384_v30  ;;  %v502_v52 = vadd.f32 %v953_v13, %v460_v44  ;;  %v461_v53 = vmul.f32 %v937_v10, %v419_v39  ;;  %v346_v54 = vmul.f32 %v955_v14, %v304_v40  ;;  %v425_v39 = vld [vmem:[%s947_s9 + $0xe0] sm:$0xff]  ;;  %v310_v40 = vld [vmem:[%s942_s28 + $0xe8] sm:$0xff] }
  0x39   : > { %595 = vst [vmem:[%s1012_s12 + $0x90] sm:$0xff] %v563_v47  ;;  %v533_v56 = vadd.f32 %v501_v48, %v385_v43  ;;  %v387_v57 = vadd.f32 %v960_v18, %v345_v50  ;;  %v462_v58 = vmul.f32 %v964_v20, %v420_v45  ;;  %v347_v59 = vmul.f32 %v924_v4, %v305_v46  ;;  %v426_v45 = vld [vmem:[%s947_s9 + $0xe8] sm:$0xff]  ;;  %v311_v50 = vld [vmem:[%s942_s28 + $0xf0] sm:$0xff] }
  0x3a   : > { %v564_v62 = vmax.f32 %v532_v51, 0.0  ;;  %v534_v63 = vadd.f32 %v502_v52, %v386_v49  ;;  %v503_v0 = vadd.f32 %v962_v19, %v461_v53  ;;  %v388_v1 = vadd.f32 %v972_v27, %v346_v54 }
  0x3b   : > { %v565_v15 = vmax.f32 %v533_v56, 0.0  ;;  %v504_v16 = vadd.f32 %v979_v33, %v462_v58  ;;  %v389_v17 = vadd.f32 %v931_v7, %v347_v59  ;;  %v463_v21 = vmul.f32 %v926_v5, %v421_v55  ;;  %v427_v55 = vld [vmem:[%s947_s9 + $0xf0] sm:$0xff]  ;;  %v312_v56 = vld [vmem:[%s942_s28 + $0xf8] sm:$0xff] }
  0x3c   : > { %596 = vst [vmem:[%s1012_s12 + $0x98] sm:$0xff] %v564_v62  ;;  %v566_v23 = vmax.f32 %v534_v63, 0.0  ;;  %v535_v24 = vadd.f32 %v503_v0, %v387_v57  ;;  %v348_v25 = vmul.f32 %v928_v6, %v306_v60  ;;  %v464_v26 = vmul.f32 %v933_v8, %v422_v61  ;;  %v428_v60 = vld [vmem:[%s947_s9 + $0xf8] sm:$0xff] }
  0x3d   : > { %597 = vst [vmem:[%s1012_s12 + $0xa0] sm:$0xff] %v565_v15  ;;  %v536_v28 = vadd.f32 %v504_v16, %v388_v1  ;;  %v505_v29 = vadd.f32 %v949_v11, %v463_v21  ;;  %v349_v30 = vmul.f32 %v935_v9, %v307_v2  ;;  %v465_v31 = vmul.f32 %v937_v10, %v423_v3 }
  0x3e   : > { %598 = vst [vmem:[%s1012_s12 + $0xa8] sm:$0xff] %v566_v23  ;;  %v567_v35 = vmax.f32 %v535_v24, 0.0  ;;  %v390_v36 = vadd.f32 %v951_v12, %v348_v25  ;;  %v506_v37 = vadd.f32 %v953_v13, %v464_v26  ;;  %v350_v38 = vmul.f32 %v955_v14, %v308_v22 }
  0x3f   : > { %v568_v41 = vmax.f32 %v536_v28, 0.0  ;;  %v537_v42 = vadd.f32 %v505_v29, %v389_v17  ;;  %v391_v43 = vadd.f32 %v960_v18, %v349_v30  ;;  %v507_v44 = vadd.f32 %v962_v19, %v465_v31 }
  0x40   : > { %599 = vst [vmem:[%s1012_s12 + $0xb0] sm:$0xff] %v567_v35  ;;  %v538_v46 = vadd.f32 %v506_v37, %v390_v36  ;;  %v392_v47 = vadd.f32 %v972_v27, %v350_v38  ;;  %v466_v48 = vmul.f32 %v964_v20, %v424_v32  ;;  %v351_v49 = vmul.f32 %v924_v4, %v309_v34 }
  0x41   : > { %600 = vst [vmem:[%s1012_s12 + $0xb8] sm:$0xff] %v568_v41  ;;  %v569_v51 = vmax.f32 %v537_v42, 0.0  ;;  %v539_v52 = vadd.f32 %v507_v44, %v391_v43  ;;  %v467_v53 = vmul.f32 %v926_v5, %v425_v39  ;;  %v352_v54 = vmul.f32 %v928_v6, %v310_v40 }
  0x42   : > { %v570_v57 = vmax.f32 %v538_v46, 0.0  ;;  %v508_v58 = vadd.f32 %v979_v33, %v466_v48  ;;  %v393_v59 = vadd.f32 %v931_v7, %v351_v49  ;;  %v468_v4 = vmul.f32 %v933_v8, %v426_v45 }
  0x43   : > { %601 = vst [vmem:[%s1012_s12 + $0xc0] sm:$0xff] %v569_v51  ;;  %v571_v61 = vmax.f32 %v539_v52, 0.0  ;;  %v509_v62 = vadd.f32 %v949_v11, %v467_v53  ;;  %v394_v5 = vadd.f32 %v951_v12, %v352_v54  ;;  %v353_v6 = vmul.f32 %v935_v9, %v311_v50 }
  0x44   : > { %602 = vst [vmem:[%s1012_s12 + $0xc8] sm:$0xff] %v570_v57  ;;  %v540_v63 = vadd.f32 %v508_v58, %v392_v47  ;;  %v510_v0 = vadd.f32 %v953_v13, %v468_v4  ;;  %v469_v1 = vmul.f32 %v937_v10, %v427_v55  ;;  %v354_v7 = vmul.f32 %v955_v14, %v312_v56 }
  0x45   : > { %603 = vst [vmem:[%s1012_s12 + $0xd0] sm:$0xff] %v571_v61  ;;  %v541_v8 = vadd.f32 %v509_v62, %v393_v59  ;;  %v395_v9 = vadd.f32 %v960_v18, %v353_v6  ;;  %v470_v11 = vmul.f32 %v964_v20, %v428_v60 }
  0x46   : > { %v572_v12 = vmax.f32 %v540_v63, 0.0  ;;  %v542_v2 = vadd.f32 %v510_v0, %v394_v5  ;;  %v511_v13 = vadd.f32 %v962_v19, %v469_v1  ;;  %v396_v10 = vadd.f32 %v972_v27, %v354_v7 }
  0x47   : > { %v573_v14 = vmax.f32 %v541_v8, 0.0  ;;  %v512_v3 = vadd.f32 %v979_v33, %v470_v11 }
  0x48   : > { %604 = vst [vmem:[%s1012_s12 + $0xd8] sm:$0xff] %v572_v12  ;;  %v574_v15 = vmax.f32 %v542_v2, 0.0  ;;  %v543_v18 = vadd.f32 %v511_v13, %v395_v9 }
  0x49   : > { %605 = vst [vmem:[%s1012_s12 + $0xe0] sm:$0xff] %v573_v14  ;;  %v544_v20 = vadd.f32 %v512_v3, %v396_v10 }
  0x4a   : > { %606 = vst [vmem:[%s1012_s12 + $0xe8] sm:$0xff] %v574_v15  ;;  %v575_v16 = vmax.f32 %v543_v18, 0.0 }
  0x4b   : > { %v576_v19 = vmax.f32 %v544_v20, 0.0 }
  0x4c   : > { %607 = vst [vmem:[%s1012_s12 + $0xf0] sm:$0xff] %v575_v16 }
  0x4d   : > { %608 = vst [vmem:[%s1012_s12 + $0xf8] sm:$0xff] %v576_v19 }
  0x4e   : > { %789 = shalt.err (!%p786_p3)
}
  0x4f   : > { %s826_s18 = smov 512   ;;  %s827_s12 = smov 32  }
  0x50   : > { %721 = dma.vmem_to_hbm [thread:$0]  (%p901_p5), %s624_s16, 4096, %s626_s17, %s610_s19, %s826_s18, %s826_s18, %s827_s12  }
  0x51 PF: > { %p727_p4 = scmp.ge.s32.totalorder %s824_s24, 2  ;;  %s640_s13 = sand.u32 1, %s812_s21  }
  0x52   : > { %s641_s25 = scalar_lea.sflag [#allocation3], %s640_s13 }
  0x53   : > { %p724_p7 = pnand %p727_p4, %p905_p6 }
  0x55   : > { %p725_p8 = pneg %p724_p7 }
  0x57   : > { %807 = dma.done.wait (%p725_p8), %s641_s25, 4096  }
  0x58   : > { %809 = vsyncadd (%p725_p8), %s641_s25, 4294963200  ;;  %p16_p9 = scmp.ge.s32.totalorder %s888_s27, 4   ;;  %s1241_s21 = smov %s816_s22 }
  0x59   : > { %s1242_s22 = smov %s820_s23  ;;  %s1243_s23 = smov %s899_s30 }
  0x5a   : > { %s1244_s24 = smov %s888_s27  ;;  %18 = sbr.rel (!%p16_p9) target bundleno = 3 (0x3), region = 82 }
  0x5f   :  { %647 = vsyncpa [#allocation3], 1 }
  0x60   :  { %649 = vsyncpa [#allocation3 + $0x1], 1 }

// kernel: fwd.15
= control target key start
LH: loop header
LB: loop body
LE: loop exit
PB: predicated region body
PF: predicated region fallthrough
CT: control target
= control target key end

     0   :  { %s2524_s24 = smov 0   ;;  %s3267_s0 = inlined_call_operand.vmem [shape: bf16[2,10,10,128], index: 0, kind: input, shape index: {}]   ;;  %s3268_s1 = inlined_call_operand.vmem [shape: bf16[9,128,128], index: 1, kind: input, shape index: {}]   ;;  %s3269_s2 = inlined_call_operand.vmem [shape: f32[1,1,128], index: 2, kind: input, shape index: {}]   ;;  %s3270_s3 = inlined_call_operand.vmem [shape: f32[1,1,128], index: 3, kind: input, shape index: {}]   ;;  %s3271_s4 = inlined_call_operand.vmem [shape: f32[10,10,1], index: 4, kind: input, shape index: {}]   ;;  %s3272_s5 = inlined_call_operand.vmem [shape: bf16[2,8,8,128], index: 5, kind: output, shape index: {0}]   ;;  %s3273_s6 = inlined_call_operand.vmem [shape: f32[2,1,128], index: 6, kind: output, shape index: {1}]   ;;  %s3274_s7 = inlined_call_operand.vmem [shape: f32[2,1,128], index: 7, kind: output, shape index: {2}]  }
   0x1 LB: > { %s1912_s25 = sadd.s32 4294967295, %s2481_s24   ;;  %p1916_p0 = scmp.ge.s32.totalorder %s2481_s24, 1  ;;  %s2481_s24 = sphi %s2524_s24, %s18_s24  }
   0x2   : > { %p242_p1 = scmp.lt.s32.totalorder %s2481_s24, 3 }
   0x4   : > { %p243_p2 = pnand %p1916_p0, %p242_p1 }
   0x5   : > { %p280_p3 = scmp.lt.s32.totalorder (!%p243_p2), %s1912_s25, 1 }
   0x6   : > { %246 = sbr.rel (%p243_p2) target bundleno = 459 (0x1cb), region = 40 }
   0xb   : > { %v416_v0 = vld [vmem:[%s3271_s4 + $0x60] sm:$0xff]  ;;  %v413_v1 = vld [vmem:[%s3271_s4 + $0x48] sm:$0x3]  ;;  %v2483_v3 = vmov 0   ;;  %v418_v4 = vld [vmem:[%s3271_s4 + $0x70] sm:$0xff]  ;;  %s3280_s25 = smov (!%p280_p3, %s1912_s25), 1 }
   0xc   : > { %v412_v2 = vld [vmem:[%s3271_s4 + $0x40] sm:$0xff]  ;;  %2472 = vset.pattern.permute.xlu2 %v2483_v3  ;;  %2471 = vset.pattern.permute.xlu1 %v2483_v3  ;;  %v415_v5 = vld [vmem:[%s3271_s4 + $0x58] sm:$0x3]  ;;  %v414_v6 = vld [vmem:[%s3271_s4 + $0x50] sm:$0xff]  ;;  %s2460_s28 = smul.u32 80, %s3280_s25  ;;  %vm914_vm0 = vcmask 1042432   ;;  %s292_s15 = scalar_lea.vmem %s3273_s6, %s3280_s25 }
   0xd   : > { %2470 = vset.pattern.permute.xlu0 %v2483_v3  ;;  %486 = vperm.xlu2 %2472, %v416_v0   ;;  %v417_v7 = vld [vmem:[%s3271_s4 + $0x68] sm:$0x3]  ;;  %v406_v8 = vld [vmem:[%s3271_s4 + $0x10] sm:$0xff]  ;;  %v404_v9 = vld [vmem:[%s3271_s4] sm:$0xff]  ;;  %vm915_vm1 = vcmask 1046532   ;;  %s2348_s8 = sshll.u32 %s3280_s25, 5  ;;  %s295_s18 = scalar_lea.vmem %s3274_s7, %s3280_s25 }
   0xe   : > { %471 = vperm.xlu1 %2471, %v413_v1   ;;  %466 = vperm.xlu0 %2470, %v412_v2   ;;  %v407_v10 = vld [vmem:[%s3271_s4 + $0x18] sm:$0x3]  ;;  %v405_v11 = vld [vmem:[%s3271_s4 + $0x8] sm:$0x3]  ;;  %v410_v14 = vld [vmem:[%s3271_s4 + $0x30] sm:$0xff]  ;;  %s2611_s10 = scalar_lea.vmem %s3267_s0, %s2460_s28  ;;  %s3241_s12 = scalar_lea.vmem %s3272_s5, %s2348_s8 }
   0xf   : > { %v419_v12 = vld [vmem:[%s3271_s4 + $0x78] sm:$0x3]  ;;  %v409_v13 = vld [vmem:[%s3271_s4 + $0x28] sm:$0x3]  ;;  %v408_v15 = vld [vmem:[%s3271_s4 + $0x20] sm:$0xff] }
  0x10   : > { %v421_v16 = vld [vmem:[%s3271_s4 + $0x88] sm:$0x3]  ;;  %v420_v17 = vld [vmem:[%s3271_s4 + $0x80] sm:$0xff]  ;;  %v411_v18 = vld [vmem:[%s3271_s4 + $0x38] sm:$0x3] }
  0x11   : > { %v423_v19 = vld [vmem:[%s3271_s4 + $0x98] sm:$0x3]  ;;  %v422_v20 = vld [vmem:[%s3271_s4 + $0x90] sm:$0xff]  ;;  %v2362_v23 = vld [vmem:[%s3268_s1 + $0x68] sm:$0xff]  ;;  %vm580_vm2 = vsmask.f32 3328 }
  0x12   : > { %v2364_v21 = vld [vmem:[%s3268_s1 + $0x78] sm:$0xff]  ;;  %v2363_v22 = vld [vmem:[%s3268_s1 + $0x70] sm:$0xff]  ;;  %v2361_v27 = vld [vmem:[%s3268_s1 + $0x60] sm:$0xff]  ;;  %vm581_vm3 = vsmask.f32 7440 }
  0x13   : > { %2444 = vmatpush.bf16.msra.mxu1 %v2364_v21  ;;  %776 = vmatpush.bf16.msra.mxu0 %v2364_v21  ;;  %v308_v24 = vld [vmem:[%s2611_s10 + $0x30] sm:$0xf]  ;;  %v2372_v25 = vld [vmem:[%s3268_s1 + $0xb8] sm:$0xff]  ;;  %v2627_v30 = vld [vmem:[%s3269_s2] ss:$0 sm:$0xff] }
  0x14   : > { %v310_v26 = vld [vmem:[%s2611_s10 + $0x38] sm:$0xf]  ;;  %1030 = vmatpush.bf16.msra.mxu2 %v2372_v25  ;;  %v328_v28 = vunpack.c.l.bf16 %v308_v24  ;;  %v2371_v29 = vld [vmem:[%s3268_s1 + $0xb0] sm:$0xff]  ;;  %v2370_v37 = vld [vmem:[%s3268_s1 + $0xa8] sm:$0xff] }
  0x15   : > { %496 = vperm.xlu2 %2472, %v418_v4   ;;  %v330_v31 = vunpack.c.l.bf16 %v310_v26  ;;  %v2380_v32 = vld [vmem:[%s3268_s1 + $0xf8] sm:$0xff]  ;;  %v309_v36 = vld [vmem:[%s2611_s10 + $0x34] sm:$0x1]  ;;  %v2643_v38 = vld [vmem:[%s3270_s3] ss:$0 sm:$0xff] }
  0x16   : > { %481 = vperm.xlu1 %2471, %v415_v5   ;;  %476 = vperm.xlu0 %2470, %v414_v6   ;;  %v2360_v34 = vld [vmem:[%s3268_s1 + $0x58] sm:$0xff]  ;;  %v352_v35 = vmul.f32 %v2627_v30, %v328_v28  ;;  %v2379_v40 = vld [vmem:[%s3268_s1 + $0xf0] sm:$0xff]  ;;  %v329_v43 = vunpack.c.l.bf16 %v309_v36  ;;  %v305_v44 = vld [vmem:[%s2611_s10 + $0x24] sm:$0x1] }
  0x17   : > { %2445 = vmatpush.bf16.msra.mxu1 %v2363_v22  ;;  %777 = vmatpush.bf16.msra.mxu0 %v2363_v22  ;;  %v354_v39 = vmul.f32 %v2627_v30, %v330_v31  ;;  %v2359_v41 = vld [vmem:[%s3268_s1 + $0x50] sm:$0xff]  ;;  %v304_v45 = vld [vmem:[%s2611_s10 + $0x20] sm:$0xf]  ;;  %v299_v46 = vld [vmem:[%s2611_s10 + $0xc] sm:$0x1]  ;;  %v325_v51 = vunpack.c.l.bf16 %v305_v44 }
  0x18   : > { %1031 = vmatpush.bf16.msra.mxu2 %v2371_v29  ;;  %1142 = vmatpush.bf16.msra.mxu3 %v2380_v32  ;;  %v376_v42 = vadd.f32 %v2643_v38, %v352_v35  ;;  %v2369_v47 = vld [vmem:[%s3268_s1 + $0xa0] sm:$0xff]  ;;  %v307_v49 = vld [vmem:[%s2611_s10 + $0x2c] sm:$0x1]  ;;  %v324_v52 = vunpack.c.l.bf16 %v304_v45  ;;  %v319_v53 = vunpack.c.l.bf16 %v299_v46  ;;  %v306_v54 = vld [vmem:[%s2611_s10 + $0x28] sm:$0xf]  ;;  %v353_v58 = vmul.f32 %v2627_v30, %v329_v43 }
  0x19   : > { %v378_v48 = vadd.f32 %v2643_v38, %v354_v39  ;;  %v2378_v50 = vld [vmem:[%s3268_s1 + $0xe8] sm:$0xff]  ;;  %v301_v55 = vld [vmem:[%s2611_s10 + $0x14] sm:$0x1]  ;;  %v327_v60 = vunpack.c.l.bf16 %v307_v49  ;;  %v2368_v61 = vld [vmem:[%s3268_s1 + $0x98] sm:$0xff]  ;;  %v326_v63 = vunpack.c.l.bf16 %v306_v54  ;;  %v349_v2 = vmul.f32 %v2627_v30, %v325_v51 }
  0x1a   : > { %v2358_v56 = vld [vmem:[%s3268_s1 + $0x48] sm:$0xff]  ;;  %v396_v57 = vmax.f32 %v376_v42, 0.0  ;;  %v321_v0 = vunpack.c.l.bf16 %v301_v55  ;;  %v2377_v1 = vld [vmem:[%s3268_s1 + $0xe0] sm:$0xff]  ;;  %v348_v3 = vmul.f32 %v2627_v30, %v324_v52  ;;  %v343_v4 = vmul.f32 %v2627_v30, %v319_v53  ;;  %v2356_v26 = vld [vmem:[%s3268_s1 + $0x38] sm:$0xff] }
  0x1b   : > { %2446 = vmatpush.bf16.msra.mxu1 %v2362_v23  ;;  %778 = vmatpush.bf16.msra.mxu0 %v2362_v23  ;;  %v398_v62 = vmax.f32 %v378_v48, 0.0  ;;  %v2357_v5 = vld [vmem:[%s3268_s1 + $0x40] sm:$0xff]  ;;  %v2376_v23 = vld [vmem:[%s3268_s1 + $0xd8] sm:$0xff]  ;;  %v2366_v39 = vld [vmem:[%s3268_s1 + $0x88] sm:$0xff] }
  0x1c   : > { %1032 = vmatpush.bf16.msra.mxu2 %v2370_v37  ;;  %1143 = vmatpush.bf16.msra.mxu3 %v2379_v40  ;;  %v297_v31 = vld [vmem:[%s2611_s10 + $0x4] sm:$0x1]  ;;  %v311_v32 = vld [vmem:[%s2611_s10 + $0x3c] sm:$0x1]  ;;  %v2375_v44 = vld [vmem:[%s3268_s1 + $0xd0] sm:$0xff] }
  0x1d   : > { %491 = vperm.xlu2 %2472, %v417_v7   ;;  %v377_v7 = vadd.f32 %v2643_v38, %v353_v58  ;;  %v331_v48 = vunpack.c.l.bf16 %v311_v32  ;;  %v2355_v49 = vld [vmem:[%s3268_s1 + $0x30] sm:$0xff]  ;;  %v302_v58 = vld [vmem:[%s2611_s10 + $0x18] sm:$0xf]  ;;  %vm2804_vm4 = vmor %vm914_vm0, %vm915_vm1 }
  0x1e   : > { %436 = vperm.xlu1 %2471, %v406_v8   ;;  %426 = vperm.xlu0 %2470, %v404_v9   ;;  %v313_v8 = vld [vmem:[%s2611_s10 + $0x44] sm:$0x1]  ;;  %v351_v9 = vmul.f32 %v2627_v30, %v327_v60  ;;  %vm2824_vm5 = vmor %vm580_vm2, %vm581_vm3 }
  0x1f   : > { %2447 = vmatpush.bf16.msra.mxu1 %v2361_v27  ;;  %779 = vmatpush.bf16.msra.mxu0 %v2361_v27  ;;  %v397_v21 = vmax.f32 %v377_v7, 0.0 }
  0x20   : > { %1033 = vmatpush.bf16.msra.mxu2 %v2369_v47  ;;  %1144 = vmatpush.bf16.msra.mxu3 %v2378_v50  ;;  %v2705_v24 = vadd.f32 %v2643_v38, %v351_v9  ;;  %v317_v47 = vunpack.c.l.bf16 %v297_v31  ;;  %v322_v9 = vunpack.c.l.bf16 %v302_v58  ;;  %v2352_v58 = vld [vmem:[%s3268_s1 + $0x18] sm:$0xff] }
  0x22   : > { %v395_v45 = vmax.f32 %v2705_v24, 0.0  ;;  %v2398_v24 = vld [vmem:[%s3268_s1 + $0x188] sm:$0xff] }
  0x23   : > { %2448 = vmatpush.bf16.msra.mxu1 %v2360_v34  ;;  %780 = vmatpush.bf16.msra.mxu0 %v2360_v34 }
  0x24   : > { %1034 = vmatpush.bf16.msra.mxu2 %v2368_v61  ;;  %1145 = vmatpush.bf16.msra.mxu3 %v2377_v1 }
  0x25   : > { %441 = vperm.xlu2 %2472, %v407_v10   ;;  %v298_v10 = vld [vmem:[%s2611_s10 + $0x8] sm:$0xf] }
  0x26   : > { %431 = vperm.xlu1 %2471, %v405_v11   ;;  %501 = vperm.xlu0 %2470, %v419_v12   ;;  %v2367_v11 = vld [vmem:[%s3268_s1 + $0x90] sm:$0xff]  ;;  %v318_v22 = vunpack.c.l.bf16 %v298_v10 }
  0x27   : > { %2449 = vmatpush.bf16.msra.mxu1 %v2359_v41  ;;  %781 = vmatpush.bf16.msra.mxu0 %v2359_v41 }
  0x28   : > { %1035 = vmatpush.bf16.msra.mxu2 %v2367_v11  ;;  %1146 = vmatpush.bf16.msra.mxu3 %v2376_v23  ;;  %v342_v43 = vmul.f32 %v2627_v30, %v318_v22 }
  0x2b   : > { %2450 = vmatpush.bf16.msra.mxu1 %v2358_v56  ;;  %782 = vmatpush.bf16.msra.mxu0 %v2358_v56 }
  0x2c   : > { %1036 = vmatpush.bf16.msra.mxu2 %v2366_v39  ;;  %1147 = vmatpush.bf16.msra.mxu3 %v2375_v44 }
  0x2d   : > { %451 = vperm.xlu2 %2472, %v409_v13   ;;  %v350_v13 = vmul.f32 %v2627_v30, %v326_v63  ;;  %v2751_v63 = vadd.f32 %v2643_v38, %v342_v43 }
  0x2e   : > { %456 = vperm.xlu1 %2471, %v410_v14   ;;  %446 = vperm.xlu0 %2470, %v408_v15   ;;  %v345_v14 = vmul.f32 %v2627_v30, %v321_v0  ;;  %v296_v15 = vld [vmem:[%s2611_s10] sm:$0xf]  ;;  %v2374_v0 = vld [vmem:[%s3268_s1 + $0xc8] sm:$0xff] }
  0x2f   : > { %2451 = vmatpush.bf16.msra.mxu1 %v2357_v5  ;;  %783 = vmatpush.bf16.msra.mxu0 %v2357_v5  ;;  %v316_v25 = vunpack.c.l.bf16 %v296_v15  ;;  %v2713_v28 = vadd.f32 %v2643_v38, %v350_v13  ;;  %v300_v5 = vld [vmem:[%s2611_s10 + $0x10] sm:$0xf]  ;;  %v386_v15 = vmax.f32 %v2751_v63, 0.0 }
  0x30   : > { %v2716_v29 = vadd.f32 %v2643_v38, %v345_v14  ;;  %1148 = vmatpush.bf16.msra.mxu3 %v2374_v0 }
  0x31   : > { %v340_v46 = vmul.f32 %v2627_v30, %v316_v25  ;;  %v394_v54 = vmax.f32 %v2713_v28, 0.0  ;;  %v2353_v25 = vld [vmem:[%s3268_s1 + $0x20] sm:$0xff] }
  0x32   : > { %v389_v55 = vmax.f32 %v2716_v29, 0.0  ;;  %v2349_v29 = vld [vmem:[%s3268_s1] sm:$0xff] }
  0x33   : > { %877 = vmatpush.bf16.msrb.mxu1 %v2356_v26  ;;  %v2388_v26 = vld [vmem:[%s3268_s1 + $0x138] sm:$0xff] }
  0x34   : > { %1267 = vmatpush.bf16.msrb.mxu0 %v2388_v26 }
  0x35   : > { %511 = vperm.xlu2 %2472, %v421_v16   ;;  %v2693_v16 = vadd.f32 %v2643_v38, %v349_v2  ;;  %v2759_v2 = vadd.f32 %v2643_v38, %v340_v46 }
  0x36   : > { %506 = vperm.xlu1 %2471, %v420_v17   ;;  %461 = vperm.xlu0 %2470, %v411_v18   ;;  %v372_v17 = vadd.f32 %v2643_v38, %v348_v3  ;;  %v2697_v18 = vadd.f32 %v2643_v38, %v343_v4  ;;  %v341_v3 = vmul.f32 %v2627_v30, %v317_v47 }
  0x37   : > { %v393_v34 = vmax.f32 %v2693_v16, 0.0  ;;  %878 = vmatpush.bf16.msrb.mxu1 %v2355_v49  ;;  %v355_v4 = vmul.f32 %v2627_v30, %v331_v48  ;;  %v320_v16 = vunpack.c.l.bf16 %v300_v5 }
  0x38   : > { %v392_v35 = vmax.f32 %v372_v17, 0.0  ;;  %v387_v36 = vmax.f32 %v2697_v18, 0.0  ;;  %v2373_v17 = vld [vmem:[%s3268_s1 + $0xc0] sm:$0xff]  ;;  %v2777_v22 = vadd.f32 %v2643_v38, %v341_v3 }
  0x39   : > { %v2780_v23 = vadd.f32 %v2643_v38, %v355_v4  ;;  %1149 = vmatpush.bf16.msra.mxu3 %v2373_v17  ;;  %v344_v47 = vmul.f32 %v2627_v30, %v320_v16 }
  0x3b   : > { %v2838_v4 = vadd.f32 %v2643_v38, %v344_v47 }
  0x3e   : > { %521 = vperm.xlu1 %2471, %v423_v19   ;;  %516 = vperm.xlu0 %2470, %v422_v20   ;;  %v333_v19 = vunpack.c.l.bf16 %v313_v8 }
  0x40   : > { %v357_v37 = vmul.f32 %v2627_v30, %v333_v19 }
  0x67   : > { %v487_v33 = vpop.permute.xlu2 %486 }
  0x68   : > { %v536_v6 = vmul.f32 %v487_v33, %v396_v57  ;;  %v2742_v57 = vadd.f32 %v2643_v38, %v357_v37 }
  0x6a   : > { %v2699_v20 = vpack.c.bf16 %v536_v6, %v536_v6  ;;  %v2354_v6 = vld [vmem:[%s3268_s1 + $0x28] sm:$0xff]  ;;  %v401_v13 = vmax.f32 %v2742_v57, 0.0 }
  0x6b   : > { %879 = vmatpush.bf16.msrb.mxu1 %v2354_v6 }
  0x6c   : > { %v668_v40 = vshrl.u32 %v2699_v20, 16  ;;  %v671_v41 = vshll.u32 %v2699_v20, 16  ;;  %v2006_v28 = vrot.slane %v2699_v20, 9 }
  0x6e   : > { %v670_v60 = vrot.slane %v668_v40, 4  ;;  %v673_v61 = vrot.slane %v671_v41, 5 }
  0x6f   : > { %v497_v59 = vpop.permute.xlu2 %496  ;;  %880 = vmatpush.bf16.msrb.mxu1 %v2353_v25 }
  0x70   : > { %v538_v12 = vmul.f32 %v497_v59, %v398_v62  ;;  %v2365_v59 = vld [vmem:[%s3268_s1 + $0x80] sm:$0xff]  ;;  %v674_v19 = vor.u32 %v673_v61, %v670_v60 }
  0x71   : > { %1037 = vmatpush.bf16.msra.mxu2 %v2365_v59  ;;  %v2387_v59 = vld [vmem:[%s3268_s1 + $0x130] sm:$0xff] }
  0x72   : > { %v2710_v27 = vpack.c.bf16 %v538_v12, %v538_v12  ;;  %v675_v48 = vrot.slane %v674_v19, 4  ;;  %1268 = vmatpush.bf16.msrb.mxu0 %v2387_v59 }
  0x73   : > { %881 = vmatpush.bf16.msrb.mxu1 %v2352_v58 }
  0x74   : > { %v682_v50 = vshrl.u32 %v2710_v27, 16  ;;  %v685_v51 = vshll.u32 %v2710_v27, 16 }
  0x76   : > { %v684_v7 = vrot.slane %v682_v50, 4  ;;  %v687_v8 = vrot.slane %v685_v51, 5  ;;  %v385_v51 = vmax.f32 %v2777_v22, 0.0 }
  0x77   : > { %v492_v33 = vpop.permute.xlu2 %491 }
  0x78   : > { %v537_v42 = vmul.f32 %v492_v33, %v397_v21  ;;  %v384_v21 = vmax.f32 %v2759_v2, 0.0  ;;  %v688_v37 = vor.u32 %v687_v8, %v684_v7 }
  0x7a   : > { %v2748_v62 = vpack.c.bf16 %v537_v42, %v537_v42 }
  0x7c   : > { %v677_v14 = vshll.u32 %v2748_v62, 16  ;;  %v943_v39 = vrot.slane %v2748_v62, 5 }
  0x7e   : > { %v679_v44 = vrot.slane %v677_v14, 5  ;;  %v2833_v2 = vsel %vm2804_vm4, %v2006_v28, %v943_v39  ;;  %v2386_v14 = vld [vmem:[%s3268_s1 + $0x128] sm:$0xff]  ;;  %v388_v39 = vmax.f32 %v2838_v4, 0.0 }
  0x7f   : > { %v442_v41 = vpop.permute.xlu2 %441  ;;  %1269 = vmatpush.bf16.msrb.mxu0 %v2386_v14 }
  0x80   : > { %v472_v52 = vpop.permute.xlu1 %471  ;;  %v467_v53 = vpop.permute.xlu0 %466  ;;  %v527_v46 = vmul.f32 %v442_v41, %v387_v36  ;;  %v399_v36 = vmax.f32 %v2780_v23, 0.0  ;;  %v680_v6 = vsel %vm2824_vm5, %v675_v48, %v679_v44  ;;  %v2350_v48 = vld [vmem:[%s3268_s1 + $0x8] sm:$0xff] }
  0x81   : > { %v532_v56 = vmul.f32 %v467_v53, %v392_v35  ;;  %v533_v10 = vmul.f32 %v472_v52, %v393_v34  ;;  %v346_v35 = vmul.f32 %v2627_v30, %v322_v9  ;;  %v2007_v52 = vrot.slane %v2710_v27, 9 }
  0x82   : > { %v2835_v3 = vpack.c.bf16 %v527_v46, %v527_v46  ;;  %v2858_v41 = vunpack.c.l.b16 %v680_v6 }
  0x83   : > { %v2756_v1 = vpack.c.bf16 %v532_v56, %v532_v56  ;;  %v2791_v40 = vpack.c.bf16 %v533_v10, %v533_v10  ;;  %v2812_v56 = vrot.slane %v688_v37, 4  ;;  %v2829_v0 = vadd.f32 %v2643_v38, %v346_v35 }
  0x84   : > { %v607_v35 = vshll.u32 %v2835_v3, 16 }
  0x85   : > { %v640_v11 = vshrl.u32 %v2756_v1, 16  ;;  %v643_v12 = vshll.u32 %v2756_v1, 16  ;;  %v649_v49 = vshll.u32 %v2791_v40, 16  ;;  %v390_v37 = vmax.f32 %v2829_v0, 0.0 }
  0x86   : > { %v935_v59 = vrot.slane %v2791_v40, 5 }
  0x87   : > { %v642_v31 = vrot.slane %v640_v11, 4  ;;  %v645_v32 = vrot.slane %v643_v12, 5  ;;  %v651_v7 = vrot.slane %v649_v49, 5  ;;  %v2404_v11 = vld [vmem:[%s3268_s1 + $0x1b8] sm:$0xff]  ;;  %v2351_v12 = vld [vmem:[%s3268_s1 + $0x10] sm:$0xff]  ;;  %v2385_v49 = vld [vmem:[%s3268_s1 + $0x120] sm:$0xff] }
  0x88   : > { %v482_v33 = vpop.permute.xlu1 %481  ;;  %v477_v34 = vpop.permute.xlu0 %476  ;;  %1489 = vmatpush.bf16.msrb.mxu2 %v2404_v11  ;;  %882 = vmatpush.bf16.msrb.mxu1 %v2351_v12 }
  0x89   : > { %v535_v42 = vmul.f32 %v482_v33, %v395_v45  ;;  %v534_v43 = vmul.f32 %v477_v34, %v394_v54  ;;  %v312_v45 = vld [vmem:[%s2611_s10 + $0x40] sm:$0xf]  ;;  %v646_v53 = vor.u32 %v645_v32, %v642_v31  ;;  %v303_v54 = vld [vmem:[%s2611_s10 + $0x1c] sm:$0x1]  ;;  %v972_v34 = vunpack.c.l.b16 %v2833_v2  ;;  %1270 = vmatpush.bf16.msrb.mxu0 %v2385_v49  ;;  %v2402_v49 = vld [vmem:[%s3268_s1 + $0x1a8] sm:$0xff] }
  0x8a   : > { %v332_v5 = vunpack.c.l.bf16 %v312_v45  ;;  %v323_v10 = vunpack.c.l.bf16 %v303_v54 }
  0x8b   : > { %v2799_v50 = vpack.c.bf16 %v534_v43, %v534_v43  ;;  %v555_v18 = vpack.c.bf16 %v535_v42, %v535_v42  ;;  %v647_v26 = vrot.slane %v646_v53, 4  ;;  %v452_v42 = vpop.permute.xlu2 %451 }
  0x8c   : > { %v347_v47 = vmul.f32 %v2627_v30, %v323_v10  ;;  %883 = vmatpush.bf16.msrb.mxu1 %v2350_v48  ;;  %v2403_v10 = vld [vmem:[%s3268_s1 + $0x1b0] sm:$0xff]  ;;  %v2396_v48 = vld [vmem:[%s3268_s1 + $0x178] sm:$0xff] }
  0x8d   : > { %v654_v60 = vshrl.u32 %v2799_v50, 16  ;;  %v657_v61 = vshll.u32 %v2799_v50, 16  ;;  %v663_v16 = vshll.u32 %v555_v18, 16  ;;  %v939_v17 = vrot.slane %v555_v18, 5  ;;  %1490 = vmatpush.bf16.msrb.mxu2 %v2403_v10 }
  0x8e   : > { %v2005_v28 = vrot.slane %v2799_v50, 9  ;;  %v652_v46 = vsel %vm2824_vm5, %v647_v26, %v651_v7 }
  0x8f   : > { %v656_v8 = vrot.slane %v654_v60, 4  ;;  %v659_v9 = vrot.slane %v657_v61, 5  ;;  %v665_v44 = vrot.slane %v663_v16, 5  ;;  %v923_v60 = vrot.slane %v2835_v3, 5  ;;  %v315_v16 = vld [vmem:[%s2611_s10 + $0x4c] sm:$0x1] }
  0x90   : > { %v437_v19 = vpop.permute.xlu1 %436  ;;  %v427_v25 = vpop.permute.xlu0 %426  ;;  %v2876_v45 = vsel %vm2804_vm4, %v2005_v28, %v939_v17  ;;  %v529_v61 = vmul.f32 %v452_v42, %v389_v55  ;;  %v2894_v11 = vunpack.c.l.b16 %v652_v46  ;;  %v2384_v17 = vld [vmem:[%s3268_s1 + $0x118] sm:$0xff]  ;;  %v609_v42 = vrot.slane %v607_v35, 5  ;;  %884 = vmatpush.bf16.msrb.mxu1 %v2349_v29 }
  0x91   : > { %v526_v31 = vmul.f32 %v437_v19, %v386_v15  ;;  %v524_v32 = vmul.f32 %v427_v25, %v384_v21  ;;  %v660_v33 = vor.u32 %v659_v9, %v656_v8  ;;  %v356_v21 = vmul.f32 %v2627_v30, %v332_v5  ;;  %v2412_v19 = vld [vmem:[%s3268_s1 + $0x1f8] sm:$0xff]  ;;  %1271 = vmatpush.bf16.msrb.mxu0 %v2384_v17 }
  0x92   : > { %v971_v25 = vunpack.c.l.b16 %v2876_v45  ;;  %v335_v23 = vunpack.c.l.bf16 %v315_v16  ;;  %1608 = vmatpush.bf16.msrb.mxu3 %v2412_v19  ;;  %1491 = vmatpush.bf16.msrb.mxu2 %v2402_v49  ;;  %v2382_v19 = vld [vmem:[%s3268_s1 + $0x108] sm:$0xff]  ;;  %v2405_v45 = vld [vmem:[%s3268_s1 + $0x1c0] sm:$0xff] }
  0x93   : > { %v2860_v43 = vpack.c.bf16 %v526_v31, %v526_v31  ;;  %v2862_v63 = vpack.c.bf16 %v524_v32, %v524_v32  ;;  %v661_v15 = vrot.slane %v660_v33, 4  ;;  %v2899_v14 = vadd.f32 %v2643_v38, %v356_v21  ;;  %v314_v33 = vld [vmem:[%s2611_s10 + $0x48] sm:$0xf] }
  0x94   : > { %v2915_v32 = vadd.f32 %v2643_v38, %v347_v47  ;;  %v334_v47 = vunpack.c.l.bf16 %v314_v33 }
  0x95   : > { %v598_v18 = vshrl.u32 %v2860_v43, 16  ;;  %v601_v53 = vshll.u32 %v2860_v43, 16  ;;  %v584_v54 = vshrl.u32 %v2862_v63, 16  ;;  %v587_v58 = vshll.u32 %v2862_v63, 16 }
  0x96   : > { %v666_v5 = vsel %vm2824_vm5, %v661_v15, %v665_v44  ;;  %v2001_v31 = vrot.slane %v2860_v43, 9  ;;  %v2000_v46 = vrot.slane %v2862_v63, 9  ;;  %v400_v10 = vmax.f32 %v2899_v14, 0.0 }
  0x97   : > { %v600_v6 = vrot.slane %v598_v18, 4  ;;  %v603_v7 = vrot.slane %v601_v53, 5  ;;  %v586_v8 = vrot.slane %v584_v54, 4  ;;  %v589_v9 = vrot.slane %v587_v58, 5  ;;  %v2383_v18 = vld [vmem:[%s3268_s1 + $0x110] sm:$0xff] }
  0x98   : > { %v432_v3 = vpop.permute.xlu1 %431  ;;  %v502_v55 = vpop.permute.xlu0 %501  ;;  %v2896_v12 = vunpack.c.l.b16 %v666_v5  ;;  %v2940_v53 = vpack.c.b16 %v972_v34, %v971_v25  ;;  %v391_v29 = vmax.f32 %v2915_v32, 0.0  ;;  %1272 = vmatpush.bf16.msrb.mxu0 %v2383_v18  ;;  %v814_v57 = vunpack.c.l.b16 %v2860_v43  ;;  %v2407_v43 = vld [vmem:[%s3268_s1 + $0x1d0] sm:$0xff] }
  0x99   : > { %v525_v26 = vmul.f32 %v432_v3, %v385_v51  ;;  %v539_v28 = vmul.f32 %v502_v55, %v399_v36  ;;  %v590_v21 = vor.u32 %v589_v9, %v586_v8  ;;  %v604_v44 = vor.u32 %v603_v7, %v600_v6  ;;  %v2411_v7 = vld [vmem:[%s3268_s1 + $0x1f0] sm:$0xff] }
  0x9a   : > { %v2920_v15 = vpack.c.b16 %v2896_v12, %v2894_v11  ;;  %v2004_v36 = vrot.slane %v2756_v1, 9  ;;  %v2945_v6 = vsel %vm2804_vm4, %v2001_v31, %v923_v60  ;;  %v2950_v8 = vpack.c.bf16 %v529_v61, %v529_v61  ;;  %v2395_v3 = vld [vmem:[%s3268_s1 + $0x170] sm:$0xff]  ;;  %v2401_v60 = vld [vmem:[%s3268_s1 + $0x1a0] sm:$0xff]  ;;  %1609 = vmatpush.bf16.msrb.mxu3 %v2411_v7 }
  0x9b   : > { %v545_v22 = vpack.c.bf16 %v525_v26, %v525_v26  ;;  %v2922_v51 = vpack.c.bf16 %v539_v28, %v539_v28  ;;  %v605_v35 = vrot.slane %v604_v44, 4  ;;  %v591_v9 = vrot.slane %v590_v21, 4  ;;  %1492 = vmatpush.bf16.msrb.mxu2 %v2401_v60 }
  0x9c   : > { %794 = vmatmul.bf16.vlgmr.msra.gmra.mxu1 %v2920_v15  ;;  %v967_v33 = vunpack.c.l.b16 %v2945_v6  ;;  %v359_v21 = vmul.f32 %v2627_v30, %v335_v23  ;;  %v358_v44 = vmul.f32 %v2627_v30, %v334_v47  ;;  %v621_v23 = vshll.u32 %v2950_v8, 16  ;;  %1273 = vmatpush.bf16.msrb.mxu0 %v2382_v19 }
  0x9d   : > { %v593_v54 = vshll.u32 %v545_v22, 16  ;;  %v919_v58 = vrot.slane %v545_v22, 5  ;;  %v691_v5 = vshll.u32 %v2922_v51, 16  ;;  %1383 = vmatpush.bf16.msra.mxu1 %v2396_v48  ;;  %v610_v17 = vsel %vm2824_vm5, %v605_v35, %v609_v42  ;;  %v512_v22 = vpop.permute.xlu2 %511 }
  0x9e   : > { %v2980_v48 = vsel %vm2804_vm4, %v2004_v36, %v935_v59  ;;  %v2983_v47 = vunpack.c.l.b16 %v610_v17  ;;  %v927_v0 = vrot.slane %v2950_v8, 5  ;;  %v541_v59 = vmul.f32 %v512_v22, %v401_v13 }
  0x9f   : > { %v595_v55 = vrot.slane %v593_v54, 5  ;;  %v693_v16 = vrot.slane %v691_v5, 5  ;;  %v920_v61 = vsel %vm2804_vm4, %v2000_v46, %v919_v58  ;;  %v3000_v18 = vadd.f32 %v2643_v38, %v359_v21 }
  0xa0   : > { %v457_v26 = vpop.permute.xlu1 %456  ;;  %v447_v28 = vpop.permute.xlu0 %446  ;;  %v966_v31 = vunpack.c.l.b16 %v920_v61  ;;  %v3003_v54 = vadd.f32 %v2643_v38, %v358_v44  ;;  %v2410_v38 = vld [vmem:[%s3268_s1 + $0x1e8] sm:$0xff]  ;;  %v947_v61 = vrot.slane %v2922_v51, 5  ;;  %v623_v51 = vrot.slane %v621_v23, 5 }
  0xa1   : > { %v530_v46 = vmul.f32 %v457_v26, %v390_v37  ;;  %v528_v42 = vmul.f32 %v447_v28, %v388_v39  ;;  %v596_v35 = vsel %vm2824_vm5, %v591_v9, %v595_v55  ;;  %1384 = vmatpush.bf16.msra.mxu1 %v2395_v3  ;;  %v694_v40 = vsel %vm2824_vm5, %v2812_v56, %v693_v16  ;;  %v2381_v39 = vld [vmem:[%s3268_s1 + $0x100] sm:$0xff]  ;;  %v2394_v23 = vld [vmem:[%s3268_s1 + $0x168] sm:$0xff] }
  0xa2   : > { %v974_v49 = vpack.c.b16 %v967_v33, %v966_v31  ;;  %v712_v30 = vunpack.c.l.b16 %v596_v35  ;;  %v3011_v7 = vunpack.c.l.b16 %v694_v40  ;;  %1274 = vmatpush.bf16.msrb.mxu0 %v2381_v39  ;;  %v561_v16 = vpack.c.bf16 %v541_v59, %v541_v59  ;;  %1610 = vmatpush.bf16.msrb.mxu3 %v2410_v38  ;;  %v2400_v40 = vld [vmem:[%s3268_s1 + $0x198] sm:$0xff]  ;;  %v2399_v38 = vld [vmem:[%s3268_s1 + $0x190] sm:$0xff] }
  0xa3   : > { %v2986_v4 = vpack.c.bf16 %v530_v46, %v530_v46  ;;  %v2988_v37 = vpack.c.bf16 %v528_v42, %v528_v42  ;;  %v970_v35 = vunpack.c.l.b16 %v2980_v48  ;;  %v403_v32 = vmax.f32 %v3000_v18, 0.0  ;;  %1493 = vmatpush.bf16.msrb.mxu2 %v2400_v40 }
  0xa4   : > { %1038 = vmatmul.bf16.vlgmr.msra.gmra.mxu2 %v974_v49  ;;  %v720_v36 = vpack.c.b16 %v2983_v47, %v712_v30  ;;  %v3030_v46 = vpack.c.b16 %v3011_v7, %v2858_v41  ;;  %v3055_v39 = vsel %vm2804_vm4, %v2007_v52, %v947_v61  ;;  %v2393_v52 = vld [vmem:[%s3268_s1 + $0x160] sm:$0xff]  ;;  %v819_v48 = vunpack.c.l.b16 %v2699_v20  ;;  %v2416_v20 = vld [vmem:[%s3268_s1 + $0x218] sm:$0xff] }
  0xa5   : > { %v626_v58 = vshrl.u32 %v2986_v4, 16  ;;  %v629_v56 = vshll.u32 %v2986_v4, 16  ;;  %v612_v5 = vshrl.u32 %v2988_v37, 16  ;;  %v615_v6 = vshll.u32 %v2988_v37, 16  ;;  %1385 = vmatpush.bf16.msra.mxu1 %v2394_v23 }
  0xa6   : > { %784 = vmatmul.bf16.vlgmr.msra.gmra.mxu0 %v720_v36  ;;  %v815_v13 = vunpack.c.l.b16 %v2988_v37  ;;  %v2002_v8 = vrot.slane %v2988_v37, 9 }
  0xa7   : > { %v628_v9 = vrot.slane %v626_v58, 4  ;;  %v631_v3 = vrot.slane %v629_v56, 5  ;;  %v614_v60 = vrot.slane %v612_v5, 4  ;;  %v617_v55 = vrot.slane %v615_v6, 5  ;;  %v2409_v58 = vld [vmem:[%s3268_s1 + $0x1e0] sm:$0xff]  ;;  %1494 = vmatpush.bf16.msrb.mxu2 %v2399_v38 }
  0xa8   : > { %v507_v17 = vpop.permute.xlu1 %506  ;;  %v462_v19 = vpop.permute.xlu0 %461  ;;  %v1086_v26 = vpack.c.b16 %v815_v13, %v814_v57  ;;  %v928_v28 = vsel %vm2804_vm4, %v2002_v8, %v927_v0  ;;  %v1307_v56 = vrot.slane %v561_v16, 5  ;;  %v2003_v6 = vrot.slane %v2986_v4, 9  ;;  %1611 = vmatpush.bf16.msrb.mxu3 %v2409_v58 }
  0xa9   : > { %v540_v31 = vmul.f32 %v507_v17, %v400_v10  ;;  %v531_v21 = vmul.f32 %v462_v19, %v391_v29  ;;  %v968_v44 = vunpack.c.l.b16 %v928_v28  ;;  %v618_v22 = vor.u32 %v617_v55, %v614_v60  ;;  %1386 = vmatpush.bf16.msra.mxu1 %v2393_v52 }
  0xaa   : > { %1150 = vmatmul.bf16.vlgmr.msra.gmra.mxu3 %v1086_v26  ;;  %v632_v42 = vor.u32 %v631_v3, %v628_v9  ;;  %v1189_v10 = vshll.u32 %v561_v16, 16  ;;  %v402_v29 = vmax.f32 %v3003_v54, 0.0  ;;  %v973_v26 = vunpack.c.l.b16 %v3055_v39 }
  0xab   : > { %v3033_v49 = vpack.c.bf16 %v540_v31, %v540_v31  ;;  %v551_v30 = vpack.c.bf16 %v531_v21, %v531_v21  ;;  %v3035_v0 = vpack.c.b16 %v968_v44, %v967_v33  ;;  %v619_v14 = vrot.slane %v618_v22, 4  ;;  %v3049_v33 = vld [vmem:[%s3268_s1 + $0x238] sm:$0xff]  ;;  %1495 = vmatpush.bf16.msrb.mxu2 %v2398_v24 }
  0xac   : > { %799 = vmatmul.bf16.gmra.mxu1 %v3030_v46  ;;  %v633_v8 = vrot.slane %v632_v42, 4  ;;  %1718 = vmatpush.bf16.msra.mxu0 %v3049_v33  ;;  %v1191_v16 = vrot.slane %v1189_v10, 5  ;;  %v977_v37 = vpack.c.b16 %v973_v26, %v972_v34 }
  0xad   : > { %v1180_v59 = vshrl.u32 %v3033_v49, 16  ;;  %v1183_v36 = vshll.u32 %v3033_v49, 16  ;;  %v2152_v18 = vrot.slane %v3033_v49, 9  ;;  %v635_v54 = vshll.u32 %v551_v30, 16 }
  0xae   : > { %v931_v5 = vrot.slane %v551_v30, 5  ;;  %v624_v55 = vsel %vm2824_vm5, %v619_v14, %v623_v51 }
  0xaf   : > { %v1182_v9 = vrot.slane %v1180_v59, 4  ;;  %v1185_v3 = vrot.slane %v1183_v36, 5  ;;  %v637_v60 = vrot.slane %v635_v54, 5  ;;  %v1308_v28 = vsel %vm2804_vm4, %v2152_v18, %v1307_v56 }
  0xb0   : > { %v522_v61 = vpop.permute.xlu1 %521  ;;  %v517_v17 = vpop.permute.xlu0 %516  ;;  %v932_v19 = vsel %vm2804_vm4, %v2003_v6, %v931_v5  ;;  %v714_v42 = vunpack.c.l.b16 %v624_v55  ;;  %v1326_v10 = vunpack.c.l.b16 %v1308_v28  ;;  %v816_v36 = vunpack.c.l.b16 %v2986_v4  ;;  %v2408_v6 = vld [vmem:[%s3268_s1 + $0x1d8] sm:$0xff] }
  0xb1   : > { %v543_v31 = vmul.f32 %v522_v61, %v403_v32  ;;  %v542_v21 = vmul.f32 %v517_v17, %v402_v29  ;;  %v969_v22 = vunpack.c.l.b16 %v932_v19  ;;  %v638_v51 = vsel %vm2824_vm5, %v633_v8, %v637_v60  ;;  %1612 = vmatpush.bf16.msrb.mxu3 %v2408_v6  ;;  %v2418_v61 = vld [vmem:[%s3268_s1 + $0x228] sm:$0xff]  ;;  %v2391_v17 = vld [vmem:[%s3268_s1 + $0x150] sm:$0xff] }
  0xb2   : > { %v3080_v30 = vunpack.c.l.b16 %v638_v51  ;;  %v1186_v14 = vor.u32 %v1185_v3, %v1182_v9  ;;  %v3098_v54 = vpack.c.b16 %v1326_v10, %v973_v26  ;;  %v817_v5 = vunpack.c.l.b16 %v2756_v1  ;;  %v2406_v19 = vld [vmem:[%s3268_s1 + $0x1c8] sm:$0xff]  ;;  %v2415_v51 = vld [vmem:[%s3268_s1 + $0x210] sm:$0xff] }
  0xb3   : > { %v3082_v23 = vpack.c.bf16 %v543_v31, %v543_v31  ;;  %v3084_v40 = vpack.c.bf16 %v542_v21, %v542_v21  ;;  %v3086_v59 = vpack.c.b16 %v969_v22, %v968_v44  ;;  %v3090_v32 = vpack.c.b16 %v970_v35, %v969_v22  ;;  %v2419_v44 = vld [vmem:[%s3268_s1 + $0x230] sm:$0xff]  ;;  %v2417_v22 = vld [vmem:[%s3268_s1 + $0x220] sm:$0xff] }
  0xb4   : > { %v3093_v29 = vpack.c.b16 %v3080_v30, %v714_v42  ;;  %v1187_v18 = vrot.slane %v1186_v14, 4  ;;  %v813_v4 = vunpack.c.l.b16 %v2862_v63  ;;  %1719 = vmatpush.bf16.msra.mxu0 %v2419_v44  ;;  %v1087_v38 = vpack.c.b16 %v817_v5, %v816_v36 }
  0xb5   : > { %v1648_v58 = vrot.slane %v3082_v23, 5  ;;  %1043 = vmatmul.bf16.gmra.mxu2 %v3086_v59  ;;  %v2297_v56 = vrot.slane %v3084_v40, 9  ;;  %1613 = vmatpush.bf16.msrb.mxu3 %v2407_v43  ;;  %v3151_v28 = vpack.c.b16 %v971_v25, %v970_v35  ;;  %v1211_v31 = vpack.c.b16 %v714_v42, %v2983_v47  ;;  %v2390_v47 = vld [vmem:[%s3268_s1 + $0x148] sm:$0xff]  ;;  %v2389_v35 = vld [vmem:[%s3268_s1 + $0x140] sm:$0xff] }
  0xb6   : > { %789 = vmatmul.bf16.gmra.mxu0 %v3093_v29  ;;  %v1192_v8 = vsel %vm2824_vm5, %v1187_v18, %v1191_v16  ;;  %v821_v60 = vpack.c.b16 %v814_v57, %v813_v4  ;;  %v2392_v16 = vld [vmem:[%s3268_s1 + $0x158] sm:$0xff]  ;;  %v2397_v57 = vld [vmem:[%s3268_s1 + $0x180] sm:$0xff]  ;;  %v818_v21 = vunpack.c.l.b16 %v2799_v50  ;;  %v822_v50 = vpack.c.b16 %v816_v36, %v815_v13 }
  0xb7   : > { %v3114_v52 = vunpack.c.l.b16 %v1192_v8  ;;  %v1649_v9 = vsel %vm2804_vm4, %v2297_v56, %v1648_v58  ;;  %1387 = vmatpush.bf16.msra.mxu1 %v2392_v16  ;;  %1496 = vmatpush.bf16.msrb.mxu2 %v2397_v57  ;;  %v1212_v13 = vpack.c.b16 %v2894_v11, %v3080_v30  ;;  %v820_v42 = vunpack.c.l.b16 %v2710_v27  ;;  %v2414_v11 = vld [vmem:[%s3268_s1 + $0x208] sm:$0xff] }
  0xb8   : > { %v1667_v3 = vunpack.c.l.b16 %v1649_v9  ;;  %1720 = vmatpush.bf16.msra.mxu0 %v2418_v61  ;;  %v1088_v25 = vpack.c.b16 %v819_v48, %v818_v21  ;;  %v823_v34 = vpack.c.b16 %v818_v21, %v817_v5  ;;  %v1213_v27 = vpack.c.b16 %v2858_v41, %v2896_v12 }
  0xb9   : > { %v1214_v63 = vpack.c.b16 %v3114_v52, %v3011_v7  ;;  %1614 = vmatpush.bf16.msrb.mxu3 %v2406_v19  ;;  %v824_v1 = vpack.c.b16 %v820_v42, %v819_v48  ;;  %v1527_v39 = vshrl.u32 %v3084_v40, 16  ;;  %v1530_v26 = vshll.u32 %v3084_v40, 16 }
  0xba   : > { %1155 = vmatmul.bf16.gmra.mxu3 %v1087_v38  ;;  %v3124_v55 = vpack.c.b16 %v1667_v3, %v1326_v10  ;;  %v1536_v14 = vshll.u32 %v3082_v23, 16 }
  0xbb   : > { %1388 = vmatpush.bf16.msra.mxu1 %v2391_v17  ;;  %2452 = vmatpush.bf16.msra.mxu2 %v3049_v33  ;;  %v1085_v33 = vunpack.c.l.b16 %v3033_v49  ;;  %v2413_v49 = vld [vmem:[%s3268_s1 + $0x200] sm:$0xff]  ;;  %v1529_v41 = vrot.slane %v1527_v39, 4  ;;  %v1532_v12 = vrot.slane %v1530_v26, 5 }
  0xbc   : > { %885 = vmatmul.bf16.vlgmr.msrb.gmra.mxu1 %v821_v60  ;;  %1721 = vmatpush.bf16.msra.mxu0 %v2417_v22 }
  0xbd   : > { %1615 = vmatpush.bf16.msrb.mxu3 %v2405_v45  ;;  %v1089_v2 = vpack.c.b16 %v1085_v33, %v820_v42  ;;  %v1533_v30 = vor.u32 %v1532_v12, %v1529_v41 }
  0xbf   : > { %2453 = vmatpush.bf16.msra.mxu2 %v2419_v44  ;;  %1389 = vmatpush.bf16.msra.mxu1 %v2390_v47  ;;  %v1534_v7 = vrot.slane %v1533_v30, 4 }
  0xc0   : > { %1722 = vmatpush.bf16.msra.mxu0 %v2416_v20 }
  0xc3   : > { %2454 = vmatpush.bf16.msra.mxu2 %v2418_v61  ;;  %1390 = vmatpush.bf16.msra.mxu1 %v2389_v35 }
  0xc4   : > { %1723 = vmatpush.bf16.msra.mxu0 %v2415_v51 }
  0xc5   : > { %1048 = vmatmul.bf16.gmra.mxu2 %v3151_v28 }
  0xc6   : > { %1275 = vmatmul.bf16.vlgmr.msrb.gmra.mxu0 %v1211_v31 }
  0xc7   : > { %2455 = vmatpush.bf16.msra.mxu2 %v2417_v22 }
  0xc8   : > { %1724 = vmatpush.bf16.msra.mxu0 %v2414_v11 }
  0xca   : > { %1160 = vmatmul.bf16.gmra.mxu3 %v1088_v25 }
  0xcb   : > { %2456 = vmatpush.bf16.msra.mxu2 %v2416_v20 }
  0xcc   : > { %890 = vmatmul.bf16.gmra.mxu1 %v822_v50  ;;  %1725 = vmatpush.bf16.msra.mxu0 %v2413_v49 }
  0xcf   : > { %2457 = vmatpush.bf16.msra.mxu2 %v2415_v51 }
  0xd3   : > { %2458 = vmatpush.bf16.msra.mxu2 %v2414_v11 }
  0xd5   : > { %1053 = vmatmul.bf16.gmra.mxu2 %v977_v37 }
  0xd6   : > { %1280 = vmatmul.bf16.gmra.mxu0 %v1212_v13 }
  0xd7   : > { %2459 = vmatpush.bf16.msra.mxu2 %v2413_v49 }
  0xda   : > { %1165 = vmatmul.bf16.gmra.mxu3 %v1089_v2 }
  0xdc   : > { %895 = vmatmul.bf16.gmra.mxu1 %v823_v34 }
  0xe5   : > { %1497 = vmatmul.bf16.vlgmr.msrb.gmra.mxu2 %v822_v50 }
  0xe6   : > { %1285 = vmatmul.bf16.gmra.mxu0 %v1213_v27 }
  0xea   : > { %1616 = vmatmul.bf16.vlgmr.msrb.gmra.mxu3 %v3093_v29 }
  0xec   : > { %900 = vmatmul.bf16.gmra.mxu1 %v824_v1 }
  0xf5   : > { %1502 = vmatmul.bf16.gmra.mxu2 %v823_v34 }
  0xf6   : > { %1290 = vmatmul.bf16.gmra.mxu0 %v1214_v63 }
  0xfa   : > { %1621 = vmatmul.bf16.gmra.mxu3 %v2920_v15  ;;  %v1538_v15 = vrot.slane %v1536_v14, 5 }
  0xfc   : > { %1391 = vmatmul.bf16.vlgmr.msra.gmra.mxu1 %v3035_v0  ;;  %v1438_v0 = vunpack.c.l.b16 %v3084_v40  ;;  %v1539_v10 = vsel %vm2824_vm5, %v1534_v7, %v1538_v15 }
  0xfd   : > { %v1557_v36 = vunpack.c.l.b16 %v1539_v10 }
  0xfe   : > { %v1439_v29 = vpack.c.b16 %v1438_v0, %v1085_v33 }
 0x105   : > { %1507 = vmatmul.bf16.gmra.mxu2 %v824_v1 }
 0x106   : > { %1726 = vmatmul.bf16.vlgmr.msra.gmra.mxu0 %v3086_v59  ;;  %v1558_v59 = vpack.c.b16 %v1557_v36, %v3114_v52 }
 0x10a   : > { %1626 = vmatmul.bf16.gmra.mxu3 %v3030_v46 }
 0x10c   : > { %1396 = vmatmul.bf16.gmra.mxu1 %v3090_v32 }
 0x115   : > { %1512 = vmatmul.bf16.gmra.mxu2 %v1439_v29 }
 0x116   : > { %1731 = vmatmul.bf16.gmra.mxu0 %v3151_v28 }
 0x119   : > { %v795_v18 = vpop.f32.mrf.mxu1 }
 0x11a   : > { %1631 = vmatmul.bf16.gmra.mxu3 %v1558_v59 }
 0x11c   : > { %1401 = vmatmul.bf16.gmra.mxu1 %v2940_v53 }
 0x121   : > { %v797_v46 = vpop.f32.mrf.mxu1 }
 0x123   : > { %v785_v23 = vpop.f32.mrf.mxu0 }
 0x125   : > { %1741 = vmatmul.bf16.vlgmr.msra.gmra.mxu2 %v3124_v55 }
 0x126   : > { %1736 = vmatmul.bf16.gmra.mxu0 %v977_v37 }
 0x127   : > { %v1039_v40 = vpop.f32.mrf.mxu2 }
 0x129   : > { %v800_v32 = vpop.f32.mrf.mxu1 }
 0x12b   : > { %v787_v62 = vpop.f32.mrf.mxu0 }
 0x12c   : > { %1406 = vmatmul.bf16.gmra.mxu1 %v3098_v54 }
 0x12d   : > { %v1151_v58 = vpop.f32.mrf.mxu3 }
 0x12f   : > { %v1041_v44 = vpop.f32.mrf.mxu2 }
 0x131   : > { %v802_v56 = vpop.f32.mrf.mxu1 }
 0x133   : > { %v790_v5 = vpop.f32.mrf.mxu0 }
 0x135   : > { %v1153_v4 = vpop.f32.mrf.mxu3 }
 0x138   : > { %v1044_v6 = vpop.f32.mrf.mxu2 }
 0x139   : > { %v886_v8 = vpop.f32.mrf.mxu1 }
 0x13a   : > { %v887_v52 = vadd.f32 %v886_v8, %v785_v23 }
 0x13b   : > { %v792_v38 = vpop.f32.mrf.mxu0 }
 0x13c   : > { %v1059_v53 = vadd.f32 %v1039_v40, %v887_v52 }
 0x13d   : > { %v1156_v9 = vpop.f32.mrf.mxu3 }
 0x13e   : > { %v1171_v63 = vadd.f32 %v1151_v58, %v1059_v53 }
 0x140   : > { %v1046_v3 = vpop.f32.mrf.mxu2 }
 0x141   : > { %v888_v60 = vpop.f32.mrf.mxu1 }
 0x142   : > { %v889_v55 = vadd.f32 %v888_v60, %v787_v62 }
 0x143   : > { %v1276_v16 = vpop.f32.mrf.mxu0 }
 0x144   : > { %v1060_v24 = vadd.f32 %v1041_v44, %v889_v55  ;;  %v1296_v61 = vadd.f32 %v1276_v16, %v1171_v63 }
 0x145   : > { %v3216_v43 = vpop.f32.mrf.mxu3 }
 0x146   : > { %v1172_v62 = vadd.f32 %v1153_v4, %v1060_v24 }
 0x148   : > { %v1049_v54 = vpop.f32.mrf.mxu2 }
 0x149   : > { %v891_v57 = vpop.f32.mrf.mxu1 }
 0x14a   : > { %v892_v17 = vadd.f32 %v891_v57, %v790_v5 }
 0x14b   : > { %v1278_v19 = vpop.f32.mrf.mxu0 }
 0x14c   : > { %v1061_v28 = vadd.f32 %v1044_v6, %v892_v17  ;;  %v1297_v58 = vadd.f32 %v1278_v19, %v1172_v62 }
 0x14d   : > { %v1161_v31 = vpop.f32.mrf.mxu3 }
 0x14e   : > { %v1173_v21 = vadd.f32 %v1156_v9, %v1061_v28 }
 0x150   : > { %v1051_v22 = vpop.f32.mrf.mxu2 }
 0x151   : > { %v893_v48 = vpop.f32.mrf.mxu1 }
 0x152   : > { %v894_v45 = vadd.f32 %v893_v48, %v792_v38 }
 0x153   : > { %v1281_v25 = vpop.f32.mrf.mxu0 }
 0x154   : > { %v1062_v50 = vadd.f32 %v1046_v3, %v894_v45  ;;  %v1298_v47 = vadd.f32 %v1281_v25, %v1173_v21 }
 0x155   : > { %v3218_v20 = vpop.f32.mrf.mxu3 }
 0x156   : > { %v1174_v4 = vadd.f32 %v3216_v43, %v1062_v50 }
 0x158   : > { %v1054_v35 = vpop.f32.mrf.mxu2 }
 0x159   : > { %v896_v37 = vpop.f32.mrf.mxu1 }
 0x15a   : > { %v897_v13 = vadd.f32 %v896_v37, %v795_v18 }
 0x15b   : > { %v1283_v33 = vpop.f32.mrf.mxu0 }
 0x15c   : > { %v1063_v51 = vadd.f32 %v1049_v54, %v897_v13 }
 0x15d   : > { %v3220_v42 = vpop.f32.mrf.mxu3 }
 0x15e   : > { %v1175_v2 = vadd.f32 %v1161_v31, %v1063_v51  ;;  %v1299_v31 = vadd.f32 %v1283_v33, %v1174_v4 }
 0x160   : > { %v1056_v34 = vpop.f32.mrf.mxu2 }
 0x161   : > { %v898_v11 = vpop.f32.mrf.mxu1 }
 0x162   : > { %v899_v49 = vadd.f32 %v898_v11, %v797_v46 }
 0x163   : > { %v1286_v27 = vpop.f32.mrf.mxu0 }
 0x164   : > { %v3222_v1 = vadd.f32 %v1051_v22, %v899_v49  ;;  %v1300_v39 = vadd.f32 %v1286_v27, %v1175_v2 }
 0x165   : > { %v3224_v26 = vpop.f32.mrf.mxu3 }
 0x168   : > { %v1498_v41 = vpop.f32.mrf.mxu2 }
 0x169   : > { %v901_v12 = vpop.f32.mrf.mxu1 }
 0x16a   : > { %v902_v30 = vadd.f32 %v901_v12, %v800_v32 }
 0x16b   : > { %v3226_v14 = vpop.f32.mrf.mxu0 }
 0x16c   : > { %v3228_v7 = vadd.f32 %v1054_v35, %v902_v30 }
 0x16d   : > { %v1617_v15 = vpop.f32.mrf.mxu3 }
 0x170   : > { %v1500_v0 = vpop.f32.mrf.mxu2 }
 0x171   : > { %v903_v10 = vpop.f32.mrf.mxu1 }
 0x172   : > { %v904_v29 = vadd.f32 %v903_v10, %v802_v56 }
 0x173   : > { %v3230_v36 = vpop.f32.mrf.mxu0 }
 0x174   : > { %v3232_v59 = vadd.f32 %v1056_v34, %v904_v29 }
 0x175   : > { %v1619_v46 = vpop.f32.mrf.mxu3 }
 0x178   : > { %v1503_v18 = vpop.f32.mrf.mxu2 }
 0x179   : > { %v1392_v23 = vpop.f32.mrf.mxu1 }
 0x17a   : > { %v1412_v32 = vadd.f32 %v1392_v23, %v1296_v61 }
 0x17b   : > { %v3234_v40 = vpop.f32.mrf.mxu0 }
 0x17c   : > { %v1518_v8 = vadd.f32 %v1498_v41, %v1412_v32  ;;  %v1176_v41 = vadd.f32 %v3218_v20, %v3222_v1 }
 0x17d   : > { %v1622_v52 = vpop.f32.mrf.mxu3 }
 0x17e   : > { %v1637_v53 = vadd.f32 %v1617_v15, %v1518_v8  ;;  %v1301_v10 = vadd.f32 %v3226_v14, %v1176_v41 }
 0x180   : > { %v1505_v44 = vpop.f32.mrf.mxu2 }
 0x181   : > { %v1394_v5 = vpop.f32.mrf.mxu1 }
 0x182   : > { %v1413_v6 = vadd.f32 %v1394_v5, %v1297_v58 }
 0x183   : > { %v1727_v38 = vpop.f32.mrf.mxu0 }
 0x184   : > { %v1519_v56 = vadd.f32 %v1500_v0, %v1413_v6  ;;  %v1747_v63 = vadd.f32 %v1727_v38, %v1637_v53 }
 0x185   : > { %v1624_v61 = vpop.f32.mrf.mxu3 }
 0x186   : > { %v1638_v55 = vadd.f32 %v1619_v46, %v1519_v56  ;;  %v1785_v24 = vmul.f32 %v1747_v63, %v1747_v63 }
 0x188   : > { %v1508_v9 = vpop.f32.mrf.mxu2 }
 0x189   : > { %v1397_v3 = vpop.f32.mrf.mxu1 }
 0x18a   : > { %v1414_v60 = vadd.f32 %v1397_v3, %v1298_v47  ;;  %v1178_v3 = vadd.f32 %v3224_v26, %v3232_v59 }
 0x18b   : > { %v1729_v16 = vpop.f32.mrf.mxu0 }
 0x18c   : > { %v1748_v54 = vadd.f32 %v1729_v16, %v1638_v55  ;;  %v1520_v57 = vadd.f32 %v1503_v18, %v1414_v60 }
 0x18d   : > { %v1627_v13 = vpop.f32.mrf.mxu3 }
 0x18e   : > { %v2424_v17 = vpack.c.bf16 %v1748_v54, %v1747_v63  ;;  %v1771_v19 = vadd.f32 %v1748_v54, %v1747_v63  ;;  %v1786_v28 = vmul.f32 %v1748_v54, %v1748_v54  ;;  %v1639_v25 = vadd.f32 %v1622_v52, %v1520_v57 }
 0x18f   : > { %v1303_v54 = vadd.f32 %v3234_v40, %v1178_v3 }
 0x190   : > { %2425 = vst [vmem:[%s3241_s12] sm:$0xff] %v2424_v17   ;;  %v1793_v21 = vadd.f32 %v1786_v28, %v1785_v24  ;;  %v1510_v22 = vpop.f32.mrf.mxu2 }
 0x191   : > { %v1399_v48 = vpop.f32.mrf.mxu1 }
 0x192   : > { %v1415_v45 = vadd.f32 %v1399_v48, %v1299_v31 }
 0x193   : > { %v1732_v43 = vpop.f32.mrf.mxu0 }
 0x194   : > { %v1749_v50 = vadd.f32 %v1732_v43, %v1639_v25  ;;  %v1521_v47 = vadd.f32 %v1505_v44, %v1415_v45  ;;  %v1177_v44 = vadd.f32 %v3220_v42, %v3228_v7 }
 0x195   : > { %v1629_v18 = vpop.f32.mrf.mxu3 }
 0x196   : > { %v1772_v35 = vadd.f32 %v1771_v19, %v1749_v50  ;;  %v1787_v37 = vmul.f32 %v1749_v50, %v1749_v50  ;;  %v1640_v49 = vadd.f32 %v1624_v61, %v1521_v47  ;;  %v1302_v6 = vadd.f32 %v3230_v36, %v1177_v44 }
 0x198   : > { %v1794_v51 = vadd.f32 %v1793_v21, %v1787_v37  ;;  %v1513_v34 = vpop.f32.mrf.mxu2 }
 0x199   : > { %v1402_v2 = vpop.f32.mrf.mxu1 }
 0x19a   : > { %v1416_v11 = vadd.f32 %v1402_v2, %v1300_v39 }
 0x19b   : > { %v1734_v27 = vpop.f32.mrf.mxu0 }
 0x19c   : > { %v1750_v33 = vadd.f32 %v1734_v27, %v1640_v49  ;;  %v1522_v12 = vadd.f32 %v1508_v9, %v1416_v11 }
 0x19d   : > { %v1632_v56 = vpop.f32.mrf.mxu3 }
 0x19e   : > { %v2429_v30 = vpack.c.bf16 %v1750_v33, %v1749_v50  ;;  %v1773_v15 = vadd.f32 %v1772_v35, %v1750_v33  ;;  %v1788_v0 = vmul.f32 %v1750_v33, %v1750_v33  ;;  %v1641_v62 = vadd.f32 %v1627_v13, %v1522_v12 }
 0x1a0   : > { %2441 = vst [vmem:[%s3241_s12 + $0x8] sm:$0xff] %v2429_v30   ;;  %v1795_v29 = vadd.f32 %v1794_v51, %v1788_v0  ;;  %v1515_v32 = vpop.f32.mrf.mxu2 }
 0x1a1   : > { %v1404_v46 = vpop.f32.mrf.mxu1 }
 0x1a2   : > { %v1417_v23 = vadd.f32 %v1404_v46, %v1301_v10 }
 0x1a3   : > { %v1737_v39 = vpop.f32.mrf.mxu0 }
 0x1a4   : > { %v1751_v58 = vadd.f32 %v1737_v39, %v1641_v62  ;;  %v1523_v5 = vadd.f32 %v1510_v22, %v1417_v23 }
 0x1a5   : > { %v1634_v31 = vpop.f32.mrf.mxu3 }
 0x1a6   : > { %v1774_v20 = vadd.f32 %v1773_v15, %v1751_v58  ;;  %v1789_v1 = vmul.f32 %v1751_v58, %v1751_v58  ;;  %v1642_v38 = vadd.f32 %v1629_v18, %v1523_v5 }
 0x1a8   : > { %v1796_v8 = vadd.f32 %v1795_v29, %v1789_v1  ;;  %v1742_v60 = vpop.f32.mrf.mxu2 }
 0x1a9   : > { %v1407_v14 = vpop.f32.mrf.mxu1 }
 0x1aa   : > { %v1418_v52 = vadd.f32 %v1407_v14, %v1302_v6 }
 0x1ab   : > { %v1739_v53 = vpop.f32.mrf.mxu0 }
 0x1ac   : > { %v1524_v9 = vadd.f32 %v1513_v34, %v1418_v52  ;;  %v1752_v63 = vadd.f32 %v1739_v53, %v1642_v38 }
 0x1ae   : > { %v1643_v55 = vadd.f32 %v1632_v56, %v1524_v9  ;;  %v2434_v42 = vpack.c.bf16 %v1752_v63, %v1751_v58  ;;  %v1775_v7 = vadd.f32 %v1774_v20, %v1752_v63  ;;  %v1790_v16 = vmul.f32 %v1752_v63, %v1752_v63 }
 0x1b0   : > { %v1753_v36 = vadd.f32 %v1742_v60, %v1643_v55  ;;  %2442 = vst [vmem:[%s3241_s12 + $0x10] sm:$0xff] %v2434_v42   ;;  %v1797_v4 = vadd.f32 %v1796_v8, %v1790_v16  ;;  %v1744_v26 = vpop.f32.mrf.mxu2 }
 0x1b1   : > { %v1409_v24 = vpop.f32.mrf.mxu1 }
 0x1b2   : > { %v1791_v61 = vmul.f32 %v1753_v36, %v1753_v36  ;;  %v1419_v57 = vadd.f32 %v1409_v24, %v1303_v54  ;;  %v1776_v17 = vadd.f32 %v1775_v7, %v1753_v36 }
 0x1b4   : > { %v1525_v19 = vadd.f32 %v1515_v32, %v1419_v57  ;;  %v1798_v28 = vadd.f32 %v1797_v4, %v1791_v61 }
 0x1b6   : > { %v1644_v21 = vadd.f32 %v1634_v31, %v1525_v19 }
 0x1b8   : > { %v1754_v59 = vadd.f32 %v1744_v26, %v1644_v21 }
 0x1ba   : > { %v2439_v22 = vpack.c.bf16 %v1754_v59, %v1753_v36  ;;  %v1777_v48 = vadd.f32 %v1776_v17, %v1754_v59  ;;  %v1792_v45 = vmul.f32 %v1754_v59, %v1754_v59 }
 0x1bc   : > { %2443 = vst [vmem:[%s3241_s12 + $0x18] sm:$0xff] %v2439_v22   ;;  %v1778_v40 = vrot.slane %v1777_v48, 4  ;;  %v1799_v25 = vadd.f32 %v1798_v28, %v1792_v45 }
 0x1be   : > { %v1779_v43 = vadd.f32 %v1778_v40, %v1777_v48  ;;  %v1800_v50 = vrot.slane %v1799_v25, 4 }
 0x1c0   : > { %v1780_v47 = vrot.slane %v1779_v43, 2  ;;  %v1801_v35 = vadd.f32 %v1800_v50, %v1799_v25 }
 0x1c2   : > { %v1781_v37 = vadd.f32 %v1780_v47, %v1779_v43  ;;  %v1802_v13 = vrot.slane %v1801_v35, 2 }
 0x1c4   : > { %v1782_v51 = vrot.slane %v1781_v37, 1  ;;  %v1803_v2 = vadd.f32 %v1802_v13, %v1801_v35 }
 0x1c6   : > { %v1783_v34 = vadd.f32 %v1782_v51, %v1781_v37  ;;  %v1804_v11 = vrot.slane %v1803_v2, 1 }
 0x1c8   : > { %1784 = vst [vmem:[%s292_s15] sm:$0x1] %v1783_v34  ;;  %v1805_v49 = vadd.f32 %v1804_v11, %v1803_v2 }
 0x1ca   : > { %1806 = vst [vmem:[%s295_s18] sm:$0x1] %v1805_v49 }
 0x1cb PF: > { %s18_s24 = sadd.s32 1, %s2481_s24  }
 0x1cc   : > { %p15_p4 = scmp.ge.s32.totalorder %s18_s24, 4  }
 0x1ce   :  { %17 = sbr.rel (!%p15_p4) target bundleno = 1 (0x1), region = 102 }

</bundles_post_ra>
